<compile_context>
chip_gen: v5e
topology: v5e:2x2
jax: 0.10.0
libtpu: 0.0.40
codegen_flags: <defaults>
</compile_context>

<pallas_src>
import jax
import jax.numpy as jnp
import numpy as np
from jax.experimental import pallas as pl
from jax.experimental.pallas import tpu as pltpu

# ---------------- model hyper-parameters (small, forward-consistent) ----------
BATCH = 2
SEQ = 8
CIN = 4            # input_channels
F = 8              # conv_filters
K = 3              # conv_kernel_size
PAD = K // 2
IMG = 16           # stand-in for 256
HID = 32           # hidden_size
NL = 2             # num_layers
OUT_IMG = 16       # stand-in for 256 (final view is (B, 1, OUT_IMG, OUT_IMG))
OUT = OUT_IMG * OUT_IMG

H2, W2 = IMG // 2, IMG // 2
H4, W4 = IMG // 4, IMG // 4
D = H4 * W4 * F            # conv_output_size fed to the LSTM (= 128)
N = BATCH * SEQ            # merged batch*seq for the conv stage (= 16)
NC = N * CIN               # lanes of the conv input (= 64)
NF = N * F                 # lanes of the conv activations (= 128)
KK = K * K


# -------------------------- pooling selection matrices ------------------------
def _make_pool_select(hin, win):
    """Stacked 0/1 row-selection for 2x2/stride-2 max pool via one matmul.

    Row (a*2+b)*hout*wout + i*wout + j of the result selects input row
    (2i+a)*win + (2j+b); max over the 4 stacked blocks gives the pooled value.
    """
    hout, wout = hin // 2, win // 2
    s = np.zeros((4, hout * wout, hin * win), np.float32)
    for a in range(2):
        for b in range(2):
            for i in range(hout):
                for j in range(wout):
                    s[a * 2 + b, i * wout + j, (2 * i + a) * win + (2 * j + b)] = 1.0
    return s.reshape(4 * hout * wout, hin * win)


SEL1_NP = _make_pool_select(IMG, IMG)   # (4*64, 256)
SEL2_NP = _make_pool_select(H2, W2)     # (4*16, 64)


# ---------------------------- conv stack kernel -------------------------------
def conv_stack_kernel(x_ref, wbig1_ref, bbig1_ref, wbig2_ref, bbig2_ref,
                      sel1_ref, sel2_ref, out_ref, im1_ref, pad2_ref, im2_ref):
    # x_ref   : (IMG+2P, IMG+2P, N*CIN) bf16, zero-padded, lane = n*CIN + c
    # wbig1   : (K*K*N*CIN, N*F) bf16 block-diag over frames
    # bbig1   : (1, N*F) f32 (b1 tiled per frame)
    # wbig2   : (K*K*N*F, N*F) bf16 block-diag;  bbig2: (1, N*F) f32
    # sel1    : (4*H2*W2, IMG*IMG) bf16 pooling selection;  sel2: (4*H4*W4, H2*W2)
    # out_ref : (H4*W4, N*F) bf16, row = h4*W4+w4, lane = n*F+f
    # im1_ref : VMEM (IMG, IMG, K*K*N*CIN) bf16   stage-1 im2col patches
    # pad2_ref: VMEM (H2+2P, W2+2P, N*F)   f32    stage-2 padded activations
    # im2_ref : VMEM (H2, W2, K*K*N*F)     f32    stage-2 im2col patches

    # ---- stage 1: im2col (64-lane-dense writes) -> one block-diag matmul ----
    for dy in range(K):
        for dx in range(K):
            t = dy * K + dx
            im1_ref[:, :, t * NC:(t + 1) * NC] = x_ref[dy:dy + IMG, dx:dx + IMG, :]
    patches1 = im1_ref[...].reshape(IMG * IMG, KK * NC)           # free reshape
    y1 = jnp.dot(patches1, wbig1_ref[...], preferred_element_type=jnp.float32)
    y1 = jnp.maximum(y1 + bbig1_ref[...], 0.0)                    # (256, 128) f32

    # ---- 2x2 max pool #1: stacked selection matmul + 3 maxes (all lane-dense) ----
    g1 = jnp.dot(sel1_ref[...], y1.astype(jnp.bfloat16),
                 preferred_element_type=jnp.float32)              # (4*64, 128)
    P1 = H2 * W2
    p1 = jnp.maximum(jnp.maximum(g1[0 * P1:1 * P1], g1[1 * P1:2 * P1]),
                     jnp.maximum(g1[2 * P1:3 * P1], g1[3 * P1:4 * P1]))  # (64, 128)

    # ---- stage 2: zero-pad, im2col (128-lane-dense writes), block-diag matmul ----
    pad2_ref[...] = jnp.zeros((H2 + 2 * PAD, W2 + 2 * PAD, NF), jnp.float32)
    pad2_ref[PAD:PAD + H2, PAD:PAD + W2, :] = p1.reshape(H2, W2, NF)
    for dy in range(K):
        for dx in range(K):
            t = dy * K + dx
            im2_ref[:, :, t * NF:(t + 1) * NF] = pad2_ref[dy:dy + H2, dx:dx + W2, :]
    patches2 = im2_ref[...].reshape(H2 * W2, KK * NF).astype(jnp.bfloat16)
    y2 = jnp.dot(patches2, wbig2_ref[...], preferred_element_type=jnp.float32)
    y2 = jnp.maximum(y2 + bbig2_ref[...], 0.0)                    # (64, 128) f32

    # ---- 2x2 max pool #2 ----
    g2 = jnp.dot(sel2_ref[...], y2.astype(jnp.bfloat16),
                 preferred_element_type=jnp.float32)              # (4*16, 128)
    P2 = H4 * W4
    z = jnp.maximum(jnp.maximum(g2[0 * P2:1 * P2], g2[1 * P2:2 * P2]),
                    jnp.maximum(g2[2 * P2:3 * P2], g2[3 * P2:4 * P2]))   # (16, 128)
    out_ref[...] = z.astype(out_ref.dtype)


def conv_stack(xp, wbig1, bbig1, wbig2, bbig2, sel1, sel2):
    # Single invocation; all operands (<2 MiB total) resident in VMEM.
    return pl.pallas_call(
        conv_stack_kernel,
        out_shape=jax.ShapeDtypeStruct((H4 * W4, NF), jnp.bfloat16),
        scratch_shapes=[
            pltpu.VMEM((IMG, IMG, KK * NC), jnp.bfloat16),
            pltpu.VMEM((H2 + 2 * PAD, W2 + 2 * PAD, NF), jnp.float32),
            pltpu.VMEM((H2, W2, KK * NF), jnp.float32),
        ],
    )(xp, wbig1, bbig1, wbig2, bbig2, sel1, sel2)


# ---------------------------- LSTM + FC kernel --------------------------------
def lstm_fc_kernel(x_ref, wih0_ref, whh0_ref, b0_ref, w1s_ref, b1_ref,
                   wfc_ref, bfc_ref, out_ref):
    # x_ref: (SEQ*BATCH, D) bf16, time-major rows (row = t*BATCH + b).
    # w1s_ref: stacked [wih1; whh1] (2*HID, 4*HID) bf16 -> 2 matmuls per step.

    # Hoisted layer-0 input projection for all timesteps: (T*B, D) @ (D, 4H)
    gx0 = jnp.dot(x_ref[...], wih0_ref[...],
                  preferred_element_type=jnp.float32) + b0_ref[...]

    def gates_to_hc(gates, c_prev):
        # full-width nonlinearities (EUP), then 32-lane slices
        s = jax.nn.sigmoid(gates)
        th = jnp.tanh(gates)
        i = s[:, 0 * HID:1 * HID]
        f = s[:, 1 * HID:2 * HID]
        g = th[:, 2 * HID:3 * HID]
        o = s[:, 3 * HID:4 * HID]
        c_new = f * c_prev + i * g
        h_new = o * jnp.tanh(c_new)
        return h_new, c_new

    h0 = jnp.zeros((BATCH, HID), jnp.float32)
    c0 = jnp.zeros((BATCH, HID), jnp.float32)
    h1 = jnp.zeros((BATCH, HID), jnp.float32)
    c1 = jnp.zeros((BATCH, HID), jnp.float32)

    # TODO(synk): dropout (between LSTM layers and after out[:, -1, :]) is identity in eval mode.
    for t in range(SEQ):   # fully unrolled; 2 MXU ops per step on the serial path
        g0 = gx0[t * BATCH:(t + 1) * BATCH, :] + jnp.dot(
            h0.astype(jnp.bfloat16), whh0_ref[...],
            preferred_element_type=jnp.float32)
        h0, c0 = gates_to_hc(g0, c0)

        hcat = jnp.concatenate([h0, h1], axis=1).astype(jnp.bfloat16)   # (B, 2*HID)
        g1 = jnp.dot(hcat, w1s_ref[...],
                     preferred_element_type=jnp.float32) + b1_ref[...]
        h1, c1 = gates_to_hc(g1, c1)

    out_ref[...] = (jnp.dot(h1.astype(jnp.bfloat16), wfc_ref[...],
                            preferred_element_type=jnp.float32)
                    + bfc_ref[...]).astype(out_ref.dtype)


def lstm_fc(x2d, wih0, whh0, b0, w1s, b1, wfc, bfc):
    return pl.pallas_call(
        lstm_fc_kernel,
        out_shape=jax.ShapeDtypeStruct((BATCH, OUT), jnp.float32),
    )(x2d, wih0, whh0, b0, w1s, b1, wfc, bfc)


# ---------------------------- params / prep / glue ----------------------------
def init_params(key):
    ks = jax.random.split(key, 10)
    w1 = jax.random.normal(ks[0], (K, K, CIN, F), jnp.float32) * 0.1
    b1 = jax.random.normal(ks[1], (F,), jnp.float32) * 0.1
    w2 = jax.random.normal(ks[2], (K, K, F, F), jnp.float32) * 0.1
    b2 = jax.random.normal(ks[3], (F,), jnp.float32) * 0.1
    lstm = []
    for layer in range(NL):
        d_in = D if layer == 0 else HID
        kk = jax.random.split(ks[4 + layer], 3)
        wih = jax.random.normal(kk[0], (d_in, 4 * HID), jnp.float32) * 0.05
        whh = jax.random.normal(kk[1], (HID, 4 * HID), jnp.float32) * 0.05
        b = jax.random.normal(kk[2], (4 * HID,), jnp.float32) * 0.05   # b_ih + b_hh combined
        lstm.append((wih, whh, b))
    wfc = jax.random.normal(ks[8], (HID, OUT), jnp.float32) * 0.1
    bfc = jax.random.normal(ks[9], (OUT,), jnp.float32) * 0.1
    return dict(w1=w1, b1=b1, w2=w2, b2=b2, lstm=tuple(lstm), wfc=wfc, bfc=bfc)


def prepare_params(p):
    """Build the kernel-ready (block-diagonal / stacked / bf16) weight bundle once."""
    eyeN = jnp.eye(N, dtype=jnp.float32)
    wbig1 = jnp.einsum('tcf,nm->tncmf', p["w1"].reshape(KK, CIN, F), eyeN)
    wbig1 = wbig1.reshape(KK * N * CIN, NF).astype(jnp.bfloat16)
    wbig2 = jnp.einsum('tcf,nm->tncmf', p["w2"].reshape(KK, F, F), eyeN)
    wbig2 = wbig2.reshape(KK * N * F, NF).astype(jnp.bfloat16)
    bbig1 = jnp.tile(p["b1"], N).reshape(1, NF).astype(jnp.float32)
    bbig2 = jnp.tile(p["b2"], N).reshape(1, NF).astype(jnp.float32)
    (wih0, whh0, b0), (wih1, whh1, b1) = p["lstm"]
    w1s = jnp.concatenate([wih1, whh1], axis=0).astype(jnp.bfloat16)  # (2*HID, 4*HID)
    return dict(
        wbig1=wbig1, bbig1=bbig1, wbig2=wbig2, bbig2=bbig2,
        sel1=jnp.asarray(SEL1_NP, jnp.bfloat16),
        sel2=jnp.asarray(SEL2_NP, jnp.bfloat16),
        wih0=wih0.astype(jnp.bfloat16), whh0=whh0.astype(jnp.bfloat16),
        b0=b0.reshape(1, 4 * HID),
        w1s=w1s, b1=b1.reshape(1, 4 * HID),
        wfc=p["wfc"].astype(jnp.bfloat16), bfc=p["bfc"].reshape(1, OUT),
    )


@jax.jit
def conv_lstm_forward(x, prep):
    # x: (BATCH, SEQ, CIN, IMG, IMG) -- PyTorch NCHW-per-frame convention.
    # time-major frame order n = s*BATCH + b; kernel layout (H, W, n*CIN + c)
    xn = jnp.transpose(x, (1, 0, 2, 3, 4)).reshape(N, CIN, IMG, IMG)
    xk = jnp.transpose(xn, (2, 3, 0, 1)).reshape(IMG, IMG, N * CIN)
    xk = jnp.pad(xk, ((PAD, PAD), (PAD, PAD), (0, 0))).astype(jnp.bfloat16)

    z = conv_stack(xk, prep["wbig1"], prep["bbig1"], prep["wbig2"], prep["bbig2"],
                   prep["sel1"], prep["sel2"])            # (H4*W4, N*F) bf16
    # (spatial-rows, frame-lanes) -> (frame-rows, PyTorch CHW-flattened lanes):
    # a 4 KB permutation with no single-matmul form; left to XLA (layout plumbing).
    x2d = jnp.transpose(z.reshape(H4 * W4, N, F), (1, 2, 0)).reshape(N, D)

    out = lstm_fc(x2d, prep["wih0"], prep["whh0"], prep["b0"],
                  prep["w1s"], prep["b1"], prep["wfc"], prep["bfc"])  # (B, OUT)
    return out.reshape(BATCH, 1, OUT_IMG, OUT_IMG)


# ------------------------------- reference ------------------------------------
def reference_forward(x, p):
    """Pure-JAX reference reproducing the PyTorch forward (eval mode), f32 HIGHEST."""
    xc = x.reshape(BATCH * SEQ, CIN, IMG, IMG)
    dot = lambda a, b: jnp.dot(a, b, precision=jax.lax.Precision.HIGHEST)

    def conv_relu_pool(z, w, b):
        wo = jnp.transpose(w, (3, 2, 0, 1))  # (F, Cin, K, K) OIHW
        y = jax.lax.conv_general_dilated(
            z, wo, window_strides=(1, 1), padding="SAME",
            dimension_numbers=("NCHW", "OIHW", "NCHW"),
            precision=jax.lax.Precision.HIGHEST)
        y = jnp.maximum(y + b.reshape(1, -1, 1, 1), 0.0)
        return jax.lax.reduce_window(y, -jnp.inf, jax.lax.max,
                                     (1, 1, 2, 2), (1, 1, 2, 2), "VALID")

    y = conv_relu_pool(xc, p["w1"], p["b1"])
    y = conv_relu_pool(y, p["w2"], p["b2"])
    feat = y.reshape(BATCH, SEQ, -1)

    h = [jnp.zeros((BATCH, HID), jnp.float32) for _ in range(NL)]
    c = [jnp.zeros((BATCH, HID), jnp.float32) for _ in range(NL)]
    for t in range(SEQ):
        xin = feat[:, t, :]
        for layer in range(NL):
            wih, whh, b = p["lstm"][layer]
            gates = dot(xin, wih) + dot(h[layer], whh) + b
            i = jax.nn.sigmoid(gates[:, :HID])
            f = jax.nn.sigmoid(gates[:, HID:2 * HID])
            g = jnp.tanh(gates[:, 2 * HID:3 * HID])
            o = jax.nn.sigmoid(gates[:, 3 * HID:])
            c[layer] = f * c[layer] + i * g
            h[layer] = o * jnp.tanh(c[layer])
            xin = h[layer]
    out = dot(h[-1], p["wfc"]) + p["bfc"]
    return out.reshape(BATCH, 1, OUT_IMG, OUT_IMG)


if __name__ == "__main__":
    key = jax.random.PRNGKey(0)
    pkey, xkey = jax.random.split(key)
    params = init_params(pkey)
    prep = prepare_params(params)
    x = jax.random.normal(xkey, (BATCH, SEQ, CIN, IMG, IMG), jnp.float32)

    out = conv_lstm_forward(x, prep)
    out = jax.block_until_ready(out)
    assert out.shape == (BATCH, 1, OUT_IMG, OUT_IMG)

    ref = reference_forward(x, params)
    # bf16 MXU operands / bf16 inter-stage activations vs. f32-HIGHEST reference.
    np.testing.assert_allclose(np.asarray(out), np.asarray(ref), rtol=2e-2, atol=2e-2)

    print("KERNEL_OK")
</pallas_src>

<mosaic_0001>
module attributes {stable_mosaic.version = 11 : i64} {
  func.func @conv_stack_kernel(%arg0: memref<18x18x64xbf16, #tpu.memory_space<vmem>>, %arg1: memref<576x128xbf16, #tpu.memory_space<vmem>>, %arg2: memref<1x128xf32, #tpu.memory_space<vmem>>, %arg3: memref<1152x128xbf16, #tpu.memory_space<vmem>>, %arg4: memref<1x128xf32, #tpu.memory_space<vmem>>, %arg5: memref<256x256xbf16, #tpu.memory_space<vmem>>, %arg6: memref<64x64xbf16, #tpu.memory_space<vmem>>, %arg7: memref<16x128xbf16, #tpu.memory_space<vmem>>, %arg8: memref<16x16x576xbf16, #tpu.memory_space<vmem>>, %arg9: memref<10x10x128xf32, #tpu.memory_space<vmem>>, %arg10: memref<8x8x1152xf32, #tpu.memory_space<vmem>>) attributes {dimension_semantics = [], scalar_prefetch = 0 : i64, scratch_operands = 3 : i64, tpu.core_type = #tpu.core_type<tc>} {
    %c0 = arith.constant 0 : index
    %c0_0 = arith.constant 0 : index
    %c0_1 = arith.constant 0 : index
    %0 = vector.load %arg0[%c0, %c0_0, %c0_1] : memref<18x18x64xbf16, #tpu.memory_space<vmem>>, vector<16x16x64xbf16>
    %c0_2 = arith.constant 0 : index
    %c0_3 = arith.constant 0 : index
    %c0_4 = arith.constant 0 : index
    %1 = vector.load %arg8[%c0_2, %c0_3, %c0_4] : memref<16x16x576xbf16, #tpu.memory_space<vmem>>, vector<16x16x64xbf16>
    tpu.vector_store %arg8[%c0_2, %c0_3, %c0_4], %0 {strides = array<i32>} : memref<16x16x576xbf16, #tpu.memory_space<vmem>>, vector<16x16x64xbf16>,
    %c0_5 = arith.constant 0 : index
    %c1 = arith.constant 1 : index
    %c0_6 = arith.constant 0 : index
    %2 = vector.load %arg0[%c0_5, %c1, %c0_6] : memref<18x18x64xbf16, #tpu.memory_space<vmem>>, vector<16x16x64xbf16>
    %c0_7 = arith.constant 0 : index
    %c0_8 = arith.constant 0 : index
    %c64 = arith.constant 64 : index
    %3 = vector.load %arg8[%c0_7, %c0_8, %c64] : memref<16x16x576xbf16, #tpu.memory_space<vmem>>, vector<16x16x64xbf16>
    tpu.vector_store %arg8[%c0_7, %c0_8, %c64], %2 {strides = array<i32>} : memref<16x16x576xbf16, #tpu.memory_space<vmem>>, vector<16x16x64xbf16>,
    %c0_9 = arith.constant 0 : index
    %c2 = arith.constant 2 : index
    %c0_10 = arith.constant 0 : index
    %4 = vector.load %arg0[%c0_9, %c2, %c0_10] : memref<18x18x64xbf16, #tpu.memory_space<vmem>>, vector<16x16x64xbf16>
    %c0_11 = arith.constant 0 : index
    %c0_12 = arith.constant 0 : index
    %c128 = arith.constant 128 : index
    %5 = vector.load %arg8[%c0_11, %c0_12, %c128] : memref<16x16x576xbf16, #tpu.memory_space<vmem>>, vector<16x16x64xbf16>
    tpu.vector_store %arg8[%c0_11, %c0_12, %c128], %4 {strides = array<i32>} : memref<16x16x576xbf16, #tpu.memory_space<vmem>>, vector<16x16x64xbf16>,
    %c1_13 = arith.constant 1 : index
    %c0_14 = arith.constant 0 : index
    %c0_15 = arith.constant 0 : index
    %6 = vector.load %arg0[%c1_13, %c0_14, %c0_15] : memref<18x18x64xbf16, #tpu.memory_space<vmem>>, vector<16x16x64xbf16>
    %c0_16 = arith.constant 0 : index
    %c0_17 = arith.constant 0 : index
    %c192 = arith.constant 192 : index
    %7 = vector.load %arg8[%c0_16, %c0_17, %c192] : memref<16x16x576xbf16, #tpu.memory_space<vmem>>, vector<16x16x64xbf16>
    tpu.vector_store %arg8[%c0_16, %c0_17, %c192], %6 {strides = array<i32>} : memref<16x16x576xbf16, #tpu.memory_space<vmem>>, vector<16x16x64xbf16>,
    %c1_18 = arith.constant 1 : index
    %c1_19 = arith.constant 1 : index
    %c0_20 = arith.constant 0 : index
    %8 = vector.load %arg0[%c1_18, %c1_19, %c0_20] : memref<18x18x64xbf16, #tpu.memory_space<vmem>>, vector<16x16x64xbf16>
    %c0_21 = arith.constant 0 : index
    %c0_22 = arith.constant 0 : index
    %c256 = arith.constant 256 : index
    %9 = vector.load %arg8[%c0_21, %c0_22, %c256] : memref<16x16x576xbf16, #tpu.memory_space<vmem>>, vector<16x16x64xbf16>
    tpu.vector_store %arg8[%c0_21, %c0_22, %c256], %8 {strides = array<i32>} : memref<16x16x576xbf16, #tpu.memory_space<vmem>>, vector<16x16x64xbf16>,
    %c1_23 = arith.constant 1 : index
    %c2_24 = arith.constant 2 : index
    %c0_25 = arith.constant 0 : index
    %10 = vector.load %arg0[%c1_23, %c2_24, %c0_25] : memref<18x18x64xbf16, #tpu.memory_space<vmem>>, vector<16x16x64xbf16>
    %c0_26 = arith.constant 0 : index
    %c0_27 = arith.constant 0 : index
    %c320 = arith.constant 320 : index
    %11 = vector.load %arg8[%c0_26, %c0_27, %c320] : memref<16x16x576xbf16, #tpu.memory_space<vmem>>, vector<16x16x64xbf16>
    tpu.vector_store %arg8[%c0_26, %c0_27, %c320], %10 {strides = array<i32>} : memref<16x16x576xbf16, #tpu.memory_space<vmem>>, vector<16x16x64xbf16>,
    %c2_28 = arith.constant 2 : index
    %c0_29 = arith.constant 0 : index
    %c0_30 = arith.constant 0 : index
    %12 = vector.load %arg0[%c2_28, %c0_29, %c0_30] : memref<18x18x64xbf16, #tpu.memory_space<vmem>>, vector<16x16x64xbf16>
    %c0_31 = arith.constant 0 : index
    %c0_32 = arith.constant 0 : index
    %c384 = arith.constant 384 : index
    %13 = vector.load %arg8[%c0_31, %c0_32, %c384] : memref<16x16x576xbf16, #tpu.memory_space<vmem>>, vector<16x16x64xbf16>
    tpu.vector_store %arg8[%c0_31, %c0_32, %c384], %12 {strides = array<i32>} : memref<16x16x576xbf16, #tpu.memory_space<vmem>>, vector<16x16x64xbf16>,
    %c2_33 = arith.constant 2 : index
    %c1_34 = arith.constant 1 : index
    %c0_35 = arith.constant 0 : index
    %14 = vector.load %arg0[%c2_33, %c1_34, %c0_35] : memref<18x18x64xbf16, #tpu.memory_space<vmem>>, vector<16x16x64xbf16>
    %c0_36 = arith.constant 0 : index
    %c0_37 = arith.constant 0 : index
    %c448 = arith.constant 448 : index
    %15 = vector.load %arg8[%c0_36, %c0_37, %c448] : memref<16x16x576xbf16, #tpu.memory_space<vmem>>, vector<16x16x64xbf16>
    tpu.vector_store %arg8[%c0_36, %c0_37, %c448], %14 {strides = array<i32>} : memref<16x16x576xbf16, #tpu.memory_space<vmem>>, vector<16x16x64xbf16>,
    %c2_38 = arith.constant 2 : index
    %c2_39 = arith.constant 2 : index
    %c0_40 = arith.constant 0 : index
    %16 = vector.load %arg0[%c2_38, %c2_39, %c0_40] : memref<18x18x64xbf16, #tpu.memory_space<vmem>>, vector<16x16x64xbf16>
    %c0_41 = arith.constant 0 : index
    %c0_42 = arith.constant 0 : index
    %c512 = arith.constant 512 : index
    %17 = vector.load %arg8[%c0_41, %c0_42, %c512] : memref<16x16x576xbf16, #tpu.memory_space<vmem>>, vector<16x16x64xbf16>
    tpu.vector_store %arg8[%c0_41, %c0_42, %c512], %16 {strides = array<i32>} : memref<16x16x576xbf16, #tpu.memory_space<vmem>>, vector<16x16x64xbf16>,
    %c0_43 = arith.constant 0 : index
    %c0_44 = arith.constant 0 : index
    %c0_45 = arith.constant 0 : index
    %18 = vector.load %arg8[%c0_43, %c0_44, %c0_45] : memref<16x16x576xbf16, #tpu.memory_space<vmem>>, vector<16x16x576xbf16>
    %19 = vector.shape_cast %18 : vector<16x16x576xbf16> to vector<256x576xbf16>
    %c0_46 = arith.constant 0 : index
    %c0_47 = arith.constant 0 : index
    %20 = vector.load %arg1[%c0_46, %c0_47] : memref<576x128xbf16, #tpu.memory_space<vmem>>, vector<576x128xbf16>
    %cst = arith.constant dense<0.000000e+00> : vector<256x128xf32>
    %21 = tpu.matmul %19, %20, %cst {dimension_numbers = #tpu.dot_dimension_numbers<[1], [0], [0], [1], [0, 0, 1, 1], [], []>} : vector<256x576xbf16>, vector<576x128xbf16>, vector<256x128xf32> -> vector<256x128xf32>
    %c0_48 = arith.constant 0 : index
    %c0_49 = arith.constant 0 : index
    %22 = vector.load %arg2[%c0_48, %c0_49] : memref<1x128xf32, #tpu.memory_space<vmem>>, vector<1x128xf32>
    %23 = vector.broadcast %22 : vector<1x128xf32> to vector<256x128xf32>
    %24 = arith.addf %21, %23 : vector<256x128xf32>
    %cst_50 = arith.constant 0.000000e+00 : f32
    %25 = vector.broadcast %cst_50 : f32 to vector<256x128xf32>
    %26 = arith.maximumf %24, %25 : vector<256x128xf32>
    %c0_51 = arith.constant 0 : index
    %c0_52 = arith.constant 0 : index
    %27 = vector.load %arg5[%c0_51, %c0_52] : memref<256x256xbf16, #tpu.memory_space<vmem>>, vector<256x256xbf16>
    %28 = arith.truncf %26 : vector<256x128xf32> to vector<256x128xbf16>
    %cst_53 = arith.constant dense<0.000000e+00> : vector<256x128xf32>
    %29 = tpu.matmul %27, %28, %cst_53 {dimension_numbers = #tpu.dot_dimension_numbers<[1], [0], [0], [1], [0, 0, 1, 1], [], []>} : vector<256x256xbf16>, vector<256x128xbf16>, vector<256x128xf32> -> vector<256x128xf32>
    %30 = vector.extract_strided_slice %29 {offsets = [0, 0], sizes = [64, 128], strides = [1, 1]} : vector<256x128xf32> to vector<64x128xf32>
    %31 = vector.extract_strided_slice %29 {offsets = [64, 0], sizes = [64, 128], strides = [1, 1]} : vector<256x128xf32> to vector<64x128xf32>
    %32 = arith.maximumf %30, %31 : vector<64x128xf32>
    %33 = vector.extract_strided_slice %29 {offsets = [128, 0], sizes = [64, 128], strides = [1, 1]} : vector<256x128xf32> to vector<64x128xf32>
    %34 = vector.extract_strided_slice %29 {offsets = [192, 0], sizes = [64, 128], strides = [1, 1]} : vector<256x128xf32> to vector<64x128xf32>
    %35 = arith.maximumf %33, %34 : vector<64x128xf32>
    %36 = arith.maximumf %32, %35 : vector<64x128xf32>
    %cst_54 = arith.constant 0.000000e+00 : f32
    %37 = vector.broadcast %cst_54 : f32 to vector<10x10x128xf32>
    %c0_55 = arith.constant 0 : index
    %c0_56 = arith.constant 0 : index
    %c0_57 = arith.constant 0 : index
    %38 = vector.load %arg9[%c0_55, %c0_56, %c0_57] : memref<10x10x128xf32, #tpu.memory_space<vmem>>, vector<10x10x128xf32>
    tpu.vector_store %arg9[%c0_55, %c0_56, %c0_57], %37 {strides = array<i32>} : memref<10x10x128xf32, #tpu.memory_space<vmem>>, vector<10x10x128xf32>,
    %39 = vector.shape_cast %36 : vector<64x128xf32> to vector<8x8x128xf32>
    %c1_58 = arith.constant 1 : index
    %c1_59 = arith.constant 1 : index
    %c0_60 = arith.constant 0 : index
    %40 = vector.load %arg9[%c1_58, %c1_59, %c0_60] : memref<10x10x128xf32, #tpu.memory_space<vmem>>, vector<8x8x128xf32>
    tpu.vector_store %arg9[%c1_58, %c1_59, %c0_60], %39 {strides = array<i32>} : memref<10x10x128xf32, #tpu.memory_space<vmem>>, vector<8x8x128xf32>,
    %c0_61 = arith.constant 0 : index
    %c0_62 = arith.constant 0 : index
    %c0_63 = arith.constant 0 : index
    %41 = vector.load %arg9[%c0_61, %c0_62, %c0_63] : memref<10x10x128xf32, #tpu.memory_space<vmem>>, vector<8x8x128xf32>
    %c0_64 = arith.constant 0 : index
    %c0_65 = arith.constant 0 : index
    %c0_66 = arith.constant 0 : index
    %42 = vector.load %arg10[%c0_64, %c0_65, %c0_66] : memref<8x8x1152xf32, #tpu.memory_space<vmem>>, vector<8x8x128xf32>
    tpu.vector_store %arg10[%c0_64, %c0_65, %c0_66], %41 {strides = array<i32>} : memref<8x8x1152xf32, #tpu.memory_space<vmem>>, vector<8x8x128xf32>,
    %c0_67 = arith.constant 0 : index
    %c1_68 = arith.constant 1 : index
    %c0_69 = arith.constant 0 : index
    %43 = vector.load %arg9[%c0_67, %c1_68, %c0_69] : memref<10x10x128xf32, #tpu.memory_space<vmem>>, vector<8x8x128xf32>
    %c0_70 = arith.constant 0 : index
    %c0_71 = arith.constant 0 : index
    %c128_72 = arith.constant 128 : index
    %44 = vector.load %arg10[%c0_70, %c0_71, %c128_72] : memref<8x8x1152xf32, #tpu.memory_space<vmem>>, vector<8x8x128xf32>
    tpu.vector_store %arg10[%c0_70, %c0_71, %c128_72], %43 {strides = array<i32>} : memref<8x8x1152xf32, #tpu.memory_space<vmem>>, vector<8x8x128xf32>,
    %c0_73 = arith.constant 0 : index
    %c2_74 = arith.constant 2 : index
    %c0_75 = arith.constant 0 : index
    %45 = vector.load %arg9[%c0_73, %c2_74, %c0_75] : memref<10x10x128xf32, #tpu.memory_space<vmem>>, vector<8x8x128xf32>
    %c0_76 = arith.constant 0 : index
    %c0_77 = arith.constant 0 : index
    %c256_78 = arith.constant 256 : index
    %46 = vector.load %arg10[%c0_76, %c0_77, %c256_78] : memref<8x8x1152xf32, #tpu.memory_space<vmem>>, vector<8x8x128xf32>
    tpu.vector_store %arg10[%c0_76, %c0_77, %c256_78], %45 {strides = array<i32>} : memref<8x8x1152xf32, #tpu.memory_space<vmem>>, vector<8x8x128xf32>,
    %c1_79 = arith.constant 1 : index
    %c0_80 = arith.constant 0 : index
    %c0_81 = arith.constant 0 : index
    %47 = vector.load %arg9[%c1_79, %c0_80, %c0_81] : memref<10x10x128xf32, #tpu.memory_space<vmem>>, vector<8x8x128xf32>
    %c0_82 = arith.constant 0 : index
    %c0_83 = arith.constant 0 : index
    %c384_84 = arith.constant 384 : index
    %48 = vector.load %arg10[%c0_82, %c0_83, %c384_84] : memref<8x8x1152xf32, #tpu.memory_space<vmem>>, vector<8x8x128xf32>
    tpu.vector_store %arg10[%c0_82, %c0_83, %c384_84], %47 {strides = array<i32>} : memref<8x8x1152xf32, #tpu.memory_space<vmem>>, vector<8x8x128xf32>,
    %c1_85 = arith.constant 1 : index
    %c1_86 = arith.constant 1 : index
    %c0_87 = arith.constant 0 : index
    %49 = vector.load %arg9[%c1_85, %c1_86, %c0_87] : memref<10x10x128xf32, #tpu.memory_space<vmem>>, vector<8x8x128xf32>
    %c0_88 = arith.constant 0 : index
    %c0_89 = arith.constant 0 : index
    %c512_90 = arith.constant 512 : index
    %50 = vector.load %arg10[%c0_88, %c0_89, %c512_90] : memref<8x8x1152xf32, #tpu.memory_space<vmem>>, vector<8x8x128xf32>
    tpu.vector_store %arg10[%c0_88, %c0_89, %c512_90], %49 {strides = array<i32>} : memref<8x8x1152xf32, #tpu.memory_space<vmem>>, vector<8x8x128xf32>,
    %c1_91 = arith.constant 1 : index
    %c2_92 = arith.constant 2 : index
    %c0_93 = arith.constant 0 : index
    %51 = vector.load %arg9[%c1_91, %c2_92, %c0_93] : memref<10x10x128xf32, #tpu.memory_space<vmem>>, vector<8x8x128xf32>
    %c0_94 = arith.constant 0 : index
    %c0_95 = arith.constant 0 : index
    %c640 = arith.constant 640 : index
    %52 = vector.load %arg10[%c0_94, %c0_95, %c640] : memref<8x8x1152xf32, #tpu.memory_space<vmem>>, vector<8x8x128xf32>
    tpu.vector_store %arg10[%c0_94, %c0_95, %c640], %51 {strides = array<i32>} : memref<8x8x1152xf32, #tpu.memory_space<vmem>>, vector<8x8x128xf32>,
    %c2_96 = arith.constant 2 : index
    %c0_97 = arith.constant 0 : index
    %c0_98 = arith.constant 0 : index
    %53 = vector.load %arg9[%c2_96, %c0_97, %c0_98] : memref<10x10x128xf32, #tpu.memory_space<vmem>>, vector<8x8x128xf32>
    %c0_99 = arith.constant 0 : index
    %c0_100 = arith.constant 0 : index
    %c768 = arith.constant 768 : index
    %54 = vector.load %arg10[%c0_99, %c0_100, %c768] : memref<8x8x1152xf32, #tpu.memory_space<vmem>>, vector<8x8x128xf32>
    tpu.vector_store %arg10[%c0_99, %c0_100, %c768], %53 {strides = array<i32>} : memref<8x8x1152xf32, #tpu.memory_space<vmem>>, vector<8x8x128xf32>,
    %c2_101 = arith.constant 2 : index
    %c1_102 = arith.constant 1 : index
    %c0_103 = arith.constant 0 : index
    %55 = vector.load %arg9[%c2_101, %c1_102, %c0_103] : memref<10x10x128xf32, #tpu.memory_space<vmem>>, vector<8x8x128xf32>
    %c0_104 = arith.constant 0 : index
    %c0_105 = arith.constant 0 : index
    %c896 = arith.constant 896 : index
    %56 = vector.load %arg10[%c0_104, %c0_105, %c896] : memref<8x8x1152xf32, #tpu.memory_space<vmem>>, vector<8x8x128xf32>
    tpu.vector_store %arg10[%c0_104, %c0_105, %c896], %55 {strides = array<i32>} : memref<8x8x1152xf32, #tpu.memory_space<vmem>>, vector<8x8x128xf32>,
    %c2_106 = arith.constant 2 : index
    %c2_107 = arith.constant 2 : index
    %c0_108 = arith.constant 0 : index
    %57 = vector.load %arg9[%c2_106, %c2_107, %c0_108] : memref<10x10x128xf32, #tpu.memory_space<vmem>>, vector<8x8x128xf32>
    %c0_109 = arith.constant 0 : index
    %c0_110 = arith.constant 0 : index
    %c1024 = arith.constant 1024 : index
    %58 = vector.load %arg10[%c0_109, %c0_110, %c1024] : memref<8x8x1152xf32, #tpu.memory_space<vmem>>, vector<8x8x128xf32>
    tpu.vector_store %arg10[%c0_109, %c0_110, %c1024], %57 {strides = array<i32>} : memref<8x8x1152xf32, #tpu.memory_space<vmem>>, vector<8x8x128xf32>,
    %c0_111 = arith.constant 0 : index
    %c0_112 = arith.constant 0 : index
    %c0_113 = arith.constant 0 : index
    %59 = vector.load %arg10[%c0_111, %c0_112, %c0_113] : memref<8x8x1152xf32, #tpu.memory_space<vmem>>, vector<8x8x1152xf32>
    %60 = vector.shape_cast %59 : vector<8x8x1152xf32> to vector<64x1152xf32>
    %61 = arith.truncf %60 : vector<64x1152xf32> to vector<64x1152xbf16>
    %c0_114 = arith.constant 0 : index
    %c0_115 = arith.constant 0 : index
    %62 = vector.load %arg3[%c0_114, %c0_115] : memref<1152x128xbf16, #tpu.memory_space<vmem>>, vector<1152x128xbf16>
    %cst_116 = arith.constant dense<0.000000e+00> : vector<64x128xf32>
    %63 = tpu.matmul %61, %62, %cst_116 {dimension_numbers = #tpu.dot_dimension_numbers<[1], [0], [0], [1], [0, 0, 1, 1], [], []>} : vector<64x1152xbf16>, vector<1152x128xbf16>, vector<64x128xf32> -> vector<64x128xf32>
    %c0_117 = arith.constant 0 : index
    %c0_118 = arith.constant 0 : index
    %64 = vector.load %arg4[%c0_117, %c0_118] : memref<1x128xf32, #tpu.memory_space<vmem>>, vector<1x128xf32>
    %65 = vector.broadcast %64 : vector<1x128xf32> to vector<64x128xf32>
    %66 = arith.addf %63, %65 : vector<64x128xf32>
    %cst_119 = arith.constant 0.000000e+00 : f32
    %67 = vector.broadcast %cst_119 : f32 to vector<64x128xf32>
    %68 = arith.maximumf %66, %67 : vector<64x128xf32>
    %c0_120 = arith.constant 0 : index
    %c0_121 = arith.constant 0 : index
    %69 = vector.load %arg6[%c0_120, %c0_121] : memref<64x64xbf16, #tpu.memory_space<vmem>>, vector<64x64xbf16>
    %70 = arith.truncf %68 : vector<64x128xf32> to vector<64x128xbf16>
    %cst_122 = arith.constant dense<0.000000e+00> : vector<64x128xf32>
    %71 = tpu.matmul %69, %70, %cst_122 {dimension_numbers = #tpu.dot_dimension_numbers<[1], [0], [0], [1], [0, 0, 1, 1], [], []>} : vector<64x64xbf16>, vector<64x128xbf16>, vector<64x128xf32> -> vector<64x128xf32>
    %72 = vector.extract_strided_slice %71 {offsets = [0, 0], sizes = [16, 128], strides = [1, 1]} : vector<64x128xf32> to vector<16x128xf32>
    %73 = vector.extract_strided_slice %71 {offsets = [16, 0], sizes = [16, 128], strides = [1, 1]} : vector<64x128xf32> to vector<16x128xf32>
    %74 = arith.maximumf %72, %73 : vector<16x128xf32>
    %75 = vector.extract_strided_slice %71 {offsets = [32, 0], sizes = [16, 128], strides = [1, 1]} : vector<64x128xf32> to vector<16x128xf32>
    %76 = vector.extract_strided_slice %71 {offsets = [48, 0], sizes = [16, 128], strides = [1, 1]} : vector<64x128xf32> to vector<16x128xf32>
    %77 = arith.maximumf %75, %76 : vector<16x128xf32>
    %78 = arith.maximumf %74, %77 : vector<16x128xf32>
    %79 = arith.truncf %78 : vector<16x128xf32> to vector<16x128xbf16>
    %c0_123 = arith.constant 0 : index
    %c0_124 = arith.constant 0 : index
    %80 = vector.load %arg7[%c0_123, %c0_124] : memref<16x128xbf16, #tpu.memory_space<vmem>>, vector<16x128xbf16>
    tpu.vector_store %arg7[%c0_123, %c0_124], %79 {strides = array<i32>} : memref<16x128xbf16, #tpu.memory_space<vmem>>, vector<16x128xbf16>,
    return
  }
}

module attributes {stable_mosaic.version = 11 : i64} {
  func.func @lstm_fc_kernel(%arg0: memref<16x128xbf16, #tpu.memory_space<vmem>>, %arg1: memref<128x128xbf16, #tpu.memory_space<vmem>>, %arg2: memref<32x128xbf16, #tpu.memory_space<vmem>>, %arg3: memref<1x128xf32, #tpu.memory_space<vmem>>, %arg4: memref<64x128xbf16, #tpu.memory_space<vmem>>, %arg5: memref<1x128xf32, #tpu.memory_space<vmem>>, %arg6: memref<32x256xbf16, #tpu.memory_space<vmem>>, %arg7: memref<1x256xf32, #tpu.memory_space<vmem>>, %arg8: memref<2x256xf32, #tpu.memory_space<vmem>>) attributes {dimension_semantics = [], scalar_prefetch = 0 : i64, scratch_operands = 0 : i64, tpu.core_type = #tpu.core_type<tc>} {
    %c0 = arith.constant 0 : index
    %c0_0 = arith.constant 0 : index
    %0 = vector.load %arg0[%c0, %c0_0] : memref<16x128xbf16, #tpu.memory_space<vmem>>, vector<16x128xbf16>
    %c0_1 = arith.constant 0 : index
    %c0_2 = arith.constant 0 : index
    %1 = vector.load %arg1[%c0_1, %c0_2] : memref<128x128xbf16, #tpu.memory_space<vmem>>, vector<128x128xbf16>
    %cst = arith.constant dense<0.000000e+00> : vector<16x128xf32>
    %2 = tpu.matmul %0, %1, %cst {dimension_numbers = #tpu.dot_dimension_numbers<[1], [0], [0], [1], [0, 0, 1, 1], [], []>} : vector<16x128xbf16>, vector<128x128xbf16>, vector<16x128xf32> -> vector<16x128xf32>
    %c0_3 = arith.constant 0 : index
    %c0_4 = arith.constant 0 : index
    %3 = vector.load %arg3[%c0_3, %c0_4] : memref<1x128xf32, #tpu.memory_space<vmem>>, vector<1x128xf32>
    %4 = vector.broadcast %3 : vector<1x128xf32> to vector<16x128xf32>
    %5 = arith.addf %2, %4 : vector<16x128xf32>
    %cst_5 = arith.constant 0.000000e+00 : f32
    %6 = vector.broadcast %cst_5 : f32 to vector<2x32xf32>
    %cst_6 = arith.constant 0.000000e+00 : f32
    %7 = vector.broadcast %cst_6 : f32 to vector<2x32xf32>
    %cst_7 = arith.constant 0.000000e+00 : f32
    %8 = vector.broadcast %cst_7 : f32 to vector<2x32xf32>
    %cst_8 = arith.constant 0.000000e+00 : f32
    %9 = vector.broadcast %cst_8 : f32 to vector<2x32xf32>
    %10 = vector.extract_strided_slice %5 {offsets = [0, 0], sizes = [2, 128], strides = [1, 1]} : vector<16x128xf32> to vector<2x128xf32>
    %11 = arith.truncf %6 : vector<2x32xf32> to vector<2x32xbf16>
    %c0_9 = arith.constant 0 : index
    %c0_10 = arith.constant 0 : index
    %12 = vector.load %arg2[%c0_9, %c0_10] : memref<32x128xbf16, #tpu.memory_space<vmem>>, vector<32x128xbf16>
    %cst_11 = arith.constant dense<0.000000e+00> : vector<2x128xf32>
    %13 = tpu.matmul %11, %12, %cst_11 {dimension_numbers = #tpu.dot_dimension_numbers<[1], [0], [0], [1], [0, 0, 1, 1], [], []>} : vector<2x32xbf16>, vector<32x128xbf16>, vector<2x128xf32> -> vector<2x128xf32>
    %14 = arith.addf %10, %13 : vector<2x128xf32>
    %15 = arith.negf %14 : vector<2x128xf32>
    %16 = math.exp %15 : vector<2x128xf32>
    %cst_12 = arith.constant 1.000000e+00 : f32
    %17 = vector.broadcast %cst_12 : f32 to vector<2x128xf32>
    %18 = arith.addf %17, %16 : vector<2x128xf32>
    %19 = arith.divf %17, %18 : vector<2x128xf32>
    %20 = math.tanh %14 : vector<2x128xf32>
    %21 = vector.extract_strided_slice %19 {offsets = [0, 0], sizes = [2, 32], strides = [1, 1]} : vector<2x128xf32> to vector<2x32xf32>
    %22 = vector.extract_strided_slice %19 {offsets = [0, 32], sizes = [2, 32], strides = [1, 1]} : vector<2x128xf32> to vector<2x32xf32>
    %23 = vector.extract_strided_slice %20 {offsets = [0, 64], sizes = [2, 32], strides = [1, 1]} : vector<2x128xf32> to vector<2x32xf32>
    %24 = vector.extract_strided_slice %19 {offsets = [0, 96], sizes = [2, 32], strides = [1, 1]} : vector<2x128xf32> to vector<2x32xf32>
    %25 = arith.mulf %22, %7 : vector<2x32xf32>
    %26 = arith.mulf %21, %23 : vector<2x32xf32>
    %27 = arith.addf %25, %26 : vector<2x32xf32>
    %28 = math.tanh %27 : vector<2x32xf32>
    %29 = arith.mulf %24, %28 : vector<2x32xf32>
    %30 = tpu.concatenate %29, %8 in 1 : vector<2x32xf32>, vector<2x32xf32> -> vector<2x64xf32>
    %31 = arith.truncf %30 : vector<2x64xf32> to vector<2x64xbf16>
    %c0_13 = arith.constant 0 : index
    %c0_14 = arith.constant 0 : index
    %32 = vector.load %arg4[%c0_13, %c0_14] : memref<64x128xbf16, #tpu.memory_space<vmem>>, vector<64x128xbf16>
    %cst_15 = arith.constant dense<0.000000e+00> : vector<2x128xf32>
    %33 = tpu.matmul %31, %32, %cst_15 {dimension_numbers = #tpu.dot_dimension_numbers<[1], [0], [0], [1], [0, 0, 1, 1], [], []>} : vector<2x64xbf16>, vector<64x128xbf16>, vector<2x128xf32> -> vector<2x128xf32>
    %c0_16 = arith.constant 0 : index
    %c0_17 = arith.constant 0 : index
    %34 = vector.load %arg5[%c0_16, %c0_17] : memref<1x128xf32, #tpu.memory_space<vmem>>, vector<1x128xf32>
    %35 = vector.broadcast %34 : vector<1x128xf32> to vector<2x128xf32>
    %36 = arith.addf %33, %35 : vector<2x128xf32>
    %37 = arith.negf %36 : vector<2x128xf32>
    %38 = math.exp %37 : vector<2x128xf32>
    %cst_18 = arith.constant 1.000000e+00 : f32
    %39 = vector.broadcast %cst_18 : f32 to vector<2x128xf32>
    %40 = arith.addf %39, %38 : vector<2x128xf32>
    %41 = arith.divf %39, %40 : vector<2x128xf32>
    %42 = math.tanh %36 : vector<2x128xf32>
    %43 = vector.extract_strided_slice %41 {offsets = [0, 0], sizes = [2, 32], strides = [1, 1]} : vector<2x128xf32> to vector<2x32xf32>
    %44 = vector.extract_strided_slice %41 {offsets = [0, 32], sizes = [2, 32], strides = [1, 1]} : vector<2x128xf32> to vector<2x32xf32>
    %45 = vector.extract_strided_slice %42 {offsets = [0, 64], sizes = [2, 32], strides = [1, 1]} : vector<2x128xf32> to vector<2x32xf32>
    %46 = vector.extract_strided_slice %41 {offsets = [0, 96], sizes = [2, 32], strides = [1, 1]} : vector<2x128xf32> to vector<2x32xf32>
    %47 = arith.mulf %44, %9 : vector<2x32xf32>
    %48 = arith.mulf %43, %45 : vector<2x32xf32>
    %49 = arith.addf %47, %48 : vector<2x32xf32>
    %50 = math.tanh %49 : vector<2x32xf32>
    %51 = arith.mulf %46, %50 : vector<2x32xf32>
    %52 = vector.extract_strided_slice %5 {offsets = [2, 0], sizes = [2, 128], strides = [1, 1]} : vector<16x128xf32> to vector<2x128xf32>
    %53 = arith.truncf %29 : vector<2x32xf32> to vector<2x32xbf16>
    %c0_19 = arith.constant 0 : index
    %c0_20 = arith.constant 0 : index
    %54 = vector.load %arg2[%c0_19, %c0_20] : memref<32x128xbf16, #tpu.memory_space<vmem>>, vector<32x128xbf16>
    %cst_21 = arith.constant dense<0.000000e+00> : vector<2x128xf32>
    %55 = tpu.matmul %53, %54, %cst_21 {dimension_numbers = #tpu.dot_dimension_numbers<[1], [0], [0], [1], [0, 0, 1, 1], [], []>} : vector<2x32xbf16>, vector<32x128xbf16>, vector<2x128xf32> -> vector<2x128xf32>
    %56 = arith.addf %52, %55 : vector<2x128xf32>
    %57 = arith.negf %56 : vector<2x128xf32>
    %58 = math.exp %57 : vector<2x128xf32>
    %cst_22 = arith.constant 1.000000e+00 : f32
    %59 = vector.broadcast %cst_22 : f32 to vector<2x128xf32>
    %60 = arith.addf %59, %58 : vector<2x128xf32>
    %61 = arith.divf %59, %60 : vector<2x128xf32>
    %62 = math.tanh %56 : vector<2x128xf32>
    %63 = vector.extract_strided_slice %61 {offsets = [0, 0], sizes = [2, 32], strides = [1, 1]} : vector<2x128xf32> to vector<2x32xf32>
    %64 = vector.extract_strided_slice %61 {offsets = [0, 32], sizes = [2, 32], strides = [1, 1]} : vector<2x128xf32> to vector<2x32xf32>
    %65 = vector.extract_strided_slice %62 {offsets = [0, 64], sizes = [2, 32], strides = [1, 1]} : vector<2x128xf32> to vector<2x32xf32>
    %66 = vector.extract_strided_slice %61 {offsets = [0, 96], sizes = [2, 32], strides = [1, 1]} : vector<2x128xf32> to vector<2x32xf32>
    %67 = arith.mulf %64, %27 : vector<2x32xf32>
    %68 = arith.mulf %63, %65 : vector<2x32xf32>
    %69 = arith.addf %67, %68 : vector<2x32xf32>
    %70 = math.tanh %69 : vector<2x32xf32>
    %71 = arith.mulf %66, %70 : vector<2x32xf32>
    %72 = tpu.concatenate %71, %51 in 1 : vector<2x32xf32>, vector<2x32xf32> -> vector<2x64xf32>
    %73 = arith.truncf %72 : vector<2x64xf32> to vector<2x64xbf16>
    %c0_23 = arith.constant 0 : index
    %c0_24 = arith.constant 0 : index
    %74 = vector.load %arg4[%c0_23, %c0_24] : memref<64x128xbf16, #tpu.memory_space<vmem>>, vector<64x128xbf16>
    %cst_25 = arith.constant dense<0.000000e+00> : vector<2x128xf32>
    %75 = tpu.matmul %73, %74, %cst_25 {dimension_numbers = #tpu.dot_dimension_numbers<[1], [0], [0], [1], [0, 0, 1, 1], [], []>} : vector<2x64xbf16>, vector<64x128xbf16>, vector<2x128xf32> -> vector<2x128xf32>
    %c0_26 = arith.constant 0 : index
    %c0_27 = arith.constant 0 : index
    %76 = vector.load %arg5[%c0_26, %c0_27] : memref<1x128xf32, #tpu.memory_space<vmem>>, vector<1x128xf32>
    %77 = vector.broadcast %76 : vector<1x128xf32> to vector<2x128xf32>
    %78 = arith.addf %75, %77 : vector<2x128xf32>
    %79 = arith.negf %78 : vector<2x128xf32>
    %80 = math.exp %79 : vector<2x128xf32>
    %cst_28 = arith.constant 1.000000e+00 : f32
    %81 = vector.broadcast %cst_28 : f32 to vector<2x128xf32>
    %82 = arith.addf %81, %80 : vector<2x128xf32>
    %83 = arith.divf %81, %82 : vector<2x128xf32>
    %84 = math.tanh %78 : vector<2x128xf32>
    %85 = vector.extract_strided_slice %83 {offsets = [0, 0], sizes = [2, 32], strides = [1, 1]} : vector<2x128xf32> to vector<2x32xf32>
    %86 = vector.extract_strided_slice %83 {offsets = [0, 32], sizes = [2, 32], strides = [1, 1]} : vector<2x128xf32> to vector<2x32xf32>
    %87 = vector.extract_strided_slice %84 {offsets = [0, 64], sizes = [2, 32], strides = [1, 1]} : vector<2x128xf32> to vector<2x32xf32>
    %88 = vector.extract_strided_slice %83 {offsets = [0, 96], sizes = [2, 32], strides = [1, 1]} : vector<2x128xf32> to vector<2x32xf32>
    %89 = arith.mulf %86, %49 : vector<2x32xf32>
    %90 = arith.mulf %85, %87 : vector<2x32xf32>
    %91 = arith.addf %89, %90 : vector<2x32xf32>
    %92 = math.tanh %91 : vector<2x32xf32>
    %93 = arith.mulf %88, %92 : vector<2x32xf32>
    %94 = vector.extract_strided_slice %5 {offsets = [4, 0], sizes = [2, 128], strides = [1, 1]} : vector<16x128xf32> to vector<2x128xf32>
    %95 = arith.truncf %71 : vector<2x32xf32> to vector<2x32xbf16>
    %c0_29 = arith.constant 0 : index
    %c0_30 = arith.constant 0 : index
    %96 = vector.load %arg2[%c0_29, %c0_30] : memref<32x128xbf16, #tpu.memory_space<vmem>>, vector<32x128xbf16>
    %cst_31 = arith.constant dense<0.000000e+00> : vector<2x128xf32>
    %97 = tpu.matmul %95, %96, %cst_31 {dimension_numbers = #tpu.dot_dimension_numbers<[1], [0], [0], [1], [0, 0, 1, 1], [], []>} : vector<2x32xbf16>, vector<32x128xbf16>, vector<2x128xf32> -> vector<2x128xf32>
    %98 = arith.addf %94, %97 : vector<2x128xf32>
    %99 = arith.negf %98 : vector<2x128xf32>
    %100 = math.exp %99 : vector<2x128xf32>
    %cst_32 = arith.constant 1.000000e+00 : f32
    %101 = vector.broadcast %cst_32 : f32 to vector<2x128xf32>
    %102 = arith.addf %101, %100 : vector<2x128xf32>
    %103 = arith.divf %101, %102 : vector<2x128xf32>
    %104 = math.tanh %98 : vector<2x128xf32>
    %105 = vector.extract_strided_slice %103 {offsets = [0, 0], sizes = [2, 32], strides = [1, 1]} : vector<2x128xf32> to vector<2x32xf32>
    %106 = vector.extract_strided_slice %103 {offsets = [0, 32], sizes = [2, 32], strides = [1, 1]} : vector<2x128xf32> to vector<2x32xf32>
    %107 = vector.extract_strided_slice %104 {offsets = [0, 64], sizes = [2, 32], strides = [1, 1]} : vector<2x128xf32> to vector<2x32xf32>
    %108 = vector.extract_strided_slice %103 {offsets = [0, 96], sizes = [2, 32], strides = [1, 1]} : vector<2x128xf32> to vector<2x32xf32>
    %109 = arith.mulf %106, %69 : vector<2x32xf32>
    %110 = arith.mulf %105, %107 : vector<2x32xf32>
    %111 = arith.addf %109, %110 : vector<2x32xf32>
    %112 = math.tanh %111 : vector<2x32xf32>
    %113 = arith.mulf %108, %112 : vector<2x32xf32>
    %114 = tpu.concatenate %113, %93 in 1 : vector<2x32xf32>, vector<2x32xf32> -> vector<2x64xf32>
    %115 = arith.truncf %114 : vector<2x64xf32> to vector<2x64xbf16>
    %c0_33 = arith.constant 0 : index
    %c0_34 = arith.constant 0 : index
    %116 = vector.load %arg4[%c0_33, %c0_34] : memref<64x128xbf16, #tpu.memory_space<vmem>>, vector<64x128xbf16>
    %cst_35 = arith.constant dense<0.000000e+00> : vector<2x128xf32>
    %117 = tpu.matmul %115, %116, %cst_35 {dimension_numbers = #tpu.dot_dimension_numbers<[1], [0], [0], [1], [0, 0, 1, 1], [], []>} : vector<2x64xbf16>, vector<64x128xbf16>, vector<2x128xf32> -> vector<2x128xf32>
    %c0_36 = arith.constant 0 : index
    %c0_37 = arith.constant 0 : index
    %118 = vector.load %arg5[%c0_36, %c0_37] : memref<1x128xf32, #tpu.memory_space<vmem>>, vector<1x128xf32>
    %119 = vector.broadcast %118 : vector<1x128xf32> to vector<2x128xf32>
    %120 = arith.addf %117, %119 : vector<2x128xf32>
    %121 = arith.negf %120 : vector<2x128xf32>
    %122 = math.exp %121 : vector<2x128xf32>
    %cst_38 = arith.constant 1.000000e+00 : f32
    %123 = vector.broadcast %cst_38 : f32 to vector<2x128xf32>
    %124 = arith.addf %123, %122 : vector<2x128xf32>
    %125 = arith.divf %123, %124 : vector<2x128xf32>
    %126 = math.tanh %120 : vector<2x128xf32>
    %127 = vector.extract_strided_slice %125 {offsets = [0, 0], sizes = [2, 32], strides = [1, 1]} : vector<2x128xf32> to vector<2x32xf32>
    %128 = vector.extract_strided_slice %125 {offsets = [0, 32], sizes = [2, 32], strides = [1, 1]} : vector<2x128xf32> to vector<2x32xf32>
    %129 = vector.extract_strided_slice %126 {offsets = [0, 64], sizes = [2, 32], strides = [1, 1]} : vector<2x128xf32> to vector<2x32xf32>
    %130 = vector.extract_strided_slice %125 {offsets = [0, 96], sizes = [2, 32], strides = [1, 1]} : vector<2x128xf32> to vector<2x32xf32>
    %131 = arith.mulf %128, %91 : vector<2x32xf32>
    %132 = arith.mulf %127, %129 : vector<2x32xf32>
    %133 = arith.addf %131, %132 : vector<2x32xf32>
    %134 = math.tanh %133 : vector<2x32xf32>
    %135 = arith.mulf %130, %134 : vector<2x32xf32>
    %136 = vector.extract_strided_slice %5 {offsets = [6, 0], sizes = [2, 128], strides = [1, 1]} : vector<16x128xf32> to vector<2x128xf32>
    %137 = arith.truncf %113 : vector<2x32xf32> to vector<2x32xbf16>
    %c0_39 = arith.constant 0 : index
    %c0_40 = arith.constant 0 : index
    %138 = vector.load %arg2[%c0_39, %c0_40] : memref<32x128xbf16, #tpu.memory_space<vmem>>, vector<32x128xbf16>
    %cst_41 = arith.constant dense<0.000000e+00> : vector<2x128xf32>
    %139 = tpu.matmul %137, %138, %cst_41 {dimension_numbers = #tpu.dot_dimension_numbers<[1], [0], [0], [1], [0, 0, 1, 1], [], []>} : vector<2x32xbf16>, vector<32x128xbf16>, vector<2x128xf32> -> vector<2x128xf32>
    %140 = arith.addf %136, %139 : vector<2x128xf32>
    %141 = arith.negf %140 : vector<2x128xf32>
    %142 = math.exp %141 : vector<2x128xf32>
    %cst_42 = arith.constant 1.000000e+00 : f32
    %143 = vector.broadcast %cst_42 : f32 to vector<2x128xf32>
    %144 = arith.addf %143, %142 : vector<2x128xf32>
    %145 = arith.divf %143, %144 : vector<2x128xf32>
    %146 = math.tanh %140 : vector<2x128xf32>
    %147 = vector.extract_strided_slice %145 {offsets = [0, 0], sizes = [2, 32], strides = [1, 1]} : vector<2x128xf32> to vector<2x32xf32>
    %148 = vector.extract_strided_slice %145 {offsets = [0, 32], sizes = [2, 32], strides = [1, 1]} : vector<2x128xf32> to vector<2x32xf32>
    %149 = vector.extract_strided_slice %146 {offsets = [0, 64], sizes = [2, 32], strides = [1, 1]} : vector<2x128xf32> to vector<2x32xf32>
    %150 = vector.extract_strided_slice %145 {offsets = [0, 96], sizes = [2, 32], strides = [1, 1]} : vector<2x128xf32> to vector<2x32xf32>
    %151 = arith.mulf %148, %111 : vector<2x32xf32>
    %152 = arith.mulf %147, %149 : vector<2x32xf32>
    %153 = arith.addf %151, %152 : vector<2x32xf32>
    %154 = math.tanh %153 : vector<2x32xf32>
    %155 = arith.mulf %150, %154 : vector<2x32xf32>
    %156 = tpu.concatenate %155, %135 in 1 : vector<2x32xf32>, vector<2x32xf32> -> vector<2x64xf32>
    %157 = arith.truncf %156 : vector<2x64xf32> to vector<2x64xbf16>
    %c0_43 = arith.constant 0 : index
    %c0_44 = arith.constant 0 : index
    %158 = vector.load %arg4[%c0_43, %c0_44] : memref<64x128xbf16, #tpu.memory_space<vmem>>, vector<64x128xbf16>
    %cst_45 = arith.constant dense<0.000000e+00> : vector<2x128xf32>
    %159 = tpu.matmul %157, %158, %cst_45 {dimension_numbers = #tpu.dot_dimension_numbers<[1], [0], [0], [1], [0, 0, 1, 1], [], []>} : vector<2x64xbf16>, vector<64x128xbf16>, vector<2x128xf32> -> vector<2x128xf32>
    %c0_46 = arith.constant 0 : index
    %c0_47 = arith.constant 0 : index
    %160 = vector.load %arg5[%c0_46, %c0_47] : memref<1x128xf32, #tpu.memory_space<vmem>>, vector<1x128xf32>
    %161 = vector.broadcast %160 : vector<1x128xf32> to vector<2x128xf32>
    %162 = arith.addf %159, %161 : vector<2x128xf32>
    %163 = arith.negf %162 : vector<2x128xf32>
    %164 = math.exp %163 : vector<2x128xf32>
    %cst_48 = arith.constant 1.000000e+00 : f32
    %165 = vector.broadcast %cst_48 : f32 to vector<2x128xf32>
    %166 = arith.addf %165, %164 : vector<2x128xf32>
    %167 = arith.divf %165, %166 : vector<2x128xf32>
    %168 = math.tanh %162 : vector<2x128xf32>
    %169 = vector.extract_strided_slice %167 {offsets = [0, 0], sizes = [2, 32], strides = [1, 1]} : vector<2x128xf32> to vector<2x32xf32>
    %170 = vector.extract_strided_slice %167 {offsets = [0, 32], sizes = [2, 32], strides = [1, 1]} : vector<2x128xf32> to vector<2x32xf32>
    %171 = vector.extract_strided_slice %168 {offsets = [0, 64], sizes = [2, 32], strides = [1, 1]} : vector<2x128xf32> to vector<2x32xf32>
    %172 = vector.extract_strided_slice %167 {offsets = [0, 96], sizes = [2, 32], strides = [1, 1]} : vector<2x128xf32> to vector<2x32xf32>
    %173 = arith.mulf %170, %133 : vector<2x32xf32>
    %174 = arith.mulf %169, %171 : vector<2x32xf32>
    %175 = arith.addf %173, %174 : vector<2x32xf32>
    %176 = math.tanh %175 : vector<2x32xf32>
    %177 = arith.mulf %172, %176 : vector<2x32xf32>
    %178 = vector.extract_strided_slice %5 {offsets = [8, 0], sizes = [2, 128], strides = [1, 1]} : vector<16x128xf32> to vector<2x128xf32>
    %179 = arith.truncf %155 : vector<2x32xf32> to vector<2x32xbf16>
    %c0_49 = arith.constant 0 : index
    %c0_50 = arith.constant 0 : index
    %180 = vector.load %arg2[%c0_49, %c0_50] : memref<32x128xbf16, #tpu.memory_space<vmem>>, vector<32x128xbf16>
    %cst_51 = arith.constant dense<0.000000e+00> : vector<2x128xf32>
    %181 = tpu.matmul %179, %180, %cst_51 {dimension_numbers = #tpu.dot_dimension_numbers<[1], [0], [0], [1], [0, 0, 1, 1], [], []>} : vector<2x32xbf16>, vector<32x128xbf16>, vector<2x128xf32> -> vector<2x128xf32>
    %182 = arith.addf %178, %181 : vector<2x128xf32>
    %183 = arith.negf %182 : vector<2x128xf32>
    %184 = math.exp %183 : vector<2x128xf32>
    %cst_52 = arith.constant 1.000000e+00 : f32
    %185 = vector.broadcast %cst_52 : f32 to vector<2x128xf32>
    %186 = arith.addf %185, %184 : vector<2x128xf32>
    %187 = arith.divf %185, %186 : vector<2x128xf32>
    %188 = math.tanh %182 : vector<2x128xf32>
    %189 = vector.extract_strided_slice %187 {offsets = [0, 0], sizes = [2, 32], strides = [1, 1]} : vector<2x128xf32> to vector<2x32xf32>
    %190 = vector.extract_strided_slice %187 {offsets = [0, 32], sizes = [2, 32], strides = [1, 1]} : vector<2x128xf32> to vector<2x32xf32>
    %191 = vector.extract_strided_slice %188 {offsets = [0, 64], sizes = [2, 32], strides = [1, 1]} : vector<2x128xf32> to vector<2x32xf32>
    %192 = vector.extract_strided_slice %187 {offsets = [0, 96], sizes = [2, 32], strides = [1, 1]} : vector<2x128xf32> to vector<2x32xf32>
    %193 = arith.mulf %190, %153 : vector<2x32xf32>
    %194 = arith.mulf %189, %191 : vector<2x32xf32>
    %195 = arith.addf %193, %194 : vector<2x32xf32>
    %196 = math.tanh %195 : vector<2x32xf32>
    %197 = arith.mulf %192, %196 : vector<2x32xf32>
    %198 = tpu.concatenate %197, %177 in 1 : vector<2x32xf32>, vector<2x32xf32> -> vector<2x64xf32>
    %199 = arith.truncf %198 : vector<2x64xf32> to vector<2x64xbf16>
    %c0_53 = arith.constant 0 : index
    %c0_54 = arith.constant 0 : index
    %200 = vector.load %arg4[%c0_53, %c0_54] : memref<64x128xbf16, #tpu.memory_space<vmem>>, vector<64x128xbf16>
    %cst_55 = arith.constant dense<0.000000e+00> : vector<2x128xf32>
    %201 = tpu.matmul %199, %200, %cst_55 {dimension_numbers = #tpu.dot_dimension_numbers<[1], [0], [0], [1], [0, 0, 1, 1], [], []>} : vector<2x64xbf16>, vector<64x128xbf16>, vector<2x128xf32> -> vector<2x128xf32>
    %c0_56 = arith.constant 0 : index
    %c0_57 = arith.constant 0 : index
    %202 = vector.load %arg5[%c0_56, %c0_57] : memref<1x128xf32, #tpu.memory_space<vmem>>, vector<1x128xf32>
    %203 = vector.broadcast %202 : vector<1x128xf32> to vector<2x128xf32>
    %204 = arith.addf %201, %203 : vector<2x128xf32>
    %205 = arith.negf %204 : vector<2x128xf32>
    %206 = math.exp %205 : vector<2x128xf32>
    %cst_58 = arith.constant 1.000000e+00 : f32
    %207 = vector.broadcast %cst_58 : f32 to vector<2x128xf32>
    %208 = arith.addf %207, %206 : vector<2x128xf32>
    %209 = arith.divf %207, %208 : vector<2x128xf32>
    %210 = math.tanh %204 : vector<2x128xf32>
    %211 = vector.extract_strided_slice %209 {offsets = [0, 0], sizes = [2, 32], strides = [1, 1]} : vector<2x128xf32> to vector<2x32xf32>
    %212 = vector.extract_strided_slice %209 {offsets = [0, 32], sizes = [2, 32], strides = [1, 1]} : vector<2x128xf32> to vector<2x32xf32>
    %213 = vector.extract_strided_slice %210 {offsets = [0, 64], sizes = [2, 32], strides = [1, 1]} : vector<2x128xf32> to vector<2x32xf32>
    %214 = vector.extract_strided_slice %209 {offsets = [0, 96], sizes = [2, 32], strides = [1, 1]} : vector<2x128xf32> to vector<2x32xf32>
    %215 = arith.mulf %212, %175 : vector<2x32xf32>
    %216 = arith.mulf %211, %213 : vector<2x32xf32>
    %217 = arith.addf %215, %216 : vector<2x32xf32>
    %218 = math.tanh %217 : vector<2x32xf32>
    %219 = arith.mulf %214, %218 : vector<2x32xf32>
    %220 = vector.extract_strided_slice %5 {offsets = [10, 0], sizes = [2, 128], strides = [1, 1]} : vector<16x128xf32> to vector<2x128xf32>
    %221 = arith.truncf %197 : vector<2x32xf32> to vector<2x32xbf16>
    %c0_59 = arith.constant 0 : index
    %c0_60 = arith.constant 0 : index
    %222 = vector.load %arg2[%c0_59, %c0_60] : memref<32x128xbf16, #tpu.memory_space<vmem>>, vector<32x128xbf16>
    %cst_61 = arith.constant dense<0.000000e+00> : vector<2x128xf32>
    %223 = tpu.matmul %221, %222, %cst_61 {dimension_numbers = #tpu.dot_dimension_numbers<[1], [0], [0], [1], [0, 0, 1, 1], [], []>} : vector<2x32xbf16>, vector<32x128xbf16>, vector<2x128xf32> -> vector<2x128xf32>
    %224 = arith.addf %220, %223 : vector<2x128xf32>
    %225 = arith.negf %224 : vector<2x128xf32>
    %226 = math.exp %225 : vector<2x128xf32>
    %cst_62 = arith.constant 1.000000e+00 : f32
    %227 = vector.broadcast %cst_62 : f32 to vector<2x128xf32>
    %228 = arith.addf %227, %226 : vector<2x128xf32>
    %229 = arith.divf %227, %228 : vector<2x128xf32>
    %230 = math.tanh %224 : vector<2x128xf32>
    %231 = vector.extract_strided_slice %229 {offsets = [0, 0], sizes = [2, 32], strides = [1, 1]} : vector<2x128xf32> to vector<2x32xf32>
    %232 = vector.extract_strided_slice %229 {offsets = [0, 32], sizes = [2, 32], strides = [1, 1]} : vector<2x128xf32> to vector<2x32xf32>
    %233 = vector.extract_strided_slice %230 {offsets = [0, 64], sizes = [2, 32], strides = [1, 1]} : vector<2x128xf32> to vector<2x32xf32>
    %234 = vector.extract_strided_slice %229 {offsets = [0, 96], sizes = [2, 32], strides = [1, 1]} : vector<2x128xf32> to vector<2x32xf32>
    %235 = arith.mulf %232, %195 : vector<2x32xf32>
    %236 = arith.mulf %231, %233 : vector<2x32xf32>
    %237 = arith.addf %235, %236 : vector<2x32xf32>
    %238 = math.tanh %237 : vector<2x32xf32>
    %239 = arith.mulf %234, %238 : vector<2x32xf32>
    %240 = tpu.concatenate %239, %219 in 1 : vector<2x32xf32>, vector<2x32xf32> -> vector<2x64xf32>
    %241 = arith.truncf %240 : vector<2x64xf32> to vector<2x64xbf16>
    %c0_63 = arith.constant 0 : index
    %c0_64 = arith.constant 0 : index
    %242 = vector.load %arg4[%c0_63, %c0_64] : memref<64x128xbf16, #tpu.memory_space<vmem>>, vector<64x128xbf16>
    %cst_65 = arith.constant dense<0.000000e+00> : vector<2x128xf32>
    %243 = tpu.matmul %241, %242, %cst_65 {dimension_numbers = #tpu.dot_dimension_numbers<[1], [0], [0], [1], [0, 0, 1, 1], [], []>} : vector<2x64xbf16>, vector<64x128xbf16>, vector<2x128xf32> -> vector<2x128xf32>
    %c0_66 = arith.constant 0 : index
    %c0_67 = arith.constant 0 : index
    %244 = vector.load %arg5[%c0_66, %c0_67] : memref<1x128xf32, #tpu.memory_space<vmem>>, vector<1x128xf32>
    %245 = vector.broadcast %244 : vector<1x128xf32> to vector<2x128xf32>
    %246 = arith.addf %243, %245 : vector<2x128xf32>
    %247 = arith.negf %246 : vector<2x128xf32>
    %248 = math.exp %247 : vector<2x128xf32>
    %cst_68 = arith.constant 1.000000e+00 : f32
    %249 = vector.broadcast %cst_68 : f32 to vector<2x128xf32>
    %250 = arith.addf %249, %248 : vector<2x128xf32>
    %251 = arith.divf %249, %250 : vector<2x128xf32>
    %252 = math.tanh %246 : vector<2x128xf32>
    %253 = vector.extract_strided_slice %251 {offsets = [0, 0], sizes = [2, 32], strides = [1, 1]} : vector<2x128xf32> to vector<2x32xf32>
    %254 = vector.extract_strided_slice %251 {offsets = [0, 32], sizes = [2, 32], strides = [1, 1]} : vector<2x128xf32> to vector<2x32xf32>
    %255 = vector.extract_strided_slice %252 {offsets = [0, 64], sizes = [2, 32], strides = [1, 1]} : vector<2x128xf32> to vector<2x32xf32>
    %256 = vector.extract_strided_slice %251 {offsets = [0, 96], sizes = [2, 32], strides = [1, 1]} : vector<2x128xf32> to vector<2x32xf32>
    %257 = arith.mulf %254, %217 : vector<2x32xf32>
    %258 = arith.mulf %253, %255 : vector<2x32xf32>
    %259 = arith.addf %257, %258 : vector<2x32xf32>
    %260 = math.tanh %259 : vector<2x32xf32>
    %261 = arith.mulf %256, %260 : vector<2x32xf32>
    %262 = vector.extract_strided_slice %5 {offsets = [12, 0], sizes = [2, 128], strides = [1, 1]} : vector<16x128xf32> to vector<2x128xf32>
    %263 = arith.truncf %239 : vector<2x32xf32> to vector<2x32xbf16>
    %c0_69 = arith.constant 0 : index
    %c0_70 = arith.constant 0 : index
    %264 = vector.load %arg2[%c0_69, %c0_70] : memref<32x128xbf16, #tpu.memory_space<vmem>>, vector<32x128xbf16>
    %cst_71 = arith.constant dense<0.000000e+00> : vector<2x128xf32>
    %265 = tpu.matmul %263, %264, %cst_71 {dimension_numbers = #tpu.dot_dimension_numbers<[1], [0], [0], [1], [0, 0, 1, 1], [], []>} : vector<2x32xbf16>, vector<32x128xbf16>, vector<2x128xf32> -> vector<2x128xf32>
    %266 = arith.addf %262, %265 : vector<2x128xf32>
    %267 = arith.negf %266 : vector<2x128xf32>
    %268 = math.exp %267 : vector<2x128xf32>
    %cst_72 = arith.constant 1.000000e+00 : f32
    %269 = vector.broadcast %cst_72 : f32 to vector<2x128xf32>
    %270 = arith.addf %269, %268 : vector<2x128xf32>
    %271 = arith.divf %269, %270 : vector<2x128xf32>
    %272 = math.tanh %266 : vector<2x128xf32>
    %273 = vector.extract_strided_slice %271 {offsets = [0, 0], sizes = [2, 32], strides = [1, 1]} : vector<2x128xf32> to vector<2x32xf32>
    %274 = vector.extract_strided_slice %271 {offsets = [0, 32], sizes = [2, 32], strides = [1, 1]} : vector<2x128xf32> to vector<2x32xf32>
    %275 = vector.extract_strided_slice %272 {offsets = [0, 64], sizes = [2, 32], strides = [1, 1]} : vector<2x128xf32> to vector<2x32xf32>
    %276 = vector.extract_strided_slice %271 {offsets = [0, 96], sizes = [2, 32], strides = [1, 1]} : vector<2x128xf32> to vector<2x32xf32>
    %277 = arith.mulf %274, %237 : vector<2x32xf32>
    %278 = arith.mulf %273, %275 : vector<2x32xf32>
    %279 = arith.addf %277, %278 : vector<2x32xf32>
    %280 = math.tanh %279 : vector<2x32xf32>
    %281 = arith.mulf %276, %280 : vector<2x32xf32>
    %282 = tpu.concatenate %281, %261 in 1 : vector<2x32xf32>, vector<2x32xf32> -> vector<2x64xf32>
    %283 = arith.truncf %282 : vector<2x64xf32> to vector<2x64xbf16>
    %c0_73 = arith.constant 0 : index
    %c0_74 = arith.constant 0 : index
    %284 = vector.load %arg4[%c0_73, %c0_74] : memref<64x128xbf16, #tpu.memory_space<vmem>>, vector<64x128xbf16>
    %cst_75 = arith.constant dense<0.000000e+00> : vector<2x128xf32>
    %285 = tpu.matmul %283, %284, %cst_75 {dimension_numbers = #tpu.dot_dimension_numbers<[1], [0], [0], [1], [0, 0, 1, 1], [], []>} : vector<2x64xbf16>, vector<64x128xbf16>, vector<2x128xf32> -> vector<2x128xf32>
    %c0_76 = arith.constant 0 : index
    %c0_77 = arith.constant 0 : index
    %286 = vector.load %arg5[%c0_76, %c0_77] : memref<1x128xf32, #tpu.memory_space<vmem>>, vector<1x128xf32>
    %287 = vector.broadcast %286 : vector<1x128xf32> to vector<2x128xf32>
    %288 = arith.addf %285, %287 : vector<2x128xf32>
    %289 = arith.negf %288 : vector<2x128xf32>
    %290 = math.exp %289 : vector<2x128xf32>
    %cst_78 = arith.constant 1.000000e+00 : f32
    %291 = vector.broadcast %cst_78 : f32 to vector<2x128xf32>
    %292 = arith.addf %291, %290 : vector<2x128xf32>
    %293 = arith.divf %291, %292 : vector<2x128xf32>
    %294 = math.tanh %288 : vector<2x128xf32>
    %295 = vector.extract_strided_slice %293 {offsets = [0, 0], sizes = [2, 32], strides = [1, 1]} : vector<2x128xf32> to vector<2x32xf32>
    %296 = vector.extract_strided_slice %293 {offsets = [0, 32], sizes = [2, 32], strides = [1, 1]} : vector<2x128xf32> to vector<2x32xf32>
    %297 = vector.extract_strided_slice %294 {offsets = [0, 64], sizes = [2, 32], strides = [1, 1]} : vector<2x128xf32> to vector<2x32xf32>
    %298 = vector.extract_strided_slice %293 {offsets = [0, 96], sizes = [2, 32], strides = [1, 1]} : vector<2x128xf32> to vector<2x32xf32>
    %299 = arith.mulf %296, %259 : vector<2x32xf32>
    %300 = arith.mulf %295, %297 : vector<2x32xf32>
    %301 = arith.addf %299, %300 : vector<2x32xf32>
    %302 = math.tanh %301 : vector<2x32xf32>
    %303 = arith.mulf %298, %302 : vector<2x32xf32>
    %304 = vector.extract_strided_slice %5 {offsets = [14, 0], sizes = [2, 128], strides = [1, 1]} : vector<16x128xf32> to vector<2x128xf32>
    %305 = arith.truncf %281 : vector<2x32xf32> to vector<2x32xbf16>
    %c0_79 = arith.constant 0 : index
    %c0_80 = arith.constant 0 : index
    %306 = vector.load %arg2[%c0_79, %c0_80] : memref<32x128xbf16, #tpu.memory_space<vmem>>, vector<32x128xbf16>
    %cst_81 = arith.constant dense<0.000000e+00> : vector<2x128xf32>
    %307 = tpu.matmul %305, %306, %cst_81 {dimension_numbers = #tpu.dot_dimension_numbers<[1], [0], [0], [1], [0, 0, 1, 1], [], []>} : vector<2x32xbf16>, vector<32x128xbf16>, vector<2x128xf32> -> vector<2x128xf32>
    %308 = arith.addf %304, %307 : vector<2x128xf32>
    %309 = arith.negf %308 : vector<2x128xf32>
    %310 = math.exp %309 : vector<2x128xf32>
    %cst_82 = arith.constant 1.000000e+00 : f32
    %311 = vector.broadcast %cst_82 : f32 to vector<2x128xf32>
    %312 = arith.addf %311, %310 : vector<2x128xf32>
    %313 = arith.divf %311, %312 : vector<2x128xf32>
    %314 = math.tanh %308 : vector<2x128xf32>
    %315 = vector.extract_strided_slice %313 {offsets = [0, 0], sizes = [2, 32], strides = [1, 1]} : vector<2x128xf32> to vector<2x32xf32>
    %316 = vector.extract_strided_slice %313 {offsets = [0, 32], sizes = [2, 32], strides = [1, 1]} : vector<2x128xf32> to vector<2x32xf32>
    %317 = vector.extract_strided_slice %314 {offsets = [0, 64], sizes = [2, 32], strides = [1, 1]} : vector<2x128xf32> to vector<2x32xf32>
    %318 = vector.extract_strided_slice %313 {offsets = [0, 96], sizes = [2, 32], strides = [1, 1]} : vector<2x128xf32> to vector<2x32xf32>
    %319 = arith.mulf %316, %279 : vector<2x32xf32>
    %320 = arith.mulf %315, %317 : vector<2x32xf32>
    %321 = arith.addf %319, %320 : vector<2x32xf32>
    %322 = math.tanh %321 : vector<2x32xf32>
    %323 = arith.mulf %318, %322 : vector<2x32xf32>
    %324 = tpu.concatenate %323, %303 in 1 : vector<2x32xf32>, vector<2x32xf32> -> vector<2x64xf32>
    %325 = arith.truncf %324 : vector<2x64xf32> to vector<2x64xbf16>
    %c0_83 = arith.constant 0 : index
    %c0_84 = arith.constant 0 : index
    %326 = vector.load %arg4[%c0_83, %c0_84] : memref<64x128xbf16, #tpu.memory_space<vmem>>, vector<64x128xbf16>
    %cst_85 = arith.constant dense<0.000000e+00> : vector<2x128xf32>
    %327 = tpu.matmul %325, %326, %cst_85 {dimension_numbers = #tpu.dot_dimension_numbers<[1], [0], [0], [1], [0, 0, 1, 1], [], []>} : vector<2x64xbf16>, vector<64x128xbf16>, vector<2x128xf32> -> vector<2x128xf32>
    %c0_86 = arith.constant 0 : index
    %c0_87 = arith.constant 0 : index
    %328 = vector.load %arg5[%c0_86, %c0_87] : memref<1x128xf32, #tpu.memory_space<vmem>>, vector<1x128xf32>
    %329 = vector.broadcast %328 : vector<1x128xf32> to vector<2x128xf32>
    %330 = arith.addf %327, %329 : vector<2x128xf32>
    %331 = arith.negf %330 : vector<2x128xf32>
    %332 = math.exp %331 : vector<2x128xf32>
    %cst_88 = arith.constant 1.000000e+00 : f32
    %333 = vector.broadcast %cst_88 : f32 to vector<2x128xf32>
    %334 = arith.addf %333, %332 : vector<2x128xf32>
    %335 = arith.divf %333, %334 : vector<2x128xf32>
    %336 = math.tanh %330 : vector<2x128xf32>
    %337 = vector.extract_strided_slice %335 {offsets = [0, 0], sizes = [2, 32], strides = [1, 1]} : vector<2x128xf32> to vector<2x32xf32>
    %338 = vector.extract_strided_slice %335 {offsets = [0, 32], sizes = [2, 32], strides = [1, 1]} : vector<2x128xf32> to vector<2x32xf32>
    %339 = vector.extract_strided_slice %336 {offsets = [0, 64], sizes = [2, 32], strides = [1, 1]} : vector<2x128xf32> to vector<2x32xf32>
    %340 = vector.extract_strided_slice %335 {offsets = [0, 96], sizes = [2, 32], strides = [1, 1]} : vector<2x128xf32> to vector<2x32xf32>
    %341 = arith.mulf %338, %301 : vector<2x32xf32>
    %342 = arith.mulf %337, %339 : vector<2x32xf32>
    %343 = arith.addf %341, %342 : vector<2x32xf32>
    %344 = math.tanh %343 : vector<2x32xf32>
    %345 = arith.mulf %340, %344 : vector<2x32xf32>
    %346 = arith.truncf %345 : vector<2x32xf32> to vector<2x32xbf16>
    %c0_89 = arith.constant 0 : index
    %c0_90 = arith.constant 0 : index
    %347 = vector.load %arg6[%c0_89, %c0_90] : memref<32x256xbf16, #tpu.memory_space<vmem>>, vector<32x256xbf16>
    %cst_91 = arith.constant dense<0.000000e+00> : vector<2x256xf32>
    %348 = tpu.matmul %346, %347, %cst_91 {dimension_numbers = #tpu.dot_dimension_numbers<[1], [0], [0], [1], [0, 0, 1, 1], [], []>} : vector<2x32xbf16>, vector<32x256xbf16>, vector<2x256xf32> -> vector<2x256xf32>
    %c0_92 = arith.constant 0 : index
    %c0_93 = arith.constant 0 : index
    %349 = vector.load %arg7[%c0_92, %c0_93] : memref<1x256xf32, #tpu.memory_space<vmem>>, vector<1x256xf32>
    %350 = vector.broadcast %349 : vector<1x256xf32> to vector<2x256xf32>
    %351 = arith.addf %348, %350 : vector<2x256xf32>
    %c0_94 = arith.constant 0 : index
    %c0_95 = arith.constant 0 : index
    %352 = vector.load %arg8[%c0_94, %c0_95] : memref<2x256xf32, #tpu.memory_space<vmem>>, vector<2x256xf32>
    tpu.vector_store %arg8[%c0_94, %c0_95], %351 {strides = array<i32>} : memref<2x256xf32, #tpu.memory_space<vmem>>, vector<2x256xf32>,
    return
  }
}

</mosaic_0001>

<bundles_post_ra>
// kernel: conv_lstm_forward.3
= control target key start
LH: loop header
LB: loop body
LE: loop exit
PB: predicated region body
PF: predicated region fallthrough
CT: control target
= control target key end

     0   :  { %v1532_v6 = vmov 0   ;;  %vm136_vm4 = vcmask 261120   ;;  %vm233_vm5 = vcmask 523264   ;;  %s1900_s1 = inlined_call_operand.vmem [shape: bf16[128,128], index: 1, kind: input, shape index: {}]   ;;  %s1901_s2 = inlined_call_operand.vmem [shape: bf16[32,128], index: 2, kind: input, shape index: {}]   ;;  %s1902_s3 = inlined_call_operand.vmem [shape: f32[1,128], index: 3, kind: input, shape index: {}]   ;;  %s1903_s0 = inlined_call_operand.vmem [shape: bf16[16,128], index: 0, kind: input, shape index: {}]   ;;  %s1904_s4 = inlined_call_operand.vmem [shape: bf16[64,128], index: 4, kind: input, shape index: {}]   ;;  %s1905_s5 = inlined_call_operand.vmem [shape: f32[1,128], index: 5, kind: input, shape index: {}]   ;;  %s1906_s6 = inlined_call_operand.vmem [shape: bf16[32,256], index: 6, kind: input, shape index: {}]   ;;  %s1907_s7 = inlined_call_operand.vmem [shape: f32[1,256], index: 7, kind: input, shape index: {}]   ;;  %s1908_s8 = inlined_call_operand.vmem [shape: f32[2,256], index: 8, kind: output, shape index: {}]  }
   0x1   :  { %v1387_v0 = vld [vmem:[%s1900_s1 + $0x38] sm:$0xff]  ;;  %v1586_v1 = vld [vmem:[%s1901_s2 + $0x8] sm:$0xff]  ;;  %v1386_v2 = vld [vmem:[%s1900_s1 + $0x30] sm:$0xff] }
   0x2   :  { %106 = vmatpush.bf16.msra.mxu0 %v1387_v0  ;;  %146 = vmatpush.bf16.msra.mxu1 %v1586_v1  ;;  %v1595_v3 = vld [vmem:[%s1901_s2] sm:$0xff]  ;;  %v1385_v4 = vld [vmem:[%s1900_s1 + $0x28] sm:$0xff]  ;;  %v1383_v7 = vld [vmem:[%s1900_s1 + $0x18] sm:$0xff] }
   0x3   :  { %300 = vmatpush.bf16.msra.mxu3 %v1586_v1  ;;  %v1384_v5 = vld [vmem:[%s1900_s1 + $0x20] sm:$0xff]  ;;  %v1382_v8 = vld [vmem:[%s1900_s1 + $0x10] sm:$0xff]  ;;  %v1381_v9 = vld [vmem:[%s1900_s1 + $0x8] sm:$0xff] }
   0x4   :  { %v1380_v10 = vld [vmem:[%s1900_s1] sm:$0xff]  ;;  %s1534_s1 = smov 32   ;;  %v1645_v38 = vld [vmem:[%s1904_s4 + $0x18] sm:$0xff]  ;;  %v1651_v39 = vld [vmem:[%s1904_s4 + $0x10] sm:$0xff] }
   0x5   :  { %v1379_v11 = vld [vmem:[%s1903_s0] sm:$0xff]  ;;  %s1533_s0 = smov 64   ;;  %241 = vmatpush.bf16.msra.mxu2 %v1645_v38  ;;  %v1658_v40 = vld [vmem:[%s1904_s4 + $0x8] sm:$0xff] }
   0x6   :  { %107 = vmatpush.bf16.msra.mxu0 %v1386_v2  ;;  %147 = vmatpush.bf16.msra.mxu1 %v1595_v3  ;;  %v1630_v14 = vld [vmem:[%s1902_s3] ss:$0 sm:$0xff] }
   0x7   :  { %301 = vmatpush.bf16.msra.mxu3 %v1595_v3  ;;  %v1668_v44 = vld [vmem:[%s1904_s4] sm:$0xff] }
   0x8   :  { %v1692_v49 = vld [vmem:[%s1905_s5] ss:$0 sm:$0xff] }
   0x9   :  { %148 = vmatmul.bf16.vlgmr.msra.gmra.mxu1 %v1532_v6  ;;  %242 = vmatpush.bf16.msra.mxu2 %v1651_v39 }
   0xa   :  { %108 = vmatpush.bf16.msra.mxu0 %v1385_v4  ;;  %371 = vmatpush.bf16.msrb.mxu1 %v1645_v38 }
   0xb   :  { %431 = vmatpush.bf16.msrb.mxu3 %v1586_v1 }
   0xd   :  { %243 = vmatpush.bf16.msra.mxu2 %v1658_v40 }
   0xe   :  { %109 = vmatpush.bf16.msra.mxu0 %v1384_v5  ;;  %372 = vmatpush.bf16.msrb.mxu1 %v1651_v39 }
   0xf   :  { %432 = vmatpush.bf16.msrb.mxu3 %v1595_v3 }
  0x11   :  { %244 = vmatpush.bf16.msra.mxu2 %v1668_v44 }
  0x12   :  { %110 = vmatpush.bf16.msra.mxu0 %v1383_v7  ;;  %373 = vmatpush.bf16.msrb.mxu1 %v1658_v40 }
  0x15   :  { %502 = vmatpush.bf16.msrb.mxu2 %v1645_v38 }
  0x16   :  { %111 = vmatpush.bf16.msra.mxu0 %v1382_v8  ;;  %374 = vmatpush.bf16.msrb.mxu1 %v1668_v44 }
  0x19   :  { %503 = vmatpush.bf16.msrb.mxu2 %v1651_v39 }
  0x1a   :  { %112 = vmatpush.bf16.msra.mxu0 %v1381_v9  ;;  %562 = vmatpush.bf16.msra.mxu1 %v1586_v1 }
  0x1d   :  { %504 = vmatpush.bf16.msrb.mxu2 %v1658_v40 }
  0x1e   :  { %113 = vmatpush.bf16.msra.mxu0 %v1380_v10  ;;  %563 = vmatpush.bf16.msra.mxu1 %v1595_v3 }
  0x21   :  { %114 = vmatmul.bf16.vlgmr.msra.gmra.mxu0 %v1379_v11  ;;  %505 = vmatpush.bf16.msrb.mxu2 %v1668_v44 }
  0x22   :  { %693 = vmatpush.bf16.msrb.mxu0 %v1586_v1 }
  0x26   :  { %694 = vmatpush.bf16.msrb.mxu0 %v1595_v3 }
  0x2a   :  { %948 = vmatpush.bf16.msra.mxu0 %v1586_v1 }
  0x2e   :  { %949 = vmatpush.bf16.msra.mxu0 %v1595_v3 }
  0x86   :  { %v149_v12 = vpop.f32.mrf.mxu1 }
  0x8e   :  { %v151_v13 = vpop.f32.mrf.mxu1 }
  0x9e   :  { %v115_v15 = vpop.f32.mrf.mxu0 }
  0x9f   :  { %v1633_v16 = vadd.f32 %v1630_v14, %v115_v15 }
  0xa1   :  { %v153_v17 = vadd.f32 %v149_v12, %v1633_v16 }
  0xa3   :  { %1403 = vtanh.f32 %v153_v17  ;;  %v1314_v19 = vmul.f32 -1.442695, %v153_v17 }
  0xa5   :  { %1405 = vpow2.f32 %v1314_v19 }
  0xa9   :  { %v1404_v18 = vpop.eup %1403 }
  0xaa   :  { %176 = vrot.lane.b32.xlu0 %v1404_v18, %s1533_s0 }
  0xab   :  { %v1406_v20 = vpop.eup %1405 }
  0xac   :  { %v157_v21 = vadd.f32 1.0, %v1406_v20 }
  0xae   :  { %1407 = vrcp.f32 %v157_v21  ;;  %v169_v27 = vand.u32 2147483648, %v157_v21  ;;  %vm163_vm1 = vweird.f32 %v157_v21  ;;  %v167_v28 = vand.u32 2147483647, %v157_v21 }
  0xb0   :  { %v170_v30 = vor.u32 1.1754944e-38, %v169_v27  ;;  %vm168_vm3 = vcmp.eq.f32.partialorder %v167_v28, 8.507059e+37 }
  0xb4   :  { %v1408_v22 = vpop.eup %1407 }
  0xb5   :  { %v159_v23 = vmul.f32 %v1408_v22, %v157_v21  ;;  %vm164_vm0 = vweird.f32 %v1408_v22 }
  0xb6   :  { %vm165_vm2 = vmor %vm163_vm1, %vm164_vm0 }
  0xb7   :  { %v160_v24 = vsub.f32 1.0, %v159_v23 }
  0xb9   :  { %v161_v25 = vmul.f32 %v1408_v22, %v160_v24 }
  0xbb   :  { %v162_v26 = vadd.f32 %v1408_v22, %v161_v25 }
  0xbd   :  { %v166_v29 = vsel %vm165_vm2, %v1408_v22, %v162_v26 }
  0xbe   :  { %v171_v32 = vsel %vm168_vm3, %v170_v30, %v166_v29 }
  0xbf   :  { %v174_v34 = vmul.f32 0.0, %v171_v32 }
 0x11c   :  { %v177_v31 = vpop.permute.xlu0 %176 }
 0x11d   :  { %v179_v33 = vmul.f32 %v177_v31, %v171_v32 }
 0x11f   :  { %181 = vrot.lane.b32.xlu0 %v179_v33, %s1534_s1 }
 0x191   :  { %v182_v35 = vpop.permute.xlu0 %181 }
 0x192   :  { %v1638_v36 = vadd.f32 %v182_v35, %v174_v34 }
 0x194   :  { %1409 = vtanh.f32 %v1638_v36  ;;  %v332_v33 = vrot.slane %v1638_v36, 6 }
 0x19a   :  { %v1410_v37 = vpop.eup %1409 }
 0x19b   :  { %187 = vrot.lane.b32.xlu1 %v1410_v37, %s1533_s0 }
 0x20d   :  { %v188_v41 = vpop.permute.xlu1 %187 }
 0x20e   :  { %v190_v42 = vmul.f32 %v188_v41, %v171_v32 }
 0x210   :  { %v287_v43 = vpack.c.bf16 %v190_v42, %v190_v42  ;;  %192 = vrot.lane.b32.xlu2 %v190_v42, %s1534_s1 }
 0x212   :  { %289 = vrot.lane.b32.xlu1 %v287_v43, %s1534_s1 }
 0x26a   :  { %v193_v45 = vpop.permute.xlu2 %192 }
 0x26b   :  { %v195_v46 = vsel %vm136_vm4, %v193_v45, 0.0 }
 0x26c   :  { %v196_v47 = vpack.c.bf16 %v195_v46, %v195_v46 }
 0x26e   :  { %1331 = vmatmul.msk.bf16.vlgmr.msra.gmra.mxu2 %vm233_vm5, %v196_v47 }
 0x26f   :  { %758 = vmatpush.bf16.msra.mxu2 %v1645_v38 }
 0x273   :  { %759 = vmatpush.bf16.msra.mxu2 %v1651_v39 }
 0x277   :  { %760 = vmatpush.bf16.msra.mxu2 %v1658_v40 }
 0x27b   :  { %761 = vmatpush.bf16.msra.mxu2 %v1668_v44 }
 0x284   :  { %v290_v48 = vpop.permute.xlu1 %289 }
 0x285   :  { %1333 = vmatmul.msk.bf16.vlgmr.msra.gmra.mxu3 %vm136_vm4, %v290_v48 }
 0x286   :  { %633 = vmatpush.bf16.msra.mxu3 %v1645_v38 }
 0x28a   :  { %634 = vmatpush.bf16.msra.mxu3 %v1651_v39 }
 0x28e   :  { %635 = vmatpush.bf16.msra.mxu3 %v1658_v40 }
 0x292   :  { %636 = vmatpush.bf16.msra.mxu3 %v1668_v44 }
 0x2f1   :  { %v246_v50 = vpop.f32.mrf.mxu2 }
 0x2f2   :  { %v247_v51 = vadd.f32 %v1692_v49, %v246_v50 }
 0x2f4   :  { %1411 = vtanh.f32 %v247_v51  ;;  %v1332_v59 = vmul.f32 -1.442695, %v247_v51 }
 0x2f9   :  { %v248_v52 = vpop.f32.mrf.mxu2 }
 0x2fa   :  { %v1412_v53 = vpop.eup %1411 }
 0x2fb   :  { %272 = vrot.lane.b32.xlu0 %v1412_v53, %s1533_s0 }
 0x308   :  { %v303_v54 = vpop.f32.mrf.mxu3 }
 0x309   :  { %v308_v55 = vrot.slane %v303_v54, 6 }
 0x30b   :  { %v310_v56 = vadd.f32 %v308_v55, %v1633_v16 }
 0x30d   :  { %1413 = vtanh.f32 %v310_v56  ;;  %v1334_v60 = vmul.f32 -1.442695, %v310_v56 }
 0x30e   :  { %1415 = vpow2.f32 %v1332_v59 }
 0x30f   :  { %1417 = vpow2.f32 %v1334_v60 }
 0x310   :  { %v305_v57 = vpop.f32.mrf.mxu3 }
 0x313   :  { %v1414_v58 = vpop.eup %1413 }
 0x314   :  { %336 = vrot.lane.b32.xlu2 %v1414_v58, %s1533_s0  ;;  %v1416_v61 = vpop.eup %1415 }
 0x315   :  { %v1418_v62 = vpop.eup %1417  ;;  %v253_v63 = vadd.f32 1.0, %v1416_v61 }
 0x316   :  { %v314_v0 = vadd.f32 1.0, %v1418_v62 }
 0x317   :  { %1419 = vrcp.f32 %v253_v63  ;;  %v265_v12 = vand.u32 2147483648, %v253_v63  ;;  %vm259_vm8 = vweird.f32 %v253_v63  ;;  %v263_v15 = vand.u32 2147483647, %v253_v63 }
 0x318   :  { %1421 = vrcp.f32 %v314_v0  ;;  %v326_v17 = vand.u32 2147483648, %v314_v0  ;;  %vm320_vm10 = vweird.f32 %v314_v0  ;;  %v324_v18 = vand.u32 2147483647, %v314_v0 }
 0x319   :  { %v266_v20 = vor.u32 1.1754944e-38, %v265_v12  ;;  %vm264_vm12 = vcmp.eq.f32.partialorder %v263_v15, 8.507059e+37 }
 0x31a   :  { %v327_v22 = vor.u32 1.1754944e-38, %v326_v17  ;;  %vm325_vm13 = vcmp.eq.f32.partialorder %v324_v18, 8.507059e+37 }
 0x31d   :  { %v1420_v2 = vpop.eup %1419 }
 0x31e   :  { %v1422_v4 = vpop.eup %1421  ;;  %v255_v5 = vmul.f32 %v1420_v2, %v253_v63  ;;  %vm260_vm6 = vweird.f32 %v1420_v2 }
 0x31f   :  { %v316_v6 = vmul.f32 %v1422_v4, %v314_v0  ;;  %vm321_vm7 = vweird.f32 %v1422_v4  ;;  %vm261_vm9 = vmor %vm259_vm8, %vm260_vm6 }
 0x320   :  { %v256_v7 = vsub.f32 1.0, %v255_v5  ;;  %vm322_vm11 = vmor %vm320_vm10, %vm321_vm7 }
 0x321   :  { %v317_v8 = vsub.f32 1.0, %v316_v6 }
 0x322   :  { %v257_v9 = vmul.f32 %v1420_v2, %v256_v7 }
 0x323   :  { %v318_v10 = vmul.f32 %v1422_v4, %v317_v8 }
 0x324   :  { %v258_v11 = vadd.f32 %v1420_v2, %v257_v9 }
 0x325   :  { %v319_v13 = vadd.f32 %v1422_v4, %v318_v10 }
 0x326   :  { %v262_v19 = vsel %vm261_vm9, %v1420_v2, %v258_v11 }
 0x327   :  { %v323_v21 = vsel %vm322_vm11, %v1422_v4, %v319_v13  ;;  %v267_v24 = vsel %vm264_vm12, %v266_v20, %v262_v19 }
 0x328   :  { %v328_v27 = vsel %vm325_vm13, %v327_v22, %v323_v21  ;;  %v270_v29 = vmul.f32 0.0, %v267_v24 }
 0x329   :  { %v334_v34 = vmul.f32 %v332_v33, %v328_v27 }
 0x36d   :  { %v273_v23 = vpop.permute.xlu0 %272 }
 0x36e   :  { %v275_v25 = vmul.f32 %v273_v23, %v267_v24  ;;  %v337_v26 = vpop.permute.xlu2 %336 }
 0x36f   :  { %v339_v28 = vmul.f32 %v337_v26, %v328_v27 }
 0x370   :  { %277 = vrot.lane.b32.xlu2 %v275_v25, %s1534_s1 }
 0x371   :  { %341 = vrot.lane.b32.xlu1 %v339_v28, %s1534_s1 }
 0x3ca   :  { %v278_v30 = vpop.permute.xlu2 %277 }
 0x3cb   :  { %v1700_v31 = vadd.f32 %v278_v30, %v270_v29 }
 0x3cd   :  { %1423 = vtanh.f32 %v1700_v31 }
 0x3d3   :  { %v1424_v32 = vpop.eup %1423 }
 0x3d4   :  { %283 = vrot.lane.b32.xlu1 %v1424_v32, %s1533_s0 }
 0x3e3   :  { %v342_v35 = vpop.permute.xlu1 %341 }
 0x3e4   :  { %v1705_v37 = vadd.f32 %v342_v35, %v334_v34 }
 0x3e6   :  { %1425 = vtanh.f32 %v1705_v37 }
 0x3ec   :  { %v1426_v41 = vpop.eup %1425 }
 0x3ed   :  { %347 = vrot.lane.b32.xlu0 %v1426_v41, %s1533_s0  ;;  %v463_v41 = vrot.slane %v1705_v37, 6 }
 0x446   :  { %v284_v42 = vpop.permute.xlu1 %283 }
 0x447   :  { %v286_v43 = vmul.f32 %v284_v42, %v267_v24 }
 0x449   :  { %v356_v45 = vrot.slane %v286_v43, 6 }
 0x44b   :  { %357 = vrot.lane.b32.xlu1 %v356_v45, %s1533_s0 }
 0x45f   :  { %v348_v46 = vpop.permute.xlu0 %347 }
 0x460   :  { %v350_v47 = vmul.f32 %v348_v46, %v328_v27 }
 0x462   :  { %v417_v48 = vpack.c.bf16 %v350_v47, %v350_v47  ;;  %352 = vrot.lane.b32.xlu0 %v350_v47, %s1534_s1 }
 0x464   :  { %v419_v36 = vrot.slane %v417_v48, 1 }
 0x466   :  { %420 = vrot.lane.b32.xlu2 %v419_v36, %s1534_s1 }
 0x4bd   :  { %v358_v51 = vpop.permute.xlu1 %357 }
 0x4c0   :  { %v421_v50 = vpop.permute.xlu2 %420 }
 0x4c1   :  { %1337 = vmatmul.msk.bf16.vlgmr.msrb.gmra.mxu3 %vm136_vm4, %v421_v50 }
 0x4c2   :  { %888 = vmatpush.bf16.msrb.mxu3 %v1645_v38 }
 0x4c6   :  { %889 = vmatpush.bf16.msrb.mxu3 %v1651_v39 }
 0x4ca   :  { %890 = vmatpush.bf16.msrb.mxu3 %v1658_v40 }
 0x4ce   :  { %891 = vmatpush.bf16.msrb.mxu3 %v1668_v44 }
 0x4d4   :  { %v353_v52 = vpop.permute.xlu0 %352 }
 0x4d5   :  { %v360_v53 = vsel %vm136_vm4, %v353_v52, %v358_v51 }
 0x4d6   :  { %v361_v54 = vpack.c.bf16 %v360_v53, %v360_v53 }
 0x4d8   :  { %v363_v55 = vrot.slane %v361_v54, 1 }
 0x4da   :  { %1335 = vmatmul.msk.bf16.vlgmr.msrb.gmra.mxu1 %vm233_vm5, %v363_v55 }
 0x4db   :  { %817 = vmatpush.bf16.msrb.mxu1 %v1586_v1 }
 0x4df   :  { %818 = vmatpush.bf16.msrb.mxu1 %v1595_v3 }
 0x544   :  { %v434_v56 = vpop.f32.mrf.mxu3 }
 0x545   :  { %v439_v57 = vrot.slane %v434_v56, 4 }
 0x547   :  { %v441_v58 = vadd.f32 %v439_v57, %v1633_v16 }
 0x549   :  { %1427 = vtanh.f32 %v441_v58  ;;  %v1338_v4 = vmul.f32 -1.442695, %v441_v58 }
 0x54c   :  { %v436_v59 = vpop.f32.mrf.mxu3 }
 0x54f   :  { %v1428_v60 = vpop.eup %1427 }
 0x550   :  { %467 = vrot.lane.b32.xlu0 %v1428_v60, %s1533_s0 }
 0x557   :  { %v376_v61 = vpop.f32.mrf.mxu1 }
 0x558   :  { %v377_v62 = vadd.f32 %v1692_v49, %v376_v61 }
 0x55a   :  { %1429 = vtanh.f32 %v377_v62  ;;  %v1336_v2 = vmul.f32 -1.442695, %v377_v62 }
 0x55c   :  { %1431 = vpow2.f32 %v1336_v2 }
 0x55d   :  { %1433 = vpow2.f32 %v1338_v4 }
 0x55f   :  { %v378_v63 = vpop.f32.mrf.mxu1 }
 0x560   :  { %v1430_v0 = vpop.eup %1429 }
 0x561   :  { %402 = vrot.lane.b32.xlu2 %v1430_v0, %s1533_s0 }
 0x562   :  { %v1432_v5 = vpop.eup %1431 }
 0x563   :  { %v383_v6 = vadd.f32 1.0, %v1432_v5  ;;  %v1434_v7 = vpop.eup %1433 }
 0x564   :  { %v445_v8 = vadd.f32 1.0, %v1434_v7 }
 0x565   :  { %1435 = vrcp.f32 %v383_v6  ;;  %v395_v19 = vand.u32 2147483648, %v383_v6  ;;  %vm389_vm15 = vweird.f32 %v383_v6  ;;  %v393_v20 = vand.u32 2147483647, %v383_v6 }
 0x566   :  { %1437 = vrcp.f32 %v445_v8  ;;  %v457_v28 = vand.u32 2147483648, %v445_v8  ;;  %vm451_vm3 = vweird.f32 %v445_v8  ;;  %v455_v29 = vand.u32 2147483647, %v445_v8 }
 0x567   :  { %v396_v23 = vor.u32 1.1754944e-38, %v395_v19  ;;  %vm394_vm1 = vcmp.eq.f32.partialorder %v393_v20, 8.507059e+37 }
 0x568   :  { %v458_v32 = vor.u32 1.1754944e-38, %v457_v28  ;;  %vm456_vm7 = vcmp.eq.f32.partialorder %v455_v29, 8.507059e+37 }
 0x56b   :  { %v1436_v9 = vpop.eup %1435 }
 0x56c   :  { %v385_v10 = vmul.f32 %v1436_v9, %v383_v6  ;;  %v1438_v11 = vpop.eup %1437  ;;  %vm390_vm14 = vweird.f32 %v1436_v9 }
 0x56d   :  { %v447_v13 = vmul.f32 %v1438_v11, %v445_v8  ;;  %vm391_vm0 = vmor %vm389_vm15, %vm390_vm14  ;;  %vm452_vm2 = vweird.f32 %v1438_v11 }
 0x56e   :  { %v386_v12 = vsub.f32 1.0, %v385_v10  ;;  %vm453_vm6 = vmor %vm451_vm3, %vm452_vm2 }
 0x56f   :  { %v448_v17 = vsub.f32 1.0, %v447_v13 }
 0x570   :  { %v387_v15 = vmul.f32 %v1436_v9, %v386_v12 }
 0x571   :  { %v449_v21 = vmul.f32 %v1438_v11, %v448_v17 }
 0x572   :  { %v388_v18 = vadd.f32 %v1436_v9, %v387_v15 }
 0x573   :  { %v450_v26 = vadd.f32 %v1438_v11, %v449_v21 }
 0x574   :  { %v392_v22 = vsel %vm391_vm0, %v1436_v9, %v388_v18 }
 0x575   :  { %v397_v24 = vsel %vm394_vm1, %v396_v23, %v392_v22  ;;  %v454_v30 = vsel %vm453_vm6, %v1438_v11, %v450_v26 }
 0x576   :  { %v459_v34 = vsel %vm456_vm7, %v458_v32, %v454_v30  ;;  %v400_v47 = vmul.f32 %v397_v24, %v1700_v31 }
 0x577   :  { %v465_v42 = vmul.f32 %v463_v41, %v459_v34 }
 0x5bb   :  { %v403_v25 = vpop.permute.xlu2 %402 }
 0x5bc   :  { %v405_v27 = vmul.f32 %v403_v25, %v397_v24 }
 0x5be   :  { %407 = vrot.lane.b32.xlu1 %v405_v27, %s1534_s1 }
 0x5c2   :  { %v468_v33 = vpop.permute.xlu0 %467 }
 0x5c3   :  { %v470_v35 = vmul.f32 %v468_v33, %v459_v34 }
 0x5c5   :  { %472 = vrot.lane.b32.xlu2 %v470_v35, %s1534_s1 }
 0x61f   :  { %v473_v43 = vpop.permute.xlu2 %472 }
 0x620   :  { %v1728_v45 = vadd.f32 %v473_v43, %v465_v42 }
 0x622   :  { %1439 = vtanh.f32 %v1728_v45 }
 0x628   :  { %v1440_v46 = vpop.eup %1439 }
 0x629   :  { %478 = vrot.lane.b32.xlu1 %v1440_v46, %s1533_s0  ;;  %v594_v46 = vrot.slane %v1728_v45, 6 }
 0x630   :  { %v408_v48 = vpop.permute.xlu1 %407 }
 0x631   :  { %v1733_v36 = vadd.f32 %v408_v48, %v400_v47 }
 0x633   :  { %1441 = vtanh.f32 %v1733_v36 }
 0x639   :  { %v1442_v50 = vpop.eup %1441 }
 0x63a   :  { %413 = vrot.lane.b32.xlu0 %v1442_v50, %s1533_s0 }
 0x69b   :  { %v479_v37 = vpop.permute.xlu1 %478 }
 0x69c   :  { %v481_v51 = vmul.f32 %v479_v37, %v459_v34 }
 0x69e   :  { %v548_v52 = vpack.c.bf16 %v481_v51, %v481_v51  ;;  %483 = vrot.lane.b32.xlu2 %v481_v51, %s1534_s1 }
 0x6a0   :  { %v550_v53 = vrot.slane %v548_v52, 2 }
 0x6a2   :  { %551 = vrot.lane.b32.xlu1 %v550_v53, %s1534_s1 }
 0x6ac   :  { %v414_v54 = vpop.permute.xlu0 %413 }
 0x6ad   :  { %v416_v55 = vmul.f32 %v414_v54, %v397_v24 }
 0x6af   :  { %v487_v56 = vrot.slane %v416_v55, 4 }
 0x6b1   :  { %488 = vrot.lane.b32.xlu0 %v487_v56, %s1533_s0 }
 0x6f8   :  { %v484_v57 = vpop.permute.xlu2 %483 }
 0x714   :  { %v552_v31 = vpop.permute.xlu1 %551 }
 0x715   :  { %1341 = vmatmul.msk.bf16.vlgmr.msra.gmra.mxu1 %vm136_vm4, %v552_v31 }
 0x716   :  { %1079 = vmatpush.bf16.msra.mxu1 %v1586_v1 }
 0x71a   :  { %1080 = vmatpush.bf16.msra.mxu1 %v1595_v3 }
 0x723   :  { %v489_v58 = vpop.permute.xlu0 %488 }
 0x724   :  { %v491_v59 = vsel %vm136_vm4, %v484_v57, %v489_v58 }
 0x725   :  { %v492_v60 = vpack.c.bf16 %v491_v59, %v491_v59 }
 0x727   :  { %v494_v61 = vrot.slane %v492_v60, 2 }
 0x729   :  { %1339 = vmatmul.msk.bf16.vlgmr.msrb.gmra.mxu2 %vm233_vm5, %v494_v61 }
 0x72a   :  { %1019 = vmatpush.bf16.msrb.mxu2 %v1645_v38 }
 0x72e   :  { %1020 = vmatpush.bf16.msrb.mxu2 %v1651_v39 }
 0x732   :  { %1021 = vmatpush.bf16.msrb.mxu2 %v1658_v40 }
 0x736   :  { %1022 = vmatpush.bf16.msrb.mxu2 %v1668_v44 }
 0x792   :  { %v565_v62 = vpop.f32.mrf.mxu1 }
 0x793   :  { %v570_v1 = vrot.slane %v565_v62, 2 }
 0x795   :  { %v572_v3 = vadd.f32 %v570_v1, %v1633_v16 }
 0x797   :  { %1443 = vtanh.f32 %v572_v3  ;;  %v1342_v7 = vmul.f32 -1.442695, %v572_v3 }
 0x79a   :  { %v567_v63 = vpop.f32.mrf.mxu1 }
 0x79b   :  { %v117_v63 = vpop.f32.mrf.mxu0 }
 0x79d   :  { %v1444_v0 = vpop.eup %1443 }
 0x79e   :  { %598 = vrot.lane.b32.xlu0 %v1444_v0, %s1533_s0  ;;  %v1776_v0 = vadd.f32 %v1630_v14, %v117_v63 }
 0x7ac   :  { %v507_v2 = vpop.f32.mrf.mxu2 }
 0x7ad   :  { %v508_v4 = vadd.f32 %v1692_v49, %v507_v2 }
 0x7af   :  { %1445 = vtanh.f32 %v508_v4  ;;  %v1340_v8 = vmul.f32 -1.442695, %v508_v4 }
 0x7b0   :  { %1447 = vpow2.f32 %v1342_v7 }
 0x7b1   :  { %1449 = vpow2.f32 %v1340_v8 }
 0x7b4   :  { %v509_v5 = vpop.f32.mrf.mxu2 }
 0x7b5   :  { %v1446_v6 = vpop.eup %1445 }
 0x7b6   :  { %533 = vrot.lane.b32.xlu2 %v1446_v6, %s1533_s0  ;;  %v1448_v9 = vpop.eup %1447 }
 0x7b7   :  { %v1450_v10 = vpop.eup %1449  ;;  %v576_v16 = vadd.f32 1.0, %v1448_v9 }
 0x7b8   :  { %v514_v11 = vadd.f32 1.0, %v1450_v10 }
 0x7b9   :  { %1451 = vrcp.f32 %v576_v16  ;;  %vm582_vm10 = vweird.f32 %v576_v16  ;;  %v588_v25 = vand.u32 2147483648, %v576_v16  ;;  %v586_v27 = vand.u32 2147483647, %v576_v16 }
 0x7ba   :  { %1453 = vrcp.f32 %v514_v11  ;;  %v526_v24 = vand.u32 2147483648, %v514_v11  ;;  %vm520_vm11 = vweird.f32 %v514_v11  ;;  %v524_v26 = vand.u32 2147483647, %v514_v11 }
 0x7bb   :  { %v589_v32 = vor.u32 1.1754944e-38, %v588_v25  ;;  %vm587_vm15 = vcmp.eq.f32.partialorder %v586_v27, 8.507059e+37 }
 0x7bc   :  { %v527_v30 = vor.u32 1.1754944e-38, %v526_v24  ;;  %vm525_vm14 = vcmp.eq.f32.partialorder %v524_v26, 8.507059e+37 }
 0x7bf   :  { %v1452_v12 = vpop.eup %1451 }
 0x7c0   :  { %v1454_v13 = vpop.eup %1453  ;;  %v578_v17 = vmul.f32 %v1452_v12, %v576_v16  ;;  %vm583_vm8 = vweird.f32 %v1452_v12 }
 0x7c1   :  { %v516_v15 = vmul.f32 %v1454_v13, %v514_v11  ;;  %vm521_vm9 = vweird.f32 %v1454_v13  ;;  %vm584_vm12 = vmor %vm582_vm10, %vm583_vm8 }
 0x7c2   :  { %v579_v19 = vsub.f32 1.0, %v578_v17  ;;  %vm522_vm13 = vmor %vm520_vm11, %vm521_vm9 }
 0x7c3   :  { %v517_v18 = vsub.f32 1.0, %v516_v15 }
 0x7c4   :  { %v580_v21 = vmul.f32 %v1452_v12, %v579_v19 }
 0x7c5   :  { %v518_v20 = vmul.f32 %v1454_v13, %v517_v18 }
 0x7c6   :  { %v581_v23 = vadd.f32 %v1452_v12, %v580_v21 }
 0x7c7   :  { %v519_v22 = vadd.f32 %v1454_v13, %v518_v20 }
 0x7c8   :  { %v585_v29 = vsel %vm584_vm12, %v1452_v12, %v581_v23 }
 0x7c9   :  { %v523_v28 = vsel %vm522_vm13, %v1454_v13, %v519_v22  ;;  %v590_v41 = vsel %vm587_vm15, %v589_v32, %v585_v29 }
 0x7ca   :  { %v528_v34 = vsel %vm525_vm14, %v527_v30, %v523_v28  ;;  %v596_v47 = vmul.f32 %v594_v46, %v590_v41 }
 0x7cb   :  { %v531_v51 = vmul.f32 %v528_v34, %v1733_v36 }
 0x810   :  { %v534_v33 = vpop.permute.xlu2 %533  ;;  %v599_v35 = vpop.permute.xlu0 %598 }
 0x811   :  { %v536_v42 = vmul.f32 %v534_v33, %v528_v34  ;;  %v601_v43 = vmul.f32 %v599_v35, %v590_v41 }
 0x813   :  { %538 = vrot.lane.b32.xlu1 %v536_v42, %s1534_s1  ;;  %603 = vrot.lane.b32.xlu2 %v601_v43, %s1534_s1 }
 0x86d   :  { %v604_v48 = vpop.permute.xlu2 %603 }
 0x86e   :  { %v1756_v50 = vadd.f32 %v604_v48, %v596_v47 }
 0x870   :  { %1455 = vtanh.f32 %v1756_v50  ;;  %v722_v43 = vrot.slane %v1756_v50, 6 }
 0x876   :  { %v1456_v37 = vpop.eup %1455 }
 0x877   :  { %609 = vrot.lane.b32.xlu1 %v1456_v37, %s1533_s0 }
 0x885   :  { %v539_v52 = vpop.permute.xlu1 %538 }
 0x886   :  { %v1761_v53 = vadd.f32 %v539_v52, %v531_v51 }
 0x888   :  { %1457 = vtanh.f32 %v1761_v53 }
 0x88e   :  { %v1458_v54 = vpop.eup %1457 }
 0x88f   :  { %544 = vrot.lane.b32.xlu0 %v1458_v54, %s1533_s0 }
 0x8e9   :  { %v610_v45 = vpop.permute.xlu1 %609 }
 0x8ea   :  { %v612_v55 = vmul.f32 %v610_v45, %v590_v41 }
 0x8ec   :  { %v679_v56 = vpack.c.bf16 %v612_v55, %v612_v55  ;;  %614 = vrot.lane.b32.xlu2 %v612_v55, %s1534_s1 }
 0x8ee   :  { %v681_v31 = vrot.slane %v679_v56, 3 }
 0x8f0   :  { %682 = vrot.lane.b32.xlu1 %v681_v31, %s1534_s1 }
 0x901   :  { %v545_v57 = vpop.permute.xlu0 %544 }
 0x902   :  { %v547_v58 = vmul.f32 %v545_v57, %v528_v34 }
 0x904   :  { %v618_v59 = vrot.slane %v547_v58, 2 }
 0x906   :  { %619 = vrot.lane.b32.xlu0 %v618_v59, %s1533_s0 }
 0x946   :  { %v615_v60 = vpop.permute.xlu2 %614 }
 0x962   :  { %v683_v36 = vpop.permute.xlu1 %682 }
 0x963   :  { %1345 = vmatmul.msk.bf16.vlgmr.msrb.gmra.mxu0 %vm136_vm4, %v683_v36 }
 0x978   :  { %v620_v61 = vpop.permute.xlu0 %619 }
 0x979   :  { %v622_v62 = vsel %vm136_vm4, %v615_v60, %v620_v61 }
 0x97a   :  { %v623_v1 = vpack.c.bf16 %v622_v62, %v622_v62 }
 0x97c   :  { %v625_v3 = vrot.slane %v623_v1, 3 }
 0x97e   :  { %1343 = vmatmul.msk.bf16.vlgmr.msra.gmra.mxu3 %vm233_vm5, %v625_v3 }
 0x97f   :  { %1150 = vmatpush.bf16.msra.mxu3 %v1645_v38 }
 0x983   :  { %1151 = vmatpush.bf16.msra.mxu3 %v1651_v39 }
 0x987   :  { %1152 = vmatpush.bf16.msra.mxu3 %v1658_v40 }
 0x98b   :  { %1153 = vmatpush.bf16.msra.mxu3 %v1668_v44 }
 0x9e0   :  { %v696_v2 = vpop.f32.mrf.mxu0 }
 0x9e1   :  { %v700_v4 = vadd.f32 %v696_v2, %v1776_v0 }
 0x9e3   :  { %1459 = vtanh.f32 %v700_v4  ;;  %v1346_v44 = vmul.f32 -1.442695, %v700_v4 }
 0x9e8   :  { %v698_v5 = vpop.f32.mrf.mxu0 }
 0x9e9   :  { %v1460_v6 = vpop.eup %1459 }
 0x9ea   :  { %726 = vrot.lane.b32.xlu0 %v1460_v6, %s1533_s0 }
 0xa01   :  { %v638_v7 = vpop.f32.mrf.mxu3 }
 0xa02   :  { %v639_v38 = vadd.f32 %v1692_v49, %v638_v7 }
 0xa04   :  { %1461 = vtanh.f32 %v639_v38  ;;  %v1344_v14 = vmul.f32 -1.442695, %v639_v38 }
 0xa05   :  { %1463 = vpow2.f32 %v1346_v44 }
 0xa06   :  { %1465 = vpow2.f32 %v1344_v14 }
 0xa09   :  { %v640_v39 = vpop.f32.mrf.mxu3 }
 0xa0a   :  { %v1462_v40 = vpop.eup %1461 }
 0xa0b   :  { %664 = vrot.lane.b32.xlu2 %v1462_v40, %s1533_s0  ;;  %v1464_v8 = vpop.eup %1463 }
 0xa0c   :  { %v704_v9 = vadd.f32 1.0, %v1464_v8  ;;  %v1466_v10 = vpop.eup %1465 }
 0xa0d   :  { %v645_v16 = vadd.f32 1.0, %v1466_v10 }
 0xa0e   :  { %1467 = vrcp.f32 %v704_v9  ;;  %v716_v20 = vand.u32 2147483648, %v704_v9  ;;  %vm710_vm1 = vweird.f32 %v704_v9  ;;  %v714_v22 = vand.u32 2147483647, %v704_v9 }
 0xa0f   :  { %1469 = vrcp.f32 %v645_v16  ;;  %v657_v30 = vand.u32 2147483648, %v645_v16  ;;  %vm651_vm7 = vweird.f32 %v645_v16  ;;  %v655_v32 = vand.u32 2147483647, %v645_v16 }
 0xa10   :  { %v717_v24 = vor.u32 1.1754944e-38, %v716_v20  ;;  %vm715_vm3 = vcmp.eq.f32.partialorder %v714_v22, 8.507059e+37 }
 0xa11   :  { %v658_v34 = vor.u32 1.1754944e-38, %v657_v30  ;;  %vm656_vm9 = vcmp.eq.f32.partialorder %v655_v32, 8.507059e+37 }
 0xa14   :  { %v1468_v11 = vpop.eup %1467 }
 0xa15   :  { %v706_v12 = vmul.f32 %v1468_v11, %v704_v9  ;;  %v1470_v15 = vpop.eup %1469  ;;  %vm711_vm0 = vweird.f32 %v1468_v11 }
 0xa16   :  { %v647_v18 = vmul.f32 %v1470_v15, %v645_v16  ;;  %vm712_vm2 = vmor %vm710_vm1, %vm711_vm0  ;;  %vm652_vm6 = vweird.f32 %v1470_v15 }
 0xa17   :  { %v707_v13 = vsub.f32 1.0, %v706_v12  ;;  %vm653_vm8 = vmor %vm651_vm7, %vm652_vm6 }
 0xa18   :  { %v648_v21 = vsub.f32 1.0, %v647_v18 }
 0xa19   :  { %v708_v17 = vmul.f32 %v1468_v11, %v707_v13 }
 0xa1a   :  { %v649_v25 = vmul.f32 %v1470_v15, %v648_v21 }
 0xa1b   :  { %v709_v19 = vadd.f32 %v1468_v11, %v708_v17 }
 0xa1c   :  { %v650_v29 = vadd.f32 %v1470_v15, %v649_v25 }
 0xa1d   :  { %v713_v23 = vsel %vm712_vm2, %v1468_v11, %v709_v19 }
 0xa1e   :  { %v718_v27 = vsel %vm715_vm3, %v717_v24, %v713_v23  ;;  %v654_v33 = vsel %vm653_vm8, %v1470_v15, %v650_v29 }
 0xa1f   :  { %v659_v41 = vsel %vm656_vm9, %v658_v34, %v654_v33  ;;  %v724_v46 = vmul.f32 %v722_v43, %v718_v27 }
 0xa20   :  { %v662_v51 = vmul.f32 %v659_v41, %v1761_v53 }
 0xa5c   :  { %v727_v26 = vpop.permute.xlu0 %726 }
 0xa5d   :  { %v729_v28 = vmul.f32 %v727_v26, %v718_v27 }
 0xa5f   :  { %731 = vrot.lane.b32.xlu2 %v729_v28, %s1534_s1 }
 0xa65   :  { %v665_v35 = vpop.permute.xlu2 %664 }
 0xa66   :  { %v667_v42 = vmul.f32 %v665_v35, %v659_v41 }
 0xa68   :  { %669 = vrot.lane.b32.xlu1 %v667_v42, %s1534_s1 }
 0xab9   :  { %v732_v47 = vpop.permute.xlu2 %731 }
 0xaba   :  { %v1785_v48 = vadd.f32 %v732_v47, %v724_v46 }
 0xabc   :  { %1471 = vtanh.f32 %v1785_v48  ;;  %v849_v34 = vrot.slane %v1785_v48, 6 }
 0xac2   :  { %v1472_v37 = vpop.eup %1471 }
 0xac3   :  { %737 = vrot.lane.b32.xlu1 %v1472_v37, %s1533_s0 }
 0xada   :  { %v670_v52 = vpop.permute.xlu1 %669 }
 0xadb   :  { %v1790_v54 = vadd.f32 %v670_v52, %v662_v51 }
 0xadd   :  { %1473 = vtanh.f32 %v1790_v54 }
 0xae3   :  { %v1474_v45 = vpop.eup %1473 }
 0xae4   :  { %675 = vrot.lane.b32.xlu0 %v1474_v45, %s1533_s0 }
 0xb35   :  { %v738_v50 = vpop.permute.xlu1 %737 }
 0xb36   :  { %v740_v55 = vmul.f32 %v738_v50, %v718_v27 }
 0xb38   :  { %v804_v56 = vpack.c.bf16 %v740_v55, %v740_v55  ;;  %742 = vrot.lane.b32.xlu2 %v740_v55, %s1534_s1 }
 0xb3a   :  { %806 = vrot.lane.b32.xlu1 %v804_v56, %s1534_s1 }
 0xb56   :  { %v676_v31 = vpop.permute.xlu0 %675 }
 0xb57   :  { %v678_v57 = vmul.f32 %v676_v31, %v659_v41 }
 0xb59   :  { %746 = vrot.lane.b32.xlu0 %v678_v57, %s1533_s0 }
 0xb92   :  { %v743_v58 = vpop.permute.xlu2 %742 }
 0xbac   :  { %v807_v53 = vpop.permute.xlu1 %806 }
 0xbad   :  { %1349 = vmatmul.msk.bf16.vlgmr.msrb.gmra.mxu1 %vm136_vm4, %v807_v53 }
 0xbcb   :  { %v747_v59 = vpop.permute.xlu0 %746 }
 0xbcc   :  { %v749_v36 = vsel %vm136_vm4, %v743_v58, %v747_v59 }
 0xbcd   :  { %v750_v60 = vpack.c.bf16 %v749_v36, %v749_v36 }
 0xbcf   :  { %1347 = vmatmul.msk.bf16.vlgmr.msra.gmra.mxu2 %vm233_vm5, %v750_v60 }
 0xc2a   :  { %v820_v61 = vpop.f32.mrf.mxu1 }
 0xc2b   :  { %v825_v62 = vrot.slane %v820_v61, 6 }
 0xc2d   :  { %v827_v1 = vadd.f32 %v825_v62, %v1776_v0 }
 0xc2f   :  { %1475 = vtanh.f32 %v827_v1  ;;  %v1350_v7 = vmul.f32 -1.442695, %v827_v1 }
 0xc32   :  { %v822_v3 = vpop.f32.mrf.mxu1 }
 0xc35   :  { %v1476_v63 = vpop.eup %1475 }
 0xc36   :  { %853 = vrot.lane.b32.xlu0 %v1476_v63, %s1533_s0 }
 0xc52   :  { %v763_v2 = vpop.f32.mrf.mxu2 }
 0xc53   :  { %v764_v4 = vadd.f32 %v1692_v49, %v763_v2 }
 0xc55   :  { %1477 = vtanh.f32 %v764_v4  ;;  %v1348_v40 = vmul.f32 -1.442695, %v764_v4 }
 0xc56   :  { %1479 = vpow2.f32 %v1350_v7 }
 0xc5a   :  { %v765_v5 = vpop.f32.mrf.mxu2 }
 0xc5b   :  { %v1478_v6 = vpop.eup %1477 }
 0xc5c   :  { %789 = vrot.lane.b32.xlu2 %v1478_v6, %s1533_s0  ;;  %v1480_v38 = vpop.eup %1479 }
 0xc5d   :  { %v831_v39 = vadd.f32 1.0, %v1480_v38 }
 0xc5f   :  { %1481 = vrcp.f32 %v831_v39  ;;  %v843_v13 = vand.u32 2147483648, %v831_v39  ;;  %vm837_vm11 = vweird.f32 %v831_v39  ;;  %v841_v15 = vand.u32 2147483647, %v831_v39 }
 0xc60   :  { %1483 = vpow2.f32 %v1348_v40 }
 0xc61   :  { %v844_v19 = vor.u32 1.1754944e-38, %v843_v13  ;;  %vm842_vm13 = vcmp.eq.f32.partialorder %v841_v15, 8.507059e+37 }
 0xc65   :  { %v1482_v44 = vpop.eup %1481 }
 0xc66   :  { %v1484_v14 = vpop.eup %1483  ;;  %v833_v8 = vmul.f32 %v1482_v44, %v831_v39  ;;  %vm838_vm10 = vweird.f32 %v1482_v44 }
 0xc67   :  { %v770_v9 = vadd.f32 1.0, %v1484_v14  ;;  %vm839_vm12 = vmor %vm837_vm11, %vm838_vm10 }
 0xc68   :  { %v834_v10 = vsub.f32 1.0, %v833_v8 }
 0xc69   :  { %1485 = vrcp.f32 %v770_v9  ;;  %v782_v26 = vand.u32 2147483648, %v770_v9  ;;  %vm776_vm15 = vweird.f32 %v770_v9  ;;  %v780_v27 = vand.u32 2147483647, %v770_v9 }
 0xc6a   :  { %v835_v16 = vmul.f32 %v1482_v44, %v834_v10 }
 0xc6b   :  { %v783_v29 = vor.u32 1.1754944e-38, %v782_v26  ;;  %vm781_vm1 = vcmp.eq.f32.partialorder %v780_v27, 8.507059e+37 }
 0xc6c   :  { %v836_v12 = vadd.f32 %v1482_v44, %v835_v16 }
 0xc6e   :  { %v840_v18 = vsel %vm839_vm12, %v1482_v44, %v836_v12 }
 0xc6f   :  { %v1486_v11 = vpop.eup %1485  ;;  %v845_v21 = vsel %vm842_vm13, %v844_v19, %v840_v18 }
 0xc70   :  { %v772_v17 = vmul.f32 %v1486_v11, %v770_v9  ;;  %vm777_vm14 = vweird.f32 %v1486_v11  ;;  %v851_v35 = vmul.f32 %v849_v34, %v845_v21 }
 0xc71   :  { %vm778_vm0 = vmor %vm776_vm15, %vm777_vm14 }
 0xc72   :  { %v773_v20 = vsub.f32 1.0, %v772_v17 }
 0xc74   :  { %v774_v24 = vmul.f32 %v1486_v11, %v773_v20 }
 0xc76   :  { %v775_v25 = vadd.f32 %v1486_v11, %v774_v24 }
 0xc78   :  { %v779_v28 = vsel %vm778_vm0, %v1486_v11, %v775_v25 }
 0xc79   :  { %v784_v32 = vsel %vm781_vm1, %v783_v29, %v779_v28 }
 0xc7a   :  { %v787_v46 = vmul.f32 %v784_v32, %v1790_v54 }
 0xca8   :  { %v854_v22 = vpop.permute.xlu0 %853 }
 0xca9   :  { %v856_v23 = vmul.f32 %v854_v22, %v845_v21 }
 0xcab   :  { %858 = vrot.lane.b32.xlu2 %v856_v23, %s1534_s1 }
 0xcb6   :  { %v790_v30 = vpop.permute.xlu2 %789 }
 0xcb7   :  { %v792_v33 = vmul.f32 %v790_v30, %v784_v32 }
 0xcb9   :  { %794 = vrot.lane.b32.xlu1 %v792_v33, %s1534_s1 }
 0xd05   :  { %v859_v41 = vpop.permute.xlu2 %858 }
 0xd06   :  { %v1807_v42 = vadd.f32 %v859_v41, %v851_v35 }
 0xd08   :  { %1487 = vtanh.f32 %v1807_v42 }
 0xd0e   :  { %v1488_v43 = vpop.eup %1487 }
 0xd0f   :  { %864 = vrot.lane.b32.xlu1 %v1488_v43, %s1533_s0 }
 0xd2b   :  { %v795_v47 = vpop.permute.xlu1 %794 }
 0xd2c   :  { %v1812_v37 = vadd.f32 %v795_v47, %v787_v46 }
 0xd2e   :  { %1489 = vtanh.f32 %v1812_v37 }
 0xd34   :  { %v1490_v51 = vpop.eup %1489 }
 0xd35   :  { %800 = vrot.lane.b32.xlu0 %v1490_v51, %s1533_s0 }
 0xd81   :  { %v865_v48 = vpop.permute.xlu1 %864 }
 0xd82   :  { %v867_v52 = vmul.f32 %v865_v48, %v845_v21 }
 0xd84   :  { %v934_v45 = vpack.c.bf16 %v867_v52, %v867_v52  ;;  %869 = vrot.lane.b32.xlu2 %v867_v52, %s1534_s1 }
 0xd86   :  { %v936_v50 = vrot.slane %v934_v45, 1 }
 0xd88   :  { %937 = vrot.lane.b32.xlu1 %v936_v50, %s1534_s1 }
 0xda7   :  { %v801_v55 = vpop.permute.xlu0 %800 }
 0xda8   :  { %v803_v56 = vmul.f32 %v801_v55, %v784_v32  ;;  %v980_v32 = vrot.slane %v1807_v42, 6 }
 0xdaa   :  { %v873_v31 = vrot.slane %v803_v56, 6 }
 0xdac   :  { %874 = vrot.lane.b32.xlu0 %v873_v31, %s1533_s0 }
 0xdde   :  { %v870_v57 = vpop.permute.xlu2 %869 }
 0xdfa   :  { %v938_v54 = vpop.permute.xlu1 %937 }
 0xdfb   :  { %1353 = vmatmul.msk.bf16.vlgmr.msra.gmra.mxu0 %vm136_vm4, %v938_v54 }
 0xe1e   :  { %v875_v53 = vpop.permute.xlu0 %874 }
 0xe1f   :  { %v877_v58 = vsel %vm136_vm4, %v870_v57, %v875_v53 }
 0xe20   :  { %v878_v59 = vpack.c.bf16 %v877_v58, %v877_v58 }
 0xe22   :  { %v880_v36 = vrot.slane %v878_v59, 1 }
 0xe24   :  { %1351 = vmatmul.msk.bf16.vlgmr.msrb.gmra.mxu3 %vm233_vm5, %v880_v36 }
 0xe78   :  { %v951_v60 = vpop.f32.mrf.mxu0 }
 0xe79   :  { %v956_v61 = vrot.slane %v951_v60, 4 }
 0xe7b   :  { %v958_v62 = vadd.f32 %v956_v61, %v1776_v0 }
 0xe7d   :  { %1491 = vtanh.f32 %v958_v62  ;;  %v1354_v6 = vmul.f32 -1.442695, %v958_v62 }
 0xe80   :  { %v953_v1 = vpop.f32.mrf.mxu0 }
 0xe83   :  { %v1492_v3 = vpop.eup %1491 }
 0xe84   :  { %984 = vrot.lane.b32.xlu0 %v1492_v3, %s1533_s0  ;;  %v1849_v3 = vld [vmem:[%s1905_s5] ss:$0 sm:$0xff] }
 0xea7   :  { %v893_v63 = vpop.f32.mrf.mxu3 }
 0xea8   :  { %v894_v2 = vadd.f32 %v1692_v49, %v893_v63 }
 0xeaa   :  { %1493 = vtanh.f32 %v894_v2  ;;  %v1352_v39 = vmul.f32 -1.442695, %v894_v2 }
 0xeab   :  { %1495 = vpow2.f32 %v1354_v6 }
 0xeaf   :  { %v895_v4 = vpop.f32.mrf.mxu3 }
 0xeb0   :  { %v1494_v5 = vpop.eup %1493 }
 0xeb1   :  { %919 = vrot.lane.b32.xlu2 %v1494_v5, %s1533_s0  ;;  %v1496_v7 = vpop.eup %1495 }
 0xeb2   :  { %v962_v38 = vadd.f32 1.0, %v1496_v7 }
 0xeb4   :  { %1497 = vrcp.f32 %v962_v38  ;;  %v974_v16 = vand.u32 2147483648, %v962_v38  ;;  %vm968_vm3 = vweird.f32 %v962_v38  ;;  %v972_v11 = vand.u32 2147483647, %v962_v38 }
 0xeb5   :  { %1499 = vpow2.f32 %v1352_v39 }
 0xeb6   :  { %v975_v13 = vor.u32 1.1754944e-38, %v974_v16  ;;  %vm973_vm7 = vcmp.eq.f32.partialorder %v972_v11, 8.507059e+37 }
 0xeba   :  { %v1498_v40 = vpop.eup %1497 }
 0xebb   :  { %v964_v44 = vmul.f32 %v1498_v40, %v962_v38  ;;  %v1500_v8 = vpop.eup %1499  ;;  %vm969_vm2 = vweird.f32 %v1498_v40 }
 0xebc   :  { %v900_v9 = vadd.f32 1.0, %v1500_v8  ;;  %vm970_vm6 = vmor %vm968_vm3, %vm969_vm2 }
 0xebd   :  { %v965_v14 = vsub.f32 1.0, %v964_v44 }
 0xebe   :  { %1501 = vrcp.f32 %v900_v9  ;;  %v912_v24 = vand.u32 2147483648, %v900_v9  ;;  %vm906_vm9 = vweird.f32 %v900_v9  ;;  %v910_v25 = vand.u32 2147483647, %v900_v9 }
 0xebf   :  { %v966_v10 = vmul.f32 %v1498_v40, %v965_v14 }
 0xec0   :  { %v913_v27 = vor.u32 1.1754944e-38, %v912_v24  ;;  %vm911_vm11 = vcmp.eq.f32.partialorder %v910_v25, 8.507059e+37 }
 0xec1   :  { %v967_v49 = vadd.f32 %v1498_v40, %v966_v10 }
 0xec3   :  { %v971_v12 = vsel %vm970_vm6, %v1498_v40, %v967_v49 }
 0xec4   :  { %v1502_v15 = vpop.eup %1501  ;;  %v976_v17 = vsel %vm973_vm7, %v975_v13, %v971_v12 }
 0xec5   :  { %v902_v20 = vmul.f32 %v1502_v15, %v900_v9  ;;  %vm907_vm8 = vweird.f32 %v1502_v15  ;;  %v982_v33 = vmul.f32 %v980_v32, %v976_v17 }
 0xec6   :  { %vm908_vm10 = vmor %vm906_vm9, %vm907_vm8  ;;  %vm1262_vm9 = vcmask 1041408  }
 0xec7   :  { %v903_v21 = vsub.f32 1.0, %v902_v20 }
 0xec9   :  { %v904_v22 = vmul.f32 %v1502_v15, %v903_v21 }
 0xecb   :  { %v905_v23 = vadd.f32 %v1502_v15, %v904_v22 }
 0xecd   :  { %v909_v26 = vsel %vm908_vm10, %v1502_v15, %v905_v23 }
 0xece   :  { %v914_v29 = vsel %vm911_vm11, %v913_v27, %v909_v26 }
 0xecf   :  { %v917_v43 = vmul.f32 %v914_v29, %v1812_v37 }
 0xef6   :  { %v985_v18 = vpop.permute.xlu0 %984 }
 0xef7   :  { %v987_v19 = vmul.f32 %v985_v18, %v976_v17 }
 0xef9   :  { %989 = vrot.lane.b32.xlu2 %v987_v19, %s1534_s1 }
 0xf0b   :  { %v920_v28 = vpop.permute.xlu2 %919 }
 0xf0c   :  { %v922_v30 = vmul.f32 %v920_v28, %v914_v29 }
 0xf0e   :  { %924 = vrot.lane.b32.xlu1 %v922_v30, %s1534_s1 }
 0xf53   :  { %v990_v34 = vpop.permute.xlu2 %989 }
 0xf54   :  { %v1829_v35 = vadd.f32 %v990_v34, %v982_v33 }
 0xf56   :  { %1503 = vtanh.f32 %v1829_v35 }
 0xf5c   :  { %v1504_v41 = vpop.eup %1503 }
 0xf5d   :  { %995 = vrot.lane.b32.xlu1 %v1504_v41, %s1533_s0 }
 0xf80   :  { %v925_v46 = vpop.permute.xlu1 %924 }
 0xf81   :  { %v1834_v47 = vadd.f32 %v925_v46, %v917_v43 }
 0xf83   :  { %1505 = vtanh.f32 %v1834_v47 }
 0xf89   :  { %v1506_v51 = vpop.eup %1505 }
 0xf8a   :  { %930 = vrot.lane.b32.xlu0 %v1506_v51, %s1533_s0 }
 0xfcf   :  { %v996_v42 = vpop.permute.xlu1 %995 }
 0xfd0   :  { %v998_v48 = vmul.f32 %v996_v42, %v976_v17 }
 0xfd2   :  { %v1065_v52 = vpack.c.bf16 %v998_v48, %v998_v48  ;;  %1000 = vrot.lane.b32.xlu2 %v998_v48, %s1534_s1 }
 0xfd4   :  { %v1067_v45 = vrot.slane %v1065_v52, 2 }
 0xfd6   :  { %1068 = vrot.lane.b32.xlu1 %v1067_v45, %s1534_s1 }
 0xffc   :  { %v931_v50 = vpop.permute.xlu0 %930 }
 0xffd   :  { %v933_v55 = vmul.f32 %v931_v50, %v914_v29  ;;  %v1111_v29 = vrot.slane %v1829_v35, 6 }
 0xfff   :  { %v1004_v56 = vrot.slane %v933_v55, 4 }
0x1001   :  { %1005 = vrot.lane.b32.xlu0 %v1004_v56, %s1533_s0 }
0x102c   :  { %v1001_v31 = vpop.permute.xlu2 %1000 }
0x1048   :  { %v1069_v37 = vpop.permute.xlu1 %1068 }
0x1049   :  { %1357 = vmatmul.msk.bf16.vlgmr.msra.gmra.mxu1 %vm136_vm4, %v1069_v37 }
0x1073   :  { %v1006_v54 = vpop.permute.xlu0 %1005 }
0x1074   :  { %v1008_v57 = vsel %vm136_vm4, %v1001_v31, %v1006_v54 }
0x1075   :  { %v1009_v53 = vpack.c.bf16 %v1008_v57, %v1008_v57 }
0x1077   :  { %v1011_v58 = vrot.slane %v1009_v53, 2 }
0x1079   :  { %1355 = vmatmul.msk.bf16.vlgmr.msrb.gmra.mxu2 %vm233_vm5, %v1011_v58 }
0x10c6   :  { %v1082_v59 = vpop.f32.mrf.mxu1 }
0x10c7   :  { %v1087_v36 = vrot.slane %v1082_v59, 2 }
0x10c9   :  { %v1089_v60 = vadd.f32 %v1087_v36, %v1776_v0 }
0x10cb   :  { %1507 = vtanh.f32 %v1089_v60  ;;  %v1358_v5 = vmul.f32 -1.442695, %v1089_v60 }
0x10ce   :  { %v1084_v61 = vpop.f32.mrf.mxu1 }
0x10d1   :  { %v1508_v62 = vpop.eup %1507 }
0x10d2   :  { %1115 = vrot.lane.b32.xlu0 %v1508_v62, %s1533_s0 }
0x10fc   :  { %v1024_v1 = vpop.f32.mrf.mxu2 }
0x10fd   :  { %v1025_v63 = vadd.f32 %v1849_v3, %v1024_v1 }
0x10ff   :  { %1509 = vtanh.f32 %v1025_v63  ;;  %v1356_v39 = vmul.f32 -1.442695, %v1025_v63 }
0x1100   :  { %1511 = vpow2.f32 %v1358_v5 }
0x1104   :  { %v1026_v2 = vpop.f32.mrf.mxu2 }
0x1105   :  { %v1510_v4 = vpop.eup %1509 }
0x1106   :  { %1050 = vrot.lane.b32.xlu2 %v1510_v4, %s1533_s0  ;;  %v1512_v0 = vpop.eup %1511 }
0x1107   :  { %v1093_v6 = vadd.f32 1.0, %v1512_v0 }
0x1109   :  { %1513 = vrcp.f32 %v1093_v6  ;;  %v1105_v9 = vand.u32 2147483648, %v1093_v6  ;;  %vm1099_vm13 = vweird.f32 %v1093_v6  ;;  %v1103_v10 = vand.u32 2147483647, %v1093_v6 }
0x110a   :  { %1515 = vpow2.f32 %v1356_v39 }
0x110b   :  { %v1106_v11 = vor.u32 1.1754944e-38, %v1105_v9  ;;  %vm1104_vm15 = vcmp.eq.f32.partialorder %v1103_v10, 8.507059e+37  ;;  %v1371_v9 = vld [vmem:[%s1906_s6 + $0x10] sm:$0xf] }
0x110f   :  { %v1514_v7 = vpop.eup %1513 }
0x1110   :  { %v1095_v38 = vmul.f32 %v1514_v7, %v1093_v6  ;;  %v1516_v14 = vpop.eup %1515  ;;  %vm1100_vm12 = vweird.f32 %v1514_v7 }
0x1111   :  { %v1031_v49 = vadd.f32 1.0, %v1516_v14  ;;  %vm1101_vm14 = vmor %vm1099_vm13, %vm1100_vm12  ;;  %v1396_v14 = vld [vmem:[%s1906_s6 + $0x14] sm:$0xf] }
0x1112   :  { %v1096_v40 = vsub.f32 1.0, %v1095_v38 }
0x1113   :  { %1517 = vrcp.f32 %v1031_v49  ;;  %v1043_v22 = vand.u32 2147483648, %v1031_v49  ;;  %vm1037_vm1 = vweird.f32 %v1031_v49  ;;  %v1041_v23 = vand.u32 2147483647, %v1031_v49 }
0x1114   :  { %v1097_v44 = vmul.f32 %v1514_v7, %v1096_v40 }
0x1115   :  { %v1044_v25 = vor.u32 1.1754944e-38, %v1043_v22  ;;  %vm1042_vm3 = vcmp.eq.f32.partialorder %v1041_v23, 8.507059e+37 }
0x1116   :  { %v1098_v8 = vadd.f32 %v1514_v7, %v1097_v44 }
0x1118   :  { %v1102_v16 = vsel %vm1101_vm14, %v1514_v7, %v1098_v8  ;;  %v1373_v8 = vld [vmem:[%s1906_s6 + $0x18] sm:$0xf0] }
0x1119   :  { %v1107_v12 = vsel %vm1104_vm15, %v1106_v11, %v1102_v16  ;;  %v1518_v17 = vpop.eup %1517  ;;  %v1376_v10 = vor.u32 %v1396_v14, %v1373_v8  ;;  %v1394_v16 = vld [vmem:[%s1906_s6 + $0x4] sm:$0xf]  ;;  %v1365_v11 = vld [vmem:[%s1906_s6 + $0x8] sm:$0xf0] }
0x111a   :  { %v1033_v18 = vmul.f32 %v1518_v17, %v1031_v49  ;;  %vm1038_vm0 = vweird.f32 %v1518_v17  ;;  %v1113_v30 = vmul.f32 %v1111_v29, %v1107_v12  ;;  %v1397_v49 = vld [vmem:[%s1906_s6 + $0x14] sm:$0xf0] }
0x111b   :  { %vm1039_vm2 = vmor %vm1037_vm1, %vm1038_vm0  ;;  %1252 = vmatpush.bf16.msra.mxu2 %v1376_v10 }
0x111c   :  { %v1034_v19 = vsub.f32 1.0, %v1033_v18 }
0x111e   :  { %v1035_v20 = vmul.f32 %v1518_v17, %v1034_v19 }
0x1120   :  { %v1036_v21 = vadd.f32 %v1518_v17, %v1035_v20 }
0x1122   :  { %v1040_v24 = vsel %vm1039_vm2, %v1518_v17, %v1036_v21  ;;  %v1368_v17 = vor.u32 %v1394_v16, %v1365_v11 }
0x1123   :  { %v1045_v27 = vsel %vm1042_vm3, %v1044_v25, %v1040_v24  ;;  %v1201_v24 = vld [vmem:[%s1907_s7] sm:$0x3] }
0x1124   :  { %v1048_v41 = vmul.f32 %v1045_v27, %v1834_v47  ;;  %1253 = vmatpush.bf16.msra.mxu2 %v1368_v17  ;;  %v1204_v25 = vperm.slane %v1201_v24, 1 }
0x1144   :  { %v1116_v13 = vpop.permute.xlu0 %1115 }
0x1145   :  { %v1118_v15 = vmul.f32 %v1116_v13, %v1107_v12  ;;  %v1363_v13 = vld [vmem:[%s1906_s6] sm:$0xf] }
0x1147   :  { %1120 = vrot.lane.b32.xlu2 %v1118_v15, %s1534_s1  ;;  %v1395_v15 = vld [vmem:[%s1906_s6 + $0x4] sm:$0xf0] }
0x1148   :  { %v1364_v18 = vor.u32 %v1395_v15, %v1363_v13 }
0x1160   :  { %v1051_v26 = vpop.permute.xlu2 %1050 }
0x1161   :  { %v1053_v28 = vmul.f32 %v1051_v26, %v1045_v27  ;;  %v1203_v26 = vperm.slane %v1201_v24, 0 }
0x1163   :  { %1055 = vrot.lane.b32.xlu1 %v1053_v28, %s1534_s1 }
0x11a1   :  { %v1121_v32 = vpop.permute.xlu2 %1120 }
0x11a2   :  { %v1123_v33 = vadd.f32 %v1121_v32, %v1113_v30 }
0x11a4   :  { %1519 = vtanh.f32 %v1123_v33 }
0x11aa   :  { %v1520_v34 = vpop.eup %1519 }
0x11ab   :  { %1126 = vrot.lane.b32.xlu1 %v1520_v34, %s1533_s0 }
0x11d5   :  { %v1056_v43 = vpop.permute.xlu1 %1055 }
0x11d6   :  { %v1058_v46 = vadd.f32 %v1056_v43, %v1048_v41 }
0x11d8   :  { %1521 = vtanh.f32 %v1058_v46 }
0x11de   :  { %v1522_v51 = vpop.eup %1521 }
0x11df   :  { %1061 = vrot.lane.b32.xlu0 %v1522_v51, %s1533_s0 }
0x121d   :  { %v1127_v42 = vpop.permute.xlu1 %1126 }
0x121e   :  { %v1129_v48 = vmul.f32 %v1127_v42, %v1107_v12  ;;  %v1372_v12 = vor.u32 %v1397_v49, %v1371_v9 }
0x1220   :  { %1131 = vrot.lane.b32.xlu2 %v1129_v48, %s1534_s1  ;;  %1239 = vmatpush.bf16.msrb.mxu0 %v1372_v12 }
0x1224   :  { %1240 = vmatpush.bf16.msrb.mxu0 %v1364_v18 }
0x1251   :  { %v1062_v35 = vpop.permute.xlu0 %1061 }
0x1252   :  { %v1064_v52 = vmul.f32 %v1062_v35, %v1045_v27 }
0x1254   :  { %v1135_v45 = vrot.slane %v1064_v52, 2 }
0x1256   :  { %1136 = vrot.lane.b32.xlu0 %v1135_v45, %s1533_s0 }
0x127a   :  { %v1132_v50 = vpop.permute.xlu2 %1131 }
0x12c8   :  { %v1137_v55 = vpop.permute.xlu0 %1136 }
0x12c9   :  { %v1139_v56 = vsel %vm136_vm4, %v1132_v50, %v1137_v55 }
0x12ca   :  { %v1140_v47 = vpack.c.bf16 %v1139_v56, %v1139_v56 }
0x12cc   :  { %v1142_v37 = vrot.slane %v1140_v47, 3 }
0x12ce   :  { %1359 = vmatmul.msk.bf16.vlgmr.msra.gmra.mxu3 %vm233_vm5, %v1142_v37 }
0x1351   :  { %v1155_v31 = vpop.f32.mrf.mxu3 }
0x1352   :  { %v1156_v54 = vadd.f32 %v1849_v3, %v1155_v31 }
0x1354   :  { %1523 = vtanh.f32 %v1156_v54  ;;  %v1360_v58 = vmul.f32 -1.442695, %v1156_v54 }
0x1356   :  { %1525 = vpow2.f32 %v1360_v58 }
0x1359   :  { %v1157_v57 = vpop.f32.mrf.mxu3 }
0x135a   :  { %v1524_v53 = vpop.eup %1523 }
0x135b   :  { %1181 = vrot.lane.b32.xlu1 %v1524_v53, %s1533_s0 }
0x135c   :  { %v1526_v59 = vpop.eup %1525 }
0x135d   :  { %v1162_v36 = vadd.f32 1.0, %v1526_v59 }
0x135f   :  { %1527 = vrcp.f32 %v1162_v36  ;;  %v1174_v2 = vand.u32 2147483648, %v1162_v36  ;;  %vm1168_vm5 = vweird.f32 %v1162_v36  ;;  %v1172_v4 = vand.u32 2147483647, %v1162_v36 }
0x1361   :  { %v1175_v5 = vor.u32 1.1754944e-38, %v1174_v2  ;;  %vm1173_vm8 = vcmp.eq.f32.partialorder %v1172_v4, 8.507059e+37 }
0x1365   :  { %v1528_v60 = vpop.eup %1527 }
0x1366   :  { %v1164_v61 = vmul.f32 %v1528_v60, %v1162_v36  ;;  %vm1169_vm6 = vweird.f32 %v1528_v60 }
0x1367   :  { %vm1170_vm7 = vmor %vm1168_vm5, %vm1169_vm6 }
0x1368   :  { %v1165_v62 = vsub.f32 1.0, %v1164_v61 }
0x136a   :  { %v1166_v1 = vmul.f32 %v1528_v60, %v1165_v62 }
0x136c   :  { %v1167_v63 = vadd.f32 %v1528_v60, %v1166_v1 }
0x136e   :  { %v1171_v3 = vsel %vm1170_vm7, %v1528_v60, %v1167_v63 }
0x136f   :  { %v1176_v6 = vsel %vm1173_vm8, %v1175_v5, %v1171_v3 }
0x1370   :  { %v1179_v38 = vmul.f32 %v1176_v6, %v1058_v46 }
0x13cd   :  { %v1182_v0 = vpop.permute.xlu1 %1181 }
0x13ce   :  { %v1184_v7 = vmul.f32 %v1182_v0, %v1176_v6 }
0x13d0   :  { %1186 = vrot.lane.b32.xlu2 %v1184_v7, %s1534_s1 }
0x142a   :  { %v1187_v39 = vpop.permute.xlu2 %1186 }
0x142b   :  { %v1189_v40 = vadd.f32 %v1187_v39, %v1179_v38 }
0x142d   :  { %1529 = vtanh.f32 %v1189_v40 }
0x1433   :  { %v1530_v44 = vpop.eup %1529 }
0x1434   :  { %1192 = vrot.lane.b32.xlu0 %v1530_v44, %s1533_s0 }
0x14a6   :  { %v1193_v19 = vpop.permute.xlu0 %1192 }
0x14a7   :  { %v1195_v20 = vmul.f32 %v1193_v19, %v1176_v6 }
0x14a9   :  { %v1196_v21 = vpack.c.bf16 %v1195_v20, %v1195_v20 }
0x14ab   :  { %1208 = vrot.lane.b32.xlu1 %v1196_v21, %s1534_s1 }
0x151d   :  { %v1209_v22 = vpop.permute.xlu1 %1208 }
0x151e   :  { %1377 = vmatmul.msk.bf16.vlgmr.msrb.gmra.mxu0 %vm136_vm4, %v1209_v22  ;;  %1378 = vmatmul.msk.bf16.vlgmr.msra.gmra.mxu2 %vm136_vm4, %v1209_v22 }
0x159b   :  { %v1242_v23 = vpop.f32.mrf.mxu0 }
0x159c   :  { %v1243_v30 = vadd.f32 %v1242_v23, %v1203_v26 }
0x15a1   :  { %v1255_v27 = vpop.f32.mrf.mxu2 }
0x15a2   :  { %v1256_v28 = vadd.f32 %v1255_v27, %v1204_v25 }
0x15a3   :  { %v1244_v29 = vpop.f32.mrf.mxu0 }
0x15a4   :  { %v1261_v32 = vrot.slane %v1256_v28, 6 }
0x15a6   :  { %v1263_v33 = vsel %vm1262_vm9, %v1243_v30, %v1261_v32 }
0x15a7   :  { %1265 = vst [vmem:[%s1908_s8] sm:$0xf] %v1263_v33 }
0x15a9   :  { %v1257_v34 = vpop.f32.mrf.mxu2 }

// kernel: conv_lstm_forward.2
= control target key start
LH: loop header
LB: loop body
LE: loop exit
PB: predicated region body
PF: predicated region fallthrough
CT: control target
= control target key end

     0   :  { %vm140_vm0 = vsmask.f32 3328  ;;  %vm141_vm1 = vsmask.f32 7440  ;;  %s7266_s17 = smov 64   ;;  %vm59_vm3 = vcmask 519168   ;;  %s10779_s0 = inlined_call_operand.vmem [shape: bf16[18,18,64], index: 0, kind: input, shape index: {}]   ;;  %s10780_s1 = inlined_call_operand.vmem [shape: bf16[576,128], index: 1, kind: input, shape index: {}]   ;;  %s10781_s2 = inlined_call_operand.vmem [shape: f32[1,128], index: 2, kind: input, shape index: {}]   ;;  %s10782_s5 = inlined_call_operand.vmem [shape: bf16[256,256], index: 5, kind: input, shape index: {}]   ;;  %s10783_s3 = inlined_call_operand.vmem [shape: bf16[1152,128], index: 3, kind: input, shape index: {}]   ;;  %s10784_s4 = inlined_call_operand.vmem [shape: f32[1,128], index: 4, kind: input, shape index: {}]   ;;  %s10785_s6 = inlined_call_operand.vmem [shape: bf16[64,64], index: 6, kind: input, shape index: {}]   ;;  %s10786_s7 = inlined_call_operand.vmem [shape: bf16[16,128], index: 7, kind: output, shape index: {}]  }
   0x1   :  { %v95_v0 = vld [vmem:[%s10779_s0 + $0xc] sm:$0xf]  ;;  %v96_v1 = vld [vmem:[%s10779_s0 + $0x10] sm:$0xf]  ;;  %v92_v6 = vld [vmem:[%s10779_s0] sm:$0xf] }
   0x2   :  { %v168_v2 = vshrl.u32 %v95_v0, 16  ;;  %v171_v3 = vshll.u32 %v95_v0, 16  ;;  %v177_v4 = vshll.u32 %v96_v1, 16  ;;  %v181_v5 = vshrl.u32 %v96_v1, 16  ;;  %v93_v7 = vld [vmem:[%s10779_s0 + $0x4] sm:$0xf]  ;;  %vm7331_vm2 = vmor %vm140_vm0, %vm141_vm1 }
   0x3   :  { %v144_v8 = vshrl.u32 %v92_v6, 16  ;;  %v147_v9 = vshll.u32 %v92_v6, 16  ;;  %v97_v10 = vld [vmem:[%s10779_s0 + $0x14] sm:$0x1]  ;;  %v94_v15 = vld [vmem:[%s10779_s0 + $0x8] sm:$0x1] }
   0x4   :  { %v170_v11 = vrot.slane %v168_v2, 4  ;;  %v173_v12 = vrot.slane %v171_v3, 5  ;;  %v179_v13 = vrot.slane %v177_v4, 5  ;;  %v183_v14 = vrot.slane %v181_v5, 4  ;;  %v102_v20 = vld [vmem:[%s10779_s0 + $0x28] sm:$0xf] }
   0x5   :  { %v146_v16 = vrot.slane %v144_v8, 4  ;;  %v149_v17 = vrot.slane %v147_v9, 5  ;;  %v153_v18 = vshll.u32 %v93_v7, 16  ;;  %v157_v19 = vshrl.u32 %v93_v7, 16  ;;  %v101_v28 = vld [vmem:[%s10779_s0 + $0x24] sm:$0xf] }
   0x6   :  { %v174_v21 = vor.u32 %v173_v12, %v170_v11  ;;  %v184_v22 = vor.u32 %v183_v14, %v179_v13  ;;  %v187_v27 = vshll.u32 %v97_v10, 16  ;;  %v163_v30 = vshll.u32 %v94_v15, 16  ;;  %v107_v41 = vld [vmem:[%s10779_s0 + $0x3c] sm:$0xf]  ;;  %v103_v43 = vld [vmem:[%s10779_s0 + $0x2c] sm:$0x1] }
   0x7   :  { %v150_v24 = vor.u32 %v149_v17, %v146_v16  ;;  %v155_v25 = vrot.slane %v153_v18, 5  ;;  %v159_v26 = vrot.slane %v157_v19, 4  ;;  %v225_v31 = vshll.u32 %v102_v20, 16  ;;  %v105_v49 = vld [vmem:[%s10779_s0 + $0x34] sm:$0xf] }
   0x8   :  { %v175_v29 = vrot.slane %v174_v21, 4  ;;  %v229_v34 = vshrl.u32 %v102_v20, 16  ;;  %v216_v36 = vshrl.u32 %v101_v28, 16  ;;  %v185_v38 = vrot.slane %v184_v22, 4  ;;  %v98_v50 = vld [vmem:[%s10779_s0 + $0x18] sm:$0xf] }
   0x9   :  { %v151_v32 = vrot.slane %v150_v24, 4  ;;  %v160_v33 = vor.u32 %v159_v26, %v155_v25  ;;  %v189_v39 = vrot.slane %v187_v27, 5  ;;  %v219_v40 = vshll.u32 %v101_v28, 16  ;;  %v99_v55 = vld [vmem:[%s10779_s0 + $0x1c] sm:$0xf] }
   0xa   :  { %v180_v35 = vsel %vm7331_vm2, %v175_v29, %v179_v13  ;;  %v165_v42 = vrot.slane %v163_v30, 5  ;;  %v7350_v44 = vrot.slane %v225_v31, 5  ;;  %v231_v45 = vrot.slane %v229_v34, 4  ;;  %v7370_v3 = vld [vmem:[%s10779_s0 + $0x40] sm:$0xf] }
   0xb   :  { %531 = vrot.lane.b32.xlu1 %v180_v35, %s7266_s17  ;;  %v156_v37 = vsel %vm7331_vm2, %v151_v32, %v155_v25  ;;  %v218_v46 = vrot.slane %v216_v36, 4  ;;  %v161_v47 = vrot.slane %v160_v33, 4  ;;  %v221_v48 = vrot.slane %v219_v40, 5  ;;  %v111_v6 = vld [vmem:[%s10779_s0 + $0x4c] sm:$0xf] }
   0xc   :  { %527 = vrot.lane.b32.xlu0 %v156_v37, %s7266_s17  ;;  %v264_v51 = vshrl.u32 %v107_v41, 16  ;;  %v267_v52 = vshll.u32 %v107_v41, 16  ;;  %v190_v53 = vsel %vm7331_vm2, %v185_v38, %v189_v39  ;;  %v235_v54 = vshll.u32 %v103_v43, 16  ;;  %v110_v11 = vld [vmem:[%s10779_s0 + $0x48] sm:$0xf] }
   0xd   :  { %v232_v56 = vor.u32 %v231_v45, %v7350_v44  ;;  %v222_v57 = vor.u32 %v221_v48, %v218_v46  ;;  %v249_v58 = vshll.u32 %v105_v49, 16  ;;  %v192_v59 = vshrl.u32 %v98_v50, 16  ;;  %v100_v16 = vld [vmem:[%s10779_s0 + $0x20] sm:$0x1]  ;;  %v106_v19 = vld [vmem:[%s10779_s0 + $0x38] sm:$0x1] }
   0xe   :  { %v166_v60 = vsel %vm7331_vm2, %v161_v47, %v165_v42  ;;  %v253_v61 = vshrl.u32 %v105_v49, 16  ;;  %v195_v62 = vshll.u32 %v98_v50, 16  ;;  %v266_v63 = vrot.slane %v264_v51, 4  ;;  %v104_v39 = vld [vmem:[%s10779_s0 + $0x30] sm:$0xf] }
   0xf   :  { %v269_v0 = vrot.slane %v267_v52, 5  ;;  %v194_v1 = vrot.slane %v192_v59, 4  ;;  %v201_v2 = vshll.u32 %v99_v55, 16  ;;  %v205_v5 = vshrl.u32 %v99_v55, 16  ;;  %v112_v40 = vld [vmem:[%s10779_s0 + $0x50] sm:$0x1] }
  0x10   :  { %v197_v4 = vrot.slane %v195_v62, 5  ;;  %v233_v7 = vrot.slane %v232_v56, 4  ;;  %v237_v8 = vrot.slane %v235_v54, 5  ;;  %v223_v9 = vrot.slane %v222_v57, 4  ;;  %v116_v43 = vld [vmem:[%s10779_s0 + $0x60] sm:$0xf] }
  0x11   :  { %v7376_v10 = vrot.slane %v249_v58, 5  ;;  %v255_v12 = vrot.slane %v253_v61, 4  ;;  %v203_v14 = vrot.slane %v201_v2, 5  ;;  %v207_v15 = vrot.slane %v205_v5, 4  ;;  %v114_v48 = vld [vmem:[%s10779_s0 + $0x58] sm:$0xf] }
  0x12   :  { %v198_v13 = vor.u32 %v197_v4, %v194_v1  ;;  %v270_v17 = vor.u32 %v269_v0, %v266_v63  ;;  %v273_v18 = vshll.u32 %v7370_v3, 16  ;;  %v297_v21 = vshll.u32 %v111_v6, 16  ;;  %v7428_v62 = vld [vmem:[%s10779_s0 + $0x64] sm:$0xf]  ;;  %v120_v2 = vld [vmem:[%s10779_s0 + $0x70] sm:$0xf] }
  0x13   :  { %533 = vrot.lane.b32.xlu1 %v190_v53, %s7266_s17  ;;  %v301_v22 = vshrl.u32 %v111_v6, 16  ;;  %v208_v24 = vor.u32 %v207_v15, %v203_v14  ;;  %v238_v25 = vsel %vm7331_vm2, %v233_v7, %v237_v8  ;;  %v288_v26 = vshrl.u32 %v110_v11, 16  ;;  %v109_v8 = vld [vmem:[%s10779_s0 + $0x44] sm:$0x1]  ;;  %v119_v15 = vld [vmem:[%s10779_s0 + $0x6c] sm:$0xf] }
  0x14   :  { %529 = vrot.lane.b32.xlu0 %v166_v60, %s7266_s17  ;;  %v199_v20 = vrot.slane %v198_v13, 4  ;;  %v291_v27 = vshll.u32 %v110_v11, 16  ;;  %v211_v28 = vshll.u32 %v100_v16, 16  ;;  %v228_v29 = vsel %vm7331_vm2, %v223_v9, %v7350_v44  ;;  %v115_v9 = vld [vmem:[%s10779_s0 + $0x5c] sm:$0x1] }
  0x15   :  { %v256_v30 = vor.u32 %v255_v12, %v7376_v10  ;;  %v259_v31 = vshll.u32 %v106_v19, 16  ;;  %v271_v33 = vrot.slane %v270_v17, 4  ;;  %v7396_v34 = vrot.slane %v273_v18, 5  ;;  %v113_v16 = vld [vmem:[%s10779_s0 + $0x54] sm:$0xf] }
  0x16   :  { %v204_v32 = vsel %vm7331_vm2, %v199_v20, %v203_v14  ;;  %v7400_v35 = vrot.slane %v297_v21, 5  ;;  %v303_v36 = vrot.slane %v301_v22, 4  ;;  %v209_v37 = vrot.slane %v208_v24, 4  ;;  %v6058_v23 = vld [vmem:[%s10779_s0 + $0x74] sm:$0x1] }
  0x17   :  { %535 = vrot.lane.b32.xlu2 %v204_v32, %s7266_s17  ;;  %v213_v38 = vrot.slane %v211_v28, 5  ;;  %v290_v41 = vrot.slane %v288_v26, 4  ;;  %v293_v42 = vrot.slane %v291_v27, 5  ;;  %v257_v44 = vrot.slane %v256_v30, 4  ;;  %v121_v32 = vld [vmem:[%s10779_s0 + $0x74] sm:$0x1] }
  0x18   :  { %v261_v45 = vrot.slane %v259_v31, 5  ;;  %v276_v46 = vsel %vm7331_vm2, %v271_v33, %v7396_v34  ;;  %v277_v47 = vshrl.u32 %v7370_v3, 16  ;;  %v240_v49 = vshrl.u32 %v104_v39, 16 }
  0x19   :  { %v243_v50 = vshll.u32 %v104_v39, 16  ;;  %v304_v51 = vor.u32 %v303_v36, %v7400_v35  ;;  %v307_v52 = vshll.u32 %v112_v40, 16  ;;  %v214_v53 = vsel %vm7331_vm2, %v209_v37, %v213_v38 }
  0x1a   :  { %v336_v54 = vshrl.u32 %v116_v43, 16  ;;  %v294_v55 = vor.u32 %v293_v42, %v290_v41  ;;  %v339_v56 = vshll.u32 %v116_v43, 16  ;;  %v242_v57 = vrot.slane %v240_v49, 4  ;;  %v125_v43 = vld [vmem:[%s10779_s0 + $0x84] sm:$0xf] }
  0x1b   :  { %541 = vrot.lane.b32.xlu1 %v238_v25, %s7266_s17  ;;  %v245_v58 = vrot.slane %v243_v50, 5  ;;  %v262_v59 = vsel %vm7331_vm2, %v257_v44, %v261_v45  ;;  %v321_v60 = vshll.u32 %v114_v48, 16  ;;  %v325_v61 = vshrl.u32 %v114_v48, 16 }
  0x1c   :  { %539 = vrot.lane.b32.xlu0 %v228_v29, %s7266_s17  ;;  %v305_v0 = vrot.slane %v304_v51, 4  ;;  %v309_v1 = vrot.slane %v307_v52, 5  ;;  %v279_v3 = vrot.slane %v277_v47, 4  ;;  %v295_v4 = vrot.slane %v294_v55, 4 }
  0x1d   :  { %v246_v63 = vor.u32 %v245_v58, %v242_v57  ;;  %v338_v5 = vrot.slane %v336_v54, 4  ;;  %v341_v6 = vrot.slane %v339_v56, 5  ;;  %v7441_v11 = vrot.slane %v321_v60, 5 }
  0x1e   :  { %v327_v12 = vrot.slane %v325_v61, 4  ;;  %v369_v13 = vshll.u32 %v120_v2, 16  ;;  %v373_v14 = vshrl.u32 %v120_v2, 16  ;;  %v345_v17 = vshll.u32 %v7428_v62, 16  ;;  %v118_v61 = vld [vmem:[%s10779_s0 + $0x68] sm:$0x1] }
  0x1f   :  { %537 = vrot.lane.b32.xlu2 %v214_v53, %s7266_s17  ;;  %v247_v7 = vrot.slane %v246_v63, 4  ;;  %v280_v19 = vor.u32 %v279_v3, %v7396_v34  ;;  %v283_v20 = vshll.u32 %v109_v8, 16  ;;  %v310_v21 = vsel %vm7331_vm2, %v305_v0, %v309_v1  ;;  %v124_v1 = vld [vmem:[%s10779_s0 + $0x80] sm:$0x1]  ;;  %v122_v2 = vld [vmem:[%s10779_s0 + $0x78] sm:$0xf] }
  0x20   :  { %v300_v22 = vsel %vm7331_vm2, %v295_v4, %v7400_v35  ;;  %v342_v24 = vor.u32 %v341_v6, %v338_v5  ;;  %v331_v25 = vshll.u32 %v115_v9, 16  ;;  %v328_v26 = vor.u32 %v327_v12, %v7441_v11  ;;  %v135_v6 = vld [vmem:[%s10779_s0 + $0xac] sm:$0xf]  ;;  %v134_v9 = vld [vmem:[%s10779_s0 + $0xa8] sm:$0xf] }
  0x21   :  { %v252_v18 = vsel %vm7331_vm2, %v247_v7, %v7376_v10  ;;  %v360_v27 = vshrl.u32 %v119_v15, 16  ;;  %v363_v28 = vshll.u32 %v119_v15, 16  ;;  %v312_v29 = vshrl.u32 %v113_v16, 16 }
  0x22   :  { %v7461_v10 = vrot.slane %v369_v13, 5  ;;  %v375_v30 = vrot.slane %v373_v14, 4  ;;  %v315_v31 = vshll.u32 %v113_v16, 16  ;;  %v281_v33 = vrot.slane %v280_v19, 4 }
  0x23   :  { %547 = vrot.lane.b32.xlu1 %v276_v46, %s7266_s17  ;;  %v285_v34 = vrot.slane %v283_v20, 5  ;;  %v314_v35 = vrot.slane %v312_v29, 4  ;;  %v343_v36 = vrot.slane %v342_v24, 4  ;;  %v347_v37 = vrot.slane %v345_v17, 5  ;;  %v123_v46 = vld [vmem:[%s10779_s0 + $0x7c] sm:$0xf] }
  0x24   :  { %545 = vrot.lane.b32.xlu0 %v262_v59, %s7266_s17  ;;  %v317_v38 = vrot.slane %v315_v31, 5  ;;  %v329_v39 = vrot.slane %v328_v26, 4  ;;  %v333_v40 = vrot.slane %v331_v25, 5  ;;  %v362_v41 = vrot.slane %v360_v27, 4  ;;  %v126_v59 = vld [vmem:[%s10779_s0 + $0x88] sm:$0xf] }
  0x25   :  { %v365_v42 = vrot.slane %v363_v28, 5  ;;  %v376_v44 = vor.u32 %v375_v30, %v7461_v10  ;;  %v379_v45 = vshll.u32 %v121_v32, 16  ;;  %v349_v47 = vshrl.u32 %v7428_v62, 16 }
  0x26   :  { %v286_v48 = vsel %vm7331_vm2, %v281_v33, %v285_v34  ;;  %v318_v49 = vor.u32 %v317_v38, %v314_v35  ;;  %v348_v50 = vsel %vm7331_vm2, %v343_v36, %v347_v37  ;;  %v408_v51 = vshrl.u32 %v125_v43, 16 }
  0x27   :  { %543 = vrot.lane.b32.xlu2 %v252_v18, %s7266_s17  ;;  %v411_v52 = vshll.u32 %v125_v43, 16  ;;  %v334_v53 = vsel %vm7331_vm2, %v329_v39, %v333_v40  ;;  %v366_v54 = vor.u32 %v365_v42, %v362_v41  ;;  %v393_v55 = vshll.u32 %v123_v46, 16 }
  0x28   :  { %v397_v56 = vshrl.u32 %v123_v46, 16  ;;  %v377_v57 = vrot.slane %v376_v44, 4  ;;  %v381_v58 = vrot.slane %v379_v45, 5  ;;  %v319_v60 = vrot.slane %v318_v49, 4 }
  0x29   :  { %v351_v62 = vrot.slane %v349_v47, 4  ;;  %v410_v63 = vrot.slane %v408_v51, 4  ;;  %v413_v0 = vrot.slane %v411_v52, 5  ;;  %v367_v3 = vrot.slane %v366_v54, 4 }
  0x2a   :  { %v7497_v4 = vrot.slane %v393_v55, 5  ;;  %v399_v5 = vrot.slane %v397_v56, 4  ;;  %v382_v7 = vsel %vm7331_vm2, %v377_v57, %v381_v58  ;;  %v417_v8 = vshll.u32 %v126_v59, 16  ;;  %v127_v55 = vld [vmem:[%s10779_s0 + $0x8c] sm:$0x1] }
  0x2b   :  { %553 = vrot.lane.b32.xlu1 %v310_v21, %s7266_s17  ;;  %v355_v12 = vshll.u32 %v118_v61, 16  ;;  %v324_v13 = vsel %vm7331_vm2, %v319_v60, %v7441_v11  ;;  %v352_v14 = vor.u32 %v351_v62, %v347_v37  ;;  %v384_v15 = vshrl.u32 %v122_v2, 16  ;;  %v128_v37 = vld [vmem:[%s10779_s0 + $0x90] sm:$0xf]  ;;  %v138_v57 = vld [vmem:[%s10779_s0 + $0xb8] sm:$0xf] }
  0x2c   :  { %551 = vrot.lane.b32.xlu0 %v300_v22, %s7266_s17  ;;  %v387_v16 = vshll.u32 %v122_v2, 16  ;;  %v414_v17 = vor.u32 %v413_v0, %v410_v63  ;;  %v403_v18 = vshll.u32 %v124_v1, 16  ;;  %v489_v19 = vshll.u32 %v135_v6, 16  ;;  %v137_v58 = vld [vmem:[%s10779_s0 + $0xb4] sm:$0xf] }
  0x2d   :  { %v493_v20 = vshrl.u32 %v135_v6, 16  ;;  %v372_v21 = vsel %vm7331_vm2, %v367_v3, %v7461_v10  ;;  %v400_v22 = vor.u32 %v399_v5, %v7497_v4  ;;  %v480_v24 = vshrl.u32 %v134_v9, 16  ;;  %v136_v10 = vld [vmem:[%s10779_s0 + $0xb0] sm:$0x1] }
  0x2e   :  { %v483_v25 = vshll.u32 %v134_v9, 16  ;;  %v353_v11 = vrot.slane %v352_v14, 4  ;;  %v357_v26 = vrot.slane %v355_v12, 5  ;;  %v386_v27 = vrot.slane %v384_v15, 4  ;;  %v139_v12 = vld [vmem:[%s10779_s0 + $0xbc] sm:$0x1] }
  0x2f   :  { %549 = vrot.lane.b32.xlu2 %v286_v48, %s7266_s17  ;;  %v389_v28 = vrot.slane %v387_v16, 5  ;;  %v415_v29 = vrot.slane %v414_v17, 4  ;;  %v419_v30 = vrot.slane %v417_v8, 5  ;;  %v491_v31 = vrot.slane %v489_v19, 5  ;;  %v129_v48 = vld [vmem:[%s10779_s0 + $0x94] sm:$0xf] }
  0x30   :  { %v495_v32 = vrot.slane %v493_v20, 4  ;;  %v401_v33 = vrot.slane %v400_v22, 4  ;;  %v405_v34 = vrot.slane %v403_v18, 5  ;;  %v482_v35 = vrot.slane %v480_v24, 4  ;;  %v7102_v15 = vld [vmem:[%s10780_s1 + $0x38] sm:$0xff] }
  0x31   :  { %v485_v36 = vrot.slane %v483_v25, 5  ;;  %v421_v38 = vshrl.u32 %v126_v59, 16  ;;  %v499_v39 = vshll.u32 %v136_v10, 16  ;;  %v358_v40 = vsel %vm7331_vm2, %v353_v11, %v357_v26  ;;  %v131_v18 = vld [vmem:[%s10779_s0 + $0x9c] sm:$0xf]  ;;  %3690 = vmatpush.bf16.msra.mxu0 %v7102_v15  ;;  %7244 = vmatpush.bf16.msra.mxu2 %v7102_v15 }
  0x32   :  { %v390_v41 = vor.u32 %v389_v28, %v386_v27  ;;  %v420_v42 = vsel %vm7331_vm2, %v415_v29, %v419_v30  ;;  %v496_v43 = vor.u32 %v495_v32, %v491_v31  ;;  %v432_v44 = vshrl.u32 %v128_v37, 16  ;;  %v5840_v26 = vld [vmem:[%s10779_s0 + $0xb8] sm:$0xf] }
  0x33   :  { %559 = vrot.lane.b32.xlu1 %v348_v50, %s7266_s17  ;;  %v435_v45 = vshll.u32 %v128_v37, 16  ;;  %v406_v46 = vsel %vm7331_vm2, %v401_v33, %v405_v34  ;;  %v486_v47 = vor.u32 %v485_v36, %v482_v35  ;;  %v423_v50 = vrot.slane %v421_v38, 4  ;;  %v130_v32 = vld [vmem:[%s10779_s0 + $0x98] sm:$0x1]  ;;  %v7101_v33 = vld [vmem:[%s10780_s1 + $0x30] sm:$0xff]  ;;  %v7100_v36 = vld [vmem:[%s10780_s1 + $0x28] sm:$0xff] }
  0x34   :  { %557 = vrot.lane.b32.xlu0 %v334_v53, %s7266_s17  ;;  %v391_v49 = vrot.slane %v390_v41, 4  ;;  %v497_v51 = vrot.slane %v496_v43, 4  ;;  %v501_v52 = vrot.slane %v499_v39, 5  ;;  %v434_v53 = vrot.slane %v432_v44, 4  ;;  %v132_v35 = vld [vmem:[%s10779_s0 + $0xa0] sm:$0xf] }
  0x35   :  { %v437_v54 = vrot.slane %v435_v45, 5  ;;  %v487_v56 = vrot.slane %v486_v47, 4  ;;  %v441_v59 = vshll.u32 %v129_v48, 16  ;;  %v424_v61 = vor.u32 %v423_v50, %v419_v30  ;;  %3691 = vmatpush.bf16.msra.mxu0 %v7101_v33  ;;  %7245 = vmatpush.bf16.msra.mxu2 %v7101_v33  ;;  %v5839_v37 = vld [vmem:[%s10779_s0 + $0xb4] sm:$0xf]  ;;  %v7099_v50 = vld [vmem:[%s10780_s1 + $0x20] sm:$0xff] }
  0x36   :  { %v396_v60 = vsel %vm7331_vm2, %v391_v49, %v7497_v4  ;;  %v427_v62 = vshll.u32 %v127_v55, 16  ;;  %v502_v63 = vsel %vm7331_vm2, %v497_v51, %v501_v52  ;;  %v513_v1 = vshll.u32 %v138_v57, 16  ;;  %v7597_v44 = vld [vmem:[%s10779_s0 + $0x10] sm:$0xf]  ;;  %v5988_v47 = vld [vmem:[%s10779_s0 + $0x1c] sm:$0xf] }
  0x37   :  { %555 = vrot.lane.b32.xlu2 %v324_v13, %s7266_s17  ;;  %v438_v0 = vor.u32 %v437_v54, %v434_v53  ;;  %v517_v2 = vshrl.u32 %v138_v57, 16  ;;  %v492_v3 = vsel %vm7331_vm2, %v487_v56, %v491_v31  ;;  %v504_v5 = vshrl.u32 %v137_v58, 16  ;;  %v5893_v51 = vld [vmem:[%s10779_s0 + $0x14] sm:$0x1]  ;;  %v29_v52 = vld [vmem:[%s10779_s0 + $0xc] sm:$0xf] }
  0x38   :  { %v507_v6 = vshll.u32 %v137_v58, 16  ;;  %v425_v8 = vrot.slane %v424_v61, 4  ;;  %v429_v4 = vrot.slane %v427_v62, 5  ;;  %v515_v13 = vrot.slane %v513_v1, 5  ;;  %v27_v53 = vld [vmem:[%s10779_s0] sm:$0xf] }
  0x39   :  { %v439_v9 = vrot.slane %v438_v0, 4  ;;  %v519_v14 = vrot.slane %v517_v2, 4  ;;  %v506_v16 = vrot.slane %v504_v5, 4  ;;  %v445_v19 = vshrl.u32 %v129_v48, 16  ;;  %3692 = vmatpush.bf16.msra.mxu0 %v7100_v36  ;;  %7246 = vmatpush.bf16.msra.mxu2 %v7100_v36  ;;  %62 = vst.msk [vmem:[#allocation2 + $0x28] sm:$0xf] %vm59_vm3, %v29_v52 }
  0x3a   :  { %v509_v17 = vrot.slane %v507_v6, 5  ;;  %v523_v20 = vshll.u32 %v139_v12, 16  ;;  %v456_v25 = vshrl.u32 %v131_v18, 16  ;;  %v459_v11 = vshll.u32 %v131_v18, 16  ;;  %v5891_v58 = vld [vmem:[%s10779_s0 + $0xc] sm:$0xe] }
  0x3b   :  { %565 = vrot.lane.b32.xlu1 %v382_v7, %s7266_s17  ;;  %v443_v7 = vrot.slane %v441_v59, 5  ;;  %v520_v24 = vor.u32 %v519_v14, %v515_v13  ;;  %v447_v29 = vrot.slane %v445_v19, 4  ;;  %v451_v39 = vshll.u32 %v130_v32, 16  ;;  %60 = vst.msk [vmem:[#allocation2] sm:$0xf] %vm59_vm3, %v27_v53  ;;  %v7097_v14 = vld [vmem:[%s10780_s1 + $0x10] sm:$0xff] }
  0x3c   :  { %563 = vrot.lane.b32.xlu0 %v372_v21, %s7266_s17  ;;  %v430_v21 = vsel %vm7331_vm2, %v425_v8, %v429_v4  ;;  %v510_v27 = vor.u32 %v509_v17, %v506_v16  ;;  %v525_v28 = vrot.slane %v523_v20, 5  ;;  %v458_v10 = vrot.slane %v456_v25, 4  ;;  %v5991_v62 = vld [vmem:[%s10779_s0 + $0x28] sm:$0xf]  ;;  %v5989_v6 = vld [vmem:[%s10779_s0 + $0x20] sm:$0x1] }
  0x3d   :  { %v444_v22 = vsel %vm7331_vm2, %v439_v9, %v443_v7  ;;  %v521_v30 = vrot.slane %v520_v24, 4  ;;  %v461_v31 = vrot.slane %v459_v11, 5  ;;  %v448_v38 = vor.u32 %v447_v29, %v443_v7  ;;  %3693 = vmatpush.bf16.msra.mxu0 %v7099_v50  ;;  %7247 = vmatpush.bf16.msra.mxu2 %v7099_v50  ;;  %v5990_v8 = vld [vmem:[%s10779_s0 + $0x24] sm:$0xf]  ;;  %v5894_v12 = vld [vmem:[%s10779_s0 + $0x18] sm:$0xe] }
  0x3e   :  { %v511_v34 = vrot.slane %v510_v27, 4  ;;  %v1718_v54 = vrot.slane %v7597_v44, 5  ;;  %v2079_v55 = vshll.u32 %v5988_v47, 16  ;;  %v2083_v56 = vshrl.u32 %v5988_v47, 16  ;;  %v133_v4 = vld [vmem:[%s10779_s0 + $0xa4] sm:$0x1] }
  0x3f   :  { %561 = vrot.lane.b32.xlu2 %v358_v40, %s7266_s17  ;;  %v526_v40 = vsel %vm7331_vm2, %v521_v30, %v525_v28  ;;  %v462_v41 = vor.u32 %v461_v31, %v458_v10  ;;  %v449_v45 = vrot.slane %v448_v38, 4  ;;  %v469_v57 = vshrl.u32 %v132_v35, 16  ;;  %v31_v15 = vld [vmem:[%s10779_s0 + $0x18] sm:$0xf]  ;;  %v30_v18 = vld [vmem:[%s10779_s0 + $0x10] sm:$0xf] }
  0x40   :  { %v516_v43 = vsel %vm7331_vm2, %v511_v34, %v515_v13  ;;  %vm752_vm4 = vcmask 1042432   ;;  %vm753_vm5 = vcmask 1046532   ;;  %v1721_v0 = vrot.slane %v5893_v51, 5  ;;  %v5987_v16 = vld [vmem:[%s10779_s0 + $0x18] sm:$0xf]  ;;  %v7096_v11 = vld [vmem:[%s10780_s1 + $0x8] sm:$0xff] }
  0x41   :  { %v463_v48 = vrot.slane %v462_v41, 4  ;;  %v1720_v1 = vrot.slane %v1718_v54, 4  ;;  %v5939_v2 = vrot.slane %v5891_v58, 9  ;;  %v2085_v5 = vrot.slane %v2083_v56, 4  ;;  %vm7665_vm6 = vmor %vm752_vm4, %vm753_vm5  ;;  %64 = vst.msk [vmem:[#allocation2 + $0x50] sm:$0xf] %vm59_vm3, %v31_v15 }
  0x42   :  { %v2103_v7 = vshll.u32 %v5991_v62, 16  ;;  %v471_v9 = vrot.slane %v469_v57, 4  ;;  %v2107_v13 = vshrl.u32 %v5991_v62, 16  ;;  %v28_v19 = vld [vmem:[%s10779_s0 + $0x4] sm:$0xf]  ;;  %v475_v25 = vshll.u32 %v133_v4, 16 }
  0x43   :  { %571 = vrot.lane.b32.xlu1 %v420_v42, %s7266_s17  ;;  %v465_v42 = vshll.u32 %v132_v35, 16  ;;  %v5841_v20 = vld [vmem:[%s10779_s0 + $0xc0] sm:$0xf]  ;;  %63 = vst.msk [vmem:[#allocation2 + $0x3c] sm:$0xf] %vm59_vm3, %v30_v18  ;;  %v2073_v27 = vshll.u32 %v5987_v16, 16  ;;  %v1722_v28 = vsel %vm7665_vm6, %v1720_v1, %v1721_v0  ;;  %v1719_v10 = vsel %vm7665_vm6, %v5939_v2, %v1718_v54 }
  0x44   :  { %569 = vrot.lane.b32.xlu0 %v406_v46, %s7266_s17  ;;  %v453_v46 = vrot.slane %v451_v39, 5  ;;  %61 = vst.msk [vmem:[#allocation2 + $0x14] sm:$0xf] %vm59_vm3, %v28_v19  ;;  %v2089_v30 = vshll.u32 %v5989_v6, 16  ;;  %v7693_v31 = vld [vmem:[%s10779_s0 + $0x1c] sm:$0xf] }
  0x45   :  { %v7603_v49 = vrot.slane %v465_v42, 5  ;;  %v5940_v32 = vrot.slane %v5894_v12, 9  ;;  %v7696_v33 = vrot.slane %v2103_v7, 5  ;;  %v2109_v34 = vrot.slane %v2107_v13, 4  ;;  %v5993_v47 = vld [vmem:[%s10779_s0 + $0x30] sm:$0xf] }
  0x46   :  { %v454_v59 = vsel %vm7331_vm2, %v449_v45, %v453_v46  ;;  %v477_v39 = vrot.slane %v475_v25, 5  ;;  %v2075_v41 = vrot.slane %v2073_v27, 5  ;;  %v1725_v42 = vrot.slane %v7693_v31, 5  ;;  %v7095_v45 = vld [vmem:[%s10780_s1] sm:$0xff]  ;;  %v32_v46 = vld [vmem:[%s10779_s0 + $0x1c] sm:$0xf] }
  0x47   :  { %567 = vrot.lane.b32.xlu2 %v396_v60, %s7266_s17  ;;  %v7098_v60 = vld [vmem:[%s10780_s1 + $0x18] sm:$0xff]  ;;  %v468_v61 = vsel %vm7331_vm2, %v463_v48, %v7603_v49  ;;  %v472_v24 = vor.u32 %v471_v9, %v7603_v49  ;;  %v2091_v44 = vrot.slane %v2089_v30, 5  ;;  %65 = vst.msk [vmem:[#allocation2 + $0x64] sm:$0xf] %vm59_vm3, %v32_v46  ;;  %v34_v48 = vld [vmem:[%s10779_s0 + $0x28] sm:$0xf]  ;;  %v2110_v49 = vor.u32 %v2109_v34, %v7696_v33 }
  0x48   :  { %3694 = vmatpush.bf16.msra.mxu0 %v7098_v60  ;;  %7248 = vmatpush.bf16.msra.mxu2 %v7098_v60  ;;  %67 = vst.msk [vmem:[#allocation2 + $0x8c] sm:$0xf] %vm59_vm3, %v34_v48  ;;  %v33_v51 = vld [vmem:[%s10779_s0 + $0x24] sm:$0xf]  ;;  %v2118_v56 = vshrl.u32 %v5993_v47, 16  ;;  %v2121_v57 = vshll.u32 %v5993_v47, 16 }
  0x49   :  { %v473_v38 = vrot.slane %v472_v24, 4  ;;  %66 = vst.msk [vmem:[#allocation2 + $0x78] sm:$0xf] %vm59_vm3, %v33_v51  ;;  %v2111_v60 = vrot.slane %v2110_v49, 4  ;;  %vm623_vm7 = vcmask 1043968   ;;  %v1727_v18 = vrot.slane %v1725_v42, 4 }
  0x4a   :  { %v2120_v0 = vrot.slane %v2118_v56, 4  ;;  %v2123_v1 = vrot.slane %v2121_v57, 5  ;;  %v7743_v6 = vld [vmem:[%s10779_s0 + $0x28] sm:$0xf]  ;;  %v37_v7 = vld [vmem:[%s10779_s0 + $0x3c] sm:$0xf] }
  0x4b   :  { %585 = vrot.lane.b32.xlu1 %v502_v63, %s7266_s17  ;;  %v5842_v63 = vld [vmem:[%s10779_s0 + $0xc4] sm:$0xf]  ;;  %v478_v53 = vsel %vm7331_vm2, %v473_v38, %v477_v39  ;;  %70 = vst.msk [vmem:[#allocation2 + $0xc8] sm:$0xf] %vm59_vm3, %v37_v7  ;;  %v5896_v15 = vld [vmem:[%s10779_s0 + $0x20] sm:$0x1] }
  0x4c   :  { %583 = vrot.lane.b32.xlu0 %v492_v3, %s7266_s17  ;;  %v7638_v3 = vrot.slane %v2079_v55, 5  ;;  %3695 = vmatpush.bf16.msra.mxu0 %v7097_v14  ;;  %v1726_v55 = vsel %vm7665_vm6, %v5940_v32, %v1725_v42  ;;  %v2124_v12 = vor.u32 %v2123_v1, %v2120_v0  ;;  %v1728_v19 = vrot.slane %v5896_v15, 5  ;;  %v38_v27 = vld [vmem:[%s10779_s0 + $0x40] sm:$0xf]  ;;  %v5897_v34 = vld [vmem:[%s10779_s0 + $0x24] sm:$0xe] }
  0x4d   :  { %7249 = vmatpush.bf16.msra.mxu2 %v7097_v14  ;;  %v1732_v14 = vrot.slane %v7743_v6, 5  ;;  %71 = vst.msk [vmem:[#allocation2 + $0xdc] sm:$0xf] %vm59_vm3, %v38_v27  ;;  %v7808_v38 = vld [vmem:[%s10779_s0 + $0x40] sm:$0xf]  ;;  %vm3641_vm8 = vcmask 523264  }
  0x4e   :  { %v2086_v29 = vor.u32 %v2085_v5, %v7638_v3  ;;  %v35_v5 = vld [vmem:[%s10779_s0 + $0x30] sm:$0xf]  ;;  %v1729_v30 = vsel %vm7665_vm6, %v1727_v18, %v1728_v19  ;;  %v43_v47 = vld [vmem:[%s10779_s0 + $0x60] sm:$0xf]  ;;  %v42_v48 = vld [vmem:[%s10779_s0 + $0x58] sm:$0xf] }
  0x4f   :  { %573 = vrot.lane.b32.xlu2 %v430_v21, %s7266_s17  ;;  %v2094_v21 = vshrl.u32 %v5990_v8, 16  ;;  %68 = vst.msk [vmem:[#allocation2 + $0xa0] sm:$0xf] %vm59_vm3, %v35_v5  ;;  %v5812_v46 = vld [vmem:[%s10779_s0 + $0x10] sm:$0xf]  ;;  %v7110_v18 = vld [vmem:[%s10780_s1 + $0x78] sm:$0xff] }
  0x50   :  { %3696 = vmatpush.bf16.msra.mxu0 %v7096_v11  ;;  %v5811_v56 = vld [vmem:[%s10779_s0 + $0xc] sm:$0xf]  ;;  %v5902_v57 = vld [vmem:[%s10779_s0 + $0x38] sm:$0x1]  ;;  %76 = vst.msk [vmem:[#allocation2 + $0x140] sm:$0xf] %vm59_vm3, %v43_v47  ;;  %7252 = vmatpush.bf16.msra.mxu3 %v7110_v18 }
  0x51   :  { %v2096_v35 = vrot.slane %v2094_v21, 4  ;;  %7250 = vmatpush.bf16.msra.mxu2 %v7096_v11  ;;  %75 = vst.msk [vmem:[#allocation2 + $0x12c] sm:$0xf] %vm59_vm3, %v42_v48  ;;  %v1742_v0 = vrot.slane %v5902_v57, 5  ;;  %v44_v7 = vld [vmem:[%s10779_s0 + $0x64] sm:$0xf]  ;;  %3779 = vmatpush.bf16.msra.mxu1 %v7110_v18 }
  0x52   :  { %77 = vst.msk [vmem:[#allocation2 + $0x154] sm:$0xf] %vm59_vm3, %v44_v7  ;;  %v5900_v19 = vld [vmem:[%s10779_s0 + $0x30] sm:$0xe]  ;;  %v50_v57 = vld [vmem:[%s10779_s0 + $0x88] sm:$0xf] }
  0x53   :  { %575 = vrot.lane.b32.xlu1 %v444_v22, %s7266_s17  ;;  %v2097_v22 = vshll.u32 %v5990_v8, 16  ;;  %v36_v8 = vld [vmem:[%s10779_s0 + $0x34] sm:$0xf]  ;;  %83 = vst.msk [vmem:[#allocation2 + $0x1cc] sm:$0xf] %vm59_vm3, %v50_v57 }
  0x54   :  { %1054 = vrot.lane.b32.xlu0 %v5840_v26, %s7266_s17  ;;  %v2070_v26 = vshrl.u32 %v5987_v16, 16  ;;  %3697 = vmatpush.bf16.msra.mxu0 %v7095_v45  ;;  %69 = vst.msk [vmem:[#allocation2 + $0xb4] sm:$0xf] %vm59_vm3, %v36_v8  ;;  %v5899_v16 = vld [vmem:[%s10779_s0 + $0x2c] sm:$0x1] }
  0x55   :  { %v2099_v36 = vrot.slane %v2097_v22, 5  ;;  %7251 = vmatpush.bf16.msra.mxu2 %v7095_v45  ;;  %v1734_v22 = vrot.slane %v1732_v14, 4  ;;  %v1735_v24 = vrot.slane %v5899_v16, 5 }
  0x57   :  { %1052 = vrot.lane.b32.xlu2 %v5839_v37, %s7266_s17  ;;  %v5992_v37 = vld [vmem:[%s10779_s0 + $0x2c] sm:$0x1]  ;;  %v2100_v52 = vor.u32 %v2099_v36, %v2096_v35  ;;  %v1736_v35 = vsel %vm7665_vm6, %v1734_v22, %v1735_v24 }
  0x58   :  { %v2113_v50 = vshll.u32 %v5992_v37, 16  ;;  %v5941_v37 = vrot.slane %v5897_v34, 9 }
  0x5a   :  { %v1733_v49 = vsel %vm7665_vm6, %v5941_v37, %v1732_v14  ;;  %v7108_v37 = vld [vmem:[%s10780_s1 + $0x68] sm:$0xff] }
  0x5b   :  { %589 = vrot.lane.b32.xlu1 %v526_v40, %s7266_s17  ;;  %v2072_v40 = vrot.slane %v2070_v26, 4  ;;  %v5996_v26 = vld [vmem:[%s10779_s0 + $0x3c] sm:$0xf] }
  0x5c   :  { %587 = vrot.lane.b32.xlu0 %v516_v43, %s7266_s17  ;;  %v2087_v43 = vrot.slane %v2086_v29, 4  ;;  %v40_v29 = vld [vmem:[%s10779_s0 + $0x4c] sm:$0xf]  ;;  %v2142_v32 = vshrl.u32 %v5996_v26, 16 }
  0x5d   :  { %v2076_v54 = vor.u32 %v2075_v41, %v2072_v40  ;;  %73 = vst.msk [vmem:[#allocation2 + $0x104] sm:$0xf] %vm59_vm3, %v40_v29 }
  0x5e   :  { %v2092_v58 = vsel %vm7331_vm2, %v2087_v43, %v2091_v44  ;;  %v2144_v39 = vrot.slane %v2142_v32, 4  ;;  %v7813_v43 = vld [vmem:[%s10779_s0 + $0x34] sm:$0xf]  ;;  %v49_v32 = vld [vmem:[%s10779_s0 + $0x84] sm:$0xf] }
  0x5f   :  { %577 = vrot.lane.b32.xlu2 %v454_v59, %s7266_s17  ;;  %v2115_v59 = vrot.slane %v2113_v50, 5  ;;  %v2077_v62 = vrot.slane %v2076_v54, 4  ;;  %v41_v44 = vld [vmem:[%s10779_s0 + $0x54] sm:$0xf]  ;;  %v5995_v50 = vld [vmem:[%s10779_s0 + $0x38] sm:$0x1] }
  0x60   :  { %v1739_v54 = vrot.slane %v7813_v43, 5  ;;  %74 = vst.msk [vmem:[#allocation2 + $0x118] sm:$0xf] %vm59_vm3, %v41_v44  ;;  %v5905_v44 = vld [vmem:[%s10779_s0 + $0x44] sm:$0x1] }
  0x61   :  { %v2082_v4 = vsel %vm7331_vm2, %v2077_v62, %v7638_v3  ;;  %v2116_v9 = vsel %vm7331_vm2, %v2111_v60, %v2115_v59  ;;  %82 = vst.msk [vmem:[#allocation2 + $0x1b8] sm:$0xf] %vm59_vm3, %v49_v32 }
  0x63   :  { %579 = vrot.lane.b32.xlu1 %v468_v61, %s7266_s17  ;;  %v2101_v61 = vrot.slane %v2100_v52, 4 }
  0x64   :  { %1058 = vrot.lane.b32.xlu0 %v5842_v63, %s7266_s17  ;;  %v7735_v63 = vld [vmem:[%s10779_s0 + $0x34] sm:$0xf] }
  0x65   :  { %v2127_v13 = vshll.u32 %v7735_v63, 16  ;;  %v2106_v3 = vsel %vm7331_vm2, %v2101_v61, %v7696_v33  ;;  %v2145_v33 = vshll.u32 %v5996_v26, 16  ;;  %v2131_v36 = vshrl.u32 %v7735_v63, 16  ;;  %v7896_v26 = vld [vmem:[%s10779_s0 + $0x40] sm:$0xf] }
  0x66   :  { %v1741_v63 = vrot.slane %v1739_v54, 4  ;;  %v1746_v43 = vrot.slane %v7896_v26, 5  ;;  %v7118_v26 = vld [vmem:[%s10780_s1 + $0xb8] sm:$0xff] }
  0x67   :  { %1056 = vrot.lane.b32.xlu2 %v5841_v20, %s7266_s17  ;;  %v2125_v20 = vrot.slane %v2124_v12, 4  ;;  %v2129_v21 = vrot.slane %v2127_v13, 5  ;;  %v2147_v40 = vrot.slane %v2145_v33, 5  ;;  %v2133_v51 = vrot.slane %v2131_v36, 4  ;;  %v5998_v33 = vld [vmem:[%s10779_s0 + $0x44] sm:$0x1]  ;;  %3868 = vmatpush.bf16.msrb.mxu2 %v7118_v26 }
  0x68   :  { %v48_v36 = vld [vmem:[%s10779_s0 + $0x7c] sm:$0xf] }
  0x69   :  { %v2130_v31 = vsel %vm7331_vm2, %v2125_v20, %v2129_v21  ;;  %v2148_v52 = vor.u32 %v2147_v40, %v2144_v39  ;;  %v2155_v20 = vshrl.u32 %v7808_v38, 16  ;;  %v2161_v39 = vshll.u32 %v5998_v33, 16  ;;  %v5814_v40 = vld [vmem:[%s10779_s0 + $0x1c] sm:$0xf]  ;;  %81 = vst.msk [vmem:[#allocation2 + $0x1a4] sm:$0xf] %vm59_vm3, %v48_v36 }
  0x6a   :  { %v7104_v36 = vld [vmem:[%s10780_s1 + $0x48] sm:$0xff] }
  0x6b   :  { %1830 = vrot.lane.b32.xlu1 %v1722_v28, %s7266_s17  ;;  %v2149_v61 = vrot.slane %v2148_v52, 4  ;;  %v2163_v48 = vrot.slane %v2161_v39, 5  ;;  %v6002_v52 = vld [vmem:[%s10779_s0 + $0x54] sm:$0xf]  ;;  %v5908_v39 = vld [vmem:[%s10779_s0 + $0x50] sm:$0x1] }
  0x6c   :  { %1828 = vrot.lane.b32.xlu0 %v1719_v10, %s7266_s17  ;;  %v39_v10 = vld [vmem:[%s10779_s0 + $0x48] sm:$0xf] }
  0x6d   :  { %72 = vst.msk [vmem:[#allocation2 + $0xf0] sm:$0xf] %vm59_vm3, %v39_v10  ;;  %v2157_v10 = vrot.slane %v2155_v20, 4  ;;  %v700_v20 = vld [vmem:[%s10779_s0 + $0xb0] sm:$0x1] }
  0x6f   :  { %581 = vrot.lane.b32.xlu2 %v478_v53, %s7266_s17  ;;  %v2151_v53 = vshll.u32 %v7808_v38, 16 }
  0x71   :  { %v536_v2 = vpop.permute.xlu2 %535  ;;  %v7849_v62 = vrot.slane %v2151_v53, 5  ;;  %v7107_v53 = vld [vmem:[%s10780_s1 + $0x60] sm:$0xff] }
  0x72   :  { %628 = vst.msk [vmem:[#allocation2 + $0x50] sm:$0xf] %vm623_vm7, %v536_v2  ;;  %v5999_v2 = vld [vmem:[%s10779_s0 + $0x48] sm:$0xf] }
  0x73   :  { %1832 = vrot.lane.b32.xlu1 %v1726_v55, %s7266_s17  ;;  %v2137_v55 = vshll.u32 %v5995_v50, 16  ;;  %v2166_v13 = vshrl.u32 %v5999_v2, 16  ;;  %v2169_v14 = vshll.u32 %v5999_v2, 16  ;;  %v2154_v16 = vsel %vm7331_vm2, %v2149_v61, %v7849_v62  ;;  %v7106_v2 = vld [vmem:[%s10780_s1 + $0x58] sm:$0xff] }
  0x74   :  { %2455 = vrot.lane.b32.xlu0 %v2092_v58, %s7266_s17  ;;  %v2134_v58 = vor.u32 %v2133_v51, %v2129_v21  ;;  %v1743_v21 = vsel %vm7665_vm6, %v1741_v63, %v1742_v0  ;;  %v2158_v38 = vor.u32 %v2157_v10, %v7849_v62  ;;  %v2190_v61 = vshrl.u32 %v6002_v52, 16  ;;  %v55_v63 = vld [vmem:[%s10779_s0 + $0xa8] sm:$0xf] }
  0x75   :  { %v2139_v60 = vrot.slane %v2137_v55, 5  ;;  %v2168_v22 = vrot.slane %v2166_v13, 4  ;;  %v2171_v24 = vrot.slane %v2169_v14, 5  ;;  %v1748_v55 = vrot.slane %v1746_v43, 4  ;;  %88 = vst.msk [vmem:[#allocation2 + $0x230] sm:$0xf] %vm59_vm3, %v55_v63 }
  0x76   :  { %v2135_v59 = vrot.slane %v2134_v58, 4  ;;  %v2159_v47 = vrot.slane %v2158_v38, 4  ;;  %v699_v13 = vld [vmem:[%s10779_s0 + $0xac] sm:$0xf]  ;;  %v7126_v63 = vld [vmem:[%s10780_s1 + $0xf8] sm:$0xff] }
  0x77   :  { %2453 = vrot.lane.b32.xlu2 %v2082_v4, %s7266_s17  ;;  %v2172_v34 = vor.u32 %v2171_v24, %v2168_v22  ;;  %v51_v22 = vld [vmem:[%s10779_s0 + $0x90] sm:$0xf]  ;;  %v858_v24 = vrot.slane %v700_v20, 5 }
  0x78   :  { %v2140_v15 = vsel %vm7331_vm2, %v2135_v59, %v2139_v60  ;;  %v56_v59 = vld [vmem:[%s10779_s0 + $0xac] sm:$0xf]  ;;  %v2164_v62 = vsel %vm7331_vm2, %v2159_v47, %v2163_v48  ;;  %84 = vst.msk [vmem:[#allocation2 + $0x1e0] sm:$0xf] %vm59_vm3, %v51_v22  ;;  %v6005_v47 = vld [vmem:[%s10779_s0 + $0x60] sm:$0xf] }
  0x79   :  { %v538_v25 = vpop.permute.xlu2 %537  ;;  %89 = vst.msk [vmem:[#allocation2 + $0x244] sm:$0xf] %vm59_vm3, %v56_v59  ;;  %v7103_v48 = vld [vmem:[%s10780_s1 + $0x40] sm:$0xff]  ;;  %v2214_v57 = vshrl.u32 %v6005_v47, 16 }
  0x7a   :  { %629 = vst.msk [vmem:[#allocation2 + $0x64] sm:$0xf] %vm623_vm7, %v538_v25  ;;  %v5942_v25 = vrot.slane %v5900_v19, 9  ;;  %v855_v19 = vrot.slane %v699_v13, 5 }
  0x7b   :  { %2459 = vrot.lane.b32.xlu1 %v2116_v9, %s7266_s17  ;;  %v46_v9 = vld [vmem:[%s10779_s0 + $0x70] sm:$0xf] }
  0x7c   :  { %2457 = vrot.lane.b32.xlu0 %v2106_v3, %s7266_s17  ;;  %v45_v3 = vld [vmem:[%s10779_s0 + $0x6c] sm:$0xf]  ;;  %79 = vst.msk [vmem:[#allocation2 + $0x17c] sm:$0xf] %vm59_vm3, %v46_v9 }
  0x7d   :  { %v532_v11 = vpop.permute.xlu1 %531  ;;  %78 = vst.msk [vmem:[#allocation2 + $0x168] sm:$0xf] %vm59_vm3, %v45_v3 }
  0x7e   :  { %626 = vst.msk [vmem:[#allocation2 + $0x28] sm:$0xf] %vm623_vm7, %v532_v11  ;;  %v528_v28 = vpop.permute.xlu0 %527  ;;  %v7891_v11 = vld [vmem:[%s10779_s0 + $0x4c] sm:$0xf] }
  0x7f   :  { %624 = vst.msk [vmem:[#allocation2] sm:$0xf] %vm623_vm7, %v528_v28  ;;  %1834 = vrot.lane.b32.xlu2 %v1729_v30, %s7266_s17  ;;  %v7109_v28 = vld [vmem:[%s10780_s1 + $0x70] sm:$0xff]  ;;  %v47_v30 = vld [vmem:[%s10779_s0 + $0x78] sm:$0xf] }
  0x80   :  { %7253 = vmatpush.bf16.msra.mxu3 %v7109_v28  ;;  %3780 = vmatpush.bf16.msra.mxu1 %v7109_v28  ;;  %80 = vst.msk [vmem:[#allocation2 + $0x190] sm:$0xf] %vm59_vm3, %v47_v30  ;;  %v857_v28 = vrot.slane %v855_v19, 4  ;;  %v5816_v30 = vld [vmem:[%s10779_s0 + $0x28] sm:$0xf] }
  0x81   :  { %v544_v41 = vpop.permute.xlu2 %543 }
  0x82   :  { %632 = vst.msk [vmem:[#allocation2 + $0xa0] sm:$0xf] %vm623_vm7, %v544_v41  ;;  %v2175_v41 = vshll.u32 %v7891_v11, 16 }
  0x83   :  { %2461 = vrot.lane.b32.xlu1 %v2130_v31, %s7266_s17 }
  0x84   :  { %1838 = vrot.lane.b32.xlu0 %v1736_v35, %s7266_s17  ;;  %v1740_v35 = vsel %vm7665_vm6, %v5942_v25, %v1739_v54  ;;  %7254 = vmatpush.bf16.msra.mxu3 %v7108_v37  ;;  %v7941_v50 = vrot.slane %v2175_v41, 5  ;;  %v7027_v41 = vld [vmem:[#allocation2 + $0x60] sm:$0xf0] }
  0x85   :  { %v534_v42 = vpop.permute.xlu1 %533  ;;  %3781 = vmatpush.bf16.msra.mxu1 %v7108_v37  ;;  %v5815_v37 = vld [vmem:[%s10779_s0 + $0x24] sm:$0xf] }
  0x86   :  { %627 = vst.msk [vmem:[#allocation2 + $0x3c] sm:$0xf] %vm623_vm7, %v534_v42  ;;  %v530_v45 = vpop.permute.xlu0 %529  ;;  %v6101_v6 = vld [vmem:[#allocation2] sm:$0xf]  ;;  %v5813_v42 = vld [vmem:[%s10779_s0 + $0x18] sm:$0xf] }
  0x87   :  { %625 = vst.msk [vmem:[#allocation2 + $0x14] sm:$0xf] %vm623_vm7, %v530_v45  ;;  %1836 = vrot.lane.b32.xlu2 %v1733_v49, %s7266_s17  ;;  %v6121_v45 = vld [vmem:[#allocation2 + $0x28] sm:$0xf] }
  0x88   :  { %7255 = vmatpush.bf16.msra.mxu3 %v7107_v53 }
  0x89   :  { %v550_v1 = vpop.permute.xlu2 %549  ;;  %3782 = vmatpush.bf16.msra.mxu1 %v7107_v53  ;;  %v52_v53 = vld [vmem:[%s10779_s0 + $0x94] sm:$0xf] }
  0x8a   :  { %635 = vst.msk [vmem:[#allocation2 + $0xdc] sm:$0xf] %vm623_vm7, %v550_v1  ;;  %v2193_v1 = vshll.u32 %v6002_v52, 16  ;;  %v1756_v52 = vrot.slane %v5908_v39, 5 }
  0x8b   :  { %998 = vrot.lane.b32.xlu1 %v5812_v46, %s7266_s17  ;;  %v2173_v46 = vrot.slane %v2172_v34, 4  ;;  %85 = vst.msk [vmem:[#allocation2 + $0x1f4] sm:$0xf] %vm59_vm3, %v52_v53  ;;  %v7113_v53 = vld [vmem:[%s10780_s1 + $0x90] sm:$0xff] }
  0x8c   :  { %996 = vrot.lane.b32.xlu0 %v5811_v56, %s7266_s17  ;;  %v1749_v56 = vrot.slane %v5905_v44, 5  ;;  %7256 = vmatpush.bf16.msra.mxu3 %v7106_v2  ;;  %v2195_v14 = vrot.slane %v2193_v1, 5 }
  0x8d   :  { %v542_v5 = vpop.permute.xlu1 %541  ;;  %v7022_v49 = vld [vmem:[#allocation2 + $0x38] sm:$0xf0]  ;;  %v2178_v0 = vsel %vm7331_vm2, %v2173_v46, %v7941_v50  ;;  %3783 = vmatpush.bf16.msra.mxu1 %v7106_v2  ;;  %v8092_v2 = vld [vmem:[%s10779_s0 + $0x64] sm:$0xf] }
  0x8e   :  { %631 = vst.msk [vmem:[#allocation2 + $0x8c] sm:$0xf] %vm623_vm7, %v542_v5  ;;  %v540_v8 = vpop.permute.xlu0 %539  ;;  %v7017_v4 = vld [vmem:[#allocation2 + $0x10] sm:$0xf0]  ;;  %v6122_v60 = vor.u32 %v7022_v49, %v6121_v45  ;;  %v5903_v5 = vld [vmem:[%s10779_s0 + $0x3c] sm:$0xe]  ;;  %v1750_v7 = vsel %vm7665_vm6, %v1748_v55, %v1749_v56 }
  0x8f   :  { %630 = vst.msk [vmem:[#allocation2 + $0x78] sm:$0xf] %vm623_vm7, %v540_v8  ;;  %v6102_v12 = vor.u32 %v7017_v4, %v6101_v6  ;;  %2463 = vrot.lane.b32.xlu2 %v2140_v15, %s7266_s17  ;;  %v2179_v6 = vshrl.u32 %v7891_v11, 16  ;;  %v7985_v8 = vld [vmem:[%s10779_s0 + $0x58] sm:$0xf]  ;;  %v2192_v4 = vrot.slane %v2190_v61, 4 }
  0x90   :  { %v5943_v9 = vrot.slane %v5903_v5, 9  ;;  %v7997_v15 = vld [vmem:[%s10779_s0 + $0x4c] sm:$0xf]  ;;  %v2199_v34 = vshll.u32 %v7985_v8, 16  ;;  %v7117_v49 = vld [vmem:[%s10780_s1 + $0xb0] sm:$0xff]  ;;  %v2203_v5 = vshrl.u32 %v7985_v8, 16 }
  0x91   :  { %3698 = vmatmul.bf16.vlgmr.msra.gmra.mxu0 %v6102_v12  ;;  %v556_v27 = vpop.permute.xlu2 %555  ;;  %v698_v12 = vld [vmem:[%s10779_s0 + $0xa8] sm:$0xe]  ;;  %v2181_v25 = vrot.slane %v2179_v6, 4  ;;  %v2196_v33 = vor.u32 %v2195_v14, %v2192_v4  ;;  %v1753_v38 = vrot.slane %v7997_v15, 5  ;;  %v58_v55 = vld [vmem:[%s10779_s0 + $0xb8] sm:$0xf]  ;;  %3869 = vmatpush.bf16.msrb.mxu2 %v7117_v49 }
  0x92   :  { %638 = vst.msk [vmem:[#allocation2 + $0x118] sm:$0xf] %vm623_vm7, %v556_v27  ;;  %v5809_v18 = vrot.slane %v698_v12, 9  ;;  %v1747_v10 = vsel %vm7665_vm6, %v5943_v9, %v1746_v43  ;;  %v8046_v45 = vrot.slane %v2199_v34, 5  ;;  %v2216_v6 = vrot.slane %v2214_v57, 4  ;;  %v7115_v8 = vld [vmem:[%s10780_s1 + $0xa0] sm:$0xff] }
  0x93   :  { %2465 = vrot.lane.b32.xlu1 %v2154_v16, %s7266_s17  ;;  %v7105_v16 = vld [vmem:[%s10780_s1 + $0x50] sm:$0xff]  ;;  %v2197_v44 = vrot.slane %v2196_v33, 4  ;;  %91 = vst.msk [vmem:[#allocation2 + $0x26c] sm:$0xf] %vm59_vm3, %v58_v55  ;;  %v8105_v12 = vld [vmem:[%s10779_s0 + $0x58] sm:$0xf] }
  0x94   :  { %1842 = vrot.lane.b32.xlu0 %v1743_v21, %s7266_s17  ;;  %7257 = vmatpush.bf16.msra.mxu3 %v7105_v16  ;;  %v856_v27 = vsel %vm7665_vm6, %v5809_v18, %v855_v19  ;;  %v701_v4 = vld [vmem:[%s10779_s0 + $0xb4] sm:$0xe]  ;;  %v2223_v19 = vshll.u32 %v8092_v2, 16  ;;  %v7114_v15 = vld [vmem:[%s10780_s1 + $0x98] sm:$0xff]  ;;  %v2205_v26 = vrot.slane %v2203_v5, 4 }
  0x95   :  { %v548_v29 = vpop.permute.xlu1 %547  ;;  %3784 = vmatpush.bf16.msra.mxu1 %v7105_v16  ;;  %927 = vst.msk [vmem:[#allocation2 + $0x234] sm:$0xf] %vm59_vm3, %v856_v27  ;;  %v2202_v61 = vsel %vm7331_vm2, %v2197_v44, %v8046_v45  ;;  %v7125_v14 = vld [vmem:[%s10780_s1 + $0xf0] sm:$0xff]  ;;  %v5810_v16 = vrot.slane %v701_v4, 9  ;;  %v7032_v34 = vld [vmem:[#allocation2 + $0x88] sm:$0xf0] }
  0x96   :  { %634 = vst.msk [vmem:[#allocation2 + $0xc8] sm:$0xf] %vm623_vm7, %v548_v29  ;;  %v546_v31 = vpop.permute.xlu0 %545  ;;  %v6001_v29 = vld [vmem:[%s10779_s0 + $0x50] sm:$0x1]  ;;  %v6161_v33 = vld [vmem:[#allocation2 + $0x78] sm:$0xf] }
  0x97   :  { %633 = vst.msk [vmem:[#allocation2 + $0xb4] sm:$0xf] %vm623_vm7, %v546_v31  ;;  %1840 = vrot.lane.b32.xlu2 %v1740_v35, %s7266_s17  ;;  %v2182_v31 = vor.u32 %v2181_v25, %v7941_v50  ;;  %v2185_v32 = vshll.u32 %v6001_v29, 16  ;;  %v859_v35 = vsel %vm7665_vm6, %v857_v28, %v858_v24  ;;  %v5818_v24 = vld [vmem:[%s10779_s0 + $0x34] sm:$0xf]  ;;  %v6162_v57 = vor.u32 %v7032_v34, %v6161_v33 }
  0x98   :  { %928 = vst.msk [vmem:[#allocation2 + $0x248] sm:$0xf] %vm59_vm3, %v859_v35  ;;  %7258 = vmatpush.bf16.msra.mxu3 %v7104_v36  ;;  %v703_v25 = vld [vmem:[%s10779_s0 + $0xbc] sm:$0x1]  ;;  %v5817_v27 = vld [vmem:[%s10779_s0 + $0x30] sm:$0xf] }
  0x99   :  { %v562_v51 = vpop.permute.xlu2 %561  ;;  %v2187_v43 = vrot.slane %v2185_v32, 5  ;;  %3785 = vmatpush.bf16.msra.mxu1 %v7104_v36  ;;  %v8138_v28 = vld [vmem:[%s10779_s0 + $0x5c] sm:$0x1]  ;;  %v5844_v32 = vld [vmem:[%s10779_s0 + $0x10] sm:$0xf]  ;;  %v7124_v36 = vld [vmem:[%s10780_s1 + $0xe8] sm:$0xff] }
  0x9a   :  { %641 = vst.msk [vmem:[#allocation2 + $0x154] sm:$0xf] %vm623_vm7, %v562_v51  ;;  %v1755_v51 = vrot.slane %v1753_v38, 4  ;;  %v1186_v44 = vshrl.u32 %v5844_v32, 16  ;;  %v5843_v49 = vld [vmem:[%s10779_s0 + $0xc] sm:$0xf] }
  0x9b   :  { %1002 = vrot.lane.b32.xlu1 %v5814_v40, %s7266_s17  ;;  %v6141_v40 = vld [vmem:[#allocation2 + $0x50] sm:$0xf]  ;;  %v5820_v34 = vld [vmem:[%s10779_s0 + $0x40] sm:$0xf] }
  0x9c   :  { %1000 = vrot.lane.b32.xlu0 %v5813_v42, %s7266_s17  ;;  %v2183_v42 = vrot.slane %v2182_v31, 4  ;;  %7259 = vmatpush.bf16.msra.mxu3 %v7103_v48  ;;  %v6142_v56 = vor.u32 %v7027_v41, %v6141_v40  ;;  %v1757_v1 = vsel %vm7665_vm6, %v1755_v51, %v1756_v52  ;;  %v865_v31 = vrot.slane %v703_v25, 5  ;;  %v5845_v40 = vld [vmem:[%s10779_s0 + $0x14] sm:$0x1] }
  0x9d   :  { %v554_v54 = vpop.permute.xlu1 %553  ;;  %3786 = vmatpush.bf16.msra.mxu1 %v7103_v48  ;;  %v8163_v41 = vrot.slane %v2223_v19, 5  ;;  %v1192_v48 = vshll.u32 %v5845_v40, 16  ;;  %v5909_v19 = vld [vmem:[%s10779_s0 + $0x54] sm:$0xe] }
  0x9e   :  { %637 = vst.msk [vmem:[#allocation2 + $0x104] sm:$0xf] %vm623_vm7, %v554_v54  ;;  %v552_v58 = vpop.permute.xlu0 %551  ;;  %v2188_v59 = vsel %vm7331_vm2, %v2183_v42, %v2187_v43  ;;  %v2206_v42 = vor.u32 %v2205_v26, %v8046_v45  ;;  %v1182_v43 = vshll.u32 %v5844_v32, 16  ;;  %v1763_v45 = vrot.slane %v8138_v28, 5 }
  0x9f   :  { %636 = vst.msk [vmem:[#allocation2 + $0xf0] sm:$0xf] %vm623_vm7, %v552_v58  ;;  %2467 = vrot.lane.b32.xlu2 %v2164_v62, %s7266_s17  ;;  %v2217_v58 = vshll.u32 %v6005_v47, 16  ;;  %v7116_v62 = vld [vmem:[%s10780_s1 + $0xa8] sm:$0xff]  ;;  %v5945_v25 = vrot.slane %v5909_v19, 9 }
  0xa0   :  { %3957 = vmatpush.bf16.msrb.mxu3 %v7126_v63  ;;  %3870 = vmatpush.bf16.msrb.mxu2 %v7116_v62  ;;  %v2207_v52 = vrot.slane %v2206_v42, 4  ;;  %v8183_v55 = vrot.slane %v1182_v43, 5  ;;  %v1173_v63 = vshrl.u32 %v5843_v49, 16  ;;  %v5955_v42 = vld [vmem:[%s10779_s0 + $0x18] sm:$0xf] }
  0xa1   :  { %3703 = vmatmul.bf16.gmra.mxu0 %v6122_v60  ;;  %v568_v3 = vpop.permute.xlu2 %567  ;;  %v57_v60 = vld [vmem:[%s10779_s0 + $0xb4] sm:$0xf]  ;;  %v2219_v9 = vrot.slane %v2217_v58, 5  ;;  %v5846_v43 = vld [vmem:[%s10779_s0 + $0x18] sm:$0xf] }
  0xa2   :  { %644 = vst.msk [vmem:[#allocation2 + $0x190] sm:$0xf] %vm623_vm7, %v568_v3  ;;  %v702_v3 = vld [vmem:[%s10779_s0 + $0xb8] sm:$0xf] }
  0xa3   :  { %2469 = vrot.lane.b32.xlu1 %v2178_v0, %s7266_s17  ;;  %v5906_v0 = vld [vmem:[%s10779_s0 + $0x48] sm:$0xe]  ;;  %90 = vst.msk [vmem:[#allocation2 + $0x258] sm:$0xf] %vm59_vm3, %v57_v60  ;;  %v862_v20 = vrot.slane %v702_v3, 5  ;;  %v2220_v35 = vor.u32 %v2219_v9, %v2216_v6  ;;  %v1188_v60 = vrot.slane %v1186_v44, 4 }
  0xa4   :  { %1846 = vrot.lane.b32.xlu0 %v1750_v7, %s7266_s17  ;;  %v5944_v7 = vrot.slane %v5906_v0, 9  ;;  %3958 = vmatpush.bf16.msrb.mxu3 %v7125_v14  ;;  %v1176_v0 = vshll.u32 %v5843_v49, 16  ;;  %v1175_v9 = vrot.slane %v1173_v63, 4  ;;  %v7122_v14 = vld [vmem:[%s10780_s1 + $0xd8] sm:$0xff]  ;;  %v6181_v44 = vld [vmem:[#allocation2 + $0xa0] sm:$0xf] }
  0xa5   :  { %v560_v21 = vpop.permute.xlu1 %559  ;;  %3871 = vmatpush.bf16.msrb.mxu2 %v7115_v8  ;;  %v1189_v6 = vor.u32 %v1188_v60, %v8183_v55  ;;  %v7112_v8 = vld [vmem:[%s10780_s1 + $0x88] sm:$0xff]  ;;  %1989 = vst.msk [vmem:[#allocation2 + $0xc] sm:$0xf] %vm59_vm3, %v5955_v42 }
  0xa6   :  { %640 = vst.msk [vmem:[#allocation2 + $0x140] sm:$0xf] %vm623_vm7, %v560_v21  ;;  %v558_v11 = vpop.permute.xlu0 %557  ;;  %v53_v21 = vld [vmem:[%s10779_s0 + $0x9c] sm:$0xf]  ;;  %v1754_v29 = vsel %vm7665_vm6, %v5944_v7, %v1753_v38  ;;  %v1760_v38 = vrot.slane %v8105_v12, 5  ;;  %v1194_v7 = vrot.slane %v1192_v48, 5 }
  0xa7   :  { %639 = vst.msk [vmem:[#allocation2 + $0x12c] sm:$0xf] %vm623_vm7, %v558_v11  ;;  %1844 = vrot.lane.b32.xlu2 %v1747_v10, %s7266_s17  ;;  %v6004_v11 = vld [vmem:[%s10779_s0 + $0x5c] sm:$0x1]  ;;  %v864_v10 = vrot.slane %v862_v20, 4 }
  0xa8   :  { %86 = vst.msk [vmem:[#allocation2 + $0x208] sm:$0xf] %vm59_vm3, %v53_v21  ;;  %3959 = vmatpush.bf16.msrb.mxu3 %v7124_v36  ;;  %v1762_v58 = vrot.slane %v1760_v38, 4  ;;  %v1761_v40 = vsel %vm7665_vm6, %v5945_v25, %v1760_v38  ;;  %v5847_v12 = vld [vmem:[%s10779_s0 + $0x1c] sm:$0xf]  ;;  %v1197_v38 = vshrl.u32 %v5846_v43, 16 }
  0xa9   :  { %v574_v46 = vpop.permute.xlu2 %573  ;;  %v866_v39 = vsel %vm7665_vm6, %v864_v10, %v865_v31  ;;  %3872 = vmatpush.bf16.msrb.mxu2 %v7114_v15  ;;  %v8230_v31 = vld [vmem:[%s10779_s0 + $0x64] sm:$0xf]  ;;  %v7121_v15 = vld [vmem:[%s10780_s1 + $0xd0] sm:$0xff] }
  0xaa   :  { %647 = vst.msk [vmem:[#allocation2 + $0x1cc] sm:$0xf] %vm623_vm7, %v574_v46  ;;  %v6008_v46 = vld [vmem:[%s10779_s0 + $0x6c] sm:$0xf]  ;;  %v1764_v3 = vsel %vm7665_vm6, %v1762_v58, %v1763_v45  ;;  %v1767_v48 = vrot.slane %v8230_v31, 5  ;;  %v1200_v45 = vshll.u32 %v5846_v43, 16 }
  0xab   :  { %1006 = vrot.lane.b32.xlu1 %v5816_v30, %s7266_s17  ;;  %v863_v30 = vsel %vm7665_vm6, %v5810_v16, %v862_v20  ;;  %930 = vst.msk [vmem:[#allocation2 + $0x270] sm:$0xf] %vm59_vm3, %v866_v39  ;;  %v2238_v62 = vshrl.u32 %v6008_v46, 16  ;;  %v8211_v16 = vld [vmem:[%s10779_s0 + $0x70] sm:$0xf]  ;;  %v2227_v20 = vshrl.u32 %v8092_v2, 16 }
  0xac   :  { %1004 = vrot.lane.b32.xlu0 %v5815_v37, %s7266_s17  ;;  %929 = vst.msk [vmem:[#allocation2 + $0x25c] sm:$0xf] %vm59_vm3, %v863_v30  ;;  %v2209_v37 = vshll.u32 %v6004_v11, 16  ;;  %v8250_v39 = vld [vmem:[%s10779_s0 + $0x68] sm:$0x1] }
  0xad   :  { %v566_v50 = vpop.permute.xlu1 %565  ;;  %3873 = vmatpush.bf16.msrb.mxu2 %v7113_v53  ;;  %v2229_v36 = vrot.slane %v2227_v20, 4  ;;  %v7120_v53 = vld [vmem:[%s10780_s1 + $0xc8] sm:$0xff] }
  0xae   :  { %643 = vst.msk [vmem:[#allocation2 + $0x17c] sm:$0xf] %vm623_vm7, %v566_v50  ;;  %v564_v54 = vpop.permute.xlu0 %563  ;;  %v2211_v47 = vrot.slane %v2209_v37, 5  ;;  %v2221_v50 = vrot.slane %v2220_v35, 4  ;;  %v5819_v37 = vld [vmem:[%s10779_s0 + $0x3c] sm:$0xf] }
  0xaf   :  { %642 = vst.msk [vmem:[#allocation2 + $0x168] sm:$0xf] %vm623_vm7, %v564_v54  ;;  %2471 = vrot.lane.b32.xlu2 %v2188_v59, %s7266_s17  ;;  %v7123_v54 = vld [vmem:[%s10780_s1 + $0xe0] sm:$0xff]  ;;  %v2230_v49 = vor.u32 %v2229_v36, %v8163_v41 }
  0xb0   :  { %v54_v59 = vld [vmem:[%s10779_s0 + $0xa0] sm:$0xf]  ;;  %3960 = vmatpush.bf16.msrb.mxu3 %v7123_v54  ;;  %v2212_v5 = vsel %vm7331_vm2, %v2207_v52, %v2211_v47  ;;  %v2226_v4 = vsel %vm7331_vm2, %v2221_v50, %v8163_v41  ;;  %v8271_v50 = vld [vmem:[%s10779_s0 + $0x78] sm:$0xf]  ;;  %v1210_v52 = vshrl.u32 %v5847_v12, 16  ;;  %v1199_v54 = vrot.slane %v1197_v38, 4 }
  0xb1   :  { %3708 = vmatmul.bf16.gmra.mxu0 %v6142_v56  ;;  %v1053_v13 = vpop.permute.xlu2 %1052  ;;  %87 = vst.msk [vmem:[#allocation2 + $0x21c] sm:$0xf] %vm59_vm3, %v54_v59  ;;  %3874 = vmatpush.bf16.msrb.mxu2 %v7112_v8  ;;  %v5956_v41 = vld [vmem:[%s10779_s0 + $0x1c] sm:$0xf]  ;;  %v5848_v8 = vld [vmem:[%s10779_s0 + $0x20] sm:$0x1] }
  0xb2   :  { %1120 = vst.msk [vmem:[#allocation2 + $0x234] sm:$0xf] %vm623_vm7, %v1053_v13  ;;  %v1178_v13 = vrot.slane %v1176_v0, 5  ;;  %v1212_v60 = vrot.slane %v1210_v52, 4  ;;  %v1769_v0 = vrot.slane %v1767_v48, 4  ;;  %v2262_v19 = vshrl.u32 %v8271_v50, 16 }
  0xb3   :  { %2473 = vrot.lane.b32.xlu1 %v2202_v61, %s7266_s17  ;;  %1990 = vst.msk [vmem:[#allocation2 + $0x20] sm:$0xf] %vm59_vm3, %v5956_v41  ;;  %v1216_v20 = vshll.u32 %v5848_v8, 16  ;;  %v5959_v41 = vld [vmem:[%s10779_s0 + $0x30] sm:$0xf] }
  0xb4   :  { %1850 = vrot.lane.b32.xlu0 %v1757_v1, %s7266_s17  ;;  %v2241_v1 = vshll.u32 %v6008_v46, 16  ;;  %v1179_v21 = vor.u32 %v1178_v13, %v1175_v9  ;;  %3961 = vmatpush.bf16.msrb.mxu3 %v7122_v14  ;;  %v7037_v46 = vld [vmem:[#allocation2 + $0xb0] sm:$0xf0]  ;;  %v7119_v13 = vld [vmem:[%s10780_s1 + $0xc0] sm:$0xff]  ;;  %1993 = vst.msk [vmem:[#allocation2 + $0x5c] sm:$0xf] %vm59_vm3, %v5959_v41 }
  0xb5   :  { %v572_v18 = vpop.permute.xlu1 %571 }
  0xb6   :  { %646 = vst.msk [vmem:[#allocation2 + $0x1b8] sm:$0xf] %vm623_vm7, %v572_v18  ;;  %v570_v22 = vpop.permute.xlu0 %569  ;;  %v1190_v18 = vrot.slane %v1189_v6, 4  ;;  %v2243_v11 = vrot.slane %v2241_v1, 5  ;;  %v1180_v2 = vrot.slane %v1179_v21, 4  ;;  %v1770_v1 = vrot.slane %v8250_v39, 5 }
  0xb7   :  { %645 = vst.msk [vmem:[#allocation2 + $0x1a4] sm:$0xf] %vm623_vm7, %v570_v22  ;;  %1848 = vrot.lane.b32.xlu2 %v1754_v29, %s7266_s17  ;;  %v2240_v22 = vrot.slane %v2238_v62, 4  ;;  %v7111_v29 = vld [vmem:[%s10780_s1 + $0x80] sm:$0xff] }
  0xb8   :  { %v1185_v35 = vsel %vm7331_vm2, %v1180_v2, %v8183_v55  ;;  %3875 = vmatpush.bf16.msrb.mxu2 %v7111_v29  ;;  %3962 = vmatpush.bf16.msrb.mxu3 %v7121_v15  ;;  %v6007_v55 = vld [vmem:[%s10779_s0 + $0x68] sm:$0x1]  ;;  %v1218_v2 = vrot.slane %v1216_v20, 5  ;;  %v5957_v29 = vld [vmem:[%s10779_s0 + $0x24] sm:$0xf] }
  0xb9   :  { %v578_v51 = vpop.permute.xlu2 %577  ;;  %v2244_v47 = vor.u32 %v2243_v11, %v2240_v22  ;;  %1588 = vst.msk [vmem:[#allocation2 + $0x8] sm:$0xf] %vm59_vm3, %v1185_v35  ;;  %v2233_v59 = vshll.u32 %v6007_v55, 16  ;;  %v5958_v11 = vld [vmem:[%s10779_s0 + $0x28] sm:$0xf]  ;;  %v2251_v35 = vshrl.u32 %v8211_v16, 16 }
  0xba   :  { %649 = vst.msk [vmem:[#allocation2 + $0x1f4] sm:$0xf] %vm623_vm7, %v578_v51  ;;  %v1206_v51 = vshll.u32 %v5847_v12, 16  ;;  %v8337_v15 = vld [vmem:[%s10779_s0 + $0x70] sm:$0xf] }
  0xbb   :  { %1010 = vrot.lane.b32.xlu1 %v5818_v24, %s7266_s17  ;;  %v1195_v24 = vsel %vm7331_vm2, %v1190_v18, %v1194_v7  ;;  %v2245_v62 = vrot.slane %v2244_v47, 4  ;;  %v6182_v7 = vor.u32 %v7037_v46, %v6181_v44  ;;  %v2235_v9 = vrot.slane %v2233_v59, 5  ;;  %1992 = vst.msk [vmem:[#allocation2 + $0x48] sm:$0xf] %vm59_vm3, %v5958_v11  ;;  %v5822_v47 = vld [vmem:[%s10779_s0 + $0x4c] sm:$0xf] }
  0xbc   :  { %1008 = vrot.lane.b32.xlu0 %v5817_v27, %s7266_s17  ;;  %v2247_v27 = vshll.u32 %v8211_v16, 16  ;;  %1589 = vst.msk [vmem:[#allocation2 + $0x1c] sm:$0xf] %vm59_vm3, %v1195_v24  ;;  %v1208_v58 = vrot.slane %v1206_v51, 5  ;;  %3963 = vmatpush.bf16.msrb.mxu3 %v7120_v53  ;;  %v8343_v16 = vld [vmem:[#allocation2 + $0xd8] sm:$0xf0] }
  0xbd   :  { %v586_v56 = vpop.permute.xlu1 %585  ;;  %1991 = vst.msk [vmem:[#allocation2 + $0x34] sm:$0xf] %vm59_vm3, %v5957_v29  ;;  %v1774_v38 = vrot.slane %v8337_v15, 5  ;;  %v2253_v52 = vrot.slane %v2251_v35, 4  ;;  %v5850_v55 = vld [vmem:[%s10779_s0 + $0x28] sm:$0xf] }
  0xbe   :  { %653 = vst.msk [vmem:[#allocation2 + $0x244] sm:$0xf] %vm623_vm7, %v586_v56  ;;  %v584_v61 = vpop.permute.xlu0 %583  ;;  %v2231_v56 = vrot.slane %v2230_v49, 4  ;;  %v8287_v63 = vrot.slane %v2247_v27, 5  ;;  %v1213_v14 = vor.u32 %v1212_v60, %v1208_v58  ;;  %v5960_v15 = vld [vmem:[%s10779_s0 + $0x34] sm:$0xf] }
  0xbf   :  { %652 = vst.msk [vmem:[#allocation2 + $0x230] sm:$0xf] %vm623_vm7, %v584_v61  ;;  %2475 = vrot.lane.b32.xlu2 %v2212_v5, %s7266_s17  ;;  %v7085_v61 = vld [vmem:[#allocation2 + $0x234] sm:$0xf]  ;;  %v1776_v60 = vrot.slane %v1774_v38, 4 }
  0xc0   :  { %v2236_v24 = vsel %vm7331_vm2, %v2231_v56, %v2235_v9  ;;  %v1214_v25 = vrot.slane %v1213_v14, 4  ;;  %v2250_v27 = vsel %vm7331_vm2, %v2245_v62, %v8287_v63  ;;  %3964 = vmatpush.bf16.msrb.mxu3 %v7119_v13  ;;  %v1230_v56 = vshll.u32 %v5850_v55, 16  ;;  %1994 = vst.msk [vmem:[#allocation2 + $0x70] sm:$0xf] %vm59_vm3, %v5960_v15  ;;  %v5825_v15 = vld [vmem:[%s10779_s0 + $0x60] sm:$0xf] }
  0xc1   :  { %3713 = vmatmul.bf16.gmra.mxu0 %v6162_v57  ;;  %v1057_v28 = vpop.permute.xlu2 %1056  ;;  %v1202_v57 = vrot.slane %v1200_v45, 5  ;;  %v5917_v45 = vld [vmem:[%s10779_s0 + $0x74] sm:$0x1] }
  0xc2   :  { %1122 = vst.msk [vmem:[#allocation2 + $0x25c] sm:$0xf] %vm623_vm7, %v1057_v28  ;;  %v2265_v28 = vshll.u32 %v8271_v50, 16  ;;  %v5821_v50 = vld [vmem:[%s10779_s0 + $0x48] sm:$0xf] }
  0xc3   :  { %2477 = vrot.lane.b32.xlu1 %v2226_v4, %s7266_s17  ;;  %v1203_v4 = vor.u32 %v1202_v57, %v1199_v54  ;;  %v6014_v54 = vld [vmem:[%s10779_s0 + $0x84] sm:$0xf]  ;;  %v1234_v57 = vshrl.u32 %v5850_v55, 16 }
  0xc4   :  { %1854 = vrot.lane.b32.xlu0 %v1764_v3, %s7266_s17  ;;  %v2267_v39 = vrot.slane %v2265_v28, 5  ;;  %v2286_v13 = vshrl.u32 %v6014_v54, 16  ;;  %v2289_v8 = vshll.u32 %v6014_v54, 16 }
  0xc5   :  { %v576_v30 = vpop.permute.xlu1 %575  ;;  %v7087_v10 = vld [vmem:[#allocation2 + $0x240] sm:$0xf0]  ;;  %v1204_v22 = vrot.slane %v1203_v4, 4 }
  0xc6   :  { %648 = vst.msk [vmem:[#allocation2 + $0x1e0] sm:$0xf] %vm623_vm7, %v576_v30  ;;  %v1055_v32 = vpop.permute.xlu0 %1054  ;;  %v6381_v33 = vld [vmem:[#allocation2 + $0x230] sm:$0xf]  ;;  %v1771_v30 = vsel %vm7665_vm6, %v1769_v0, %v1770_v1  ;;  %v6010_v0 = vld [vmem:[%s10779_s0 + $0x74] sm:$0x1] }
  0xc7   :  { %1121 = vst.msk [vmem:[#allocation2 + $0x248] sm:$0xf] %vm623_vm7, %v1055_v32  ;;  %v6382_v26 = vor.u32 %v7087_v10, %v6381_v33  ;;  %1852 = vrot.lane.b32.xlu2 %v1761_v40, %s7266_s17  ;;  %v1209_v10 = vsel %vm7331_vm2, %v1204_v22, %v1208_v58  ;;  %v8323_v32 = vld [vmem:[%s10779_s0 + $0x7c] sm:$0xf]  ;;  %v1219_v33 = vsel %vm7331_vm2, %v1214_v25, %v1218_v2  ;;  %v8406_v2 = vld [vmem:[%s10779_s0 + $0x88] sm:$0xf] }
  0xc8   :  { %1590 = vst.msk [vmem:[#allocation2 + $0x30] sm:$0xf] %vm59_vm3, %v1209_v10  ;;  %v2271_v12 = vshll.u32 %v8323_v32, 16  ;;  %v2254_v58 = vor.u32 %v2253_v52, %v8287_v63 }
  0xc9   :  { %3768 = vmatmul.bf16.vlgmr.msra.gmra.mxu2 %v6382_v26  ;;  %v582_v5 = vpop.permute.xlu2 %581  ;;  %1591 = vst.msk [vmem:[#allocation2 + $0x44] sm:$0xf] %vm59_vm3, %v1219_v33  ;;  %v8341_v26 = vld [vmem:[#allocation2 + $0xc8] sm:$0xf]  ;;  %v7090_v1 = vld [vmem:[#allocation2 + $0x25c] sm:$0xf] }
  0xca   :  { %651 = vst.msk [vmem:[#allocation2 + $0x21c] sm:$0xf] %vm623_vm7, %v582_v5  ;;  %v6202_v31 = vor.u32 %v8343_v16, %v8341_v26  ;;  %v8379_v59 = vrot.slane %v2271_v12, 5  ;;  %v8388_v5 = vrot.slane %v1230_v56, 5  ;;  %v2255_v63 = vrot.slane %v2254_v58, 4 }
  0xcb   :  { %1014 = vrot.lane.b32.xlu1 %v5820_v34, %s7266_s17  ;;  %v5912_v34 = vld [vmem:[%s10779_s0 + $0x60] sm:$0xe]  ;;  %v658_v33 = vld [vmem:[%s10779_s0 + $0x8] sm:$0x1]  ;;  %v2275_v12 = vshrl.u32 %v8323_v32, 16 }
  0xcc   :  { %1012 = vrot.lane.b32.xlu0 %v5819_v37, %s7266_s17  ;;  %v5946_v36 = vrot.slane %v5912_v34, 9  ;;  %v2264_v37 = vrot.slane %v2262_v19, 4  ;;  %v760_v26 = vrot.slane %v658_v33, 5  ;;  %v5920_v56 = vld [vmem:[%s10779_s0 + $0x80] sm:$0x1] }
  0xcd   :  { %v590_v6 = vpop.permute.xlu1 %589 }
  0xce   :  { %655 = vst.msk [vmem:[#allocation2 + $0x26c] sm:$0xf] %vm623_vm7, %v590_v6  ;;  %v588_v3 = vpop.permute.xlu0 %587  ;;  %v6383_v18 = vld [vmem:[#allocation2 + $0x244] sm:$0xf0]  ;;  %v1768_v51 = vsel %vm7665_vm6, %v5946_v36, %v1767_v48  ;;  %v2268_v53 = vor.u32 %v2267_v39, %v2264_v37  ;;  %v5851_v48 = vld [vmem:[%s10779_s0 + $0x2c] sm:$0x1] }
  0xcf   :  { %654 = vst.msk [vmem:[#allocation2 + $0x258] sm:$0xf] %vm623_vm7, %v588_v3  ;;  %v6386_v21 = vor.u32 %v7085_v61, %v6383_v18  ;;  %2479 = vrot.lane.b32.xlu2 %v2236_v24, %s7266_s17  ;;  %v1777_v61 = vrot.slane %v5917_v45, 5  ;;  %v1240_v62 = vshll.u32 %v5851_v48, 16  ;;  %v1236_v6 = vrot.slane %v1234_v57, 4 }
  0xd0   :  { %v2269_v4 = vrot.slane %v2268_v53, 4  ;;  %v5849_v3 = vld [vmem:[%s10779_s0 + $0x24] sm:$0xf]  ;;  %v656_v37 = vld [vmem:[%s10779_s0] sm:$0xe]  ;;  %v2288_v39 = vrot.slane %v2286_v13, 4 }
  0xd1   :  { %3718 = vmatmul.bf16.gmra.mxu0 %v6182_v7  ;;  %3857 = vmatmul.bf16.vlgmr.msra.gmra.mxu3 %v6386_v21  ;;  %v2454_v40 = vpop.permute.xlu2 %2453  ;;  %v2257_v7 = vshll.u32 %v6010_v0, 16  ;;  %v1242_v14 = vrot.slane %v1240_v62, 5  ;;  %v1237_v19 = vor.u32 %v1236_v6, %v8388_v5  ;;  %v1221_v21 = vshrl.u32 %v5849_v3, 16  ;;  %v6221_v0 = vld [vmem:[#allocation2 + $0xf0] sm:$0xf] }
  0xd2   :  { %2549 = vst.msk [vmem:[#allocation2 + $0xc] sm:$0xf] %vm623_vm7, %v2454_v40  ;;  %v1224_v22 = vshll.u32 %v5849_v3, 16  ;;  %v1778_v11 = vsel %vm7665_vm6, %v1776_v60, %v1777_v61  ;;  %v2274_v34 = vsel %vm7331_vm2, %v2269_v4, %v8379_v59  ;;  %v2291_v40 = vrot.slane %v2289_v8, 5  ;;  %v5824_v60 = vld [vmem:[%s10779_s0 + $0x58] sm:$0xf] }
  0xd3   :  { %2481 = vrot.lane.b32.xlu1 %v2250_v27, %s7266_s17  ;;  %v2259_v20 = vrot.slane %v2257_v7, 5  ;;  %v657_v27 = vld [vmem:[%s10779_s0 + $0x4] sm:$0xf]  ;;  %v1238_v29 = vrot.slane %v1237_v19, 4  ;;  %v1223_v10 = vrot.slane %v1221_v21, 4  ;;  %v5795_v16 = vrot.slane %v656_v37, 9 }
  0xd4   :  { %1858 = vrot.lane.b32.xlu0 %v1771_v30, %s7266_s17  ;;  %v1226_v35 = vrot.slane %v1224_v22, 5  ;;  %v757_v36 = vrot.slane %v657_v27, 5  ;;  %v2295_v45 = vshll.u32 %v8406_v2, 16  ;;  %v2292_v55 = vor.u32 %v2291_v40, %v2288_v39  ;;  %v5823_v61 = vld [vmem:[%s10779_s0 + $0x54] sm:$0xf] }
  0xd5   :  { %v580_v42 = vpop.permute.xlu1 %579  ;;  %v7092_v43 = vld [vmem:[#allocation2 + $0x268] sm:$0xf0]  ;;  %v2260_v30 = vsel %vm7331_vm2, %v2255_v63, %v2259_v20  ;;  %v2277_v63 = vrot.slane %v2275_v12, 4  ;;  %v1784_v4 = vrot.slane %v5920_v56, 5  ;;  %v5853_v8 = vld [vmem:[%s10779_s0 + $0x34] sm:$0xf] }
  0xd6   :  { %650 = vst.msk [vmem:[#allocation2 + $0x208] sm:$0xf] %vm623_vm7, %v580_v42  ;;  %v1059_v44 = vpop.permute.xlu0 %1058  ;;  %v6401_v46 = vld [vmem:[#allocation2 + $0x258] sm:$0xf]  ;;  %v8422_v42 = vld [vmem:[%s10779_s0 + $0x7c] sm:$0xf] }
  0xd7   :  { %1123 = vst.msk [vmem:[#allocation2 + $0x270] sm:$0xf] %vm623_vm7, %v1059_v44  ;;  %v6402_v49 = vor.u32 %v7092_v43, %v6401_v46  ;;  %1856 = vrot.lane.b32.xlu2 %v1768_v51, %s7266_s17  ;;  %v1243_v43 = vsel %vm7331_vm2, %v1238_v29, %v1242_v14  ;;  %v1227_v44 = vor.u32 %v1226_v35, %v1223_v10  ;;  %v759_v46 = vrot.slane %v757_v36, 4  ;;  %v6013_v21 = vld [vmem:[%s10779_s0 + $0x80] sm:$0x1] }
  0xd8   :  { %1593 = vst.msk [vmem:[#allocation2 + $0x6c] sm:$0xf] %vm59_vm3, %v1243_v43  ;;  %v1781_v51 = vrot.slane %v8422_v42, 5  ;;  %v8460_v6 = vrot.slane %v2295_v45, 5  ;;  %v2293_v7 = vrot.slane %v2292_v55, 4  ;;  %v2278_v14 = vor.u32 %v2277_v63, %v8379_v59 }
  0xd9   :  { %3773 = vmatmul.bf16.gmra.mxu2 %v6402_v49  ;;  %v1835_v9 = vpop.permute.xlu2 %1834  ;;  %v758_v49 = vsel %vm7665_vm6, %v5795_v16, %v757_v36  ;;  %v1228_v52 = vrot.slane %v1227_v44, 4  ;;  %v761_v54 = vsel %vm7665_vm6, %v759_v46, %v760_v26  ;;  %v7016_v13 = vld [vmem:[#allocation2 + $0xc] sm:$0xf]  ;;  %v1254_v19 = vshll.u32 %v5853_v8, 16  ;;  %v5852_v43 = vld [vmem:[%s10779_s0 + $0x30] sm:$0xf] }
  0xda   :  { %1927 = vst.msk [vmem:[#allocation2 + $0x44] sm:$0xf] %vm623_vm7, %v1835_v9  ;;  %v5961_v9 = vld [vmem:[%s10779_s0 + $0x3c] sm:$0xf]  ;;  %v1258_v20 = vshrl.u32 %v5853_v8, 16  ;;  %v2279_v33 = vrot.slane %v2278_v14, 4  ;;  %v2298_v35 = vsel %vm7331_vm2, %v2293_v7, %v8460_v6 }
  0xdb   :  { %1018 = vrot.lane.b32.xlu1 %v5822_v47, %s7266_s17  ;;  %v5915_v47 = vld [vmem:[%s10779_s0 + $0x6c] sm:$0xe]  ;;  %899 = vst.msk [vmem:[#allocation2 + $0x4] sm:$0xf] %vm59_vm3, %v758_v49  ;;  %v1233_v57 = vsel %vm7331_vm2, %v1228_v52, %v8388_v5  ;;  %v1783_v5 = vrot.slane %v1781_v51, 4  ;;  %v1245_v46 = vshrl.u32 %v5852_v43, 16 }
  0xdc   :  { %1016 = vrot.lane.b32.xlu0 %v5821_v50, %s7266_s17  ;;  %v5947_v50 = vrot.slane %v5915_v47, 9  ;;  %900 = vst.msk [vmem:[#allocation2 + $0x18] sm:$0xf] %vm59_vm3, %v761_v54  ;;  %v1260_v29 = vrot.slane %v1258_v20, 4  ;;  %v1248_v47 = vshll.u32 %v5852_v43, 16 }
  0xdd   :  { %v1831_v18 = vpop.permute.xlu1 %1830  ;;  %1592 = vst.msk [vmem:[#allocation2 + $0x58] sm:$0xf] %vm59_vm3, %v1233_v57  ;;  %v1785_v10 = vsel %vm7665_vm6, %v1783_v5, %v1784_v4  ;;  %v660_v12 = vld [vmem:[%s10779_s0 + $0x10] sm:$0xf]  ;;  %v659_v52 = vld [vmem:[%s10779_s0 + $0xc] sm:$0xe] }
  0xde   :  { %1925 = vst.msk [vmem:[#allocation2 + $0x1c] sm:$0xf] %vm623_vm7, %v1831_v18  ;;  %v1829_v24 = vpop.permute.xlu0 %1828  ;;  %v6403_v25 = vld [vmem:[#allocation2 + $0x26c] sm:$0xf0]  ;;  %v1775_v62 = vsel %vm7665_vm6, %v5947_v50, %v1774_v38  ;;  %v5854_v18 = vld [vmem:[%s10779_s0 + $0x38] sm:$0x1] }
  0xdf   :  { %1924 = vst.msk [vmem:[#allocation2 + $0x8] sm:$0xf] %vm623_vm7, %v1829_v24  ;;  %v6406_v28 = vor.u32 %v7090_v1, %v6403_v25  ;;  %2483 = vrot.lane.b32.xlu2 %v2260_v30, %s7266_s17  ;;  %v7047_v1 = vld [vmem:[#allocation2 + $0x100] sm:$0xf0]  ;;  %v6017_v38 = vld [vmem:[%s10779_s0 + $0x90] sm:$0xf] }
  0xe0   :  { %1995 = vst.msk [vmem:[#allocation2 + $0x84] sm:$0xf] %vm59_vm3, %v5961_v9  ;;  %v6222_v24 = vor.u32 %v7047_v1, %v6221_v0  ;;  %v2310_v25 = vshrl.u32 %v6017_v38, 16  ;;  %v2313_v37 = vshll.u32 %v6017_v38, 16  ;;  %v661_v50 = vld [vmem:[%s10779_s0 + $0x14] sm:$0x1] }
  0xe1   :  { %3723 = vmatmul.bf16.gmra.mxu0 %v6202_v31  ;;  %3862 = vmatmul.bf16.gmra.mxu3 %v6406_v28  ;;  %v1837_v53 = vpop.permute.xlu2 %1836  ;;  %v8492_v28 = vrot.slane %v1254_v19, 5  ;;  %v7023_v26 = vld [vmem:[#allocation2 + $0x40] sm:$0xf0]  ;;  %v764_v45 = vrot.slane %v660_v12, 5  ;;  %v1247_v54 = vrot.slane %v1245_v46, 4  ;;  %v5796_v57 = vrot.slane %v659_v52, 9 }
  0xe2   :  { %1928 = vst.msk [vmem:[#allocation2 + $0x58] sm:$0xf] %vm623_vm7, %v1837_v53  ;;  %v2312_v16 = vrot.slane %v2310_v25, 4  ;;  %v2315_v55 = vrot.slane %v2313_v37, 5  ;;  %v5826_v5 = vld [vmem:[%s10779_s0 + $0x64] sm:$0xf] }
  0xe3   :  { %2485 = vrot.lane.b32.xlu1 %v2274_v34, %s7266_s17  ;;  %v2281_v34 = vshll.u32 %v6013_v21, 16  ;;  %v1261_v39 = vor.u32 %v1260_v29, %v8492_v28  ;;  %v766_v56 = vrot.slane %v764_v45, 4  ;;  %v765_v7 = vsel %vm7665_vm6, %v5796_v57, %v764_v45  ;;  %v5918_v4 = vld [vmem:[%s10779_s0 + $0x78] sm:$0xe]  ;;  %v7052_v8 = vld [vmem:[#allocation2 + $0x128] sm:$0xf0] }
  0xe4   :  { %1862 = vrot.lane.b32.xlu0 %v1778_v11, %s7266_s17  ;;  %v1264_v11 = vshll.u32 %v5854_v18, 16  ;;  %v5948_v9 = vrot.slane %v5918_v4, 9  ;;  %v2316_v14 = vor.u32 %v2315_v55, %v2312_v16  ;;  %v5923_v18 = vld [vmem:[%s10779_s0 + $0x8c] sm:$0x1]  ;;  %901 = vst.msk [vmem:[#allocation2 + $0x2c] sm:$0xf] %vm59_vm3, %v765_v7 }
  0xe5   :  { %v1833_v32 = vpop.permute.xlu1 %1832  ;;  %v7018_v41 = vld [vmem:[#allocation2 + $0x18] sm:$0xf0]  ;;  %v2283_v44 = vrot.slane %v2281_v34, 5  ;;  %v1262_v49 = vrot.slane %v1261_v39, 4  ;;  %v5856_v39 = vld [vmem:[%s10779_s0 + $0x40] sm:$0xf] }
  0xe6   :  { %1926 = vst.msk [vmem:[#allocation2 + $0x30] sm:$0xf] %vm623_vm7, %v1833_v32  ;;  %v2456_v31 = vpop.permute.xlu0 %2455  ;;  %v6109_v48 = vld [vmem:[#allocation2 + $0x8] sm:$0xf]  ;;  %v1266_v40 = vrot.slane %v1264_v11, 5  ;;  %v1250_v32 = vrot.slane %v1248_v47, 5  ;;  %v1782_v21 = vsel %vm7665_vm6, %v5948_v9, %v1781_v51 }
  0xe7   :  { %2550 = vst.msk [vmem:[#allocation2 + $0x20] sm:$0xf] %vm623_vm7, %v2456_v31  ;;  %v6110_v58 = vor.u32 %v7018_v41, %v6109_v48  ;;  %1860 = vrot.lane.b32.xlu2 %v1775_v62, %s7266_s17  ;;  %v2284_v53 = vsel %vm7331_vm2, %v2279_v33, %v2283_v44  ;;  %v767_v41 = vrot.slane %v661_v50, 5  ;;  %v8524_v62 = vld [vmem:[%s10779_s0 + $0x94] sm:$0xf]  ;;  %v1791_v33 = vrot.slane %v5923_v18, 5 }
  0xe8   :  { %v1267_v31 = vsel %vm7331_vm2, %v1262_v49, %v1266_v40  ;;  %v1251_v0 = vor.u32 %v1250_v32, %v1247_v54  ;;  %v6020_v25 = vld [vmem:[%s10779_s0 + $0x9c] sm:$0xf]  ;;  %v5962_v51 = vld [vmem:[%s10779_s0 + $0x40] sm:$0xf]  ;;  %v5857_v40 = vld [vmem:[%s10779_s0 + $0x44] sm:$0x1] }
  0xe9   :  { %3876 = vmatmul.bf16.vlgmr.msrb.gmra.mxu2 %v6110_v58  ;;  %v2464_v3 = vpop.permute.xlu2 %2463  ;;  %v2299_v58 = vshrl.u32 %v8406_v2, 16  ;;  %1595 = vst.msk [vmem:[#allocation2 + $0x94] sm:$0xf] %vm59_vm3, %v1267_v31  ;;  %v8534_v2 = vld [vmem:[%s10779_s0 + $0x88] sm:$0xf]  ;;  %v768_v63 = vsel %vm7665_vm6, %v766_v56, %v767_v41  ;;  %v1278_v44 = vshll.u32 %v5856_v39, 16 }
  0xea   :  { %2554 = vst.msk [vmem:[#allocation2 + $0x70] sm:$0xf] %vm623_vm7, %v2464_v3  ;;  %v1252_v38 = vrot.slane %v1251_v0, 4  ;;  %v2319_v3 = vshll.u32 %v8524_v62, 16  ;;  %v1788_v19 = vrot.slane %v8534_v2, 5  ;;  %v1282_v46 = vshrl.u32 %v5856_v39, 16 }
  0xeb   :  { %1022 = vrot.lane.b32.xlu1 %v5824_v60, %s7266_s17  ;;  %902 = vst.msk [vmem:[#allocation2 + $0x40] sm:$0xf] %vm59_vm3, %v768_v63  ;;  %v2301_v11 = vrot.slane %v2299_v58, 4  ;;  %v6149_v16 = vld [vmem:[#allocation2 + $0x58] sm:$0xf]  ;;  %v8604_v45 = vrot.slane %v1278_v44, 5 }
  0xec   :  { %1020 = vrot.lane.b32.xlu0 %v5823_v61, %s7266_s17  ;;  %v1257_v20 = vsel %vm7331_vm2, %v1252_v38, %v8492_v28  ;;  %v8568_v42 = vrot.slane %v2319_v3, 5  ;;  %1996 = vst.msk [vmem:[#allocation2 + $0x98] sm:$0xf] %vm59_vm3, %v5962_v51  ;;  %v8598_v12 = vld [vmem:[%s10779_s0 + $0xa0] sm:$0xf]  ;;  %v1284_v52 = vrot.slane %v1282_v46, 4 }
  0xed   :  { %v2460_v22 = vpop.permute.xlu1 %2459  ;;  %v6129_v36 = vld [vmem:[#allocation2 + $0x30] sm:$0xf]  ;;  %1594 = vst.msk [vmem:[#allocation2 + $0x80] sm:$0xf] %vm59_vm3, %v1257_v20  ;;  %v2302_v37 = vor.u32 %v2301_v11, %v8460_v6  ;;  %v1288_v6 = vshll.u32 %v5857_v40, 16  ;;  %v2323_v32 = vshrl.u32 %v8524_v62, 16 }
  0xee   :  { %2552 = vst.msk [vmem:[#allocation2 + $0x48] sm:$0xf] %vm623_vm7, %v2460_v22  ;;  %v2458_v59 = vpop.permute.xlu0 %2457  ;;  %v6111_v27 = vld [vmem:[#allocation2 + $0x1c] sm:$0xf0]  ;;  %v6130_v61 = vor.u32 %v7023_v26, %v6129_v36  ;;  %v2337_v36 = vshll.u32 %v6020_v25, 16  ;;  %v1285_v57 = vor.u32 %v1284_v52, %v8604_v45 }
  0xef   :  { %2551 = vst.msk [vmem:[#allocation2 + $0x34] sm:$0xf] %vm623_vm7, %v2458_v59  ;;  %v6114_v30 = vor.u32 %v7016_v13, %v6111_v27  ;;  %2487 = vrot.lane.b32.xlu2 %v2284_v53, %s7266_s17  ;;  %v6241_v13 = vld [vmem:[#allocation2 + $0x118] sm:$0xf]  ;;  %v2317_v59 = vrot.slane %v2316_v14, 4  ;;  %v2303_v53 = vrot.slane %v2302_v37, 4 }
  0xf0   :  { %v6242_v29 = vor.u32 %v7052_v8, %v6241_v13  ;;  %v5963_v26 = vld [vmem:[%s10779_s0 + $0x48] sm:$0xf]  ;;  %v6016_v49 = vld [vmem:[%s10779_s0 + $0x8c] sm:$0x1]  ;;  %v2339_v55 = vrot.slane %v2337_v36, 5  ;;  %v1286_v3 = vrot.slane %v1285_v57, 4 }
  0xf1   :  { %3728 = vmatmul.bf16.gmra.mxu0 %v6222_v24  ;;  %3965 = vmatmul.bf16.vlgmr.msrb.gmra.mxu3 %v6114_v30  ;;  %v1841_v48 = vpop.permute.xlu2 %1840  ;;  %v2322_v43 = vsel %vm7331_vm2, %v2317_v59, %v8568_v42  ;;  %1997 = vst.msk [vmem:[#allocation2 + $0xac] sm:$0xf] %vm59_vm3, %v5963_v26  ;;  %v2305_v54 = vshll.u32 %v6016_v49, 16  ;;  %v8611_v31 = vld [vmem:[%s10779_s0 + $0x94] sm:$0xf]  ;;  %v2325_v36 = vrot.slane %v2323_v32, 4 }
  0xf2   :  { %1930 = vst.msk [vmem:[#allocation2 + $0x80] sm:$0xf] %vm623_vm7, %v1841_v48  ;;  %v1290_v48 = vrot.slane %v1288_v6, 5  ;;  %v5855_v56 = vld [vmem:[%s10779_s0 + $0x3c] sm:$0xf] }
  0xf3   :  { %2489 = vrot.lane.b32.xlu1 %v2298_v35, %s7266_s17  ;;  %v2334_v35 = vshrl.u32 %v6020_v25, 16  ;;  %v2307_v58 = vrot.slane %v2305_v54, 5  ;;  %v663_v0 = vld [vmem:[%s10779_s0 + $0x1c] sm:$0xf]  ;;  %v8623_v7 = vld [vmem:[#allocation2 + $0x140] sm:$0xf] }
  0xf4   :  { %1866 = vrot.lane.b32.xlu0 %v1785_v10, %s7266_s17  ;;  %v1790_v10 = vrot.slane %v1788_v19, 4  ;;  %v8625_v4 = vld [vmem:[#allocation2 + $0x150] sm:$0xf0]  ;;  %v664_v38 = vld [vmem:[%s10779_s0 + $0x20] sm:$0x1]  ;;  %v771_v9 = vrot.slane %v663_v0, 5 }
  0xf5   :  { %v2462_v60 = vpop.permute.xlu1 %2461  ;;  %v6131_v24 = vld [vmem:[#allocation2 + $0x44] sm:$0xf0]  ;;  %v2336_v41 = vrot.slane %v2334_v35, 4  ;;  %v5828_v14 = vld [vmem:[%s10779_s0 + $0x70] sm:$0xf]  ;;  %v2308_v18 = vsel %vm7331_vm2, %v2303_v53, %v2307_v58  ;;  %v774_v59 = vrot.slane %v664_v38, 5  ;;  %v6262_v26 = vor.u32 %v8625_v4, %v8623_v7 }
  0xf6   :  { %2553 = vst.msk [vmem:[#allocation2 + $0x5c] sm:$0xf] %vm623_vm7, %v2462_v60  ;;  %v1839_v1 = vpop.permute.xlu0 %1838  ;;  %v7021_v22 = vld [vmem:[#allocation2 + $0x34] sm:$0xf]  ;;  %v1792_v47 = vsel %vm7665_vm6, %v1790_v10, %v1791_v33  ;;  %v1269_v60 = vshrl.u32 %v5855_v56, 16  ;;  %v773_v11 = vrot.slane %v771_v9, 4 }
  0xf7   :  { %1929 = vst.msk [vmem:[#allocation2 + $0x6c] sm:$0xf] %vm623_vm7, %v1839_v1  ;;  %1864 = vrot.lane.b32.xlu2 %v1782_v21, %s7266_s17  ;;  %v6134_v30 = vor.u32 %v7021_v22, %v6131_v24  ;;  %v5827_v22 = vld [vmem:[%s10779_s0 + $0x6c] sm:$0xf]  ;;  %v6151_v24 = vld [vmem:[#allocation2 + $0x6c] sm:$0xf0]  ;;  %v2340_v51 = vor.u32 %v2339_v55, %v2336_v41  ;;  %v2326_v41 = vor.u32 %v2325_v36, %v8568_v42 }
  0xf8   :  { %v1271_v20 = vrot.slane %v1269_v60, 4  ;;  %v5921_v37 = vld [vmem:[%s10779_s0 + $0x84] sm:$0xe]  ;;  %v6023_v39 = vld [vmem:[%s10779_s0 + $0xa8] sm:$0xf] }
  0xf9   :  { %3881 = vmatmul.bf16.gmra.mxu2 %v6130_v61  ;;  %v2468_v27 = vpop.permute.xlu2 %2467  ;;  %v1272_v61 = vshll.u32 %v5855_v56, 16  ;;  %v5949_v44 = vrot.slane %v5921_v37, 9  ;;  %v2341_v6 = vrot.slane %v2340_v51, 4  ;;  %v2358_v32 = vshrl.u32 %v6023_v39, 16  ;;  %v6169_v2 = vld [vmem:[#allocation2 + $0x80] sm:$0xf] }
  0xfa   :  { %2556 = vst.msk [vmem:[#allocation2 + $0x98] sm:$0xf] %vm623_vm7, %v2468_v27  ;;  %v5926_v27 = vld [vmem:[%s10779_s0 + $0x98] sm:$0x1]  ;;  %v5964_v42 = vld [vmem:[%s10779_s0 + $0x4c] sm:$0xf] }
  0xfb   :  { %1026 = vrot.lane.b32.xlu1 %v5826_v5, %s7266_s17  ;;  %v1274_v25 = vrot.slane %v1272_v61, 5  ;;  %v1798_v49 = vrot.slane %v5926_v27, 5  ;;  %v1789_v54 = vsel %vm7665_vm6, %v5949_v44, %v1788_v19  ;;  %v2361_v19 = vshll.u32 %v6023_v39, 16  ;;  %v5965_v58 = vld [vmem:[%s10779_s0 + $0x54] sm:$0xf] }
  0xfc   :  { %1024 = vrot.lane.b32.xlu0 %v5825_v15, %s7266_s17  ;;  %v2343_v15 = vshll.u32 %v8598_v12, 16  ;;  %v8696_v57 = vrot.slane %v2358_v32, 4  ;;  %v2327_v60 = vrot.slane %v2326_v41, 4  ;;  %1998 = vst.msk [vmem:[#allocation2 + $0xc0] sm:$0xf] %vm59_vm3, %v5964_v42 }
  0xfd   :  { %v999_v28 = vpop.permute.xlu1 %998  ;;  %v7026_v10 = vld [vmem:[#allocation2 + $0x5c] sm:$0xf]  ;;  %v1275_v33 = vor.u32 %v1274_v25, %v1271_v20  ;;  %v5859_v0 = vld [vmem:[%s10779_s0 + $0x4c] sm:$0xf]  ;;  %v2363_v4 = vrot.slane %v2361_v19, 5 }
  0xfe   :  { %1093 = vst.msk [vmem:[#allocation2 + $0x18] sm:$0xf] %vm623_vm7, %v999_v28  ;;  %v997_v34 = vpop.permute.xlu0 %996  ;;  %v7028_v50 = vld [vmem:[#allocation2 + $0x68] sm:$0xf0]  ;;  %v1795_v28 = vrot.slane %v8611_v31, 5  ;;  %v8664_v40 = vrot.slane %v2343_v15, 5  ;;  %v6154_v46 = vor.u32 %v7026_v10, %v6151_v24 }
  0xff   :  { %1092 = vst.msk [vmem:[#allocation2 + $0x4] sm:$0xf] %vm623_vm7, %v997_v34  ;;  %v6150_v63 = vor.u32 %v7028_v50, %v6149_v16  ;;  %2491 = vrot.lane.b32.xlu2 %v2308_v18, %s7266_s17  ;;  %v775_v34 = vsel %vm7665_vm6, %v773_v11, %v774_v59  ;;  %v1306_v7 = vshrl.u32 %v5859_v0, 16  ;;  %v6019_v38 = vld [vmem:[%s10779_s0 + $0x98] sm:$0x1] }
 0x100   :  { %904 = vst.msk [vmem:[#allocation2 + $0x68] sm:$0xf] %vm59_vm3, %v775_v34  ;;  %v2329_v20 = vshll.u32 %v6019_v38, 16  ;;  %v5830_v25 = vld [vmem:[%s10779_s0 + $0x7c] sm:$0xf] }
 0x101   :  { %3733 = vmatmul.bf16.gmra.mxu0 %v6242_v29  ;;  %3970 = vmatmul.bf16.gmra.mxu3 %v6134_v30  ;;  %v8618_v62 = vpop.permute.xlu2 %1844  ;;  %v1291_v29 = vsel %vm7331_vm2, %v1286_v3, %v1290_v48  ;;  %v662_v30 = vld [vmem:[%s10779_s0 + $0x18] sm:$0xe]  ;;  %1999 = vst.msk [vmem:[#allocation2 + $0xd4] sm:$0xf] %vm59_vm3, %v5965_v58  ;;  %v1308_v18 = vrot.slane %v1306_v7, 4 }
 0x102   :  { %1597 = vst.msk [vmem:[#allocation2 + $0xbc] sm:$0xf] %vm59_vm3, %v1291_v29  ;;  %v5797_v35 = vrot.slane %v662_v30, 9  ;;  %v6281_v11 = vld [vmem:[#allocation2 + $0x168] sm:$0xf]  ;;  %v2331_v10 = vrot.slane %v2329_v20, 5 }
 0x103   :  { %2493 = vrot.lane.b32.xlu1 %v2322_v43, %s7266_s17  ;;  %v1276_v43 = vrot.slane %v1275_v33, 4  ;;  %v5829_v51 = vld [vmem:[%s10779_s0 + $0x78] sm:$0xf]  ;;  %v7062_v27 = vld [vmem:[#allocation2 + $0x178] sm:$0xf0] }
 0x104   :  { %1870 = vrot.lane.b32.xlu0 %v1792_v47, %s7266_s17  ;;  %v772_v16 = vsel %vm7665_vm6, %v5797_v35, %v771_v9  ;;  %v1797_v47 = vrot.slane %v1795_v28, 4  ;;  %v6171_v34 = vld [vmem:[#allocation2 + $0x94] sm:$0xf0]  ;;  %v2364_v35 = vor.u32 %v2363_v4, %v8696_v57  ;;  %v5858_v39 = vld [vmem:[%s10779_s0 + $0x48] sm:$0xf] }
 0x105   :  { %v2466_v1 = vpop.permute.xlu1 %2465  ;;  %v6103_v5 = vld [vmem:[#allocation2 + $0x14] sm:$0xf0]  ;;  %903 = vst.msk [vmem:[#allocation2 + $0x54] sm:$0xf] %vm59_vm3, %v772_v16  ;;  %v1281_v53 = vsel %vm7331_vm2, %v1276_v43, %v8604_v45  ;;  %v2346_v45 = vsel %vm7331_vm2, %v2341_v6, %v8664_v40  ;;  %v2332_v16 = vsel %vm7331_vm2, %v2327_v60, %v2331_v10  ;;  %v1293_v44 = vshrl.u32 %v5858_v39, 16 }
 0x106   :  { %2555 = vst.msk [vmem:[#allocation2 + $0x84] sm:$0xf] %vm623_vm7, %v2466_v1  ;;  %v1843_v13 = vpop.permute.xlu0 %1842  ;;  %v7015_v8 = vld [vmem:[#allocation2 + $0x4] sm:$0xf]  ;;  %v1799_v56 = vsel %vm7665_vm6, %v1797_v47, %v1798_v49  ;;  %v8714_v1 = vld [vmem:[%s10779_s0 + $0xa0] sm:$0xf]  ;;  %v6282_v49 = vor.u32 %v7062_v27, %v6281_v11 }
 0x107   :  { %1931 = vst.msk [vmem:[#allocation2 + $0x94] sm:$0xf] %vm623_vm7, %v1843_v13  ;;  %v6106_v21 = vor.u32 %v7015_v8, %v6103_v5  ;;  %1868 = vrot.lane.b32.xlu2 %v1789_v54, %s7266_s17  ;;  %v5860_v5 = vld [vmem:[%s10779_s0 + $0x50] sm:$0x1]  ;;  %v1802_v37 = vrot.slane %v8714_v1, 5  ;;  %v2347_v47 = vshrl.u32 %v8598_v12, 16 }
 0x108   :  { %1596 = vst.msk [vmem:[#allocation2 + $0xa8] sm:$0xf] %vm59_vm3, %v1281_v53  ;;  %v1312_v15 = vshll.u32 %v5860_v5, 16  ;;  %v666_v6 = vld [vmem:[%s10779_s0 + $0x28] sm:$0xf]  ;;  %v1295_v32 = vrot.slane %v1293_v44, 4 }
 0x109   :  { %3787 = vmatmul.bf16.vlgmr.msra.gmra.mxu1 %v6106_v21  ;;  %3886 = vmatmul.bf16.gmra.mxu2 %v6150_v63  ;;  %v2472_v50 = vpop.permute.xlu2 %2471  ;;  %1932 = vst.msk [vmem:[#allocation2 + $0xa8] sm:$0xf] %vm623_vm7, %v8618_v62  ;;  %v8709_v62 = vld [vmem:[%s10779_s0 + $0xac] sm:$0xf]  ;;  %v1302_v63 = vshll.u32 %v5859_v0, 16  ;;  %v1804_v58 = vrot.slane %v1802_v37, 4 }
 0x10a   :  { %2558 = vst.msk [vmem:[#allocation2 + $0xc0] sm:$0xf] %vm623_vm7, %v2472_v50  ;;  %v1314_v30 = vrot.slane %v1312_v15, 5  ;;  %v2367_v36 = vshll.u32 %v8709_v62, 16  ;;  %v667_v50 = vld [vmem:[%s10779_s0 + $0x2c] sm:$0x1] }
 0x10b   :  { %1030 = vrot.lane.b32.xlu1 %v5828_v14, %s7266_s17  ;;  %v8727_v3 = vrot.slane %v1302_v63, 5  ;;  %v665_v53 = vld [vmem:[%s10779_s0 + $0x24] sm:$0xe]  ;;  %v781_v12 = vrot.slane %v667_v50, 5  ;;  %v5924_v0 = vld [vmem:[%s10779_s0 + $0x90] sm:$0xe] }
 0x10c   :  { %1028 = vrot.lane.b32.xlu0 %v5827_v22, %s7266_s17  ;;  %v5798_v19 = vrot.slane %v665_v53, 9  ;;  %v5950_v15 = vrot.slane %v5924_v0, 9  ;;  %v8809_v31 = vld [vmem:[%s10779_s0 + $0xb8] sm:$0xf]  ;;  %v6301_v44 = vld [vmem:[#allocation2 + $0x190] sm:$0xf] }
 0x10d   :  { %v1003_v52 = vpop.permute.xlu1 %1002  ;;  %v1309_v29 = vor.u32 %v1308_v18, %v8727_v3  ;;  %v7031_v33 = vld [vmem:[#allocation2 + $0x84] sm:$0xf]  ;;  %v5966_v27 = vld [vmem:[%s10779_s0 + $0x58] sm:$0xf] }
 0x10e   :  { %1095 = vst.msk [vmem:[#allocation2 + $0x40] sm:$0xf] %vm623_vm7, %v1003_v52  ;;  %v1001_v55 = vpop.permute.xlu0 %1000  ;;  %v8681_v48 = vpop.f32.mrf.mxu0  ;;  %v7033_v61 = vld [vmem:[#allocation2 + $0x90] sm:$0xf0]  ;;  %v778_v52 = vrot.slane %v666_v6, 5  ;;  %v6174_v57 = vor.u32 %v7031_v33, %v6171_v34 }
 0x10f   :  { %1094 = vst.msk [vmem:[#allocation2 + $0x2c] sm:$0xf] %vm623_vm7, %v1001_v55  ;;  %v6170_v14 = vor.u32 %v7033_v61, %v6169_v2  ;;  %v1310_v43 = vrot.slane %v1309_v29, 4  ;;  %2495 = vrot.lane.b32.xlu2 %v2332_v16, %s7266_s17  ;;  %v2365_v55 = vrot.slane %v2364_v35, 4  ;;  %v5862_v29 = vld [vmem:[%s10779_s0 + $0x58] sm:$0xf] }
 0x110   :  { %v780_v2 = vrot.slane %v778_v52, 4  ;;  %v779_v4 = vsel %vm7665_vm6, %v5798_v19, %v778_v52  ;;  %v6189_v11 = vld [vmem:[#allocation2 + $0xa8] sm:$0xf]  ;;  %2000 = vst.msk [vmem:[#allocation2 + $0xe8] sm:$0xf] %vm59_vm3, %v5966_v27  ;;  %v1326_v35 = vshll.u32 %v5862_v29, 16 }
 0x111   :  { %3738 = vmatmul.bf16.gmra.mxu0 %v6262_v26  ;;  %3975 = vmatmul.bf16.gmra.mxu3 %v6154_v46  ;;  %v8725_v9 = vpop.permute.xlu2 %1848  ;;  %v5929_v26 = vld [vmem:[%s10779_s0 + $0xa4] sm:$0x1]  ;;  %v1296_v46 = vshll.u32 %v5858_v39, 16  ;;  %v1315_v54 = vsel %vm7331_vm2, %v1310_v43, %v1314_v30  ;;  %905 = vst.msk [vmem:[#allocation2 + $0x7c] sm:$0xf] %vm59_vm3, %v779_v4  ;;  %v1330_v50 = vshrl.u32 %v5862_v29, 16 }
 0x112   :  { %1599 = vst.msk [vmem:[#allocation2 + $0xe4] sm:$0xf] %vm59_vm3, %v1315_v54  ;;  %v1805_v60 = vrot.slane %v5929_v26, 5  ;;  %v782_v7 = vsel %vm7665_vm6, %v780_v2, %v781_v12  ;;  %v5832_v16 = vld [vmem:[%s10779_s0 + $0x88] sm:$0xf] }
 0x113   :  { %2497 = vrot.lane.b32.xlu1 %v2346_v45, %s7266_s17  ;;  %v1298_v41 = vrot.slane %v1296_v46, 5  ;;  %v8766_v45 = vrot.slane %v2367_v36, 5  ;;  %906 = vst.msk [vmem:[#allocation2 + $0x90] sm:$0xf] %vm59_vm3, %v782_v7  ;;  %v7067_v46 = vld [vmem:[#allocation2 + $0x1a0] sm:$0xf0] }
 0x114   :  { %1874 = vrot.lane.b32.xlu0 %v1799_v56, %s7266_s17  ;;  %v5831_v52 = vld [vmem:[%s10779_s0 + $0x84] sm:$0xf]  ;;  %v5863_v54 = vld [vmem:[%s10779_s0 + $0x5c] sm:$0x1]  ;;  %v5861_v4 = vld [vmem:[%s10779_s0 + $0x54] sm:$0xf] }
 0x115   :  { %v2470_v13 = vpop.permute.xlu1 %2469  ;;  %v6123_v8 = vld [vmem:[#allocation2 + $0x3c] sm:$0xf0]  ;;  %v1299_v61 = vor.u32 %v1298_v41, %v1295_v32  ;;  %v8844_v32 = vrot.slane %v1326_v35, 5  ;;  %v1332_v41 = vrot.slane %v1330_v50, 4  ;;  %v1336_v12 = vshll.u32 %v5863_v54, 16 }
 0x116   :  { %2557 = vst.msk [vmem:[#allocation2 + $0xac] sm:$0xf] %vm623_vm7, %v2470_v13  ;;  %v1847_v21 = vpop.permute.xlu0 %1846  ;;  %v8730_v22 = vpop.f32.mrf.mxu0  ;;  %v7020_v24 = vld [vmem:[#allocation2 + $0x2c] sm:$0xf]  ;;  %v6026_v13 = vld [vmem:[%s10779_s0 + $0xb4] sm:$0xf] }
 0x117   :  { %1933 = vst.msk [vmem:[#allocation2 + $0xbc] sm:$0xf] %vm623_vm7, %v1847_v21  ;;  %v6126_v59 = vor.u32 %v7020_v24, %v6123_v8  ;;  %v1300_v38 = vrot.slane %v1299_v61, 4  ;;  %v2370_v8 = vsel %vm7331_vm2, %v2365_v55, %v8766_v45  ;;  %v2382_v18 = vshrl.u32 %v6026_v13, 16  ;;  %v6022_v55 = vld [vmem:[%s10779_s0 + $0xa4] sm:$0x1] }
 0x118   :  { %v2385_v20 = vshll.u32 %v6026_v13, 16  ;;  %v1806_v21 = vsel %vm7665_vm6, %v1804_v58, %v1805_v60  ;;  %v1333_v58 = vor.u32 %v1332_v41, %v8844_v32  ;;  %v1338_v60 = vrot.slane %v1336_v12, 5  ;;  %v8917_v12 = vld [vmem:[%s10779_s0 + $0xc4] sm:$0xf] }
 0x119   :  { %3792 = vmatmul.bf16.gmra.mxu1 %v6126_v59  ;;  %3891 = vmatmul.bf16.gmra.mxu2 %v6170_v14  ;;  %v8769_v42 = vpop.permute.xlu2 %2475  ;;  %v1796_v14 = vsel %vm7665_vm6, %v5950_v15, %v1795_v28  ;;  %v1305_v24 = vsel %vm7331_vm2, %v1300_v38, %v8727_v3  ;;  %v2384_v28 = vrot.slane %v2382_v18, 4  ;;  %v6302_v61 = vor.u32 %v7067_v46, %v6301_v44  ;;  %v669_v15 = vld [vmem:[%s10779_s0 + $0x34] sm:$0xf] }
 0x11a   :  { %1598 = vst.msk [vmem:[#allocation2 + $0xd0] sm:$0xf] %vm59_vm3, %v1305_v24  ;;  %1872 = vrot.lane.b32.xlu2 %v1796_v14, %s7266_s17  ;;  %v2387_v3 = vrot.slane %v2385_v20, 5  ;;  %v1334_v38 = vrot.slane %v1333_v58, 4  ;;  %v1317_v13 = vshrl.u32 %v5861_v4, 16  ;;  %v785_v18 = vrot.slane %v669_v15, 5 }
 0x11b   :  { %1034 = vrot.lane.b32.xlu1 %v5830_v25, %s7266_s17  ;;  %v2349_v25 = vrot.slane %v2347_v47, 4  ;;  %1934 = vst.msk [vmem:[#allocation2 + $0xd0] sm:$0xf] %vm623_vm7, %v8725_v9  ;;  %v5967_v9 = vld [vmem:[%s10779_s0 + $0x60] sm:$0xf]  ;;  %v2415_v15 = vshll.u32 %v8917_v12, 16 }
 0x11c   :  { %1032 = vrot.lane.b32.xlu0 %v5829_v51, %s7266_s17  ;;  %v8815_v51 = vld [vmem:[%s10779_s0 + $0xac] sm:$0xf]  ;;  %v6191_v47 = vld [vmem:[#allocation2 + $0xbc] sm:$0xf0]  ;;  %v2388_v53 = vor.u32 %v2387_v3, %v2384_v28  ;;  %2560 = vst.msk [vmem:[#allocation2 + $0xe8] sm:$0xf] %vm623_vm7, %v8769_v42 }
 0x11d   :  { %v1007_v56 = vpop.permute.xlu1 %1006  ;;  %v2350_v36 = vor.u32 %v2349_v25, %v8664_v40  ;;  %v7036_v6 = vld [vmem:[#allocation2 + $0xac] sm:$0xf]  ;;  %v1809_v2 = vrot.slane %v8815_v51, 5  ;;  %2001 = vst.msk [vmem:[#allocation2 + $0xfc] sm:$0xf] %vm59_vm3, %v5967_v9  ;;  %v1339_v9 = vsel %vm7331_vm2, %v1334_v38, %v1338_v60  ;;  %v1319_v29 = vrot.slane %v1317_v13, 4 }
 0x11e   :  { %1097 = vst.msk [vmem:[#allocation2 + $0x68] sm:$0xf] %vm623_vm7, %v1007_v56  ;;  %v1005_v5 = vpop.permute.xlu0 %1004  ;;  %v8777_v63 = vpop.f32.mrf.mxu0  ;;  %v7038_v59 = vld [vmem:[#allocation2 + $0xb8] sm:$0xf0]  ;;  %v2353_v56 = vshll.u32 %v6022_v55, 16  ;;  %v6194_v0 = vor.u32 %v7036_v6, %v6191_v47 }
 0x11f   :  { %1096 = vst.msk [vmem:[#allocation2 + $0x54] sm:$0xf] %vm623_vm7, %v1005_v5  ;;  %v6190_v34 = vor.u32 %v7038_v59, %v6189_v11  ;;  %v2351_v19 = vrot.slane %v2350_v36, 4  ;;  %v5932_v42 = vld [vmem:[%s10779_s0 + $0xb0] sm:$0x1]  ;;  %v2389_v5 = vrot.slane %v2388_v53, 4 }
 0x120   :  { %v2355_v7 = vrot.slane %v2353_v56, 5  ;;  %v670_v14 = vld [vmem:[%s10779_s0 + $0x38] sm:$0x1]  ;;  %v1811_v24 = vrot.slane %v1809_v2, 4  ;;  %v1812_v25 = vrot.slane %v5932_v42, 5 }
 0x121   :  { %3743 = vmatmul.bf16.gmra.mxu0 %v6282_v49  ;;  %3980 = vmatmul.bf16.gmra.mxu3 %v6174_v57  ;;  %v8826_v30 = vpop.permute.xlu2 %1852  ;;  %v2391_v49 = vshll.u32 %v8809_v31, 16  ;;  %v788_v59 = vrot.slane %v670_v14, 5  ;;  %v668_v28 = vld [vmem:[%s10779_s0 + $0x30] sm:$0xe]  ;;  %1601 = vst.msk [vmem:[#allocation2 + $0x10c] sm:$0xf] %vm59_vm3, %v1339_v9 }
 0x122   :  { %v2356_v11 = vsel %vm7331_vm2, %v2351_v19, %v2355_v7  ;;  %v5799_v35 = vrot.slane %v668_v28, 9  ;;  %v5927_v6 = vld [vmem:[%s10779_s0 + $0x9c] sm:$0xe]  ;;  %v6029_v47 = vld [vmem:[%s10779_s0 + $0xc0] sm:$0xf] }
 0x123   :  { %2501 = vrot.lane.b32.xlu1 %v2370_v8, %s7266_s17  ;;  %v8853_v57 = vrot.slane %v2391_v49, 5  ;;  %v1320_v8 = vshll.u32 %v5861_v4, 16  ;;  %2499 = vrot.lane.b32.xlu2 %v2356_v11, %s7266_s17  ;;  %v5951_v50 = vrot.slane %v5927_v6, 9  ;;  %v8922_v56 = vld [vmem:[%s10779_s0 + $0xb8] sm:$0xf] }
 0x124   :  { %1878 = vrot.lane.b32.xlu0 %v1806_v21, %s7266_s17  ;;  %v786_v46 = vsel %vm7665_vm6, %v5799_v35, %v785_v18  ;;  %v5833_v4 = vld [vmem:[%s10779_s0 + $0x90] sm:$0xf]  ;;  %v5935_v38 = vld [vmem:[%s10779_s0 + $0xbc] sm:$0x1]  ;;  %v1816_v13 = vrot.slane %v8922_v56, 5 }
 0x125   :  { %v2474_v10 = vpop.permute.xlu1 %2473  ;;  %v6143_v33 = vld [vmem:[#allocation2 + $0x64] sm:$0xf0]  ;;  %v2394_v36 = vsel %vm7331_vm2, %v2389_v5, %v8853_v57  ;;  %907 = vst.msk [vmem:[#allocation2 + $0xa4] sm:$0xf] %vm59_vm3, %v786_v46  ;;  %v1803_v41 = vsel %vm7665_vm6, %v5951_v50, %v1802_v37  ;;  %v5968_v5 = vld [vmem:[%s10779_s0 + $0x64] sm:$0xf] }
 0x126   :  { %2559 = vst.msk [vmem:[#allocation2 + $0xd4] sm:$0xf] %vm623_vm7, %v2474_v10  ;;  %v1851_v26 = vpop.permute.xlu0 %1850  ;;  %v8831_v39 = vpop.f32.mrf.mxu0  ;;  %v7025_v43 = vld [vmem:[#allocation2 + $0x54] sm:$0xf]  ;;  %v1322_v10 = vrot.slane %v1320_v8, 5  ;;  %v2395_v50 = vshrl.u32 %v8809_v31, 16 }
 0x127   :  { %1935 = vst.msk [vmem:[#allocation2 + $0xe4] sm:$0xf] %vm623_vm7, %v1851_v26  ;;  %v6146_v40 = vor.u32 %v7025_v43, %v6143_v33  ;;  %v2371_v33 = vshrl.u32 %v8709_v62, 16  ;;  %v6209_v26 = vld [vmem:[#allocation2 + $0xd0] sm:$0xf] }
 0x128   :  { %v1323_v43 = vor.u32 %v1322_v10, %v1319_v29  ;;  %2002 = vst.msk [vmem:[#allocation2 + $0x110] sm:$0xf] %vm59_vm3, %v5968_v5 }
 0x129   :  { %3797 = vmatmul.bf16.gmra.mxu1 %v6146_v40  ;;  %3896 = vmatmul.bf16.gmra.mxu2 %v6190_v34  ;;  %v8870_v20 = vpop.permute.xlu2 %2479  ;;  %v787_v34 = vrot.slane %v785_v18, 4  ;;  %v2406_v40 = vshrl.u32 %v6029_v47, 16  ;;  %v2373_v53 = vrot.slane %v2371_v33, 4  ;;  %v6211_v18 = vld [vmem:[#allocation2 + $0xe4] sm:$0xf0] }
 0x12a   :  { %v1324_v49 = vrot.slane %v1323_v43, 4  ;;  %2562 = vst.msk [vmem:[#allocation2 + $0x110] sm:$0xf] %vm623_vm7, %v8870_v20  ;;  %v1818_v20 = vrot.slane %v1816_v13, 4 }
 0x12b   :  { %1038 = vrot.lane.b32.xlu1 %v5832_v16, %s7266_s17  ;;  %v1813_v16 = vsel %vm7665_vm6, %v1811_v24, %v1812_v25  ;;  %v789_v62 = vsel %vm7665_vm6, %v787_v34, %v788_v59  ;;  %v2408_v55 = vrot.slane %v2406_v40, 4  ;;  %1876 = vrot.lane.b32.xlu2 %v1803_v41, %s7266_s17  ;;  %v2374_v8 = vor.u32 %v2373_v53, %v8766_v45  ;;  %v5969_v24 = vld [vmem:[%s10779_s0 + $0x6c] sm:$0xf]  ;;  %v5865_v25 = vld [vmem:[%s10779_s0 + $0x64] sm:$0xf] }
 0x12c   :  { %1036 = vrot.lane.b32.xlu0 %v5831_v52, %s7266_s17  ;;  %908 = vst.msk [vmem:[#allocation2 + $0xb8] sm:$0xf] %vm59_vm3, %v789_v62  ;;  %v2409_v52 = vshll.u32 %v6029_v47, 16  ;;  %v1329_v54 = vsel %vm7331_vm2, %v1324_v49, %v8844_v32  ;;  %v5866_v45 = vld [vmem:[%s10779_s0 + $0x68] sm:$0x1]  ;;  %v1354_v11 = vshrl.u32 %v5865_v25, 16 }
 0x12d   :  { %v1011_v21 = vpop.permute.xlu1 %1010  ;;  %1600 = vst.msk [vmem:[#allocation2 + $0xf8] sm:$0xf] %vm59_vm3, %v1329_v54  ;;  %v7041_v14 = vld [vmem:[#allocation2 + $0xd4] sm:$0xf]  ;;  %v6321_v59 = vld [vmem:[#allocation2 + $0x1b8] sm:$0xf] }
 0x12e   :  { %1099 = vst.msk [vmem:[#allocation2 + $0x90] sm:$0xf] %vm623_vm7, %v1011_v21  ;;  %v1009_v3 = vpop.permute.xlu0 %1008  ;;  %v8880_v27 = vpop.f32.mrf.mxu0  ;;  %v7043_v44 = vld [vmem:[#allocation2 + $0xe0] sm:$0xf0]  ;;  %v2411_v19 = vrot.slane %v2409_v52, 5  ;;  %v1360_v28 = vshll.u32 %v5866_v45, 16 }
 0x12f   :  { %1098 = vst.msk [vmem:[#allocation2 + $0x7c] sm:$0xf] %vm623_vm7, %v1009_v3  ;;  %v6210_v1 = vor.u32 %v7043_v44, %v6209_v26  ;;  %v6025_v3 = vld [vmem:[%s10779_s0 + $0xb0] sm:$0x1]  ;;  %v1356_v29 = vrot.slane %v1354_v11, 4  ;;  %v2375_v10 = vrot.slane %v2374_v8, 4  ;;  %v6214_v44 = vor.u32 %v7041_v14, %v6211_v18 }
 0x130   :  { %1936 = vst.msk [vmem:[#allocation2 + $0xf8] sm:$0xf] %vm623_vm7, %v8826_v30  ;;  %v2412_v21 = vor.u32 %v2411_v19, %v2408_v55  ;;  %v1350_v30 = vshll.u32 %v5865_v25, 16  ;;  %v2377_v33 = vshll.u32 %v6025_v3, 16  ;;  %v7072_v34 = vld [vmem:[#allocation2 + $0x1c8] sm:$0xf0] }
 0x131   :  { %3748 = vmatmul.bf16.gmra.mxu0 %v6302_v61  ;;  %3985 = vmatmul.bf16.gmra.mxu3 %v6194_v0  ;;  %v8924_v42 = vpop.permute.xlu2 %1856  ;;  %v5834_v0 = vld [vmem:[%s10779_s0 + $0x94] sm:$0xf]  ;;  %2003 = vst.msk [vmem:[#allocation2 + $0x124] sm:$0xf] %vm59_vm3, %v5969_v24  ;;  %v1819_v26 = vrot.slane %v5935_v38, 5  ;;  %v1362_v46 = vrot.slane %v1360_v28, 5  ;;  %v6322_v41 = vor.u32 %v7072_v34, %v6321_v59 }
 0x132   :  { %v8966_v9 = vrot.slane %v1350_v30, 5  ;;  %v2413_v35 = vrot.slane %v2412_v21, 4  ;;  %v2379_v6 = vrot.slane %v2377_v33, 5  ;;  %v5864_v47 = vld [vmem:[%s10779_s0 + $0x60] sm:$0xf]  ;;  %v7130_v38 = vld [vmem:[%s10780_s1 + $0x118] sm:$0xff] }
 0x133   :  { %2505 = vrot.lane.b32.xlu1 %v2394_v36, %s7266_s17  ;;  %v8969_v36 = vrot.slane %v2415_v15, 5  ;;  %v672_v49 = vld [vmem:[%s10779_s0 + $0x40] sm:$0xf]  ;;  %v1341_v53 = vshrl.u32 %v5864_v47, 16  ;;  %v1344_v54 = vshll.u32 %v5864_v47, 16  ;;  %v1820_v31 = vsel %vm7665_vm6, %v1818_v20, %v1819_v26  ;;  %4050 = vmatpush.bf16.msrb.mxu0 %v7130_v38 }
 0x134   :  { %1882 = vrot.lane.b32.xlu0 %v1813_v16, %s7266_s17  ;;  %v1357_v62 = vor.u32 %v1356_v29, %v8966_v9  ;;  %v2380_v19 = vsel %vm7331_vm2, %v2375_v10, %v2379_v6  ;;  %v5930_v25 = vld [vmem:[%s10779_s0 + $0xa8] sm:$0xe]  ;;  %v6032_v45 = vld [vmem:[%s10779_s0 + $0xcc] sm:$0xf]  ;;  %v9023_v59 = vld [vmem:[%s10779_s0 + $0xd0] sm:$0xf] }
 0x135   :  { %v2478_v32 = vpop.permute.xlu1 %2477  ;;  %v6163_v58 = vld [vmem:[#allocation2 + $0x8c] sm:$0xf0]  ;;  %2503 = vrot.lane.b32.xlu2 %v2380_v19, %s7266_s17  ;;  %v5952_v11 = vrot.slane %v5930_v25, 9  ;;  %v2430_v10 = vshrl.u32 %v6032_v45, 16  ;;  %v2433_v33 = vshll.u32 %v6032_v45, 16  ;;  %v2397_v6 = vrot.slane %v2395_v50, 4 }
 0x136   :  { %2561 = vst.msk [vmem:[#allocation2 + $0xfc] sm:$0xf] %vm623_vm7, %v2478_v32  ;;  %v1855_v37 = vpop.permute.xlu0 %1854  ;;  %v8928_v60 = vpop.f32.mrf.mxu0  ;;  %v7030_v61 = vld [vmem:[#allocation2 + $0x7c] sm:$0xf]  ;;  %v1358_v55 = vrot.slane %v1357_v62, 4  ;;  %v792_v32 = vrot.slane %v672_v49, 5 }
 0x137   :  { %1937 = vst.msk [vmem:[#allocation2 + $0x10c] sm:$0xf] %vm623_vm7, %v1855_v37  ;;  %v6166_v7 = vor.u32 %v7030_v61, %v6163_v58  ;;  %v2418_v58 = vsel %vm7331_vm2, %v2413_v35, %v8969_v36  ;;  %v1346_v37 = vrot.slane %v1344_v54, 5  ;;  %v673_v61 = vld [vmem:[%s10779_s0 + $0x44] sm:$0x1]  ;;  %v1810_v62 = vsel %vm7665_vm6, %v5952_v11, %v1809_v2 }
 0x138   :  { %v1363_v5 = vsel %vm7331_vm2, %v1358_v55, %v1362_v46  ;;  %v6229_v8 = vld [vmem:[#allocation2 + $0xf8] sm:$0xf]  ;;  %v2439_v46 = vshll.u32 %v9023_v59, 16  ;;  %v5835_v49 = vld [vmem:[%s10779_s0 + $0x9c] sm:$0xf] }
 0x139   :  { %3802 = vmatmul.bf16.gmra.mxu1 %v6166_v7  ;;  %3901 = vmatmul.bf16.gmra.mxu2 %v6210_v1  ;;  %v8973_v43 = vpop.permute.xlu2 %2483  ;;  %v1343_v1 = vrot.slane %v1341_v53, 4  ;;  %v794_v7 = vrot.slane %v792_v32, 4  ;;  %1603 = vst.msk [vmem:[#allocation2 + $0x134] sm:$0xf] %vm59_vm3, %v1363_v5  ;;  %v2435_v53 = vrot.slane %v2433_v33, 5  ;;  %v2398_v5 = vor.u32 %v2397_v6, %v8853_v57 }
 0x13a   :  { %v6231_v2 = vld [vmem:[#allocation2 + $0x10c] sm:$0xf0]  ;;  %v5938_v50 = vld [vmem:[%s10779_s0 + $0xc8] sm:$0x1]  ;;  %v9059_v55 = vrot.slane %v2439_v46, 5 }
 0x13b   :  { %1042 = vrot.lane.b32.xlu1 %v5834_v0, %s7266_s17  ;;  %v671_v0 = vld [vmem:[%s10779_s0 + $0x3c] sm:$0xe]  ;;  %v1347_v18 = vor.u32 %v1346_v37, %v1343_v1  ;;  %v5970_v19 = vld [vmem:[%s10779_s0 + $0x70] sm:$0xf]  ;;  %v1826_v37 = vrot.slane %v5938_v50, 5 }
 0x13c   :  { %1040 = vrot.lane.b32.xlu0 %v5833_v4, %s7266_s17  ;;  %v795_v4 = vrot.slane %v673_v61, 5  ;;  %v5800_v15 = vrot.slane %v671_v0, 9  ;;  %2004 = vst.msk [vmem:[#allocation2 + $0x138] sm:$0xf] %vm59_vm3, %v5970_v19  ;;  %v5868_v0 = vld [vmem:[%s10779_s0 + $0x70] sm:$0xf] }
 0x13d   :  { %v1015_v16 = vpop.permute.xlu1 %1014  ;;  %v1348_v30 = vrot.slane %v1347_v18, 4  ;;  %v7046_v51 = vld [vmem:[#allocation2 + $0xfc] sm:$0xf]  ;;  %1880 = vrot.lane.b32.xlu2 %v1810_v62, %s7266_s17  ;;  %2564 = vst.msk [vmem:[#allocation2 + $0x138] sm:$0xf] %vm623_vm7, %v8973_v43  ;;  %v1378_v38 = vshrl.u32 %v5868_v0, 16 }
 0x13e   :  { %1101 = vst.msk [vmem:[#allocation2 + $0xb8] sm:$0xf] %vm623_vm7, %v1015_v16  ;;  %v1013_v40 = vpop.permute.xlu0 %1012  ;;  %v8984_v52 = vpop.f32.mrf.mxu0  ;;  %v7048_v14 = vld [vmem:[#allocation2 + $0x108] sm:$0xf0]  ;;  %v796_v21 = vsel %vm7665_vm6, %v794_v7, %v795_v4  ;;  %v793_v24 = vsel %vm7665_vm6, %v5800_v15, %v792_v32  ;;  %v5836_v16 = vld [vmem:[%s10779_s0 + $0xa0] sm:$0xf] }
 0x13f   :  { %1100 = vst.msk [vmem:[#allocation2 + $0xa4] sm:$0xf] %vm623_vm7, %v1013_v40  ;;  %v6230_v29 = vor.u32 %v7048_v14, %v6229_v8  ;;  %v2432_v40 = vrot.slane %v2430_v10, 4  ;;  %v7129_v32 = vld [vmem:[%s10780_s1 + $0x110] sm:$0xff]  ;;  %v7128_v7 = vld [vmem:[%s10780_s1 + $0x108] sm:$0xff]  ;;  %v1374_v15 = vshll.u32 %v5868_v0, 16  ;;  %v6234_v14 = vor.u32 %v7046_v51, %v6231_v2 }
 0x140   :  { %910 = vst.msk [vmem:[#allocation2 + $0xe0] sm:$0xf] %vm59_vm3, %v796_v21  ;;  %4051 = vmatpush.bf16.msrb.mxu0 %v7129_v32  ;;  %v5869_v43 = vld [vmem:[%s10779_s0 + $0x74] sm:$0x1]  ;;  %v9091_v57 = vld [vmem:[%s10781_s2] ss:$0 sm:$0xff] }
 0x141   :  { %3753 = vmatmul.bf16.gmra.mxu0 %v6322_v41  ;;  %3990 = vmatmul.bf16.gmra.mxu3 %v6214_v44  ;;  %909 = vst.msk [vmem:[#allocation2 + $0xcc] sm:$0xf] %vm59_vm3, %v793_v24  ;;  %v9026_v34 = vpop.permute.xlu2 %1860  ;;  %v1353_v44 = vsel %vm7331_vm2, %v1348_v30, %v8966_v9  ;;  %v9049_v9 = vld [vmem:[%s10779_s0 + $0xc4] sm:$0xf]  ;;  %v2436_v41 = vor.u32 %v2435_v53, %v2432_v40  ;;  %v1384_v18 = vshll.u32 %v5869_v43, 16  ;;  %v2419_v24 = vshrl.u32 %v8917_v12, 16 }
 0x142   :  { %1602 = vst.msk [vmem:[#allocation2 + $0x120] sm:$0xf] %vm59_vm3, %v1353_v44  ;;  %v1823_v54 = vrot.slane %v9049_v9, 5  ;;  %v6028_v21 = vld [vmem:[%s10779_s0 + $0xbc] sm:$0x1]  ;;  %v9100_v30 = vrot.slane %v1374_v15, 5 }
 0x143   :  { %2509 = vrot.lane.b32.xlu1 %v2418_v58, %s7266_s17  ;;  %1938 = vst.msk [vmem:[#allocation2 + $0x120] sm:$0xf] %vm623_vm7, %v8924_v42  ;;  %v6341_v58 = vld [vmem:[#allocation2 + $0x1e0] sm:$0xf]  ;;  %v5971_v42 = vld [vmem:[%s10779_s0 + $0x78] sm:$0xf] }
 0x144   :  { %1886 = vrot.lane.b32.xlu0 %v1820_v31, %s7266_s17  ;;  %v7077_v31 = vld [vmem:[#allocation2 + $0x1f0] sm:$0xf0]  ;;  %v1825_v1 = vrot.slane %v1823_v54, 4  ;;  %v2437_v61 = vrot.slane %v2436_v41, 4  ;;  %2005 = vst.msk [vmem:[#allocation2 + $0x14c] sm:$0xf] %vm59_vm3, %v5971_v42  ;;  %4052 = vmatpush.bf16.msrb.mxu0 %v7128_v7 }
 0x145   :  { %v2482_v28 = vpop.permute.xlu1 %2481  ;;  %v6183_v3 = vld [vmem:[#allocation2 + $0xb4] sm:$0xf0]  ;;  %v1380_v11 = vrot.slane %v1378_v38, 4  ;;  %v2401_v10 = vshll.u32 %v6028_v21, 16  ;;  %v7127_v12 = vld [vmem:[%s10780_s1 + $0x100] sm:$0xff]  ;;  %v2421_v32 = vrot.slane %v2419_v24, 4 }
 0x146   :  { %2563 = vst.msk [vmem:[#allocation2 + $0x124] sm:$0xf] %vm623_vm7, %v2482_v28  ;;  %v1859_v35 = vpop.permute.xlu0 %1858  ;;  %v9029_v20 = vpop.f32.mrf.mxu0  ;;  %v7035_v26 = vld [vmem:[#allocation2 + $0xa4] sm:$0xf]  ;;  %v6342_v28 = vor.u32 %v7077_v31, %v6341_v58  ;;  %v5867_v46 = vld [vmem:[%s10779_s0 + $0x6c] sm:$0xf] }
 0x147   :  { %1939 = vst.msk [vmem:[#allocation2 + $0x134] sm:$0xf] %vm623_vm7, %v1859_v35  ;;  %v6186_v47 = vor.u32 %v7035_v26, %v6183_v3  ;;  %v1386_v3 = vrot.slane %v1384_v18, 5  ;;  %v2442_v35 = vsel %vm7331_vm2, %v2437_v61, %v9059_v55  ;;  %v1827_v26 = vsel %vm7665_vm6, %v1825_v1, %v1826_v37  ;;  %v675_v6 = vld [vmem:[%s10779_s0 + $0x4c] sm:$0xf] }
 0x148   :  { %v1365_v40 = vshrl.u32 %v5867_v46, 16  ;;  %v1368_v53 = vshll.u32 %v5867_v46, 16  ;;  %v676_v51 = vld [vmem:[%s10779_s0 + $0x50] sm:$0x1]  ;;  %v799_v50 = vrot.slane %v675_v6, 5  ;;  %4053 = vmatpush.bf16.msrb.mxu0 %v7127_v12 }
 0x149   :  { %3807 = vmatmul.bf16.gmra.mxu1 %v6186_v47  ;;  %3906 = vmatmul.bf16.gmra.mxu2 %v6230_v29  ;;  %v2399_v29 = vrot.slane %v2398_v5, 4  ;;  %v9103_v33 = vpop.permute.xlu2 %2487  ;;  %v802_v41 = vrot.slane %v676_v51, 5  ;;  %v674_v19 = vld [vmem:[%s10779_s0 + $0x48] sm:$0xe]  ;;  %v5838_v21 = vld [vmem:[%s10779_s0 + $0xac] sm:$0xf] }
 0x14a   :  { %v6249_v44 = vld [vmem:[#allocation2 + $0x120] sm:$0xf]  ;;  %v1367_v31 = vrot.slane %v1365_v40, 4  ;;  %v1370_v1 = vrot.slane %v1368_v53, 5  ;;  %v5801_v37 = vrot.slane %v674_v19, 9  ;;  %v801_v5 = vrot.slane %v799_v50, 4 }
 0x14b   :  { %1046 = vrot.lane.b32.xlu1 %v5836_v16, %s7266_s17  ;;  %v1381_v16 = vor.u32 %v1380_v11, %v9100_v30  ;;  %v5933_v11 = vld [vmem:[%s10779_s0 + $0xb4] sm:$0xe]  ;;  %v6251_v12 = vld [vmem:[#allocation2 + $0x134] sm:$0xf0]  ;;  %v5871_v46 = vld [vmem:[%s10779_s0 + $0x7c] sm:$0xf] }
 0x14c   :  { %1044 = vrot.lane.b32.xlu0 %v5835_v49, %s7266_s17  ;;  %v3769_v4 = vpop.f32.mrf.mxu2  ;;  %v2403_v49 = vrot.slane %v2401_v10, 5  ;;  %v1371_v38 = vor.u32 %v1370_v1, %v1367_v31  ;;  %v803_v24 = vsel %vm7665_vm6, %v801_v5, %v802_v41  ;;  %v1402_v40 = vshrl.u32 %v5871_v46, 16  ;;  %v6361_v53 = vld [vmem:[#allocation2 + $0x208] sm:$0xf]  ;;  %v7082_v51 = vld [vmem:[#allocation2 + $0x218] sm:$0xf0] }
 0x14d   :  { %v1019_v8 = vpop.permute.xlu1 %1018  ;;  %v3770_v47 = vadd.f32 %v9091_v57, %v3769_v4  ;;  %v1382_v2 = vrot.slane %v1381_v16, 4  ;;  %v7051_v10 = vld [vmem:[#allocation2 + $0x124] sm:$0xf]  ;;  %912 = vst.msk [vmem:[#allocation2 + $0x108] sm:$0xf] %vm59_vm3, %v803_v24  ;;  %v2443_v24 = vshrl.u32 %v9023_v59, 16 }
 0x14e   :  { %1103 = vst.msk [vmem:[#allocation2 + $0xe0] sm:$0xf] %vm623_vm7, %v1019_v8  ;;  %v1017_v25 = vpop.permute.xlu0 %1016  ;;  %v9098_v45 = vpop.f32.mrf.mxu0  ;;  %v7053_v62 = vld [vmem:[#allocation2 + $0x130] sm:$0xf0]  ;;  %v2404_v58 = vsel %vm7331_vm2, %v2399_v29, %v2403_v49  ;;  %v1372_v29 = vrot.slane %v1371_v38, 4  ;;  %v1398_v49 = vshll.u32 %v5871_v46, 16 }
 0x14f   :  { %1102 = vst.msk [vmem:[#allocation2 + $0xcc] sm:$0xf] %vm623_vm7, %v1017_v25  ;;  %v1387_v0 = vsel %vm7331_vm2, %v1382_v2, %v1386_v3  ;;  %2507 = vrot.lane.b32.xlu2 %v2404_v58, %s7266_s17  ;;  %v6250_v15 = vor.u32 %v7053_v62, %v6249_v44  ;;  %v800_v25 = vsel %vm7665_vm6, %v5801_v37, %v799_v50  ;;  %v5837_v3 = vld [vmem:[%s10779_s0 + $0xa8] sm:$0xf]  ;;  %v5972_v62 = vld [vmem:[%s10779_s0 + $0x7c] sm:$0xf] }
 0x150   :  { %1605 = vst.msk [vmem:[#allocation2 + $0x15c] sm:$0xf] %vm59_vm3, %v1387_v0  ;;  %v9183_v56 = vrot.slane %v1398_v49, 5  ;;  %v6254_v58 = vor.u32 %v7051_v10, %v6251_v12  ;;  %v5973_v31 = vld [vmem:[%s10779_s0 + $0x84] sm:$0xf] }
 0x151   :  { %3758 = vmatmul.bf16.gmra.mxu0 %v6342_v28  ;;  %3995 = vmatmul.bf16.gmra.mxu3 %v6234_v14  ;;  %v9155_v16 = vpop.permute.xlu2 %1864  ;;  %911 = vst.msk [vmem:[#allocation2 + $0xf4] sm:$0xf] %vm59_vm3, %v800_v25  ;;  %v678_v5 = vld [vmem:[%s10779_s0 + $0x58] sm:$0xf]  ;;  %v677_v59 = vld [vmem:[%s10779_s0 + $0x54] sm:$0xe] }
 0x152   :  { %2006 = vst.msk [vmem:[#allocation2 + $0x160] sm:$0xf] %vm59_vm3, %v5972_v62  ;;  %v5802_v46 = vrot.slane %v677_v59, 9  ;;  %v6037_v49 = vld [vmem:[%s10779_s0 + $0x20] sm:$0x1] }
 0x153   :  { %2513 = vrot.lane.b32.xlu1 %v2442_v35, %s7266_s17  ;;  %v5953_v35 = vrot.slane %v5933_v11, 9  ;;  %2566 = vst.msk [vmem:[#allocation2 + $0x160] sm:$0xf] %vm623_vm7, %v9103_v33  ;;  %v679_v33 = vld [vmem:[%s10779_s0 + $0x5c] sm:$0x1] }
 0x154   :  { %1890 = vrot.lane.b32.xlu0 %v1827_v26, %s7266_s17  ;;  %v3771_v42 = vpop.f32.mrf.mxu2  ;;  %v3858_v61 = vpop.f32.mrf.mxu3  ;;  %v2422_v26 = vor.u32 %v2421_v32, %v8969_v36  ;;  %v1377_v36 = vsel %vm7331_vm2, %v1372_v29, %v9100_v30  ;;  %v6031_v30 = vld [vmem:[%s10779_s0 + $0xc8] sm:$0x1]  ;;  %2007 = vst.msk [vmem:[#allocation2 + $0x174] sm:$0xf] %vm59_vm3, %v5973_v31 }
 0x155   :  { %v9134_v7 = vadd.f32 %v3858_v61, %v3770_v47  ;;  %v2486_v4 = vpop.permute.xlu1 %2485  ;;  %v6203_v43 = vld [vmem:[#allocation2 + $0xdc] sm:$0xf0]  ;;  %v3772_v44 = vadd.f32 %v9091_v57, %v3771_v42  ;;  %v1817_v6 = vsel %vm7665_vm6, %v5953_v35, %v1816_v13  ;;  %1604 = vst.msk [vmem:[#allocation2 + $0x148] sm:$0xf] %vm59_vm3, %v1377_v36  ;;  %v1404_v13 = vrot.slane %v1402_v40, 4 }
 0x156   :  { %2565 = vst.msk [vmem:[#allocation2 + $0x14c] sm:$0xf] %vm623_vm7, %v2486_v4  ;;  %v1863_v8 = vpop.permute.xlu0 %1862  ;;  %v9138_v14 = vpop.f32.mrf.mxu0  ;;  %v7040_v18 = vld [vmem:[#allocation2 + $0xcc] sm:$0xf]  ;;  %v5872_v47 = vld [vmem:[%s10779_s0 + $0x80] sm:$0x1] }
 0x157   :  { %10791 = vst [vmem:[#allocation5_spill] sm:$0xff] %v9134_v7  ;;  %v6206_v28 = vor.u32 %v7040_v18, %v6203_v43  ;;  %v1408_v2 = vshll.u32 %v5872_v47, 16  ;;  %v2423_v50 = vrot.slane %v2422_v26, 4  ;;  %v2425_v41 = vshll.u32 %v6031_v30, 16  ;;  %1884 = vrot.lane.b32.xlu2 %v1817_v6, %s7266_s17  ;;  %v6035_v6 = vld [vmem:[%s10779_s0 + $0x18] sm:$0xe] }
 0x158   :  { %1941 = vst.msk [vmem:[#allocation2 + $0x15c] sm:$0xf] %vm623_vm7, %v1863_v8  ;;  %v1405_v42 = vor.u32 %v1404_v13, %v9183_v56  ;;  %v6362_v8 = vor.u32 %v7082_v51, %v6361_v53  ;;  %v6036_v47 = vld [vmem:[%s10779_s0 + $0x1c] sm:$0xf]  ;;  %v6083_v30 = vrot.slane %v6035_v6, 9  ;;  %v2445_v13 = vrot.slane %v2443_v24, 4 }
 0x159   :  { %3812 = vmatmul.bf16.gmra.mxu1 %v6206_v28  ;;  %3911 = vmatmul.bf16.gmra.mxu2 %v6250_v15  ;;  %1940 = vst.msk [vmem:[#allocation2 + $0x148] sm:$0xf] %vm623_vm7, %v9026_v34  ;;  %v5870_v34 = vld [vmem:[%s10779_s0 + $0x78] sm:$0xf]  ;;  %v1410_v61 = vrot.slane %v1408_v2, 5  ;;  %v2427_v0 = vrot.slane %v2425_v41, 5  ;;  %v9219_v26 = vpop.permute.xlu2 %2491 }
 0x15a   :  { %v1389_v15 = vshrl.u32 %v5870_v34, 16  ;;  %v1392_v38 = vshll.u32 %v5870_v34, 16  ;;  %v1406_v18 = vrot.slane %v1405_v42, 4  ;;  %v809_v28 = vrot.slane %v679_v33, 5  ;;  %v5974_v24 = vld [vmem:[%s10779_s0 + $0x88] sm:$0xf] }
 0x15b   :  { %1050 = vrot.lane.b32.xlu1 %v5838_v21, %s7266_s17  ;;  %v806_v21 = vrot.slane %v678_v5, 5  ;;  %v2428_v12 = vsel %vm7331_vm2, %v2423_v50, %v2427_v0  ;;  %v2446_v33 = vor.u32 %v2445_v13, %v9059_v55  ;;  %2008 = vst.msk [vmem:[#allocation2 + $0x188] sm:$0xf] %vm59_vm3, %v5974_v24  ;;  %v5975_v6 = vld [vmem:[%s10779_s0 + $0x90] sm:$0xf] }
 0x15c   :  { %1048 = vrot.lane.b32.xlu0 %v5837_v3, %s7266_s17  ;;  %v3774_v19 = vpop.f32.mrf.mxu2  ;;  %v3860_v32 = vpop.f32.mrf.mxu3  ;;  %v1391_v25 = vrot.slane %v1389_v15, 4  ;;  %v1394_v11 = vrot.slane %v1392_v38, 5  ;;  %v1411_v29 = vsel %vm7331_vm2, %v1406_v18, %v1410_v61  ;;  %v2682_v61 = vrot.slane %v6037_v49, 5  ;;  %v5936_v15 = vld [vmem:[%s10779_s0 + $0xc0] sm:$0xe] }
 0x15d   :  { %v9194_v1 = vadd.f32 %v3860_v32, %v3772_v44  ;;  %v1023_v37 = vpop.permute.xlu1 %1022  ;;  %v3775_v3 = vadd.f32 %v9091_v57, %v3774_v19  ;;  %v808_v35 = vrot.slane %v806_v21, 4  ;;  %1607 = vst.msk [vmem:[#allocation2 + $0x184] sm:$0xf] %vm59_vm3, %v1411_v29  ;;  %v807_v2 = vsel %vm7665_vm6, %v5802_v46, %v806_v21  ;;  %v7056_v38 = vld [vmem:[#allocation2 + $0x14c] sm:$0xf] }
 0x15e   :  { %1105 = vst.msk [vmem:[#allocation2 + $0x108] sm:$0xf] %vm623_vm7, %v1023_v37  ;;  %v1021_v4 = vpop.permute.xlu0 %1020  ;;  %v9203_v43 = vpop.f32.mrf.mxu0  ;;  %v1395_v62 = vor.u32 %v1394_v11, %v1391_v25  ;;  %v5954_v18 = vrot.slane %v5936_v15, 9  ;;  %v5874_v25 = vld [vmem:[%s10779_s0 + $0x88] sm:$0xf]  ;;  %v2447_v59 = vrot.slane %v2446_v33, 4 }
 0x15f   :  { %10792 = vst [vmem:[#allocation6_spill] sm:$0xff] %v9194_v1  ;;  %v7058_v10 = vld [vmem:[#allocation2 + $0x158] sm:$0xf0]  ;;  %v810_v36 = vsel %vm7665_vm6, %v808_v35, %v809_v28  ;;  %2511 = vrot.lane.b32.xlu2 %v2428_v12, %s7266_s17  ;;  %v1422_v11 = vshll.u32 %v5874_v25, 16  ;;  %v1426_v28 = vshrl.u32 %v5874_v25, 16 }
 0x160   :  { %1104 = vst.msk [vmem:[#allocation2 + $0xf4] sm:$0xf] %vm623_vm7, %v1021_v4  ;;  %v6269_v44 = vld [vmem:[#allocation2 + $0x148] sm:$0xf]  ;;  %v1396_v51 = vrot.slane %v1395_v62, 4  ;;  %v1824_v55 = vsel %vm7665_vm6, %v5954_v18, %v1823_v54 }
 0x161   :  { %3763 = vmatmul.bf16.gmra.mxu0 %v6362_v8  ;;  %4000 = vmatmul.bf16.gmra.mxu3 %v6254_v58  ;;  %914 = vst.msk [vmem:[#allocation2 + $0x130] sm:$0xf] %vm59_vm3, %v810_v36  ;;  %v6270_v32 = vor.u32 %v7058_v10, %v6269_v44  ;;  %v2679_v58 = vrot.slane %v6036_v47, 5  ;;  %v6271_v8 = vld [vmem:[#allocation2 + $0x15c] sm:$0xf0]  ;;  %v9277_v10 = vpop.permute.xlu2 %1868  ;;  %v9283_v54 = vrot.slane %v1422_v11, 5 }
 0x162   :  { %913 = vst.msk [vmem:[#allocation2 + $0x11c] sm:$0xf] %vm59_vm3, %v807_v2  ;;  %v1401_v42 = vsel %vm7331_vm2, %v1396_v51, %v9183_v56  ;;  %v6034_v29 = vld [vmem:[%s10779_s0 + $0xd4] sm:$0x1]  ;;  %v1428_v35 = vrot.slane %v1426_v28, 4  ;;  %v6274_v36 = vor.u32 %v7056_v38, %v6271_v8 }
 0x163   :  { %v2680_v5 = vsel %vm7665_vm6, %v6083_v30, %v2679_v58  ;;  %v2681_v4 = vrot.slane %v2679_v58, 4  ;;  %1606 = vst.msk [vmem:[#allocation2 + $0x170] sm:$0xf] %vm59_vm3, %v1401_v42  ;;  %v2449_v44 = vshll.u32 %v6034_v29, 16  ;;  %v5873_v47 = vld [vmem:[%s10779_s0 + $0x84] sm:$0xf] }
 0x164   :  { %v3776_v40 = vpop.f32.mrf.mxu2  ;;  %v3863_v53 = vpop.f32.mrf.mxu3  ;;  %1942 = vst.msk [vmem:[#allocation2 + $0x170] sm:$0xf] %vm623_vm7, %v9155_v16  ;;  %v5875_v16 = vld [vmem:[%s10779_s0 + $0x8c] sm:$0x1]  ;;  %v1413_v30 = vshrl.u32 %v5873_v47, 16 }
 0x165   :  { %v9237_v50 = vadd.f32 %v3863_v53, %v3775_v3  ;;  %v2490_v41 = vpop.permute.xlu1 %2489  ;;  %v6223_v19 = vld [vmem:[#allocation2 + $0x104] sm:$0xf0]  ;;  %v3777_v56 = vadd.f32 %v9091_v57, %v3776_v40  ;;  %v2683_v21 = vsel %vm7665_vm6, %v2681_v4, %v2682_v61  ;;  %2821 = vst.msk [vmem:[#allocation2 + $0x10] sm:$0xf] %vm59_vm3, %v2680_v5  ;;  %v1432_v3 = vshll.u32 %v5875_v16, 16 }
 0x166   :  { %2567 = vst.msk [vmem:[#allocation2 + $0x174] sm:$0xf] %vm623_vm7, %v2490_v41  ;;  %v1867_v31 = vpop.permute.xlu0 %1866  ;;  %v9241_v34 = vpop.f32.mrf.mxu0  ;;  %v1429_v53 = vor.u32 %v1428_v35, %v9283_v54  ;;  %v2451_v2 = vrot.slane %v2449_v44, 5  ;;  %v681_v13 = vld [vmem:[%s10779_s0 + $0x64] sm:$0xf] }
 0x167   :  { %10793 = vst [vmem:[#allocation7_spill] sm:$0xff] %v9237_v50  ;;  %v7045_v37 = vld [vmem:[#allocation2 + $0xf4] sm:$0xf]  ;;  %1888 = vrot.lane.b32.xlu2 %v1824_v55, %s7266_s17  ;;  %v1434_v51 = vrot.slane %v1432_v3, 5  ;;  %v682_v42 = vld [vmem:[%s10779_s0 + $0x68] sm:$0x1] }
 0x168   :  { %1943 = vst.msk [vmem:[#allocation2 + $0x184] sm:$0xf] %vm623_vm7, %v1867_v31  ;;  %v6226_v0 = vor.u32 %v7045_v37, %v6223_v19  ;;  %v1430_v41 = vrot.slane %v1429_v53, 4  ;;  %v2452_v31 = vsel %vm7331_vm2, %v2447_v59, %v2451_v2  ;;  %v813_v61 = vrot.slane %v681_v13, 5  ;;  %v680_v15 = vld [vmem:[%s10779_s0 + $0x60] sm:$0xe] }
 0x169   :  { %3916 = vmatmul.bf16.gmra.mxu2 %v6270_v32  ;;  %2822 = vst.msk [vmem:[#allocation2 + $0x24] sm:$0xf] %vm59_vm3, %v2683_v21  ;;  %v1415_v32 = vrot.slane %v1413_v30, 4  ;;  %v816_v33 = vrot.slane %v682_v42, 5  ;;  %v5803_v24 = vrot.slane %v680_v15, 9 }
 0x16a   :  { %3817 = vmatmul.bf16.gmra.mxu1 %v6226_v0  ;;  %2568 = vst.msk [vmem:[#allocation2 + $0x188] sm:$0xf] %vm623_vm7, %v9219_v26  ;;  %v1416_v26 = vshll.u32 %v5873_v47, 16  ;;  %v1435_v5 = vsel %vm7331_vm2, %v1430_v41, %v1434_v51  ;;  %v815_v18 = vrot.slane %v813_v61, 4  ;;  %v6038_v25 = vld [vmem:[%s10779_s0 + $0x24] sm:$0xe] }
 0x16b   :  { %2009 = vst.msk [vmem:[#allocation2 + $0x19c] sm:$0xf] %vm59_vm3, %v5975_v6  ;;  %v6289_v4 = vld [vmem:[#allocation2 + $0x170] sm:$0xf]  ;;  %v6039_v55 = vld [vmem:[%s10779_s0 + $0x28] sm:$0xf]  ;;  %v814_v51 = vsel %vm7665_vm6, %v5803_v24, %v813_v61 }
 0x16c   :  { %v3865_v12 = vpop.f32.mrf.mxu3  ;;  %v9279_v9 = vpop.f32.mrf.mxu2  ;;  %v6117_v58 = vld [vmem:[#allocation2 + $0x10] sm:$0xf]  ;;  %v1418_v37 = vrot.slane %v1416_v26, 5  ;;  %1609 = vst.msk [vmem:[#allocation2 + $0x1ac] sm:$0xf] %vm59_vm3, %v1435_v5 }
 0x16d   :  { %v9285_v62 = vadd.f32 %v3865_v12, %v3777_v56  ;;  %v1027_v46 = vpop.permute.xlu1 %1026  ;;  %v6040_v29 = vld [vmem:[%s10779_s0 + $0x2c] sm:$0x1]  ;;  %v2496_v12 = vpop.permute.xlu2 %2495  ;;  %v7061_v2 = vld [vmem:[#allocation2 + $0x174] sm:$0xf]  ;;  %v5878_v41 = vld [vmem:[%s10779_s0 + $0x98] sm:$0x1] }
 0x16e   :  { %1107 = vst.msk [vmem:[#allocation2 + $0x130] sm:$0xf] %vm623_vm7, %v1027_v46  ;;  %v1025_v49 = vpop.permute.xlu0 %1024  ;;  %v9296_v40 = vpop.f32.mrf.mxu0  ;;  %v1419_v8 = vor.u32 %v1418_v37, %v1415_v32  ;;  %v6084_v46 = vrot.slane %v6038_v25, 9  ;;  %v2689_v53 = vrot.slane %v6040_v29, 5  ;;  %v5877_v13 = vld [vmem:[%s10779_s0 + $0x94] sm:$0xf] }
 0x16f   :  { %10794 = vst [vmem:[#allocation8_spill] sm:$0xff] %v9285_v62  ;;  %v7063_v19 = vld [vmem:[#allocation2 + $0x180] sm:$0xf0]  ;;  %2515 = vrot.lane.b32.xlu2 %v2452_v31, %s7266_s17  ;;  %v1446_v32 = vshll.u32 %v5877_v13, 16  ;;  %v1456_v31 = vshll.u32 %v5878_v41, 16 }
 0x170   :  { %1106 = vst.msk [vmem:[#allocation2 + $0x11c] sm:$0xf] %vm623_vm7, %v1025_v49  ;;  %v7019_v0 = vld [vmem:[#allocation2 + $0x20] sm:$0xf0]  ;;  %v6290_v28 = vor.u32 %v7063_v19, %v6289_v4  ;;  %v1420_v3 = vrot.slane %v1419_v8, 4  ;;  %v817_v49 = vsel %vm7665_vm6, %v815_v18, %v816_v33 }
 0x171   :  { %4005 = vmatmul.bf16.gmra.mxu3 %v6274_v36  ;;  %v6118_v38 = vor.u32 %v7019_v0, %v6117_v58  ;;  %v2686_v36 = vrot.slane %v6039_v55, 5  ;;  %v6291_v30 = vld [vmem:[#allocation2 + $0x184] sm:$0xf0]  ;;  %916 = vst.msk [vmem:[#allocation2 + $0x158] sm:$0xf] %vm59_vm3, %v817_v49  ;;  %v1450_v58 = vshrl.u32 %v5877_v13, 16 }
 0x172   :  { %v1425_v47 = vsel %vm7331_vm2, %v1420_v3, %v9283_v54  ;;  %915 = vst.msk [vmem:[#allocation2 + $0x144] sm:$0xf] %vm59_vm3, %v814_v51  ;;  %v5876_v37 = vld [vmem:[%s10779_s0 + $0x90] sm:$0xf]  ;;  %v9370_v5 = vrot.slane %v1446_v32, 5  ;;  %v6294_v8 = vor.u32 %v7061_v2, %v6291_v30  ;;  %v1458_v3 = vrot.slane %v1456_v31, 5 }
 0x173   :  { %6563 = vmatmul.msk.bf16.vlgmr.msrb.gmra.mxu0 %vm3641_vm8, %v6118_v38  ;;  %1608 = vst.msk [vmem:[#allocation2 + $0x198] sm:$0xf] %vm59_vm3, %v1425_v47  ;;  %v2688_v26 = vrot.slane %v2686_v36, 4  ;;  %v2687_v54 = vsel %vm7665_vm6, %v6084_v46, %v2686_v36  ;;  %v684_v42 = vld [vmem:[%s10779_s0 + $0x70] sm:$0xf]  ;;  %v1452_v4 = vrot.slane %v1450_v58, 4 }
 0x174   :  { %v9315_v56 = vpop.f32.mrf.mxu2  ;;  %v9317_v21 = vpop.f32.mrf.mxu3  ;;  %1944 = vst.msk [vmem:[#allocation2 + $0x198] sm:$0xf] %vm623_vm7, %v9277_v10  ;;  %v5976_v10 = vld [vmem:[%s10779_s0 + $0x94] sm:$0xf]  ;;  %v1437_v15 = vshrl.u32 %v5876_v37, 16  ;;  %v1440_v33 = vshll.u32 %v5876_v37, 16 }
 0x175   :  { %v2494_v16 = vpop.permute.xlu1 %2493  ;;  %v6243_v11 = vld [vmem:[#allocation2 + $0x12c] sm:$0xf0]  ;;  %v2690_v19 = vsel %vm7665_vm6, %v2688_v26, %v2689_v53  ;;  %2823 = vst.msk [vmem:[#allocation2 + $0x38] sm:$0xf] %vm59_vm3, %v2687_v54  ;;  %v5977_v18 = vld [vmem:[%s10779_s0 + $0x9c] sm:$0xf]  ;;  %v9376_v24 = vpop.permute.xlu2 %1872 }
 0x176   :  { %2569 = vst.msk [vmem:[#allocation2 + $0x19c] sm:$0xf] %vm623_vm7, %v2494_v16  ;;  %v1871_v35 = vpop.permute.xlu0 %1870  ;;  %v9331_v59 = vpop.f32.mrf.mxu0  ;;  %v685_v25 = vld [vmem:[%s10779_s0 + $0x74] sm:$0x1]  ;;  %v820_v55 = vrot.slane %v684_v42, 5  ;;  %v1439_v29 = vrot.slane %v1437_v15, 4 }
 0x177   :  { %v7050_v44 = vld [vmem:[#allocation2 + $0x11c] sm:$0xf]  ;;  %1945 = vst.msk [vmem:[#allocation2 + $0x1ac] sm:$0xf] %vm623_vm7, %v1871_v35  ;;  %v823_v35 = vrot.slane %v685_v25, 5 }
 0x178   :  { %v6246_v6 = vor.u32 %v7050_v44, %v6243_v11  ;;  %2824 = vst.msk [vmem:[#allocation2 + $0x4c] sm:$0xf] %vm59_vm3, %v2690_v19  ;;  %v1442_v44 = vrot.slane %v1440_v33, 5  ;;  %v822_v46 = vrot.slane %v820_v55, 4  ;;  %v683_v36 = vld [vmem:[%s10779_s0 + $0x6c] sm:$0xe] }
 0x179   :  { %3921 = vmatmul.bf16.gmra.mxu2 %v6290_v28  ;;  %v1453_v28 = vor.u32 %v1452_v4, %v9370_v5  ;;  %2010 = vst.msk [vmem:[#allocation2 + $0x1b0] sm:$0xf] %vm59_vm3, %v5976_v10  ;;  %v5804_v49 = vrot.slane %v683_v36, 9  ;;  %v6041_v30 = vld [vmem:[%s10779_s0 + $0x30] sm:$0xe]  ;;  %v3700_v4 = vadd.f32 %v9091_v57, %v8681_v48 }
 0x17a   :  { %3822 = vmatmul.bf16.gmra.mxu1 %v6246_v6  ;;  %2570 = vst.msk [vmem:[#allocation2 + $0x1b0] sm:$0xf] %vm623_vm7, %v2496_v12  ;;  %v1443_v51 = vor.u32 %v1442_v44, %v1439_v29  ;;  %v824_v2 = vsel %vm7665_vm6, %v822_v46, %v823_v35  ;;  %v6042_v12 = vld [vmem:[%s10779_s0 + $0x34] sm:$0xf]  ;;  %v6043_v13 = vld [vmem:[%s10779_s0 + $0x38] sm:$0x1] }
 0x17b   :  { %v1454_v6 = vrot.slane %v1453_v28, 4  ;;  %v6309_v53 = vld [vmem:[#allocation2 + $0x198] sm:$0xf]  ;;  %2011 = vst.msk [vmem:[#allocation2 + $0x1c4] sm:$0xf] %vm59_vm3, %v5977_v18  ;;  %v821_v54 = vsel %vm7665_vm6, %v5804_v49, %v820_v55  ;;  %v6085_v32 = vrot.slane %v6041_v30, 9 }
 0x17c   :  { %v9365_v61 = vpop.f32.mrf.mxu2  ;;  %v9367_v0 = vpop.f32.mrf.mxu3  ;;  %v6137_v41 = vld [vmem:[#allocation2 + $0x38] sm:$0xf]  ;;  %v1444_v19 = vrot.slane %v1443_v51, 4  ;;  %918 = vst.msk [vmem:[#allocation2 + $0x180] sm:$0xf] %vm59_vm3, %v824_v2  ;;  %v2693_v37 = vrot.slane %v6042_v12, 5 }
 0x17d   :  { %v1031_v38 = vpop.permute.xlu1 %1030  ;;  %v1459_v26 = vsel %vm7331_vm2, %v1454_v6, %v1458_v3  ;;  %v2696_v42 = vrot.slane %v6043_v13, 5  ;;  %917 = vst.msk [vmem:[#allocation2 + $0x16c] sm:$0xf] %vm59_vm3, %v821_v54  ;;  %v5880_v44 = vld [vmem:[%s10779_s0 + $0xa0] sm:$0xf] }
 0x17e   :  { %1109 = vst.msk [vmem:[#allocation2 + $0x158] sm:$0xf] %vm623_vm7, %v1031_v38  ;;  %v1029_v16 = vpop.permute.xlu0 %1028  ;;  %v9382_v11 = vpop.f32.mrf.mxu0  ;;  %v7068_v47 = vld [vmem:[#allocation2 + $0x1a8] sm:$0xf0]  ;;  %v1449_v33 = vsel %vm7331_vm2, %v1444_v19, %v9370_v5  ;;  %v2695_v28 = vrot.slane %v2693_v37, 4  ;;  %v2694_v35 = vsel %vm7665_vm6, %v6085_v32, %v2693_v37  ;;  %v1470_v51 = vshll.u32 %v5880_v44, 16 }
 0x17f   :  { %1108 = vst.msk [vmem:[#allocation2 + $0x144] sm:$0xf] %vm623_vm7, %v1029_v16  ;;  %v7024_v58 = vld [vmem:[#allocation2 + $0x48] sm:$0xf0]  ;;  %v6310_v18 = vor.u32 %v7068_v47, %v6309_v53  ;;  %v5978_v5 = vld [vmem:[%s10779_s0 + $0xa0] sm:$0xf]  ;;  %v2500_v47 = vpop.permute.xlu2 %2499 }
 0x180   :  { %1611 = vst.msk [vmem:[#allocation2 + $0x1d4] sm:$0xf] %vm59_vm3, %v1459_v26  ;;  %v6138_v15 = vor.u32 %v7024_v58, %v6137_v41  ;;  %v7066_v46 = vld [vmem:[#allocation2 + $0x19c] sm:$0xf]  ;;  %v2697_v6 = vsel %vm7665_vm6, %v2695_v28, %v2696_v42  ;;  %v5881_v49 = vld [vmem:[%s10779_s0 + $0xa4] sm:$0x1] }
 0x181   :  { %4010 = vmatmul.bf16.gmra.mxu3 %v6294_v8  ;;  %1610 = vst.msk [vmem:[#allocation2 + $0x1c0] sm:$0xf] %vm59_vm3, %v1449_v33  ;;  %v6311_v36 = vld [vmem:[#allocation2 + $0x1ac] sm:$0xf0]  ;;  %v1474_v2 = vshrl.u32 %v5880_v44, 16  ;;  %v1480_v26 = vshll.u32 %v5881_v49, 16 }
 0x182   :  { %1946 = vst.msk [vmem:[#allocation2 + $0x1c0] sm:$0xf] %vm623_vm7, %v9376_v24  ;;  %v5879_v30 = vld [vmem:[%s10779_s0 + $0x9c] sm:$0xf]  ;;  %v1472_v13 = vrot.slane %v1470_v51, 5 }
 0x183   :  { %6564 = vmatmul.msk.bf16.gmra.mxu0 %vm3641_vm8, %v6138_v15  ;;  %2825 = vst.msk [vmem:[#allocation2 + $0x60] sm:$0xf] %vm59_vm3, %v2694_v35  ;;  %v1461_v54 = vshrl.u32 %v5879_v30, 16  ;;  %v1464_v12 = vshll.u32 %v5879_v30, 16  ;;  %v1476_v41 = vrot.slane %v1474_v2, 4  ;;  %v1482_v37 = vrot.slane %v1480_v26, 5 }
 0x184   :  { %v9408_v31 = vpop.f32.mrf.mxu2  ;;  %v9410_v10 = vpop.f32.mrf.mxu3  ;;  %2826 = vst.msk [vmem:[#allocation2 + $0x74] sm:$0xf] %vm59_vm3, %v2697_v6  ;;  %v687_v24 = vld [vmem:[%s10779_s0 + $0x7c] sm:$0xf] }
 0x185   :  { %v2498_v38 = vpop.permute.xlu1 %2497  ;;  %v6263_v8 = vld [vmem:[#allocation2 + $0x154] sm:$0xf0]  ;;  %2012 = vst.msk [vmem:[#allocation2 + $0x1d8] sm:$0xf] %vm59_vm3, %v5978_v5  ;;  %v1463_v42 = vrot.slane %v1461_v54, 4  ;;  %v827_v15 = vrot.slane %v687_v24, 5  ;;  %v1477_v33 = vor.u32 %v1476_v41, %v1472_v13 }
 0x186   :  { %2571 = vst.msk [vmem:[#allocation2 + $0x1c4] sm:$0xf] %vm623_vm7, %v2498_v38  ;;  %v3788_v25 = vpop.f32.mrf.mxu1  ;;  %v1875_v55 = vpop.permute.xlu0 %1874  ;;  %v7055_v16 = vld [vmem:[#allocation2 + $0x144] sm:$0xf]  ;;  %v3702_v38 = vadd.f32 %v9091_v57, %v8730_v22  ;;  %v6044_v30 = vld [vmem:[%s10779_s0 + $0x3c] sm:$0xe] }
 0x187   :  { %v3789_v3 = vadd.f32 %v3788_v25, %v3700_v4  ;;  %1947 = vst.msk [vmem:[#allocation2 + $0x1d4] sm:$0xf] %vm623_vm7, %v1875_v55  ;;  %v9422_v48 = vpop.f32.mrf.mxu0  ;;  %v6266_v29 = vor.u32 %v7055_v16, %v6263_v8  ;;  %v1466_v4 = vrot.slane %v1464_v12, 5  ;;  %v686_v25 = vld [vmem:[%s10779_s0 + $0x78] sm:$0xe]  ;;  %v1478_v5 = vrot.slane %v1477_v33, 4 }
 0x188   :  { %2572 = vst.msk [vmem:[#allocation2 + $0x1d8] sm:$0xf] %vm623_vm7, %v2500_v47  ;;  %v5805_v44 = vrot.slane %v686_v25, 9  ;;  %v1877_v47 = vpop.permute.xlu2 %1876  ;;  %v6045_v12 = vld [vmem:[%s10779_s0 + $0x40] sm:$0xf]  ;;  %v6086_v24 = vrot.slane %v6044_v30, 9 }
 0x189   :  { %v3878_v53 = vadd.f32 %v9279_v9, %v3789_v3  ;;  %3926 = vmatmul.bf16.gmra.mxu2 %v6310_v18  ;;  %v5979_v9 = vld [vmem:[%s10779_s0 + $0xa8] sm:$0xf]  ;;  %v6314_v18 = vor.u32 %v7066_v46, %v6311_v36  ;;  %v1467_v28 = vor.u32 %v1466_v4, %v1463_v42  ;;  %v829_v3 = vrot.slane %v827_v15, 4  ;;  %v6329_v46 = vld [vmem:[#allocation2 + $0x1c0] sm:$0xf] }
 0x18a   :  { %3827 = vmatmul.bf16.gmra.mxu1 %v6266_v29  ;;  %2013 = vst.msk [vmem:[#allocation2 + $0x1ec] sm:$0xf] %vm59_vm3, %v5979_v9  ;;  %v6157_v51 = vld [vmem:[#allocation2 + $0x60] sm:$0xf]  ;;  %v1483_v2 = vsel %vm7331_vm2, %v1478_v5, %v1482_v37  ;;  %v6046_v41 = vld [vmem:[%s10779_s0 + $0x44] sm:$0x1] }
 0x18b   :  { %v9453_v19 = vadd.f32 %v9317_v21, %v3878_v53  ;;  %v688_v21 = vld [vmem:[%s10779_s0 + $0x80] sm:$0x1]  ;;  %v1468_v6 = vrot.slane %v1467_v28, 4  ;;  %v7029_v26 = vld [vmem:[#allocation2 + $0x70] sm:$0xf0]  ;;  %v2700_v37 = vrot.slane %v6045_v12, 5 }
 0x18c   :  { %v9455_v32 = vpop.f32.mrf.mxu2  ;;  %v9457_v58 = vpop.f32.mrf.mxu3  ;;  %v830_v22 = vrot.slane %v688_v21, 5  ;;  %1613 = vst.msk [vmem:[#allocation2 + $0x1fc] sm:$0xf] %vm59_vm3, %v1483_v2  ;;  %v6158_v9 = vor.u32 %v7029_v26, %v6157_v51  ;;  %v5980_v28 = vld [vmem:[%s10779_s0 + $0xac] sm:$0xf] }
 0x18d   :  { %v1035_v8 = vpop.permute.xlu1 %1034  ;;  %v1473_v54 = vsel %vm7331_vm2, %v1468_v6, %v1472_v13  ;;  %v2701_v21 = vsel %vm7665_vm6, %v6086_v24, %v2700_v37  ;;  %v5981_v5 = vld [vmem:[%s10779_s0 + $0xb4] sm:$0xf]  ;;  %v5884_v6 = vld [vmem:[%s10779_s0 + $0xb0] sm:$0x1]  ;;  %v5882_v2 = vld [vmem:[%s10779_s0 + $0xa8] sm:$0xf] }
 0x18e   :  { %1111 = vst.msk [vmem:[#allocation2 + $0x180] sm:$0xf] %vm623_vm7, %v1035_v8  ;;  %v3790_v55 = vpop.f32.mrf.mxu1  ;;  %v1033_v16 = vpop.permute.xlu0 %1032  ;;  %v7073_v36 = vld [vmem:[#allocation2 + $0x1d0] sm:$0xf0]  ;;  %v831_v49 = vsel %vm7665_vm6, %v829_v3, %v830_v22  ;;  %v1504_v51 = vshll.u32 %v5884_v6, 16  ;;  %v1488_v12 = vshll.u32 %v5882_v2, 16 }
 0x18f   :  { %v3791_v29 = vadd.f32 %v3790_v55, %v3702_v38  ;;  %1110 = vst.msk [vmem:[#allocation2 + $0x16c] sm:$0xf] %vm623_vm7, %v1033_v16  ;;  %v9471_v35 = vpop.f32.mrf.mxu0  ;;  %v3705_v38 = vadd.f32 %v9091_v57, %v8777_v63  ;;  %v6330_v33 = vor.u32 %v7073_v36, %v6329_v46  ;;  %v7071_v46 = vld [vmem:[#allocation2 + $0x1c4] sm:$0xf]  ;;  %v6331_v36 = vld [vmem:[#allocation2 + $0x1d4] sm:$0xf0] }
 0x190   :  { %920 = vst.msk [vmem:[#allocation2 + $0x1a8] sm:$0xf] %vm59_vm3, %v831_v49  ;;  %v2504_v30 = vpop.permute.xlu2 %2503 }
 0x191   :  { %v3880_v53 = vadd.f32 %v9315_v56, %v3791_v29  ;;  %4015 = vmatmul.bf16.gmra.mxu3 %v6314_v18  ;;  %v828_v56 = vsel %vm7665_vm6, %v5805_v44, %v827_v15  ;;  %1612 = vst.msk [vmem:[#allocation2 + $0x1e8] sm:$0xf] %vm59_vm3, %v1473_v54  ;;  %v2703_v15 = vrot.slane %v6046_v41, 5  ;;  %v5883_v44 = vld [vmem:[%s10779_s0 + $0xac] sm:$0xf] }
 0x192   :  { %1948 = vst.msk [vmem:[#allocation2 + $0x1e8] sm:$0xf] %vm623_vm7, %v1877_v47  ;;  %v1494_v47 = vshll.u32 %v5883_v44, 16  ;;  %v1498_v49 = vshrl.u32 %v5883_v44, 16 }
 0x193   :  { %v9496_v42 = vadd.f32 %v9367_v0, %v3880_v53  ;;  %919 = vst.msk [vmem:[#allocation2 + $0x194] sm:$0xf] %vm59_vm3, %v828_v56  ;;  %v2702_v0 = vrot.slane %v2700_v37, 4  ;;  %6565 = vmatmul.msk.bf16.gmra.mxu0 %vm3641_vm8, %v6158_v9  ;;  %v1485_v56 = vshrl.u32 %v5882_v2, 16  ;;  %v1506_v9 = vrot.slane %v1504_v51, 5 }
 0x194   :  { %v9498_v13 = vpop.f32.mrf.mxu2  ;;  %v9500_v4 = vpop.f32.mrf.mxu3  ;;  %2827 = vst.msk [vmem:[#allocation2 + $0x88] sm:$0xf] %vm59_vm3, %v2701_v21  ;;  %v1496_v26 = vrot.slane %v1494_v47, 5  ;;  %v1500_v54 = vrot.slane %v1498_v49, 4  ;;  %v6334_v21 = vor.u32 %v7071_v46, %v6331_v36  ;;  %v6047_v51 = vld [vmem:[%s10779_s0 + $0x48] sm:$0xe] }
 0x195   :  { %v2502_v8 = vpop.permute.xlu1 %2501  ;;  %v6283_v18 = vld [vmem:[#allocation2 + $0x17c] sm:$0xf0]  ;;  %v2704_v29 = vsel %vm7665_vm6, %v2702_v0, %v2703_v15  ;;  %2014 = vst.msk [vmem:[#allocation2 + $0x200] sm:$0xf] %vm59_vm3, %v5980_v28  ;;  %v1487_v15 = vrot.slane %v1485_v56, 4 }
 0x196   :  { %2573 = vst.msk [vmem:[#allocation2 + $0x1ec] sm:$0xf] %vm623_vm7, %v2502_v8  ;;  %v3793_v25 = vpop.f32.mrf.mxu1  ;;  %v1879_v55 = vpop.permute.xlu0 %1878  ;;  %v7060_v16 = vld [vmem:[#allocation2 + $0x16c] sm:$0xf]  ;;  %v1501_v37 = vor.u32 %v1500_v54, %v1496_v26  ;;  %v690_v8 = vld [vmem:[%s10779_s0 + $0x88] sm:$0xf] }
 0x197   :  { %v3794_v63 = vadd.f32 %v3793_v25, %v3705_v38  ;;  %1949 = vst.msk [vmem:[#allocation2 + $0x1fc] sm:$0xf] %vm623_vm7, %v1879_v55  ;;  %v9514_v3 = vpop.f32.mrf.mxu0  ;;  %v6286_v22 = vor.u32 %v7060_v16, %v6283_v18  ;;  %v1490_v38 = vrot.slane %v1488_v12, 5  ;;  %v3707_v18 = vadd.f32 %v9091_v57, %v8831_v39  ;;  %v689_v25 = vld [vmem:[%s10779_s0 + $0x84] sm:$0xe] }
 0x198   :  { %2828 = vst.msk [vmem:[#allocation2 + $0x9c] sm:$0xf] %vm59_vm3, %v2704_v29  ;;  %v834_v0 = vrot.slane %v690_v8, 5  ;;  %v1502_v28 = vrot.slane %v1501_v37, 4  ;;  %v6048_v2 = vld [vmem:[%s10779_s0 + $0x4c] sm:$0xf]  ;;  %v1881_v56 = vpop.permute.xlu2 %1880 }
 0x199   :  { %v3883_v53 = vadd.f32 %v9365_v61, %v3794_v63  ;;  %3931 = vmatmul.bf16.gmra.mxu2 %v6330_v33  ;;  %2574 = vst.msk [vmem:[#allocation2 + $0x200] sm:$0xf] %vm623_vm7, %v2504_v30  ;;  %v1491_v63 = vor.u32 %v1490_v38, %v1487_v15  ;;  %v6349_v6 = vld [vmem:[#allocation2 + $0x1e8] sm:$0xf]  ;;  %v6049_v12 = vld [vmem:[%s10779_s0 + $0x50] sm:$0x1] }
 0x19a   :  { %3832 = vmatmul.bf16.gmra.mxu1 %v6286_v22  ;;  %2015 = vst.msk [vmem:[#allocation2 + $0x214] sm:$0xf] %vm59_vm3, %v5981_v5  ;;  %v836_v57 = vrot.slane %v834_v0, 4  ;;  %v5806_v5 = vrot.slane %v689_v25, 9  ;;  %v1507_v36 = vsel %vm7331_vm2, %v1502_v28, %v1506_v9  ;;  %v6087_v37 = vrot.slane %v6047_v51, 9 }
 0x19b   :  { %v9536_v61 = vadd.f32 %v9410_v10, %v3883_v53  ;;  %v691_v10 = vld [vmem:[%s10779_s0 + $0x8c] sm:$0x1]  ;;  %v6177_v44 = vld [vmem:[#allocation2 + $0x88] sm:$0xf]  ;;  %v1492_v47 = vrot.slane %v1491_v63, 4  ;;  %v2707_v15 = vrot.slane %v6048_v2, 5 }
 0x19c   :  { %v9538_v41 = vpop.f32.mrf.mxu2  ;;  %v9540_v24 = vpop.f32.mrf.mxu3  ;;  %v837_v22 = vrot.slane %v691_v10, 5  ;;  %1615 = vst.msk [vmem:[#allocation2 + $0x224] sm:$0xf] %vm59_vm3, %v1507_v36  ;;  %v2710_v38 = vrot.slane %v6049_v12, 5  ;;  %v5887_v36 = vld [vmem:[%s10779_s0 + $0xbc] sm:$0x1] }
 0x19d   :  { %v1039_v33 = vpop.permute.xlu1 %1038  ;;  %v1497_v54 = vsel %vm7331_vm2, %v1492_v47, %v1496_v26  ;;  %v7076_v47 = vld [vmem:[#allocation2 + $0x1ec] sm:$0xf]  ;;  %v1528_v51 = vshll.u32 %v5887_v36, 16  ;;  %v5885_v2 = vld [vmem:[%s10779_s0 + $0xb4] sm:$0xf] }
 0x19e   :  { %1113 = vst.msk [vmem:[#allocation2 + $0x1a8] sm:$0xf] %vm623_vm7, %v1039_v33  ;;  %v3795_v55 = vpop.f32.mrf.mxu1  ;;  %v1037_v16 = vpop.permute.xlu0 %1036  ;;  %v838_v53 = vsel %vm7665_vm6, %v836_v57, %v837_v22  ;;  %v7078_v30 = vld [vmem:[#allocation2 + $0x1f8] sm:$0xf0]  ;;  %v9590_v33 = vld [vmem:[%s10781_s2] ss:$0 sm:$0xff] }
 0x19f   :  { %v3796_v29 = vadd.f32 %v3795_v55, %v3707_v18  ;;  %1112 = vst.msk [vmem:[#allocation2 + $0x194] sm:$0xf] %vm623_vm7, %v1037_v16  ;;  %v9556_v39 = vpop.f32.mrf.mxu0  ;;  %v7034_v46 = vld [vmem:[#allocation2 + $0x98] sm:$0xf0]  ;;  %v6350_v25 = vor.u32 %v7078_v30, %v6349_v6  ;;  %v2708_v55 = vsel %vm7665_vm6, %v6087_v37, %v2707_v15  ;;  %v2709_v16 = vrot.slane %v2707_v15, 4 }
 0x1a0   :  { %922 = vst.msk [vmem:[#allocation2 + $0x1d0] sm:$0xf] %vm59_vm3, %v838_v53  ;;  %v6178_v9 = vor.u32 %v7034_v46, %v6177_v44  ;;  %v3727_v17 = vadd.f32 %v9590_v33, %v9241_v34 }
 0x1a1   :  { %v3885_v49 = vadd.f32 %v9408_v31, %v3796_v29  ;;  %4020 = vmatmul.bf16.gmra.mxu3 %v6334_v21  ;;  %v835_v31 = vsel %vm7665_vm6, %v5806_v5, %v834_v0  ;;  %1614 = vst.msk [vmem:[#allocation2 + $0x210] sm:$0xf] %vm59_vm3, %v1497_v54  ;;  %v3710_v21 = vadd.f32 %v9590_v33, %v8880_v27  ;;  %v5983_v27 = vld [vmem:[%s10779_s0 + $0xc0] sm:$0xf]  ;;  %v5886_v29 = vld [vmem:[%s10779_s0 + $0xb8] sm:$0xf] }
 0x1a2   :  { %1950 = vst.msk [vmem:[#allocation2 + $0x210] sm:$0xf] %vm623_vm7, %v1881_v56  ;;  %v2711_v46 = vsel %vm7665_vm6, %v2709_v16, %v2710_v38  ;;  %v1518_v6 = vshll.u32 %v5886_v29, 16  ;;  %v1522_v53 = vshrl.u32 %v5886_v29, 16  ;;  %v1509_v56 = vshrl.u32 %v5885_v2, 16 }
 0x1a3   :  { %v9585_v26 = vadd.f32 %v9457_v58, %v3885_v49  ;;  %921 = vst.msk [vmem:[#allocation2 + $0x1bc] sm:$0xf] %vm59_vm3, %v835_v31  ;;  %v5982_v58 = vld [vmem:[%s10779_s0 + $0xb8] sm:$0xf]  ;;  %6566 = vmatmul.msk.bf16.gmra.mxu0 %vm3641_vm8, %v6178_v9  ;;  %v6351_v49 = vld [vmem:[#allocation2 + $0x1fc] sm:$0xf0]  ;;  %v3712_v38 = vadd.f32 %v9590_v33, %v8928_v60 }
 0x1a4   :  { %v9579_v8 = vpop.f32.mrf.mxu2  ;;  %v9581_v18 = vpop.f32.mrf.mxu3  ;;  %2829 = vst.msk [vmem:[#allocation2 + $0xb0] sm:$0xf] %vm59_vm3, %v2708_v55  ;;  %v1520_v54 = vrot.slane %v1518_v6, 5  ;;  %v1512_v31 = vshll.u32 %v5885_v2, 16  ;;  %v1524_v12 = vrot.slane %v1522_v53, 4  ;;  %v1511_v37 = vrot.slane %v1509_v56, 4 }
 0x1a5   :  { %v2506_v10 = vpop.permute.xlu1 %2505  ;;  %v6303_v0 = vld [vmem:[#allocation2 + $0x1a4] sm:$0xf0]  ;;  %2830 = vst.msk [vmem:[#allocation2 + $0xc4] sm:$0xf] %vm59_vm3, %v2711_v46  ;;  %v693_v9 = vld [vmem:[%s10779_s0 + $0x94] sm:$0xf] }
 0x1a6   :  { %2575 = vst.msk [vmem:[#allocation2 + $0x214] sm:$0xf] %vm623_vm7, %v2506_v10  ;;  %v3798_v28 = vpop.f32.mrf.mxu1  ;;  %v1883_v63 = vpop.permute.xlu0 %1882  ;;  %v7065_v22 = vld [vmem:[#allocation2 + $0x194] sm:$0xf]  ;;  %v1514_v15 = vrot.slane %v1512_v31, 5  ;;  %v841_v16 = vrot.slane %v693_v9, 5 }
 0x1a7   :  { %v3799_v57 = vadd.f32 %v3798_v28, %v3710_v21  ;;  %1951 = vst.msk [vmem:[#allocation2 + $0x224] sm:$0xf] %vm623_vm7, %v1883_v63  ;;  %v9609_v5 = vpop.f32.mrf.mxu0  ;;  %v6306_v44 = vor.u32 %v7065_v22, %v6303_v0  ;;  %v1525_v0 = vor.u32 %v1524_v12, %v1520_v54  ;;  %v694_v55 = vld [vmem:[%s10779_s0 + $0x98] sm:$0x1]  ;;  %v6354_v28 = vor.u32 %v7076_v47, %v6351_v49  ;;  %v6050_v46 = vld [vmem:[%s10779_s0 + $0x54] sm:$0xe] }
 0x1a8   :  { %2016 = vst.msk [vmem:[#allocation2 + $0x228] sm:$0xf] %vm59_vm3, %v5982_v58  ;;  %v692_v58 = vld [vmem:[%s10779_s0 + $0x90] sm:$0xe]  ;;  %v1515_v63 = vor.u32 %v1514_v15, %v1511_v37  ;;  %v844_v22 = vrot.slane %v694_v55, 5 }
 0x1a9   :  { %v3888_v30 = vadd.f32 %v9455_v32, %v3799_v57  ;;  %3936 = vmatmul.bf16.gmra.mxu2 %v6350_v25  ;;  %2017 = vst.msk [vmem:[#allocation2 + $0x23c] sm:$0xf] %vm59_vm3, %v5983_v27  ;;  %v1530_v25 = vrot.slane %v1528_v51, 5  ;;  %v5807_v60 = vrot.slane %v692_v58, 9  ;;  %v1526_v57 = vrot.slane %v1525_v0, 4  ;;  %v2508_v47 = vpop.permute.xlu2 %2507 }
 0x1aa   :  { %3837 = vmatmul.bf16.gmra.mxu1 %v6306_v44  ;;  %v843_v44 = vrot.slane %v841_v16, 4  ;;  %v1516_v49 = vrot.slane %v1515_v63, 4  ;;  %2576 = vst.msk [vmem:[#allocation2 + $0x228] sm:$0xf] %vm623_vm7, %v2508_v47  ;;  %v6051_v31 = vld [vmem:[%s10779_s0 + $0x58] sm:$0xf] }
 0x1ab   :  { %v9628_v32 = vadd.f32 %v9500_v4, %v3888_v30  ;;  %v6197_v53 = vld [vmem:[#allocation2 + $0xb0] sm:$0xf]  ;;  %v1531_v2 = vsel %vm7331_vm2, %v1526_v57, %v1530_v25  ;;  %v842_v37 = vsel %vm7665_vm6, %v5807_v60, %v841_v16  ;;  %v6052_v15 = vld [vmem:[%s10779_s0 + $0x5c] sm:$0x1]  ;;  %v2714_v25 = vrot.slane %v6051_v31, 5 }
 0x1ac   :  { %v9632_v21 = vpop.f32.mrf.mxu2  ;;  %v9634_v10 = vpop.f32.mrf.mxu3  ;;  %v7039_v51 = vld [vmem:[#allocation2 + $0xc0] sm:$0xf0]  ;;  %v6369_v30 = vld [vmem:[#allocation2 + $0x210] sm:$0xf]  ;;  %v845_v56 = vsel %vm7665_vm6, %v843_v44, %v844_v22  ;;  %1617 = vst.msk [vmem:[#allocation2 + $0x24c] sm:$0xf] %vm59_vm3, %v1531_v2  ;;  %v1521_v9 = vsel %vm7331_vm2, %v1516_v49, %v1520_v54 }
 0x1ad   :  { %v1043_v4 = vpop.permute.xlu1 %1042  ;;  %1616 = vst.msk [vmem:[#allocation2 + $0x238] sm:$0xf] %vm59_vm3, %v1521_v9  ;;  %v2717_v55 = vrot.slane %v6052_v15, 5  ;;  %v5889_v54 = vld [vmem:[%s10779_s0 + $0xc4] sm:$0xf]  ;;  %v2716_v63 = vrot.slane %v2714_v25, 4 }
 0x1ae   :  { %1115 = vst.msk [vmem:[#allocation2 + $0x1d0] sm:$0xf] %vm623_vm7, %v1043_v4  ;;  %v3800_v27 = vpop.f32.mrf.mxu1  ;;  %v1041_v29 = vpop.permute.xlu0 %1040  ;;  %v7083_v0 = vld [vmem:[#allocation2 + $0x220] sm:$0xf0]  ;;  %v5890_v22 = vld [vmem:[%s10779_s0 + $0xc8] sm:$0x1] }
 0x1af   :  { %v3801_v36 = vadd.f32 %v3800_v27, %v3712_v38  ;;  %1114 = vst.msk [vmem:[#allocation2 + $0x1bc] sm:$0xf] %vm623_vm7, %v1041_v29  ;;  %v9647_v6 = vpop.f32.mrf.mxu0  ;;  %v6088_v38 = vrot.slane %v6050_v46, 9  ;;  %v1542_v60 = vshll.u32 %v5889_v54, 16  ;;  %v3715_v27 = vadd.f32 %v9590_v33, %v8984_v52  ;;  %v5984_v44 = vld [vmem:[%s10779_s0 + $0xc4] sm:$0xf] }
 0x1b0   :  { %924 = vst.msk [vmem:[#allocation2 + $0x1f8] sm:$0xf] %vm59_vm3, %v845_v56  ;;  %v6370_v57 = vor.u32 %v7083_v0, %v6369_v30  ;;  %v1546_v46 = vshrl.u32 %v5889_v54, 16  ;;  %v2718_v49 = vsel %vm7665_vm6, %v2716_v63, %v2717_v55  ;;  %v1552_v52 = vshll.u32 %v5890_v22, 16  ;;  %v696_v0 = vld [vmem:[%s10779_s0 + $0xa0] sm:$0xf] }
 0x1b1   :  { %v3890_v12 = vadd.f32 %v9498_v13, %v3801_v36  ;;  %4025 = vmatmul.bf16.gmra.mxu3 %v6354_v28  ;;  %v6198_v13 = vor.u32 %v7039_v51, %v6197_v53  ;;  %923 = vst.msk [vmem:[#allocation2 + $0x1e4] sm:$0xf] %vm59_vm3, %v842_v37  ;;  %v2715_v28 = vsel %vm7665_vm6, %v6088_v38, %v2714_v25  ;;  %v9693_v51 = vrot.slane %v1542_v60, 5  ;;  %v1885_v31 = vpop.permute.xlu2 %1884  ;;  %v7081_v37 = vld [vmem:[#allocation2 + $0x214] sm:$0xf] }
 0x1b2   :  { %2831 = vst.msk [vmem:[#allocation2 + $0xd8] sm:$0xf] %vm59_vm3, %v2715_v28  ;;  %v1548_v9 = vrot.slane %v1546_v46, 4  ;;  %v6371_v15 = vld [vmem:[#allocation2 + $0x224] sm:$0xf0]  ;;  %v1554_v63 = vrot.slane %v1552_v52, 5 }
 0x1b3   :  { %v9672_v58 = vadd.f32 %v9540_v24, %v3890_v12  ;;  %6567 = vmatmul.msk.bf16.gmra.mxu0 %vm3641_vm8, %v6198_v13  ;;  %v5985_v12 = vld [vmem:[%s10779_s0 + $0xcc] sm:$0xf]  ;;  %1952 = vst.msk [vmem:[#allocation2 + $0x238] sm:$0xf] %vm623_vm7, %v1885_v31  ;;  %v5888_v38 = vld [vmem:[%s10779_s0 + $0xc0] sm:$0xf] }
 0x1b4   :  { %v9674_v16 = vpop.f32.mrf.mxu2  ;;  %v9676_v4 = vpop.f32.mrf.mxu3  ;;  %2832 = vst.msk [vmem:[#allocation2 + $0xec] sm:$0xf] %vm59_vm3, %v2718_v49  ;;  %v1549_v55 = vor.u32 %v1548_v9, %v9693_v51  ;;  %v1533_v13 = vshrl.u32 %v5888_v38, 16  ;;  %v1536_v54 = vshll.u32 %v5888_v38, 16  ;;  %v697_v28 = vld [vmem:[%s10779_s0 + $0xa4] sm:$0x1]  ;;  %v3717_v49 = vadd.f32 %v9590_v33, %v9029_v20 }
 0x1b5   :  { %v2510_v24 = vpop.permute.xlu1 %2509  ;;  %v6323_v29 = vld [vmem:[#allocation2 + $0x1cc] sm:$0xf0]  ;;  %2018 = vst.msk [vmem:[#allocation2 + $0x250] sm:$0xf] %vm59_vm3, %v5984_v44  ;;  %v848_v22 = vrot.slane %v696_v0, 5 }
 0x1b6   :  { %2577 = vst.msk [vmem:[#allocation2 + $0x23c] sm:$0xf] %vm623_vm7, %v2510_v24  ;;  %v3803_v36 = vpop.f32.mrf.mxu1  ;;  %v1887_v53 = vpop.permute.xlu0 %1886  ;;  %v7070_v47 = vld [vmem:[#allocation2 + $0x1bc] sm:$0xf]  ;;  %v1550_v60 = vrot.slane %v1549_v55, 4  ;;  %v1538_v24 = vrot.slane %v1536_v54, 5 }
 0x1b7   :  { %v3804_v2 = vadd.f32 %v3803_v36, %v3715_v27  ;;  %1953 = vst.msk [vmem:[#allocation2 + $0x24c] sm:$0xf] %vm623_vm7, %v1887_v53  ;;  %v9697_v30 = vpop.f32.mrf.mxu0  ;;  %v6326_v56 = vor.u32 %v7070_v47, %v6323_v29  ;;  %v1535_v27 = vrot.slane %v1533_v13, 4  ;;  %v850_v46 = vrot.slane %v848_v22, 4  ;;  %v6053_v44 = vld [vmem:[%s10779_s0 + $0x60] sm:$0xe] }
 0x1b8   :  { %10795 = vst [vmem:[#allocation9_spill] sm:$0xff] %v9697_v30  ;;  %v851_v36 = vrot.slane %v697_v28, 5  ;;  %v6054_v31 = vld [vmem:[%s10779_s0 + $0x64] sm:$0xf]  ;;  %v1555_v38 = vsel %vm7331_vm2, %v1550_v60, %v1554_v63  ;;  %v6089_v0 = vrot.slane %v6053_v44, 9 }
 0x1b9   :  { %v3893_v25 = vadd.f32 %v9538_v41, %v3804_v2  ;;  %3941 = vmatmul.bf16.gmra.mxu2 %v6370_v57  ;;  %v695_v41 = vld [vmem:[%s10779_s0 + $0x9c] sm:$0xe]  ;;  %2019 = vst.msk [vmem:[#allocation2 + $0x264] sm:$0xf] %vm59_vm3, %v5985_v12  ;;  %v6374_v2 = vor.u32 %v7081_v37, %v6371_v15  ;;  %v2721_v20 = vrot.slane %v6054_v31, 5  ;;  %v2512_v55 = vpop.permute.xlu2 %2511 }
 0x1ba   :  { %3842 = vmatmul.bf16.gmra.mxu1 %v6326_v56  ;;  %v5808_v53 = vrot.slane %v695_v41, 9  ;;  %v1539_v56 = vor.u32 %v1538_v24, %v1535_v27  ;;  %v6217_v15 = vld [vmem:[#allocation2 + $0xd8] sm:$0xf]  ;;  %2578 = vst.msk [vmem:[#allocation2 + $0x250] sm:$0xf] %vm623_vm7, %v2512_v55  ;;  %v852_v63 = vsel %vm7665_vm6, %v850_v46, %v851_v36 }
 0x1bb   :  { %v9728_v47 = vadd.f32 %v9581_v18, %v3893_v25  ;;  %v6055_v18 = vld [vmem:[%s10779_s0 + $0x68] sm:$0x1]  ;;  %v7044_v54 = vld [vmem:[#allocation2 + $0xe8] sm:$0xf0]  ;;  %v6389_v28 = vld [vmem:[#allocation2 + $0x238] sm:$0xf] }
 0x1bc   :  { %v9720_v29 = vpop.f32.mrf.mxu2  ;;  %v9722_v57 = vpop.f32.mrf.mxu3  ;;  %v1540_v13 = vrot.slane %v1539_v56, 4  ;;  %v849_v60 = vsel %vm7665_vm6, %v5808_v53, %v848_v22  ;;  %1619 = vst.msk [vmem:[#allocation2 + $0x274] sm:$0xf] %vm59_vm3, %v1555_v38  ;;  %v2723_v44 = vrot.slane %v2721_v20, 4  ;;  %v2722_v22 = vsel %vm7665_vm6, %v6089_v0, %v2721_v20 }
 0x1bd   :  { %v1047_v52 = vpop.permute.xlu1 %1046  ;;  %926 = vst.msk [vmem:[#allocation2 + $0x220] sm:$0xf] %vm59_vm3, %v852_v63  ;;  %v3720_v56 = vadd.f32 %v9590_v33, %v9098_v45  ;;  %v2731_v0 = vrot.slane %v6058_v23, 5  ;;  %v7086_v63 = vld [vmem:[#allocation2 + $0x23c] sm:$0xf] }
 0x1be   :  { %1117 = vst.msk [vmem:[#allocation2 + $0x1f8] sm:$0xf] %vm623_vm7, %v1047_v52  ;;  %v3805_v12 = vpop.f32.mrf.mxu1  ;;  %v1045_v9 = vpop.permute.xlu0 %1044  ;;  %v7088_v41 = vld [vmem:[#allocation2 + $0x248] sm:$0xf0]  ;;  %v1545_v24 = vsel %vm7331_vm2, %v1540_v13, %v9693_v51  ;;  %v6218_v51 = vor.u32 %v7044_v54, %v6217_v15 }
 0x1bf   :  { %v3806_v25 = vadd.f32 %v3805_v12, %v3717_v49  ;;  %1116 = vst.msk [vmem:[#allocation2 + $0x1e4] sm:$0xf] %vm623_vm7, %v1045_v9  ;;  %v9742_v37 = vpop.f32.mrf.mxu0  ;;  %v2724_v49 = vrot.slane %v6055_v18, 5  ;;  %v6056_v52 = vld [vmem:[%s10779_s0 + $0x6c] sm:$0xe]  ;;  %v6390_v38 = vor.u32 %v7088_v41, %v6389_v28 }
 0x1c0   :  { %1618 = vst.msk [vmem:[#allocation2 + $0x260] sm:$0xf] %vm59_vm3, %v1545_v24  ;;  %v5986_v28 = vld [vmem:[%s10779_s0 + $0xd0] sm:$0xf]  ;;  %v6060_v41 = vld [vmem:[%s10779_s0 + $0x7c] sm:$0xf] }
 0x1c1   :  { %v3895_v27 = vadd.f32 %v9579_v8, %v3806_v25  ;;  %4030 = vmatmul.bf16.gmra.mxu3 %v6374_v2  ;;  %v6057_v8 = vld [vmem:[%s10779_s0 + $0x70] sm:$0xf]  ;;  %925 = vst.msk [vmem:[#allocation2 + $0x20c] sm:$0xf] %vm59_vm3, %v849_v60  ;;  %v6090_v2 = vrot.slane %v6056_v52, 9  ;;  %v2725_v15 = vsel %vm7665_vm6, %v2723_v44, %v2724_v49  ;;  %v1889_v54 = vpop.permute.xlu2 %1888  ;;  %v2735_v24 = vrot.slane %v6060_v41, 5 }
 0x1c2   :  { %v2728_v46 = vrot.slane %v6057_v8, 5  ;;  %2833 = vst.msk [vmem:[#allocation2 + $0x100] sm:$0xf] %vm59_vm3, %v2722_v22  ;;  %v6391_v60 = vld [vmem:[#allocation2 + $0x24c] sm:$0xf0] }
 0x1c3   :  { %v9768_v36 = vadd.f32 %v9634_v10, %v3895_v27  ;;  %6568 = vmatmul.msk.bf16.gmra.mxu0 %vm3641_vm8, %v6218_v51  ;;  %1954 = vst.msk [vmem:[#allocation2 + $0x260] sm:$0xf] %vm623_vm7, %v1889_v54  ;;  %v6059_v52 = vld [vmem:[%s10779_s0 + $0x78] sm:$0xe]  ;;  %v6061_v22 = vld [vmem:[%s10779_s0 + $0x80] sm:$0x1] }
 0x1c4   :  { %v9770_v53 = vpop.f32.mrf.mxu3  ;;  %v9775_v31 = vpop.f32.mrf.mxu2  ;;  %v2730_v18 = vrot.slane %v2728_v46, 4  ;;  %v2729_v27 = vsel %vm7665_vm6, %v6090_v2, %v2728_v46  ;;  %2834 = vst.msk [vmem:[#allocation2 + $0x114] sm:$0xf] %vm59_vm3, %v2725_v15  ;;  %v6091_v8 = vrot.slane %v6059_v52, 9  ;;  %v2737_v23 = vrot.slane %v2735_v24, 4 }
 0x1c5   :  { %v2514_v12 = vpop.permute.xlu1 %2513  ;;  %v6343_v9 = vld [vmem:[#allocation2 + $0x1f4] sm:$0xf0]  ;;  %2020 = vst.msk [vmem:[#allocation2 + $0x278] sm:$0xf] %vm59_vm3, %v5986_v28 }
 0x1c6   :  { %2579 = vst.msk [vmem:[#allocation2 + $0x264] sm:$0xf] %vm623_vm7, %v2514_v12  ;;  %v3808_v10 = vpop.f32.mrf.mxu1  ;;  %v1891_v20 = vpop.permute.xlu0 %1890  ;;  %v7075_v25 = vld [vmem:[#allocation2 + $0x1e4] sm:$0xf]  ;;  %v2732_v49 = vsel %vm7665_vm6, %v2730_v18, %v2731_v0  ;;  %v2736_v2 = vsel %vm7665_vm6, %v6091_v8, %v2735_v24  ;;  %v6394_v12 = vor.u32 %v7086_v63, %v6391_v60  ;;  %v6064_v8 = vld [vmem:[%s10779_s0 + $0x8c] sm:$0x1] }
 0x1c7   :  { %v3809_v45 = vadd.f32 %v3808_v10, %v3720_v56  ;;  %1955 = vst.msk [vmem:[#allocation2 + $0x274] sm:$0xf] %vm623_vm7, %v1891_v20  ;;  %v9783_v55 = vpop.f32.mrf.mxu0  ;;  %v6346_v13 = vor.u32 %v7075_v25, %v6343_v9 }
 0x1c8   :  { %10796 = vst [vmem:[#allocation10_spill] sm:$0xff] %v9783_v55 }
 0x1c9   :  { %v3898_v44 = vadd.f32 %v9632_v21, %v3809_v45  ;;  %3946 = vmatmul.bf16.gmra.mxu2 %v6390_v38  ;;  %v2738_v21 = vrot.slane %v6061_v22, 5  ;;  %2835 = vst.msk [vmem:[#allocation2 + $0x128] sm:$0xf] %vm59_vm3, %v2729_v27  ;;  %v2516_v0 = vpop.permute.xlu2 %2515  ;;  %v6237_v20 = vld [vmem:[#allocation2 + $0x100] sm:$0xf] }
 0x1ca   :  { %3847 = vmatmul.bf16.gmra.mxu1 %v6346_v13  ;;  %2836 = vst.msk [vmem:[#allocation2 + $0x13c] sm:$0xf] %vm59_vm3, %v2732_v49  ;;  %v6409_v15 = vld [vmem:[#allocation2 + $0x260] sm:$0xf]  ;;  %v6062_v22 = vld [vmem:[%s10779_s0 + $0x84] sm:$0xe] }
 0x1cb   :  { %v9807_v51 = vadd.f32 %v9676_v4, %v3898_v44  ;;  %2837 = vst.msk [vmem:[#allocation2 + $0x150] sm:$0xf] %vm59_vm3, %v2736_v2  ;;  %v2739_v4 = vsel %vm7665_vm6, %v2737_v23, %v2738_v21  ;;  %v7049_v25 = vld [vmem:[#allocation2 + $0x110] sm:$0xf0]  ;;  %v6063_v44 = vld [vmem:[%s10779_s0 + $0x88] sm:$0xf] }
 0x1cc   :  { %v9809_v46 = vpop.f32.mrf.mxu3  ;;  %v9823_v10 = vpop.f32.mrf.mxu2  ;;  %2580 = vst.msk [vmem:[#allocation2 + $0x278] sm:$0xf] %vm623_vm7, %v2516_v0  ;;  %v6238_v13 = vor.u32 %v7049_v25, %v6237_v20  ;;  %v2742_v49 = vrot.slane %v6063_v44, 5  ;;  %v6092_v2 = vrot.slane %v6062_v22, 9  ;;  %v6066_v44 = vld [vmem:[%s10779_s0 + $0x94] sm:$0xf] }
 0x1cd   :  { %v1051_v56 = vpop.permute.xlu1 %1050  ;;  %2838 = vst.msk [vmem:[#allocation2 + $0x164] sm:$0xf] %vm59_vm3, %v2739_v4  ;;  %v7091_v52 = vld [vmem:[#allocation2 + $0x264] sm:$0xf]  ;;  %v6065_v22 = vld [vmem:[%s10779_s0 + $0x90] sm:$0xe] }
 0x1ce   :  { %1119 = vst.msk [vmem:[#allocation2 + $0x220] sm:$0xf] %vm623_vm7, %v1051_v56  ;;  %v9816_v9 = vpop.f32.mrf.mxu1  ;;  %v1049_v38 = vpop.permute.xlu0 %1048  ;;  %v7093_v45 = vld [vmem:[#allocation2 + $0x270] sm:$0xf0]  ;;  %v2744_v56 = vrot.slane %v2742_v49, 4  ;;  %v2743_v4 = vsel %vm7665_vm6, %v6092_v2, %v2742_v49 }
 0x1cf   :  { %1118 = vst.msk [vmem:[#allocation2 + $0x20c] sm:$0xf] %vm623_vm7, %v1049_v38  ;;  %v9821_v18 = vpop.f32.mrf.mxu0  ;;  %v6410_v41 = vor.u32 %v7093_v45, %v6409_v15 }
 0x1d0   :  { %2839 = vst.msk [vmem:[#allocation2 + $0x178] sm:$0xf] %vm59_vm3, %v2743_v4  ;;  %v6257_v45 = vld [vmem:[#allocation2 + $0x128] sm:$0xf] }
 0x1d1   :  { %4035 = vmatmul.bf16.gmra.mxu3 %v6394_v12  ;;  %v2745_v12 = vrot.slane %v6064_v8, 5  ;;  %v6067_v8 = vld [vmem:[%s10779_s0 + $0x98] sm:$0x1] }
 0x1d3   :  { %6569 = vmatmul.msk.bf16.gmra.mxu0 %vm3641_vm8, %v6238_v13  ;;  %v6411_v21 = vld [vmem:[#allocation2 + $0x274] sm:$0xf0]  ;;  %v2746_v0 = vsel %vm7665_vm6, %v2744_v56, %v2745_v12  ;;  %v7054_v13 = vld [vmem:[#allocation2 + $0x138] sm:$0xf0]  ;;  %v2752_v56 = vrot.slane %v6067_v8, 5 }
 0x1d4   :  { %v9827_v54 = vpop.f32.mrf.mxu3  ;;  %v9843_v23 = vpop.f32.mrf.mxu2  ;;  %v6414_v20 = vor.u32 %v7091_v52, %v6411_v21  ;;  %2840 = vst.msk [vmem:[#allocation2 + $0x18c] sm:$0xf] %vm59_vm3, %v2746_v0  ;;  %v2749_v52 = vrot.slane %v6066_v44, 5  ;;  %v6093_v21 = vrot.slane %v6065_v22, 9 }
 0x1d5   :  { %v6363_v28 = vld [vmem:[#allocation2 + $0x21c] sm:$0xf0] }
 0x1d6   :  { %v9829_v63 = vpop.f32.mrf.mxu1  ;;  %v7080_v60 = vld [vmem:[#allocation2 + $0x20c] sm:$0xf]  ;;  %v2751_v2 = vrot.slane %v2749_v52, 4  ;;  %v2750_v12 = vsel %vm7665_vm6, %v6093_v21, %v2749_v52  ;;  %v6069_v21 = vld [vmem:[%s10779_s0 + $0xa0] sm:$0xf] }
 0x1d7   :  { %v9832_v27 = vpop.f32.mrf.mxu0  ;;  %v6366_v24 = vor.u32 %v7080_v60, %v6363_v28  ;;  %v6258_v28 = vor.u32 %v7054_v13, %v6257_v45  ;;  %2841 = vst.msk [vmem:[#allocation2 + $0x1a0] sm:$0xf] %vm59_vm3, %v2750_v12  ;;  %v6277_v13 = vld [vmem:[#allocation2 + $0x150] sm:$0xf]  ;;  %v6068_v12 = vld [vmem:[%s10779_s0 + $0x9c] sm:$0xe] }
 0x1d8   :  { %10797 = vst [vmem:[#allocation11_spill] sm:$0xff] %v9832_v27  ;;  %v2753_v4 = vsel %vm7665_vm6, %v2751_v2, %v2752_v56  ;;  %v2756_v56 = vrot.slane %v6069_v21, 5 }
 0x1d9   :  { %3951 = vmatmul.bf16.gmra.mxu2 %v6410_v41  ;;  %2842 = vst.msk [vmem:[#allocation2 + $0x1b4] sm:$0xf] %vm59_vm3, %v2753_v4  ;;  %v6070_v4 = vld [vmem:[%s10779_s0 + $0xa4] sm:$0x1] }
 0x1da   :  { %3852 = vmatmul.bf16.gmra.mxu1 %v6366_v24  ;;  %v2759_v62 = vrot.slane %v6070_v4, 5 }
 0x1db   :  { %v7064_v4 = vld [vmem:[#allocation2 + $0x188] sm:$0xf0] }
 0x1dc   :  { %v9845_v38 = vpop.f32.mrf.mxu3  ;;  %v9857_v41 = vpop.f32.mrf.mxu2 }
 0x1de   :  { %v9852_v25 = vpop.f32.mrf.mxu1 }
 0x1df   :  { %v9855_v15 = vpop.f32.mrf.mxu0 }
 0x1e0   :  { %10798 = vst [vmem:[#allocation12_spill] sm:$0xff] %v9855_v15 }
 0x1e1   :  { %4040 = vmatmul.bf16.gmra.mxu3 %v6414_v20 }
 0x1e3   :  { %6570 = vmatmul.msk.bf16.gmra.mxu0 %vm3641_vm8, %v6258_v28  ;;  %v7059_v28 = vld [vmem:[#allocation2 + $0x160] sm:$0xf0] }
 0x1e4   :  { %v9859_v60 = vpop.f32.mrf.mxu3  ;;  %v9880_v0 = vpop.f32.mrf.mxu2  ;;  %v6278_v8 = vor.u32 %v7059_v28, %v6277_v13  ;;  %v6094_v28 = vrot.slane %v6068_v12, 9  ;;  %v6297_v12 = vld [vmem:[#allocation2 + $0x178] sm:$0xf] }
 0x1e6   :  { %v2757_v50 = vsel %vm7665_vm6, %v6094_v28, %v2756_v56 }
 0x1e7   :  { %v9861_v24 = vpop.f32.mrf.mxu1  ;;  %v9867_v49 = vpop.f32.mrf.mxu0  ;;  %2843 = vst.msk [vmem:[#allocation2 + $0x1c8] sm:$0xf] %vm59_vm3, %v2757_v50 }
 0x1e8   :  { %10799 = vst [vmem:[#allocation13_spill] sm:$0xff] %v9867_v49 }
 0x1ec   :  { %v9885_v45 = vpop.f32.mrf.mxu3  ;;  %v3917_v2 = vpop.f32.mrf.mxu2 }
 0x1ef   :  { %v9882_v20 = vpop.f32.mrf.mxu1 }
 0x1f0   :  { %v4055_v44 = vpop.f32.mrf.mxu0 }
 0x1f1   :  { %v4056_v22 = vadd.f32 %v4055_v44, %v9453_v19  ;;  %v2758_v44 = vrot.slane %v2756_v56, 4 }
 0x1f3   :  { %6571 = vmatmul.msk.bf16.gmra.mxu0 %vm3641_vm8, %v6278_v8  ;;  %v2760_v21 = vsel %vm7665_vm6, %v2758_v44, %v2759_v62  ;;  %v4135_v1 = vmax.f32 %v4056_v22, 0.0  ;;  %v3740_v62 = vadd.f32 %v9590_v33, %v9471_v35  ;;  %v6073_v35 = vld [vmem:[%s10779_s0 + $0xb0] sm:$0x1] }
 0x1f4   :  { %v4006_v19 = vpop.f32.mrf.mxu3  ;;  %2844 = vst.msk [vmem:[#allocation2 + $0x1dc] sm:$0xf] %vm59_vm3, %v2760_v21  ;;  %v9911_v27 = vpop.f32.mrf.mxu2 }
 0x1f7   :  { %v9888_v52 = vpop.f32.mrf.mxu1 }
 0x1f8   :  { %v4057_v13 = vpop.f32.mrf.mxu0 }
 0x1f9   :  { %v4058_v8 = vadd.f32 %v4057_v13, %v9496_v42  ;;  %v6298_v42 = vor.u32 %v7064_v4, %v6297_v12  ;;  %v2766_v12 = vrot.slane %v6073_v35, 5  ;;  %v7069_v35 = vld [vmem:[#allocation2 + $0x1b0] sm:$0xf0] }
 0x1fb   :  { %v4136_v7 = vmax.f32 %v4058_v8, 0.0  ;;  %v6071_v8 = vld [vmem:[%s10779_s0 + $0xa8] sm:$0xe] }
 0x1fc   :  { %v9913_v13 = vpop.f32.mrf.mxu3  ;;  %v6095_v21 = vrot.slane %v6071_v8, 9 }
 0x1fd   :  { %v9909_v15 = vpack.c.bf16 %v4136_v7, %v4135_v1  ;;  %v6072_v7 = vld [vmem:[%s10779_s0 + $0xac] sm:$0xf] }
 0x1fe   :  { %v2763_v1 = vrot.slane %v6072_v7, 5 }
 0x1ff   :  { %v9906_v49 = vpop.f32.mrf.mxu1  ;;  %10800 = vst [vmem:[#allocation14_spill] sm:$0xff] %v9909_v15 }
 0x200   :  { %v4060_v56 = vpop.f32.mrf.mxu0 }
 0x201   :  { %v4061_v22 = vadd.f32 %v4060_v56, %v9536_v61  ;;  %v2765_v61 = vrot.slane %v2763_v1, 4 }
 0x203   :  { %6572 = vmatmul.msk.bf16.gmra.mxu0 %vm3641_vm8, %v6298_v42  ;;  %v3922_v42 = vpop.f32.mrf.mxu2  ;;  %v4137_v8 = vmax.f32 %v4061_v22, 0.0  ;;  %v6075_v22 = vld [vmem:[%s10779_s0 + $0xb8] sm:$0xf] }
 0x207   :  { %v3828_v50 = vpop.f32.mrf.mxu1 }
 0x208   :  { %v3829_v28 = vadd.f32 %v3828_v50, %v3740_v62  ;;  %v4062_v56 = vpop.f32.mrf.mxu0  ;;  %v2764_v62 = vsel %vm7665_vm6, %v6095_v21, %v2763_v1  ;;  %v3745_v21 = vadd.f32 %v9590_v33, %v9556_v39  ;;  %v6074_v39 = vld [vmem:[%s10779_s0 + $0xb4] sm:$0xe] }
 0x209   :  { %v4063_v50 = vadd.f32 %v4062_v56, %v9585_v26  ;;  %2845 = vst.msk [vmem:[#allocation2 + $0x1f0] sm:$0xf] %vm59_vm3, %v2764_v62 }
 0x20a   :  { %v3918_v44 = vadd.f32 %v3917_v2, %v3829_v28  ;;  %v2767_v2 = vsel %vm7665_vm6, %v2765_v61, %v2766_v12  ;;  %v4011_v28 = vpop.f32.mrf.mxu3 }
 0x20b   :  { %2846 = vst.msk [vmem:[#allocation2 + $0x204] sm:$0xf] %vm59_vm3, %v2767_v2  ;;  %v9944_v61 = vpop.f32.mrf.mxu2  ;;  %v2770_v2 = vrot.slane %v6075_v22, 5 }
 0x20c   :  { %v9928_v4 = vadd.f32 %v4006_v19, %v3918_v44  ;;  %v4138_v19 = vmax.f32 %v4063_v50, 0.0  ;;  %v6317_v44 = vld [vmem:[#allocation2 + $0x1a0] sm:$0xf] }
 0x20d   :  { %v6318_v30 = vor.u32 %v7069_v35, %v6317_v44 }
 0x20e   :  { %v9939_v55 = vpack.c.bf16 %v4138_v19, %v4137_v8  ;;  %v6096_v8 = vrot.slane %v6074_v39, 9  ;;  %v2772_v19 = vrot.slane %v2770_v2, 4 }
 0x20f   :  { %v9936_v7 = vpop.f32.mrf.mxu1 }
 0x210   :  { %v4065_v1 = vpop.f32.mrf.mxu0 }
 0x211   :  { %v4066_v26 = vadd.f32 %v4065_v1, %v9628_v32  ;;  %v6076_v32 = vld [vmem:[%s10779_s0 + $0xbc] sm:$0x1]  ;;  %v2771_v1 = vsel %vm7665_vm6, %v6096_v8, %v2770_v2 }
 0x212   :  { %v9950_v62 = vpop.f32.mrf.mxu3  ;;  %2847 = vst.msk [vmem:[#allocation2 + $0x218] sm:$0xf] %vm59_vm3, %v2771_v1 }
 0x213   :  { %6573 = vmatmul.msk.bf16.gmra.mxu0 %vm3641_vm8, %v6318_v30  ;;  %v2773_v30 = vrot.slane %v6076_v32, 5  ;;  %v3927_v39 = vpop.f32.mrf.mxu2 }
 0x217   :  { %v3833_v12 = vpop.f32.mrf.mxu1 }
 0x218   :  { %v3834_v56 = vadd.f32 %v3833_v12, %v3745_v21  ;;  %v4067_v35 = vpop.f32.mrf.mxu0 }
 0x219   :  { %v4068_v21 = vadd.f32 %v4067_v35, %v9672_v58 }
 0x21a   :  { %v3923_v50 = vadd.f32 %v3922_v42, %v3834_v56  ;;  %v2774_v42 = vsel %vm7665_vm6, %v2772_v19, %v2773_v30  ;;  %v4139_v56 = vmax.f32 %v4066_v26, 0.0  ;;  %v4016_v15 = vpop.f32.mrf.mxu3  ;;  %v3750_v19 = vadd.f32 %v9590_v33, %v9647_v6  ;;  %v6078_v26 = vld [vmem:[%s10779_s0 + $0xc4] sm:$0xf]  ;;  %v6079_v6 = vld [vmem:[%s10779_s0 + $0xc8] sm:$0x1] }
 0x21b   :  { %2848 = vst.msk [vmem:[#allocation2 + $0x22c] sm:$0xf] %vm59_vm3, %v2774_v42  ;;  %v4140_v22 = vmax.f32 %v4068_v21, 0.0  ;;  %v2777_v1 = vrot.slane %v6078_v26, 5  ;;  %v6077_v21 = vld [vmem:[%s10779_s0 + $0xc0] sm:$0xe] }
 0x21c   :  { %v9958_v44 = vadd.f32 %v4011_v28, %v3923_v50  ;;  %v6337_v28 = vld [vmem:[#allocation2 + $0x1c8] sm:$0xf]  ;;  %v7074_v50 = vld [vmem:[#allocation2 + $0x1d8] sm:$0xf0] }
 0x21d   :  { %v9969_v32 = vpack.c.bf16 %v4140_v22, %v4139_v56  ;;  %v6338_v2 = vor.u32 %v7074_v50, %v6337_v28  ;;  %v9984_v56 = vpop.f32.mrf.mxu2  ;;  %v2779_v22 = vrot.slane %v2777_v1, 4  ;;  %v2780_v28 = vrot.slane %v6079_v6, 5 }
 0x21e   :  { %v3722_v6 = vadd.f32 %v9590_v33, %v9138_v14  ;;  %v6081_v14 = vld [vmem:[%s10779_s0 + $0xd0] sm:$0xf] }
 0x21f   :  { %v9966_v12 = vpop.f32.mrf.mxu1 }
 0x220   :  { %v4070_v8 = vpop.f32.mrf.mxu0 }
 0x221   :  { %v4071_v58 = vadd.f32 %v4070_v8, %v9728_v47  ;;  %v6097_v47 = vrot.slane %v6077_v21, 9  ;;  %v7079_v21 = vld [vmem:[#allocation2 + $0x200] sm:$0xf0] }
 0x223   :  { %6574 = vmatmul.msk.bf16.gmra.mxu0 %vm3641_vm8, %v6338_v2  ;;  %v9988_v2 = vpop.f32.mrf.mxu3  ;;  %v4141_v26 = vmax.f32 %v4071_v58, 0.0 }
 0x224   :  { %10801 = vst [vmem:[#allocation15_spill] sm:$0xff] %v9988_v2 }
 0x227   :  { %v3838_v30 = vpop.f32.mrf.mxu1 }
 0x228   :  { %v3839_v35 = vadd.f32 %v3838_v30, %v3750_v19  ;;  %v4072_v8 = vpop.f32.mrf.mxu0  ;;  %v2781_v19 = vsel %vm7665_vm6, %v2779_v22, %v2780_v28  ;;  %v3932_v22 = vpop.f32.mrf.mxu2  ;;  %v3755_v28 = vadd.f32 %v9590_v33, %v9742_v37  ;;  %v6082_v37 = vld [vmem:[%s10779_s0 + $0xd4] sm:$0x1] }
 0x229   :  { %v4073_v30 = vadd.f32 %v4072_v8, %v9768_v36  ;;  %2850 = vst.msk [vmem:[#allocation2 + $0x254] sm:$0xf] %vm59_vm3, %v2781_v19 }
 0x22a   :  { %v3928_v42 = vadd.f32 %v3927_v39, %v3839_v35  ;;  %v2778_v39 = vsel %vm7665_vm6, %v6097_v47, %v2777_v1  ;;  %v3811_v1 = vadd.f32 %v9816_v9, %v3722_v6  ;;  %v2784_v9 = vrot.slane %v6081_v14, 5  ;;  %v6377_v14 = vld [vmem:[#allocation2 + $0x218] sm:$0xf] }
 0x22b   :  { %2849 = vst.msk [vmem:[#allocation2 + $0x240] sm:$0xf] %vm59_vm3, %v2778_v39  ;;  %v4021_v39 = vpop.f32.mrf.mxu3 }
 0x22c   :  { %v9986_v50 = vadd.f32 %v4016_v15, %v3928_v42  ;;  %v4142_v15 = vmax.f32 %v4073_v30, 0.0  ;;  %v6357_v42 = vld [vmem:[#allocation2 + $0x1f0] sm:$0xf]  ;;  %v3900_v19 = vadd.f32 %v9674_v16, %v3811_v1  ;;  %v2787_v16 = vrot.slane %v6082_v37, 5 }
 0x22d   :  { %v6358_v47 = vor.u32 %v7079_v21, %v6357_v42  ;;  %v2786_v42 = vrot.slane %v2784_v9, 4  ;;  %v3816_v37 = vadd.f32 %v9852_v25, %v3727_v17  ;;  %v3732_v17 = vadd.f32 %v9590_v33, %v9331_v59 }
 0x22e   :  { %v10001_v2 = vpack.c.bf16 %v4142_v15, %v4141_v26  ;;  %v6080_v15 = vld [vmem:[%s10779_s0 + $0xcc] sm:$0xe]  ;;  %v3989_v21 = vadd.f32 %v9722_v57, %v3900_v19  ;;  %v3725_v57 = vadd.f32 %v9590_v33, %v9203_v43  ;;  %v3760_v43 = vadd.f32 %v9590_v33, %v9821_v18 }
 0x22f   :  { %v9996_v35 = vpop.f32.mrf.mxu1 }
 0x230   :  { %v4075_v36 = vpop.f32.mrf.mxu0 }
 0x231   :  { %v4076_v8 = vadd.f32 %v4075_v36, %v9807_v51  ;;  %v6098_v51 = vrot.slane %v6080_v15, 9 }
 0x233   :  { %6575 = vmatmul.msk.bf16.gmra.mxu0 %vm3641_vm8, %v6358_v47  ;;  %v2785_v47 = vsel %vm7665_vm6, %v6098_v51, %v2784_v9  ;;  %v7084_v9 = vld [vmem:[#allocation2 + $0x228] sm:$0xf0] }
 0x234   :  { %2851 = vst.msk [vmem:[#allocation2 + $0x268] sm:$0xf] %vm59_vm3, %v2785_v47  ;;  %v6378_v51 = vor.u32 %v7084_v9, %v6377_v14  ;;  %v6397_v14 = vld [vmem:[#allocation2 + $0x240] sm:$0xf]  ;;  %v7089_v9 = vld [vmem:[#allocation2 + $0x250] sm:$0xf0] }
 0x237   :  { %v3843_v58 = vpop.f32.mrf.mxu1 }
 0x238   :  { %v3844_v30 = vadd.f32 %v3843_v58, %v3755_v28  ;;  %v4077_v1 = vpop.f32.mrf.mxu0  ;;  %v10026_v28 = vpop.f32.mrf.mxu2 }
 0x239   :  { %v4078_v36 = vadd.f32 %v4077_v1, %v3989_v21  ;;  %v3905_v21 = vadd.f32 %v9775_v31, %v3816_v37  ;;  %v3821_v37 = vadd.f32 %v9882_v20, %v3732_v17 }
 0x23a   :  { %v3933_v26 = vadd.f32 %v3932_v22, %v3844_v30  ;;  %v2788_v22 = vsel %vm7665_vm6, %v2786_v42, %v2787_v16  ;;  %v10033_v30 = vpop.f32.mrf.mxu3 }
 0x23b   :  { %2852 = vst.msk [vmem:[#allocation2 + $0x27c] sm:$0xf] %vm59_vm3, %v2788_v22  ;;  %v4144_v19 = vmax.f32 %v4078_v36, 0.0  ;;  %v3994_v25 = vadd.f32 %v9809_v46, %v3905_v21  ;;  %v6398_v46 = vor.u32 %v7089_v9, %v6397_v14 }
 0x23c   :  { %v10019_v6 = vadd.f32 %v4021_v39, %v3933_v26  ;;  %v4143_v39 = vmax.f32 %v4076_v8, 0.0  ;;  %v3814_v26 = vadd.f32 %v9829_v63, %v3725_v57 }
 0x23e   :  { %v10038_v15 = vpack.c.bf16 %v4144_v19, %v4143_v39  ;;  %v3903_v8 = vadd.f32 %v9720_v29, %v3814_v26  ;;  %v3730_v29 = vadd.f32 %v9590_v33, %v9296_v40 }
 0x23f   :  { %v10028_v58 = vpop.f32.mrf.mxu1 }
 0x240   :  { %v4080_v42 = vpop.f32.mrf.mxu0  ;;  %v3937_v34 = vpop.f32.mrf.mxu2  ;;  %v3992_v63 = vadd.f32 %v9770_v53, %v3903_v8  ;;  %v3819_v53 = vadd.f32 %v9861_v24, %v3730_v29  ;;  %v3735_v24 = vadd.f32 %v9590_v33, %v9382_v11 }
 0x242   :  { %v4026_v22 = vpop.f32.mrf.mxu3  ;;  %v4081_v36 = vadd.f32 %v4080_v42, %v3992_v63  ;;  %v3908_v42 = vadd.f32 %v9823_v10, %v3819_v53  ;;  %v7094_v63 = vld [vmem:[#allocation2 + $0x278] sm:$0xf0]  ;;  %v3737_v10 = vadd.f32 %v9590_v33, %v9422_v48 }
 0x243   :  { %6576 = vmatmul.msk.bf16.gmra.mxu0 %vm3641_vm8, %v6378_v51 }
 0x244   :  { %v4145_v19 = vmax.f32 %v4081_v36, 0.0  ;;  %v3997_v40 = vadd.f32 %v9827_v54, %v3908_v42  ;;  %v3826_v54 = vadd.f32 %v9906_v49, %v3737_v10  ;;  %v10075_v49 = vld [vmem:[%s10781_s2] ss:$0 sm:$0xff] }
 0x247   :  { %v3848_v16 = vpop.f32.mrf.mxu1 }
 0x248   :  { %v3849_v1 = vadd.f32 %v3848_v16, %v3760_v43  ;;  %v4082_v39 = vpop.f32.mrf.mxu0  ;;  %v3910_v43 = vadd.f32 %v9843_v23, %v3821_v37  ;;  %v3824_v23 = vadd.f32 %v9888_v52, %v3735_v24 }
 0x249   :  { %v4083_v18 = vadd.f32 %v4082_v39, %v3994_v25  ;;  %v3915_v25 = vadd.f32 %v9880_v0, %v3826_v54 }
 0x24a   :  { %v3938_v47 = vadd.f32 %v3937_v34, %v3849_v1  ;;  %v3999_v16 = vadd.f32 %v9845_v38, %v3910_v43  ;;  %v6417_v34 = vld [vmem:[#allocation2 + $0x268] sm:$0xf]  ;;  %v3913_v38 = vadd.f32 %v9857_v41, %v3824_v23  ;;  %v3742_v41 = vadd.f32 %v10075_v49, %v9514_v3  ;;  %v3939_v23 = vpop.f32.mrf.mxu2 }
 0x24b   :  { %v4146_v31 = vmax.f32 %v4083_v18, 0.0  ;;  %v4004_v18 = vadd.f32 %v9885_v45, %v3915_v25  ;;  %v3747_v3 = vadd.f32 %v10075_v49, %v9609_v5  ;;  %v10802_v43 = vld [vmem:[#allocation14_spill] sm:$0xff] }
 0x24c   :  { %v10048_v57 = vadd.f32 %v4026_v22, %v3938_v47  ;;  %v6418_v22 = vor.u32 %v7094_v63, %v6417_v34  ;;  %v4002_v11 = vadd.f32 %v9859_v60, %v3913_v38 }
 0x24d   :  { %v4204_v26 = vpack.c.bf16 %v4146_v31, %v4145_v19  ;;  %v3831_v19 = vadd.f32 %v9936_v7, %v3742_v41 }
 0x24f   :  { %v3920_v45 = vadd.f32 %v9911_v27, %v3831_v19  ;;  %v3850_v54 = vpop.f32.mrf.mxu1 }
 0x250   :  { %v4085_v51 = vpop.f32.mrf.mxu0 }
 0x251   :  { %v4086_v8 = vadd.f32 %v4085_v51, %v3997_v40  ;;  %v4009_v14 = vadd.f32 %v9913_v13, %v3920_v45 }
 0x253   :  { %6577 = vmatmul.msk.bf16.gmra.mxu0 %vm3641_vm8, %v6398_v46  ;;  %v4147_v1 = vmax.f32 %v4086_v8, 0.0  ;;  %v3836_v46 = vadd.f32 %v9966_v12, %v3747_v3  ;;  %v10803_v12 = vld [vmem:[#allocation9_spill] sm:$0xff]  ;;  %v10804_v8 = vld [vmem:[#allocation15_spill] sm:$0xff] }
 0x255   :  { %v3925_v13 = vadd.f32 %v9944_v61, %v3836_v46 }
 0x258   :  { %v4087_v21 = vpop.f32.mrf.mxu0 }
 0x259   :  { %v4088_v59 = vadd.f32 %v4087_v21, %v3999_v16 }
 0x25b   :  { %v4148_v20 = vmax.f32 %v4088_v59, 0.0 }
 0x25d   :  { %v4205_v47 = vpack.c.bf16 %v4148_v20, %v4147_v1  ;;  %v10805_v1 = vld [vmem:[#allocation10_spill] sm:$0xff] }
 0x25e   :  { %v3757_v20 = vadd.f32 %v10075_v49, %v10805_v1 }
 0x260   :  { %v4090_v36 = vpop.f32.mrf.mxu0  ;;  %v3846_v63 = vadd.f32 %v10028_v58, %v3757_v20 }
 0x261   :  { %v4091_v39 = vadd.f32 %v4090_v36, %v4002_v11  ;;  %v10806_v11 = vld [vmem:[#allocation11_spill] sm:$0xff] }
 0x263   :  { %6578 = vmatmul.msk.bf16.gmra.mxu0 %vm3641_vm8, %v6418_v22  ;;  %v4149_v33 = vmax.f32 %v4091_v39, 0.0  ;;  %v3762_v39 = vadd.f32 %v10075_v49, %v10806_v11 }
 0x265   :  { %v3851_v58 = vadd.f32 %v3850_v54, %v3762_v39 }
 0x268   :  { %v4092_v29 = vpop.f32.mrf.mxu0 }
 0x269   :  { %v4093_v48 = vadd.f32 %v4092_v29, %v4004_v18  ;;  %v3942_v29 = vpop.f32.mrf.mxu2 }
 0x26b   :  { %v4150_v52 = vmax.f32 %v4093_v48, 0.0 }
 0x26d   :  { %v4206_v0 = vpack.c.bf16 %v4150_v52, %v4149_v33  ;;  %v3853_v33 = vpop.f32.mrf.mxu1  ;;  %v3940_v52 = vadd.f32 %v3939_v23, %v3851_v58 }
 0x26f   :  { %4375 = vmatpush.bf16.msrb.mxu1 %v4206_v0 }
 0x270   :  { %v4095_v60 = vpop.f32.mrf.mxu0 }
 0x271   :  { %v4096_v31 = vadd.f32 %v4095_v60, %v9928_v4  ;;  %v3944_v19 = vpop.f32.mrf.mxu2  ;;  %v10807_v60 = vld [vmem:[#allocation12_spill] sm:$0xff] }
 0x273   :  { %4376 = vmatpush.bf16.msrb.mxu1 %v4205_v47  ;;  %v4151_v53 = vmax.f32 %v4096_v31, 0.0  ;;  %v3765_v31 = vadd.f32 %v10075_v49, %v10807_v60  ;;  %v7134_v60 = vld [vmem:[%s10782_s5 + $0x14] sm:$0xf0] }
 0x275   :  { %v3854_v3 = vadd.f32 %v3853_v33, %v3765_v31  ;;  %v7132_v33 = vld [vmem:[%s10782_s5 + $0x4] sm:$0xf0] }
 0x277   :  { %4377 = vmatpush.bf16.msrb.mxu1 %v4204_v26 }
 0x278   :  { %v4097_v9 = vpop.f32.mrf.mxu0 }
 0x279   :  { %v4098_v17 = vadd.f32 %v4097_v9, %v4009_v14 }
 0x27b   :  { %v4152_v37 = vmax.f32 %v4098_v17, 0.0  ;;  %4378 = vmatpush.bf16.msrb.mxu1 %v10038_v15  ;;  %v4014_v15 = vadd.f32 %v9950_v62, %v3925_v13  ;;  %v3855_v17 = vpop.f32.mrf.mxu1 }
 0x27d   :  { %v10086_v7 = vpack.c.bf16 %v4152_v37, %v4151_v53  ;;  %v10808_v53 = vld [vmem:[#allocation13_spill] sm:$0xff] }
 0x27e   :  { %v3767_v37 = vadd.f32 %v10075_v49, %v10808_v53  ;;  %v6591_v53 = vld [vmem:[%s10782_s5 + $0x18] sm:$0xf0] }
 0x27f   :  { %4379 = vmatpush.bf16.msrb.mxu1 %v10001_v2  ;;  %v3752_v2 = vadd.f32 %v10075_v49, %v10803_v12  ;;  %v10809_v49 = vld [vmem:[#allocation5_spill] sm:$0xff] }
 0x280   :  { %v4100_v27 = vpop.f32.mrf.mxu0 }
 0x281   :  { %v4101_v4 = vadd.f32 %v4100_v27, %v9958_v44  ;;  %v3841_v44 = vadd.f32 %v9996_v35, %v3752_v2 }
 0x283   :  { %4380 = vmatpush.bf16.msrb.mxu1 %v9969_v32  ;;  %v4153_v5 = vmax.f32 %v4101_v4, 0.0  ;;  %v3943_v4 = vadd.f32 %v3942_v29, %v3854_v3  ;;  %v7138_v3 = vld [vmem:[%s10782_s5 + $0x34] sm:$0xf0] }
 0x287   :  { %4381 = vmatpush.bf16.msrb.mxu1 %v9939_v55  ;;  %v3930_v55 = vadd.f32 %v9984_v56, %v3841_v44  ;;  %v4028_v56 = vpop.f32.mrf.mxu3 }
 0x288   :  { %v4102_v26 = vpop.f32.mrf.mxu0  ;;  %v4029_v41 = vadd.f32 %v4028_v56, %v3940_v52 }
 0x289   :  { %v4103_v51 = vadd.f32 %v4102_v26, %v4014_v15  ;;  %v4019_v62 = vadd.f32 %v10804_v8, %v3930_v55  ;;  %v3947_v15 = vpop.f32.mrf.mxu2 }
 0x28b   :  { %v4154_v42 = vmax.f32 %v4103_v51, 0.0  ;;  %4382 = vmatpush.bf16.msrb.mxu1 %v10802_v43 }
 0x28d   :  { %v10098_v40 = vpack.c.bf16 %v4154_v42, %v4153_v5 }
 0x290   :  { %v4105_v61 = vpop.f32.mrf.mxu0 }
 0x291   :  { %v4106_v32 = vadd.f32 %v4105_v61, %v9986_v50  ;;  %v3935_v50 = vadd.f32 %v10026_v28, %v3846_v63  ;;  %v4031_v28 = vpop.f32.mrf.mxu3 }
 0x292   :  { %v4032_v26 = vadd.f32 %v4031_v28, %v3943_v4  ;;  %v6581_v28 = vld [vmem:[%s10782_s5] sm:$0xf] }
 0x293   :  { %v4155_v59 = vmax.f32 %v4106_v32, 0.0  ;;  %v4024_v47 = vadd.f32 %v10033_v30, %v3935_v50  ;;  %v3949_v32 = vpop.f32.mrf.mxu2  ;;  %v6582_v52 = vor.u32 %v7132_v33, %v6581_v28  ;;  %v6613_v4 = vld [vmem:[%s10782_s5 + $0x40] sm:$0xf]  ;;  %v7152_v33 = vld [vmem:[%s10782_s5 + $0xa4] sm:$0xf0] }
 0x294   :  { %v6661_v28 = vld [vmem:[%s10782_s5 + $0xa0] sm:$0xf] }
 0x295   :  { %4383 = vmatmul.bf16.vlgmr.msrb.gmra.mxu1 %v6582_v52 }
 0x298   :  { %v4107_v16 = vpop.f32.mrf.mxu0 }
 0x299   :  { %v4108_v21 = vadd.f32 %v4107_v16, %v4019_v62  ;;  %v4033_v9 = vpop.f32.mrf.mxu3  ;;  %v3948_v62 = vadd.f32 %v3947_v15, %v10809_v49  ;;  %v10810_v16 = vld [vmem:[#allocation6_spill] sm:$0xff] }
 0x29b   :  { %v4156_v24 = vmax.f32 %v4108_v21, 0.0  ;;  %v3950_v21 = vadd.f32 %v3949_v32, %v10810_v16  ;;  %v3952_v20 = vpop.f32.mrf.mxu2  ;;  %v6629_v32 = vld [vmem:[%s10782_s5 + $0x60] sm:$0xf]  ;;  %v6623_v16 = vld [vmem:[%s10782_s5 + $0x58] sm:$0xf0] }
 0x29d   :  { %v10106_v34 = vpack.c.bf16 %v4156_v24, %v4155_v59 }
 0x2a0   :  { %v4110_v10 = vpop.f32.mrf.mxu0 }
 0x2a1   :  { %v4111_v35 = vadd.f32 %v4110_v10, %v10019_v6  ;;  %v4036_v51 = vpop.f32.mrf.mxu3 }
 0x2a2   :  { %v4037_v59 = vadd.f32 %v4036_v51, %v3948_v62  ;;  %v7137_v51 = vld [vmem:[%s10782_s5 + $0x34] sm:$0xf] }
 0x2a3   :  { %v4157_v38 = vmax.f32 %v4111_v35, 0.0  ;;  %v3954_v54 = vpop.f32.mrf.mxu2  ;;  %v7141_v62 = vld [vmem:[%s10782_s5 + $0x54] sm:$0xf] }
 0x2a8   :  { %v4112_v22 = vpop.f32.mrf.mxu0 }
 0x2a9   :  { %v4113_v36 = vadd.f32 %v4112_v22, %v4024_v47  ;;  %v4038_v55 = vpop.f32.mrf.mxu3  ;;  %v10811_v22 = vld [vmem:[#allocation7_spill] sm:$0xff] }
 0x2aa   :  { %v4039_v24 = vadd.f32 %v4038_v55, %v3950_v21  ;;  %v7144_v55 = vld [vmem:[%s10782_s5 + $0x64] sm:$0xf0]  ;;  %v6637_v21 = vld [vmem:[%s10782_s5 + $0x70] sm:$0xf] }
 0x2ab   :  { %v4158_v25 = vmax.f32 %v4113_v36, 0.0  ;;  %v3953_v36 = vadd.f32 %v3952_v20, %v10811_v22  ;;  %v6630_v49 = vor.u32 %v7144_v55, %v6629_v32  ;;  %v7143_v20 = vld [vmem:[%s10782_s5 + $0x64] sm:$0xf]  ;;  %v6639_v22 = vld [vmem:[%s10782_s5 + $0x78] sm:$0xf0] }
 0x2ac   :  { %v6685_v32 = vld [vmem:[%s10782_s5 + $0xd0] sm:$0xf]  ;;  %v7158_v55 = vld [vmem:[%s10782_s5 + $0xd4] sm:$0xf0] }
 0x2ad   :  { %v10114_v18 = vpack.c.bf16 %v4158_v25, %v4157_v38  ;;  %v10812_v25 = vld [vmem:[#allocation8_spill] sm:$0xff] }
 0x2ae   :  { %v3955_v11 = vadd.f32 %v3954_v54, %v10812_v25  ;;  %v7145_v54 = vld [vmem:[%s10782_s5 + $0x74] sm:$0xf]  ;;  %v7150_v25 = vld [vmem:[%s10782_s5 + $0x94] sm:$0xf0] }
 0x2b0   :  { %v4115_v48 = vpop.f32.mrf.mxu0 }
 0x2b1   :  { %v4116_v6 = vadd.f32 %v4115_v48, %v10048_v57  ;;  %v3856_v57 = vadd.f32 %v3855_v17, %v3767_v37  ;;  %v4041_v35 = vpop.f32.mrf.mxu3  ;;  %v6605_v37 = vld [vmem:[%s10782_s5 + $0x30] sm:$0xf] }
 0x2b2   :  { %v4042_v39 = vadd.f32 %v4041_v35, %v3953_v36  ;;  %v6645_v35 = vld [vmem:[%s10782_s5 + $0x80] sm:$0xf] }
 0x2b3   :  { %v4159_v45 = vmax.f32 %v4116_v6, 0.0  ;;  %v3945_v13 = vadd.f32 %v3944_v19, %v3856_v57  ;;  %v6589_v19 = vld [vmem:[%s10782_s5 + $0x10] sm:$0xf]  ;;  %v7135_v57 = vld [vmem:[%s10782_s5 + $0x24] sm:$0xf] }
 0x2b4   :  { %v6590_v31 = vor.u32 %v7134_v60, %v6589_v19  ;;  %v7149_v60 = vld [vmem:[%s10782_s5 + $0x94] sm:$0xf] }
 0x2b5   :  { %v4034_v42 = vadd.f32 %v4033_v9, %v3945_v13  ;;  %v6597_v9 = vld [vmem:[%s10782_s5 + $0x20] sm:$0xf]  ;;  %v7140_v13 = vld [vmem:[%s10782_s5 + $0x44] sm:$0xf0] }
 0x2b6   :  { %4388 = vmatmul.bf16.gmra.mxu1 %v6590_v31  ;;  %v6655_v31 = vld [vmem:[%s10782_s5 + $0x98] sm:$0xf0] }
 0x2b8   :  { %v4117_v30 = vpop.f32.mrf.mxu0 }
 0x2b9   :  { %v4118_v0 = vadd.f32 %v4117_v30, %v4029_v41  ;;  %v4043_v38 = vpop.f32.mrf.mxu3 }
 0x2ba   :  { %v4044_v58 = vadd.f32 %v4043_v38, %v3955_v11  ;;  %v6653_v38 = vld [vmem:[%s10782_s5 + $0x90] sm:$0xf]  ;;  %v6642_v11 = vor.u32 %v7145_v54, %v6639_v22 }
 0x2bb   :  { %v4160_v14 = vmax.f32 %v4118_v0, 0.0 }
 0x2bd   :  { %v4211_v46 = vpack.c.bf16 %v4160_v14, %v4159_v45  ;;  %v7131_v45 = vld [vmem:[%s10782_s5 + $0x4] sm:$0xf]  ;;  %v6583_v14 = vld [vmem:[%s10782_s5 + $0x8] sm:$0xf0] }
 0x2be   :  { %v6586_v17 = vor.u32 %v7131_v45, %v6583_v14 }
 0x2c0   :  { %v4120_v27 = vpop.f32.mrf.mxu0 }
 0x2c1   :  { %v4121_v5 = vadd.f32 %v4120_v27, %v4032_v26  ;;  %v6599_v27 = vld [vmem:[%s10782_s5 + $0x28] sm:$0xf0]  ;;  %v6614_v26 = vor.u32 %v7140_v13, %v6613_v4  ;;  %v6677_v4 = vld [vmem:[%s10782_s5 + $0xc0] sm:$0xf]  ;;  %v7156_v13 = vld [vmem:[%s10782_s5 + $0xc4] sm:$0xf0] }
 0x2c2   :  { %v6602_v15 = vor.u32 %v7135_v57, %v6599_v27 }
 0x2c3   :  { %v4161_v2 = vmax.f32 %v4121_v5, 0.0  ;;  %v6607_v5 = vld [vmem:[%s10782_s5 + $0x38] sm:$0xf0] }
 0x2c8   :  { %v4122_v43 = vpop.f32.mrf.mxu0 }
 0x2c9   :  { %v4123_v12 = vadd.f32 %v4122_v43, %v4034_v42  ;;  %v6621_v42 = vld [vmem:[%s10782_s5 + $0x50] sm:$0xf]  ;;  %v7142_v43 = vld [vmem:[%s10782_s5 + $0x54] sm:$0xf0] }
 0x2cb   :  { %v4162_v44 = vmax.f32 %v4123_v12, 0.0  ;;  %v6610_v12 = vor.u32 %v7137_v51, %v6607_v5  ;;  %v6678_v51 = vor.u32 %v7156_v13, %v6677_v4 }
 0x2cd   :  { %v4212_v61 = vpack.c.bf16 %v4162_v44, %v4161_v2  ;;  %v6622_v2 = vor.u32 %v7142_v43, %v6621_v42  ;;  %v7139_v44 = vld [vmem:[%s10782_s5 + $0x44] sm:$0xf] }
 0x2d0   :  { %v4125_v8 = vpop.f32.mrf.mxu0 }
 0x2d1   :  { %v4126_v1 = vadd.f32 %v4125_v8, %v4037_v59  ;;  %v7146_v59 = vld [vmem:[%s10782_s5 + $0x74] sm:$0xf0] }
 0x2d3   :  { %v4163_v50 = vmax.f32 %v4126_v1, 0.0  ;;  %v6638_v1 = vor.u32 %v7146_v59, %v6637_v21 }
 0x2d8   :  { %v4127_v63 = vpop.f32.mrf.mxu0 }
 0x2d9   :  { %v4128_v10 = vadd.f32 %v4127_v63, %v4039_v24  ;;  %v6626_v24 = vor.u32 %v7141_v62, %v6623_v16  ;;  %v6631_v63 = vld [vmem:[%s10782_s5 + $0x68] sm:$0xf0]  ;;  %v6686_v62 = vor.u32 %v7158_v55, %v6685_v32  ;;  %v7202_v32 = vld [vmem:[%s10783_s3 + $0x138] sm:$0xff] }
 0x2da   :  { %5555 = vmatpush.bf16.msra.mxu0 %v7202_v32  ;;  %v7214_v32 = vld [vmem:[%s10783_s3 + $0x198] sm:$0xff] }
 0x2db   :  { %v4164_v23 = vmax.f32 %v4128_v10, 0.0 }
 0x2dd   :  { %v4213_v56 = vpack.c.bf16 %v4164_v23, %v4163_v50  ;;  %v7148_v50 = vld [vmem:[%s10782_s5 + $0x84] sm:$0xf0]  ;;  %v6634_v23 = vor.u32 %v7143_v20, %v6631_v63  ;;  %v6693_v63 = vld [vmem:[%s10782_s5 + $0xe0] sm:$0xf] }
 0x2e0   :  { %v4130_v47 = vpop.f32.mrf.mxu0 }
 0x2e1   :  { %v4131_v29 = vadd.f32 %v4130_v47, %v4042_v39  ;;  %v6654_v39 = vor.u32 %v7150_v25, %v6653_v38  ;;  %v7157_v38 = vld [vmem:[%s10782_s5 + $0xd4] sm:$0xf]  ;;  %v6687_v25 = vld [vmem:[%s10782_s5 + $0xd8] sm:$0xf0] }
 0x2e3   :  { %v4165_v41 = vmax.f32 %v4131_v29, 0.0  ;;  %v7147_v29 = vld [vmem:[%s10782_s5 + $0x84] sm:$0xf] }
 0x2e8   :  { %v4132_v48 = vpop.f32.mrf.mxu0 }
 0x2e9   :  { %v4133_v6 = vadd.f32 %v4132_v48, %v4044_v58  ;;  %v6647_v48 = vld [vmem:[%s10782_s5 + $0x88] sm:$0xf0] }
 0x2ea   :  { %v6650_v52 = vor.u32 %v7147_v29, %v6647_v48  ;;  %v6690_v29 = vor.u32 %v7157_v38, %v6687_v25  ;;  %v7166_v25 = vld [vmem:[%s10783_s3 + $0x18] sm:$0xff] }
 0x2eb   :  { %v4166_v30 = vmax.f32 %v4133_v6, 0.0 }
 0x2ed   :  { %v4214_v0 = vpack.c.bf16 %v4166_v30, %v4165_v41  ;;  %v6662_v41 = vor.u32 %v7152_v33, %v6661_v28 }
 0x2ef   :  { %4464 = vmatpush.bf16.msra.mxu2 %v4214_v0 }
 0x2f3   :  { %4465 = vmatpush.bf16.msra.mxu2 %v4213_v56  ;;  %v6646_v56 = vor.u32 %v7148_v50, %v6645_v35 }
 0x2f7   :  { %4466 = vmatpush.bf16.msra.mxu2 %v4212_v61  ;;  %v6615_v61 = vld [vmem:[%s10782_s5 + $0x48] sm:$0xf0] }
 0x2f8   :  { %v6618_v8 = vor.u32 %v7139_v44, %v6615_v61 }
 0x2fb   :  { %4467 = vmatpush.bf16.msra.mxu2 %v4211_v46 }
 0x2ff   :  { %4468 = vmatpush.bf16.msra.mxu2 %v10114_v18  ;;  %v7136_v18 = vld [vmem:[%s10782_s5 + $0x24] sm:$0xf0] }
 0x303   :  { %4469 = vmatpush.bf16.msra.mxu2 %v10106_v34  ;;  %v6598_v34 = vor.u32 %v7136_v18, %v6597_v9  ;;  %v6669_v9 = vld [vmem:[%s10782_s5 + $0xb0] sm:$0xf]  ;;  %v7154_v18 = vld [vmem:[%s10782_s5 + $0xb4] sm:$0xf0] }
 0x305   :  { %4393 = vmatmul.bf16.gmra.mxu1 %v6598_v34  ;;  %v6658_v34 = vor.u32 %v7149_v60, %v6655_v31 }
 0x307   :  { %4470 = vmatpush.bf16.msra.mxu2 %v10098_v40  ;;  %v7133_v40 = vld [vmem:[%s10782_s5 + $0x14] sm:$0xf] }
 0x308   :  { %v6594_v46 = vor.u32 %v7133_v40, %v6591_v53  ;;  %v6670_v40 = vor.u32 %v7154_v18, %v6669_v9 }
 0x30b   :  { %4471 = vmatpush.bf16.msra.mxu2 %v10086_v7  ;;  %v6606_v7 = vor.u32 %v7138_v3, %v6605_v37 }
 0x30e   :  { %4472 = vmatmul.bf16.vlgmr.msra.gmra.mxu2 %v6586_v17 }
 0x312   :  { %v4384_v10 = vpop.f32.mrf.mxu1 }
 0x315   :  { %4398 = vmatmul.bf16.gmra.mxu1 %v6606_v7  ;;  %v6663_v7 = vld [vmem:[%s10782_s5 + $0xa8] sm:$0xf0] }
 0x31a   :  { %v4386_v47 = vpop.f32.mrf.mxu1 }
 0x31e   :  { %4477 = vmatmul.bf16.gmra.mxu2 %v6594_v46  ;;  %v7151_v46 = vld [vmem:[%s10782_s5 + $0xa4] sm:$0xf] }
 0x325   :  { %4403 = vmatmul.bf16.gmra.mxu1 %v6614_v26  ;;  %v6666_v26 = vor.u32 %v7151_v46, %v6663_v7 }
 0x32e   :  { %4482 = vmatmul.bf16.gmra.mxu2 %v6602_v15 }
 0x333   :  { %v4389_v36 = vpop.f32.mrf.mxu1 }
 0x335   :  { %4408 = vmatmul.bf16.gmra.mxu1 %v6622_v2  ;;  %v6671_v2 = vld [vmem:[%s10782_s5 + $0xb8] sm:$0xf0] }
 0x33b   :  { %v4391_v58 = vpop.f32.mrf.mxu1 }
 0x33e   :  { %4487 = vmatmul.bf16.gmra.mxu2 %v6610_v12  ;;  %v7153_v12 = vld [vmem:[%s10782_s5 + $0xb4] sm:$0xf] }
 0x345   :  { %4413 = vmatmul.bf16.gmra.mxu1 %v6630_v49  ;;  %v6674_v49 = vor.u32 %v7153_v12, %v6671_v2 }
 0x34e   :  { %4492 = vmatmul.bf16.gmra.mxu2 %v6618_v8 }
 0x355   :  { %4418 = vmatmul.bf16.gmra.mxu1 %v6638_v1  ;;  %v6679_v1 = vld [vmem:[%s10782_s5 + $0xc8] sm:$0xf0] }
 0x35e   :  { %4497 = vmatmul.bf16.gmra.mxu2 %v6626_v24  ;;  %v7155_v24 = vld [vmem:[%s10782_s5 + $0xc4] sm:$0xf] }
 0x35f   :  { %v6682_v50 = vor.u32 %v7155_v24, %v6679_v1  ;;  %v7168_v1 = vld [vmem:[%s10783_s3 + $0x28] sm:$0xff] }
 0x365   :  { %4423 = vmatmul.bf16.gmra.mxu1 %v6646_v56 }
 0x36e   :  { %4502 = vmatmul.bf16.gmra.mxu2 %v6634_v23 }
 0x375   :  { %4428 = vmatmul.bf16.gmra.mxu1 %v6654_v39  ;;  %v6701_v39 = vld [vmem:[%s10782_s5 + $0xf0] sm:$0xf] }
 0x37e   :  { %4507 = vmatmul.bf16.gmra.mxu2 %v6642_v11 }
 0x382   :  { %v4394_v6 = vpop.f32.mrf.mxu1 }
 0x385   :  { %4433 = vmatmul.bf16.gmra.mxu1 %v6662_v41  ;;  %v7159_v41 = vld [vmem:[%s10782_s5 + $0xe4] sm:$0xf] }
 0x38a   :  { %v4396_v0 = vpop.f32.mrf.mxu1 }
 0x38e   :  { %4512 = vmatmul.bf16.gmra.mxu2 %v6650_v52 }
 0x391   :  { %v4473_v30 = vpop.f32.mrf.mxu2 }
 0x392   :  { %v10249_v19 = vadd.f32 %v4473_v30, %v4384_v10  ;;  %v4399_v14 = vpop.f32.mrf.mxu1  ;;  %v7160_v10 = vld [vmem:[%s10782_s5 + $0xe4] sm:$0xf0]  ;;  %v6695_v30 = vld [vmem:[%s10782_s5 + $0xe8] sm:$0xf0] }
 0x393   :  { %v6694_v23 = vor.u32 %v7160_v10, %v6693_v63  ;;  %v6698_v31 = vor.u32 %v7159_v41, %v6695_v30  ;;  %v7200_v63 = vld [vmem:[%s10783_s3 + $0x128] sm:$0xff]  ;;  %v7167_v10 = vld [vmem:[%s10783_s3 + $0x20] sm:$0xff]  ;;  %v7217_v41 = vld [vmem:[%s10783_s3 + $0x1b0] sm:$0xff] }
 0x394   :  { %v7197_v30 = vld [vmem:[%s10783_s3 + $0x110] sm:$0xff] }
 0x395   :  { %4438 = vmatmul.bf16.gmra.mxu1 %v6670_v40  ;;  %v6703_v40 = vld [vmem:[%s10782_s5 + $0xf8] sm:$0xf0] }
 0x399   :  { %v4475_v45 = vpop.f32.mrf.mxu2 }
 0x39a   :  { %v10263_v17 = vadd.f32 %v4475_v45, %v4386_v47  ;;  %v4401_v37 = vpop.f32.mrf.mxu1 }
 0x39e   :  { %4517 = vmatmul.bf16.gmra.mxu2 %v6658_v34  ;;  %v7161_v34 = vld [vmem:[%s10782_s5 + $0xf4] sm:$0xf] }
 0x3a1   :  { %v4478_v53 = vpop.f32.mrf.mxu2 }
 0x3a2   :  { %v10265_v3 = vadd.f32 %v4478_v53, %v4389_v36  ;;  %v4404_v27 = vpop.f32.mrf.mxu1 }
 0x3a5   :  { %4443 = vmatmul.bf16.gmra.mxu1 %v6678_v51 }
 0x3a9   :  { %v4480_v57 = vpop.f32.mrf.mxu2 }
 0x3aa   :  { %v10279_v15 = vadd.f32 %v4480_v57, %v4391_v58  ;;  %v10281_v42 = vpop.f32.mrf.mxu1  ;;  %v7162_v58 = vld [vmem:[%s10782_s5 + $0xf4] sm:$0xf0] }
 0x3ab   :  { %v6702_v48 = vor.u32 %v7162_v58, %v6701_v39  ;;  %v7208_v39 = vld [vmem:[%s10783_s3 + $0x168] sm:$0xff]  ;;  %v7218_v58 = vld [vmem:[%s10783_s3 + $0x1b8] sm:$0xff] }
 0x3ac   :  { %5613 = vmatpush.bf16.msrb.mxu2 %v7218_v58 }
 0x3ae   :  { %4522 = vmatmul.bf16.gmra.mxu2 %v6666_v26 }
 0x3b0   :  { %5614 = vmatpush.bf16.msrb.mxu2 %v7217_v41 }
 0x3b1   :  { %v4483_v5 = vpop.f32.mrf.mxu2 }
 0x3b2   :  { %v10283_v43 = vadd.f32 %v4483_v5, %v4394_v6  ;;  %v4409_v61 = vpop.f32.mrf.mxu1 }
 0x3b5   :  { %4448 = vmatmul.bf16.gmra.mxu1 %v6686_v62 }
 0x3b9   :  { %v4485_v44 = vpop.f32.mrf.mxu2 }
 0x3ba   :  { %v10297_v8 = vadd.f32 %v4485_v44, %v4396_v0  ;;  %v10299_v21 = vpop.f32.mrf.mxu1 }
 0x3be   :  { %4527 = vmatmul.bf16.gmra.mxu2 %v6674_v49  ;;  %v7169_v49 = vld [vmem:[%s10783_s3 + $0x30] sm:$0xff] }
 0x3c1   :  { %v4488_v16 = vpop.f32.mrf.mxu2 }
 0x3c2   :  { %v10301_v59 = vadd.f32 %v4488_v16, %v4399_v14  ;;  %v4414_v56 = vpop.f32.mrf.mxu1  ;;  %v7201_v16 = vld [vmem:[%s10783_s3 + $0x130] sm:$0xff] }
 0x3c3   :  { %5556 = vmatpush.bf16.msra.mxu0 %v7201_v16 }
 0x3c5   :  { %4453 = vmatmul.bf16.gmra.mxu1 %v6694_v23  ;;  %v7199_v23 = vld [vmem:[%s10783_s3 + $0x120] sm:$0xff] }
 0x3c7   :  { %5557 = vmatpush.bf16.msra.mxu0 %v7200_v63 }
 0x3c9   :  { %v4490_v20 = vpop.f32.mrf.mxu2 }
 0x3ca   :  { %v10315_v35 = vadd.f32 %v4490_v20, %v4401_v37  ;;  %v10321_v36 = vpop.f32.mrf.mxu1  ;;  %v6706_v37 = vor.u32 %v7161_v34, %v6703_v40  ;;  %v7210_v20 = vld [vmem:[%s10783_s3 + $0x178] sm:$0xff]  ;;  %v7216_v40 = vld [vmem:[%s10783_s3 + $0x1a8] sm:$0xff] }
 0x3cb   :  { %5584 = vmatpush.bf16.msra.mxu1 %v7210_v20  ;;  %5558 = vmatpush.bf16.msra.mxu0 %v7199_v23  ;;  %v7206_v34 = vld [vmem:[%s10783_s3 + $0x158] sm:$0xff]  ;;  %v7213_v20 = vld [vmem:[%s10783_s3 + $0x190] sm:$0xff]  ;;  %v7211_v23 = vld [vmem:[%s10783_s3 + $0x180] sm:$0xff] }
 0x3cc   :  { %5615 = vmatpush.bf16.msrb.mxu2 %v7216_v40  ;;  %v7177_v40 = vld [vmem:[%s10783_s3 + $0x70] sm:$0xff] }
 0x3ce   :  { %4532 = vmatmul.bf16.gmra.mxu2 %v6682_v50  ;;  %v7209_v50 = vld [vmem:[%s10783_s3 + $0x170] sm:$0xff] }
 0x3cf   :  { %5585 = vmatpush.bf16.msra.mxu1 %v7209_v50 }
 0x3d1   :  { %v4493_v47 = vpop.f32.mrf.mxu2 }
 0x3d2   :  { %v10317_v54 = vadd.f32 %v4493_v47, %v4404_v27  ;;  %v4419_v6 = vpop.f32.mrf.mxu1  ;;  %v7267_v47 = vmov 0.0  }
 0x3d3   :  { %4579 = vst [vmem:[#allocation3 + $0x10] sm:$0xff] %v7267_v47  ;;  %5586 = vmatpush.bf16.msra.mxu1 %v7208_v39 }
 0x3d4   :  { %v4553_v22 = vmax.f32 %v10249_v19, %v10317_v54  ;;  %4580 = vst [vmem:[#allocation3 + $0x18] sm:$0x3] %v7267_v47 }
 0x3d5   :  { %4458 = vmatmul.bf16.gmra.mxu1 %v6702_v48  ;;  %4577 = vst [vmem:[#allocation3] sm:$0xff] %v7267_v47  ;;  %v7198_v48 = vld [vmem:[%s10783_s3 + $0x118] sm:$0xff] }
 0x3d6   :  { %4578 = vst [vmem:[#allocation3 + $0x8] sm:$0x3] %v7267_v47  ;;  %5559 = vmatpush.bf16.msra.mxu0 %v7198_v48 }
 0x3d7   :  { %4581 = vst [vmem:[#allocation3 + $0x20] sm:$0xff] %v7267_v47 }
 0x3d8   :  { %4582 = vst [vmem:[#allocation3 + $0x28] sm:$0x3] %v7267_v47 }
 0x3d9   :  { %v10329_v11 = vpop.f32.mrf.mxu2  ;;  %4583 = vst [vmem:[#allocation3 + $0x30] sm:$0xff] %v7267_v47 }
 0x3da   :  { %v10349_v60 = vpop.f32.mrf.mxu1  ;;  %4584 = vst [vmem:[#allocation3 + $0x38] sm:$0x3] %v7267_v47  ;;  %5560 = vmatpush.bf16.msra.mxu0 %v7197_v30  ;;  %v4496_v48 = vadd.f32 %v10329_v11, %v10281_v42 }
 0x3db   :  { %4585 = vst [vmem:[#allocation3 + $0x40] sm:$0xff] %v7267_v47 }
 0x3dc   :  { %4586 = vst [vmem:[#allocation3 + $0x48] sm:$0x3] %v7267_v47  ;;  %v4554_v30 = vmax.f32 %v10263_v17, %v4496_v48  ;;  %v7234_v17 = vld [vmem:[%s10783_s3 + $0x238] sm:$0xff]  ;;  %v7173_v48 = vld [vmem:[%s10783_s3 + $0x50] sm:$0xff] }
 0x3dd   :  { %4587 = vst [vmem:[#allocation3 + $0x50] sm:$0xff] %v7267_v47 }
 0x3de   :  { %4537 = vmatmul.bf16.gmra.mxu2 %v6690_v29  ;;  %4588 = vst [vmem:[#allocation3 + $0x58] sm:$0x3] %v7267_v47 }
 0x3df   :  { %4589 = vst [vmem:[#allocation3 + $0x60] sm:$0xff] %v7267_v47 }
 0x3e0   :  { %4590 = vst [vmem:[#allocation3 + $0x68] sm:$0x3] %v7267_v47 }
 0x3e1   :  { %v4498_v28 = vpop.f32.mrf.mxu2  ;;  %4591 = vst [vmem:[#allocation3 + $0x70] sm:$0xff] %v7267_v47 }
 0x3e2   :  { %v10337_v33 = vadd.f32 %v4498_v28, %v4409_v61  ;;  %v4424_v9 = vpop.f32.mrf.mxu1  ;;  %v7170_v61 = vld [vmem:[%s10783_s3 + $0x38] sm:$0xff]  ;;  %v7207_v28 = vld [vmem:[%s10783_s3 + $0x160] sm:$0xff]  ;;  %4592 = vst [vmem:[#allocation3 + $0x78] sm:$0x3] %v7267_v47 }
 0x3e3   :  { %5439 = vmatpush.bf16.msra.mxu3 %v7170_v61  ;;  %5587 = vmatpush.bf16.msra.mxu1 %v7207_v28  ;;  %4593 = vst [vmem:[#allocation3 + $0x80] sm:$0xff] %v7267_v47  ;;  %v7204_v61 = vld [vmem:[%s10783_s3 + $0x148] sm:$0xff] }
 0x3e4   :  { %v4555_v52 = vmax.f32 %v10265_v3, %v10337_v33  ;;  %4594 = vst [vmem:[#allocation3 + $0x88] sm:$0x3] %v7267_v47 }
 0x3e5   :  { %4595 = vst [vmem:[#allocation3 + $0x90] sm:$0xff] %v7267_v47 }
 0x3e6   :  { %4596 = vst [vmem:[#allocation3 + $0x98] sm:$0x3] %v7267_v47 }
 0x3e7   :  { %5440 = vmatpush.bf16.msra.mxu3 %v7169_v49  ;;  %5588 = vmatpush.bf16.msra.mxu1 %v7206_v34 }
 0x3e9   :  { %v10347_v0 = vpop.f32.mrf.mxu2 }
 0x3ea   :  { %v10363_v46 = vpop.f32.mrf.mxu1 }
 0x3eb   :  { %5441 = vmatpush.bf16.msra.mxu3 %v7168_v1  ;;  %v7203_v1 = vld [vmem:[%s10783_s3 + $0x140] sm:$0xff] }
 0x3ee   :  { %4542 = vmatmul.bf16.gmra.mxu2 %v6698_v31 }
 0x3ef   :  { %5442 = vmatpush.bf16.msra.mxu3 %v7167_v10  ;;  %v7212_v10 = vld [vmem:[%s10783_s3 + $0x188] sm:$0xff] }
 0x3f1   :  { %v4503_v45 = vpop.f32.mrf.mxu2 }
 0x3f2   :  { %v10351_v14 = vadd.f32 %v4503_v45, %v4414_v56  ;;  %v4429_v4 = vpop.f32.mrf.mxu1 }
 0x3f3   :  { %5443 = vmatpush.bf16.msra.mxu3 %v7166_v25 }
 0x3f4   :  { %v4557_v18 = vmax.f32 %v10283_v43, %v10351_v14 }
 0x3f9   :  { %v10361_v53 = vpop.f32.mrf.mxu2 }
 0x3fa   :  { %v10371_v51 = vpop.f32.mrf.mxu1 }
 0x3fe   :  { %4547 = vmatmul.bf16.gmra.mxu2 %v6706_v37  ;;  %v7196_v37 = vld [vmem:[%s10783_s3 + $0x108] sm:$0xff] }
 0x3ff   :  { %5561 = vmatpush.bf16.msra.mxu0 %v7196_v37  ;;  %v7233_v37 = vld [vmem:[%s10783_s3 + $0x230] sm:$0xff] }
 0x401   :  { %v4508_v7 = vpop.f32.mrf.mxu2 }
 0x402   :  { %v10365_v57 = vadd.f32 %v4508_v7, %v4419_v6  ;;  %v4434_v2 = vpop.f32.mrf.mxu1  ;;  %v7165_v6 = vld [vmem:[%s10783_s3 + $0x10] sm:$0xff]  ;;  %v7163_v7 = vld [vmem:[%s10783_s3] sm:$0xff] }
 0x403   :  { %5444 = vmatpush.bf16.msra.mxu3 %v7165_v6 }
 0x404   :  { %v4559_v27 = vmax.f32 %v10301_v59, %v10365_v57 }
 0x409   :  { %v10369_v13 = vpop.f32.mrf.mxu2 }
 0x40a   :  { %v10388_v62 = vpop.f32.mrf.mxu1 }
 0x411   :  { %v4513_v26 = vpop.f32.mrf.mxu2 }
 0x412   :  { %v10373_v5 = vadd.f32 %v4513_v26, %v4424_v9  ;;  %v4439_v56 = vpop.f32.mrf.mxu1  ;;  %v7164_v9 = vld [vmem:[%s10783_s3 + $0x8] sm:$0xff]  ;;  %v7215_v26 = vld [vmem:[%s10783_s3 + $0x1a0] sm:$0xff] }
 0x413   :  { %5445 = vmatpush.bf16.msra.mxu3 %v7164_v9  ;;  %5616 = vmatpush.bf16.msrb.mxu2 %v7215_v26 }
 0x417   :  { %5446 = vmatpush.bf16.msra.mxu3 %v7163_v7  ;;  %5617 = vmatpush.bf16.msrb.mxu2 %v7214_v32  ;;  %v4501_v7 = vadd.f32 %v10347_v0, %v10299_v21 }
 0x419   :  { %v10375_v12 = vpop.f32.mrf.mxu2 }
 0x41a   :  { %v10450_v45 = vpop.f32.mrf.mxu1  ;;  %v4516_v28 = vadd.f32 %v10375_v12, %v10363_v46  ;;  %v7178_v46 = vld [vmem:[%s10783_s3 + $0x78] sm:$0xff] }
 0x41b   :  { %5618 = vmatpush.bf16.msrb.mxu2 %v7213_v20  ;;  %5468 = vmatpush.bf16.msrb.mxu3 %v7178_v46  ;;  %v7171_v46 = vld [vmem:[%s10783_s3 + $0x40] sm:$0xff] }
 0x41f   :  { %5619 = vmatpush.bf16.msrb.mxu2 %v7212_v10  ;;  %5469 = vmatpush.bf16.msrb.mxu3 %v7177_v40 }
 0x421   :  { %v4518_v44 = vpop.f32.mrf.mxu2 }
 0x422   :  { %v10383_v55 = vadd.f32 %v4518_v44, %v4429_v4  ;;  %v7205_v4 = vld [vmem:[%s10783_s3 + $0x150] sm:$0xff]  ;;  %v4444_v16 = vpop.f32.mrf.mxu1 }
 0x423   :  { %5589 = vmatpush.bf16.msra.mxu1 %v7205_v4  ;;  %5620 = vmatpush.bf16.msrb.mxu2 %v7211_v23 }
 0x427   :  { %5590 = vmatpush.bf16.msra.mxu1 %v7204_v61  ;;  %v7232_v61 = vld [vmem:[%s10783_s3 + $0x228] sm:$0xff] }
 0x429   :  { %v10393_v24 = vpop.f32.mrf.mxu2 }
 0x42a   :  { %v4446_v50 = vpop.f32.mrf.mxu1  ;;  %v4521_v21 = vadd.f32 %v10393_v24, %v10371_v51  ;;  %v7175_v51 = vld [vmem:[%s10783_s3 + $0x60] sm:$0xff] }
 0x42b   :  { %5591 = vmatpush.bf16.msra.mxu1 %v7203_v1  ;;  %v7231_v24 = vld [vmem:[%s10783_s3 + $0x220] sm:$0xff] }
 0x431   :  { %v4523_v38 = vpop.f32.mrf.mxu2 }
 0x432   :  { %v10424_v29 = vadd.f32 %v4523_v38, %v4434_v2  ;;  %v7195_v2 = vld [vmem:[%s10783_s3 + $0x100] sm:$0xff]  ;;  %v4449_v58 = vpop.f32.mrf.mxu1 }
 0x433   :  { %5562 = vmatpush.bf16.msra.mxu0 %v7195_v2 }
 0x437   :  { %5671 = vmatpush.bf16.msrb.mxu0 %v7234_v17 }
 0x439   :  { %v10448_v31 = vpop.f32.mrf.mxu2 }
 0x43b   :  { %5672 = vmatpush.bf16.msrb.mxu0 %v7233_v37 }
 0x43f   :  { %5673 = vmatpush.bf16.msrb.mxu0 %v7232_v61 }
 0x441   :  { %v4528_v44 = vpop.f32.mrf.mxu2 }
 0x442   :  { %v10491_v49 = vadd.f32 %v4528_v44, %v4439_v56  ;;  %v7176_v44 = vld [vmem:[%s10783_s3 + $0x68] sm:$0xff] }
 0x443   :  { %5470 = vmatpush.bf16.msrb.mxu3 %v7176_v44  ;;  %5674 = vmatpush.bf16.msrb.mxu0 %v7231_v24  ;;  %v4511_v44 = vadd.f32 %v10369_v13, %v10349_v60 }
 0x447   :  { %5471 = vmatpush.bf16.msrb.mxu3 %v7175_v51 }
 0x449   :  { %v10501_v63 = vpop.f32.mrf.mxu2 }
 0x44a   :  { %v4531_v59 = vadd.f32 %v10501_v63, %v10450_v45 }
 0x451   :  { %v4533_v56 = vpop.f32.mrf.mxu2 }
 0x452   :  { %v4534_v38 = vadd.f32 %v4533_v56, %v4444_v16  ;;  %v4556_v16 = vmax.f32 %v10279_v15, %v4501_v7 }
 0x454   :  { %v4561_v25 = vmax.f32 %v10373_v5, %v4534_v38  ;;  %v7174_v38 = vld [vmem:[%s10783_s3 + $0x58] sm:$0xff] }
 0x455   :  { %5472 = vmatpush.bf16.msrb.mxu3 %v7174_v38 }
 0x456   :  { %v10513_v39 = vmax.f32 %v4553_v22, %v4561_v25  ;;  %v4451_v22 = vpop.f32.mrf.mxu1  ;;  %v7230_v25 = vld [vmem:[%s10783_s3 + $0x218] sm:$0xff] }
 0x457   :  { %5675 = vmatpush.bf16.msrb.mxu0 %v7230_v25 }
 0x458   :  { %4598 = vst [vmem:[#allocation3 + $0x11] sm:$0xff] %v10513_v39 }
 0x459   :  { %v4535_v6 = vpop.f32.mrf.mxu2  ;;  %5473 = vmatpush.bf16.msrb.mxu3 %v7173_v48  ;;  %v7185_v48 = vld [vmem:[%s10783_s3 + $0xb0] sm:$0xff] }
 0x45a   :  { %v4536_v41 = vadd.f32 %v4535_v6, %v4446_v50 }
 0x45c   :  { %v4562_v9 = vmax.f32 %v4516_v28, %v4536_v41  ;;  %v7229_v41 = vld [vmem:[%s10783_s3 + $0x210] sm:$0xff] }
 0x45d   :  { %5676 = vmatpush.bf16.msrb.mxu0 %v7229_v41  ;;  %v7181_v41 = vld [vmem:[%s10783_s3 + $0x90] sm:$0xff] }
 0x45e   :  { %v4570_v5 = vmax.f32 %v4554_v30, %v4562_v9  ;;  %v4454_v32 = vpop.f32.mrf.mxu1  ;;  %v4506_v30 = vadd.f32 %v10361_v53, %v10321_v36  ;;  %v4526_v36 = vadd.f32 %v10448_v31, %v10388_v62  ;;  %v7227_v31 = vld [vmem:[%s10783_s3 + $0x200] sm:$0xff] }
 0x45f   :  { %v10521_v34 = vld [vmem:[#allocation3 + $0x10] sm:$0xff] }
 0x460   :  { %4599 = vst [vmem:[#allocation3 + $0x21] sm:$0xff] %v4570_v5  ;;  %v4823_v19 = vpack.c.bf16 %v10521_v34, %v7267_v47  ;;  %v4827_v54 = vpack.c.bf16 %v4570_v5, %v10513_v39  ;;  %v10544_v4 = vld [vmem:[#allocation3 + $0x12] sm:$0xff] }
 0x461   :  { %v4538_v42 = vpop.f32.mrf.mxu2 }
 0x462   :  { %v4539_v11 = vadd.f32 %v4538_v42, %v4449_v58  ;;  %5447 = vmatmul.bf16.vlgmr.msra.gmra.mxu3 %v4823_v19  ;;  %5563 = vmatmul.bf16.vlgmr.msra.gmra.mxu0 %v4827_v54  ;;  %v7172_v54 = vld [vmem:[%s10783_s3 + $0x48] sm:$0xff] }
 0x463   :  { %v7228_v42 = vld [vmem:[%s10783_s3 + $0x208] sm:$0xff]  ;;  %5474 = vmatpush.bf16.msrb.mxu3 %v7172_v54  ;;  %v7194_v54 = vld [vmem:[%s10783_s3 + $0xf8] sm:$0xff] }
 0x464   :  { %v4563_v12 = vmax.f32 %v10383_v55, %v4539_v11  ;;  %5677 = vmatpush.bf16.msrb.mxu0 %v7228_v42 }
 0x466   :  { %v4571_v47 = vmax.f32 %v4555_v52, %v4563_v12  ;;  %v4456_v6 = vpop.f32.mrf.mxu1 }
 0x467   :  { %v10546_v55 = vld [vmem:[#allocation3 + $0x22] sm:$0xff]  ;;  %5475 = vmatpush.bf16.msrb.mxu3 %v7171_v46 }
 0x468   :  { %v10548_v26 = vld [vmem:[#allocation3 + $0x20] sm:$0xff]  ;;  %4600 = vst [vmem:[#allocation3 + $0x31] sm:$0xff] %v4571_v47  ;;  %v4828_v3 = vpack.c.bf16 %v10546_v55, %v10544_v4  ;;  %v10552_v33 = vpack.c.bf16 %v4571_v47, %v4570_v5  ;;  %5678 = vmatpush.bf16.msrb.mxu0 %v7227_v31 }
 0x469   :  { %v4826_v52 = vpack.c.bf16 %v10548_v26, %v10521_v34  ;;  %v4540_v2 = vpop.f32.mrf.mxu2 }
 0x46a   :  { %v4541_v0 = vadd.f32 %v4540_v2, %v4451_v22  ;;  %5592 = vmatmul.bf16.vlgmr.msra.gmra.mxu1 %v4828_v3  ;;  %v4558_v22 = vmax.f32 %v10297_v8, %v4506_v30  ;;  %v7180_v30 = vld [vmem:[%s10783_s3 + $0x88] sm:$0xff] }
 0x46c   :  { %v4564_v1 = vmax.f32 %v4521_v21, %v4541_v0 }
 0x46e   :  { %v4572_v20 = vmax.f32 %v4556_v16, %v4564_v1  ;;  %v4459_v17 = vpop.f32.mrf.mxu1 }
 0x46f   :  { %v10571_v10 = vld [vmem:[#allocation3 + $0x30] sm:$0xff] }
 0x470   :  { %4601 = vst [vmem:[#allocation3 + $0x41] sm:$0xff] %v4572_v20  ;;  %v4832_v50 = vpack.c.bf16 %v10571_v10, %v10548_v26  ;;  %v4836_v23 = vpack.c.bf16 %v4572_v20, %v4571_v47  ;;  %v10593_v9 = vld [vmem:[#allocation3 + $0x32] sm:$0xff] }
 0x471   :  { %v4543_v15 = vpop.f32.mrf.mxu2  ;;  %v4831_v25 = vpack.c.bf16 %v10593_v9, %v10546_v55  ;;  %v7183_v55 = vld [vmem:[%s10783_s3 + $0xa0] sm:$0xff] }
 0x472   :  { %v4544_v56 = vadd.f32 %v4543_v15, %v4454_v32  ;;  %5452 = vmatmul.bf16.gmra.mxu3 %v4832_v50  ;;  %5621 = vmatmul.bf16.vlgmr.msrb.gmra.mxu2 %v4832_v50  ;;  %v4622_v15 = vld [vmem:[#allocation3 + $0x1] sm:$0xff] }
 0x473   :  { %5568 = vmatmul.bf16.gmra.mxu0 %v4836_v23 }
 0x474   :  { %v4565_v58 = vmax.f32 %v10424_v29, %v4544_v56  ;;  %v4824_v56 = vpack.c.bf16 %v10513_v39, %v4622_v15  ;;  %v7184_v39 = vld [vmem:[%s10783_s3 + $0xa8] sm:$0xff] }
 0x476   :  { %v4573_v28 = vmax.f32 %v4557_v18, %v4565_v58  ;;  %v4461_v1 = vpop.f32.mrf.mxu1  ;;  %v7186_v58 = vld [vmem:[%s10783_s3 + $0xb8] sm:$0xff] }
 0x477   :  { %v10595_v29 = vld [vmem:[#allocation3 + $0x42] sm:$0xff]  ;;  %5497 = vmatpush.bf16.msra.mxu3 %v7186_v58 }
 0x478   :  { %v10597_v5 = vld [vmem:[#allocation3 + $0x40] sm:$0xff]  ;;  %4602 = vst [vmem:[#allocation3 + $0x51] sm:$0xff] %v4573_v28  ;;  %v4837_v19 = vpack.c.bf16 %v10595_v29, %v10593_v9  ;;  %v10601_v43 = vpack.c.bf16 %v4573_v28, %v4572_v20 }
 0x479   :  { %v4835_v14 = vpack.c.bf16 %v10597_v5, %v10571_v10  ;;  %v4545_v18 = vpop.f32.mrf.mxu2  ;;  %v7179_v9 = vld [vmem:[%s10783_s3 + $0x80] sm:$0xff] }
 0x47a   :  { %v4546_v53 = vadd.f32 %v4545_v18, %v4456_v6  ;;  %5597 = vmatmul.bf16.gmra.mxu1 %v4837_v19  ;;  %v4742_v19 = vld [vmem:[#allocation3 + $0x92] sm:$0xff] }
 0x47b   :  { %5498 = vmatpush.bf16.msra.mxu3 %v7185_v48 }
 0x47c   :  { %v4566_v11 = vmax.f32 %v4526_v36, %v4546_v53  ;;  %v4638_v36 = vld [vmem:[#allocation3 + $0x2] sm:$0xff] }
 0x47d   :  { %v4825_v53 = vpack.c.bf16 %v10544_v4, %v4638_v36  ;;  %v7191_v4 = vld [vmem:[%s10783_s3 + $0xe0] sm:$0xff] }
 0x47e   :  { %v4574_v62 = vmax.f32 %v4558_v22, %v4566_v11  ;;  %v7193_v22 = vld [vmem:[%s10783_s3 + $0xf0] sm:$0xff]  ;;  %v7192_v11 = vld [vmem:[%s10783_s3 + $0xe8] sm:$0xff] }
 0x47f   :  { %v10620_v12 = vld [vmem:[#allocation3 + $0x50] sm:$0xff]  ;;  %5499 = vmatpush.bf16.msra.mxu3 %v7184_v39 }
 0x480   :  { %4603 = vst [vmem:[#allocation3 + $0x61] sm:$0xff] %v4574_v62  ;;  %v4841_v47 = vpack.c.bf16 %v10620_v12, %v10597_v5  ;;  %v4845_v8 = vpack.c.bf16 %v4574_v62, %v4573_v28  ;;  %v4690_v2 = vld [vmem:[#allocation3 + $0x52] sm:$0xff] }
 0x481   :  { %v4548_v40 = vpop.f32.mrf.mxu2  ;;  %v4840_v6 = vpack.c.bf16 %v4690_v2, %v10595_v29  ;;  %v7182_v28 = vld [vmem:[%s10783_s3 + $0x98] sm:$0xff] }
 0x482   :  { %v4549_v37 = vadd.f32 %v4548_v40, %v4459_v17  ;;  %5457 = vmatmul.bf16.gmra.mxu3 %v4841_v47  ;;  %5626 = vmatmul.bf16.gmra.mxu2 %v4841_v47  ;;  %v7189_v17 = vld [vmem:[%s10783_s3 + $0xd0] sm:$0xff]  ;;  %v7188_v47 = vld [vmem:[%s10783_s3 + $0xc8] sm:$0xff]  ;;  %v7187_v40 = vld [vmem:[%s10783_s3 + $0xc0] sm:$0xff] }
 0x483   :  { %5573 = vmatmul.bf16.gmra.mxu0 %v4845_v8  ;;  %5500 = vmatpush.bf16.msra.mxu3 %v7183_v55 }
 0x484   :  { %v4567_v7 = vmax.f32 %v10491_v49, %v4549_v37 }
 0x486   :  { %v4575_v3 = vmax.f32 %v4559_v27, %v4567_v7  ;;  %v4560_v27 = vmax.f32 %v10315_v35, %v4511_v44  ;;  %v7226_v44 = vld [vmem:[%s10783_s3 + $0x1f8] sm:$0xff] }
 0x487   :  { %v4691_v21 = vld [vmem:[#allocation3 + $0x62] sm:$0xff]  ;;  %5501 = vmatpush.bf16.msra.mxu3 %v7182_v28 }
 0x488   :  { %v10628_v0 = vld [vmem:[#allocation3 + $0x60] sm:$0xff]  ;;  %4604 = vst [vmem:[#allocation3 + $0x71] sm:$0xff] %v4575_v3  ;;  %v4846_v61 = vpack.c.bf16 %v4691_v21, %v4690_v2  ;;  %v10632_v32 = vpack.c.bf16 %v4575_v3, %v4574_v62  ;;  %v7190_v62 = vld [vmem:[%s10783_s3 + $0xd8] sm:$0xff] }
 0x489   :  { %v4844_v16 = vpack.c.bf16 %v10628_v0, %v10620_v12  ;;  %v4550_v49 = vpop.f32.mrf.mxu2 }
 0x48a   :  { %v4551_v57 = vadd.f32 %v4550_v49, %v4461_v1  ;;  %5602 = vmatmul.bf16.gmra.mxu1 %v4846_v61 }
 0x48b   :  { %5502 = vmatpush.bf16.msra.mxu3 %v7181_v41 }
 0x48c   :  { %v4568_v20 = vmax.f32 %v4531_v59, %v4551_v57  ;;  %v7225_v59 = vld [vmem:[%s10783_s3 + $0x1f0] sm:$0xff]  ;;  %v7224_v57 = vld [vmem:[%s10783_s3 + $0x1e8] sm:$0xff] }
 0x48e   :  { %v10639_v51 = vmax.f32 %v4560_v27, %v4568_v20  ;;  %v7222_v20 = vld [vmem:[%s10783_s3 + $0x1d8] sm:$0xff] }
 0x48f   :  { %v10641_v60 = vld [vmem:[#allocation3 + $0x70] sm:$0xff]  ;;  %5503 = vmatpush.bf16.msra.mxu3 %v7180_v30 }
 0x490   :  { %4605 = vst [vmem:[#allocation3 + $0x81] sm:$0xff] %v10639_v51  ;;  %v4850_v13 = vpack.c.bf16 %v10641_v60, %v10628_v0  ;;  %v4854_v24 = vpack.c.bf16 %v10639_v51, %v4575_v3  ;;  %v4692_v45 = vld [vmem:[#allocation3 + $0x72] sm:$0xff] }
 0x491   :  { %v4849_v29 = vpack.c.bf16 %v4692_v45, %v4691_v21  ;;  %v7263_v21 = vld [vmem:[%s10784_s4] ss:$0 sm:$0xff] }
 0x492   :  { %5462 = vmatmul.bf16.gmra.mxu3 %v4850_v13  ;;  %5631 = vmatmul.bf16.gmra.mxu2 %v4850_v13 }
 0x493   :  { %5578 = vmatmul.bf16.gmra.mxu0 %v4854_v24  ;;  %5504 = vmatpush.bf16.msra.mxu3 %v7179_v9 }
 0x497   :  { %v4693_v63 = vld [vmem:[#allocation3 + $0x82] sm:$0xff] }
 0x498   :  { %v10647_v50 = vld [vmem:[#allocation3 + $0x80] sm:$0xff]  ;;  %v4855_v35 = vpack.c.bf16 %v4693_v63, %v4692_v45  ;;  %v4858_v18 = vpack.c.bf16 %v4742_v19, %v4693_v63  ;;  %v7221_v63 = vld [vmem:[%s10783_s3 + $0x1d0] sm:$0xff] }
 0x499   :  { %v4853_v23 = vpack.c.bf16 %v10647_v50, %v10641_v60  ;;  %v4856_v38 = vpack.c.bf16 0.0, %v10647_v50 }
 0x49a   :  { %5607 = vmatmul.bf16.gmra.mxu1 %v4855_v35  ;;  %v7220_v35 = vld [vmem:[%s10783_s3 + $0x1c8] sm:$0xff] }
 0x4a2   :  { %5476 = vmatmul.bf16.vlgmr.msrb.gmra.mxu3 %v4824_v56  ;;  %5636 = vmatmul.bf16.gmra.mxu2 %v4856_v38 }
 0x4a3   :  { %5679 = vmatmul.bf16.vlgmr.msrb.gmra.mxu0 %v4831_v25  ;;  %5526 = vmatpush.bf16.msrb.mxu3 %v7194_v54 }
 0x4a7   :  { %5527 = vmatpush.bf16.msrb.mxu3 %v7193_v22 }
 0x4ab   :  { %5528 = vmatpush.bf16.msrb.mxu3 %v7192_v11 }
 0x4af   :  { %5529 = vmatpush.bf16.msrb.mxu3 %v7191_v4 }
 0x4b2   :  { %5481 = vmatmul.bf16.gmra.mxu3 %v10552_v33 }
 0x4b3   :  { %5684 = vmatmul.bf16.gmra.mxu0 %v4840_v6  ;;  %5530 = vmatpush.bf16.msrb.mxu3 %v7190_v62 }
 0x4b7   :  { %5531 = vmatpush.bf16.msrb.mxu3 %v7189_v17 }
 0x4bb   :  { %5532 = vmatpush.bf16.msrb.mxu3 %v7188_v47 }
 0x4bf   :  { %5533 = vmatpush.bf16.msrb.mxu3 %v7187_v40 }
 0x4c2   :  { %5486 = vmatmul.bf16.gmra.mxu3 %v10601_v43 }
 0x4c3   :  { %5689 = vmatmul.bf16.gmra.mxu0 %v4849_v29 }
 0x4d2   :  { %5491 = vmatmul.bf16.gmra.mxu3 %v10632_v32 }
 0x4d3   :  { %5694 = vmatmul.bf16.gmra.mxu0 %v4858_v18 }
 0x4e2   :  { %5505 = vmatmul.bf16.vlgmr.msra.gmra.mxu3 %v4825_v53 }
 0x4e3   :  { %5642 = vmatpush.bf16.msra.mxu3 %v7226_v44 }
 0x4e5   :  { %v5448_v42 = vpop.f32.mrf.mxu3 }
 0x4e6   :  { %v5449_v61 = vadd.f32 %v7263_v21, %v5448_v42  ;;  %v4726_v42 = vld [vmem:[#allocation3 + $0x91] sm:$0xff] }
 0x4e7   :  { %5643 = vmatpush.bf16.msra.mxu3 %v7225_v59  ;;  %v5593_v40 = vpop.f32.mrf.mxu1 }
 0x4eb   :  { %5644 = vmatpush.bf16.msra.mxu3 %v7224_v57 }
 0x4ed   :  { %v5450_v46 = vpop.f32.mrf.mxu3 }
 0x4ee   :  { %v5451_v27 = vadd.f32 %v7263_v21, %v5450_v46 }
 0x4f2   :  { %5510 = vmatmul.bf16.gmra.mxu3 %v4831_v25 }
 0x4f5   :  { %v5453_v31 = vpop.f32.mrf.mxu3 }
 0x4f6   :  { %v5454_v13 = vadd.f32 %v7263_v21, %v5453_v31 }
 0x4fd   :  { %v5455_v8 = vpop.f32.mrf.mxu3 }
 0x4fe   :  { %v5456_v15 = vadd.f32 %v7263_v21, %v5455_v8 }
 0x502   :  { %5515 = vmatmul.bf16.gmra.mxu3 %v4840_v6 }
 0x505   :  { %v5458_v37 = vpop.f32.mrf.mxu3 }
 0x506   :  { %v5459_v56 = vadd.f32 %v7263_v21, %v5458_v37 }
 0x50d   :  { %v5460_v7 = vpop.f32.mrf.mxu3 }
 0x50e   :  { %v5461_v58 = vadd.f32 %v7263_v21, %v5460_v7  ;;  %v5622_v7 = vpop.f32.mrf.mxu2 }
 0x512   :  { %5520 = vmatmul.bf16.gmra.mxu3 %v4849_v29 }
 0x515   :  { %v5463_v3 = vpop.f32.mrf.mxu3 }
 0x516   :  { %v5464_v55 = vadd.f32 %v7263_v21, %v5463_v3 }
 0x51d   :  { %v5465_v2 = vpop.f32.mrf.mxu3 }
 0x51e   :  { %v5466_v41 = vadd.f32 %v7263_v21, %v5465_v2 }
 0x522   :  { %5534 = vmatmul.bf16.vlgmr.msrb.gmra.mxu3 %v4826_v52  ;;  %v7223_v52 = vld [vmem:[%s10783_s3 + $0x1e0] sm:$0xff] }
 0x523   :  { %5645 = vmatpush.bf16.msra.mxu3 %v7223_v52 }
 0x525   :  { %v5477_v1 = vpop.f32.mrf.mxu3 }
 0x526   :  { %v5478_v49 = vadd.f32 %v5477_v1, %v5449_v61 }
 0x527   :  { %5646 = vmatpush.bf16.msra.mxu3 %v7222_v20 }
 0x52b   :  { %5647 = vmatpush.bf16.msra.mxu3 %v7221_v63 }
 0x52d   :  { %v5479_v34 = vpop.f32.mrf.mxu3 }
 0x52e   :  { %v5480_v26 = vadd.f32 %v5479_v34, %v5451_v27 }
 0x52f   :  { %5648 = vmatpush.bf16.msra.mxu3 %v7220_v35  ;;  %v5595_v35 = vpop.f32.mrf.mxu1 }
 0x532   :  { %5539 = vmatmul.bf16.gmra.mxu3 %v4835_v14  ;;  %v7219_v14 = vld [vmem:[%s10783_s3 + $0x1c0] sm:$0xff] }
 0x533   :  { %5649 = vmatpush.bf16.msra.mxu3 %v7219_v14 }
 0x535   :  { %v5482_v24 = vpop.f32.mrf.mxu3 }
 0x536   :  { %v5483_v45 = vadd.f32 %v5482_v24, %v5454_v13 }
 0x53d   :  { %v5484_v10 = vpop.f32.mrf.mxu3 }
 0x53e   :  { %v5485_v5 = vadd.f32 %v5484_v10, %v5456_v15  ;;  %v5624_v10 = vpop.f32.mrf.mxu2 }
 0x542   :  { %5544 = vmatmul.bf16.gmra.mxu3 %v4844_v16 }
 0x545   :  { %v5487_v38 = vpop.f32.mrf.mxu3 }
 0x546   :  { %v5488_v25 = vadd.f32 %v5487_v38, %v5459_v56  ;;  %v5598_v56 = vpop.f32.mrf.mxu1 }
 0x54d   :  { %v5489_v48 = vpop.f32.mrf.mxu3 }
 0x54e   :  { %v5490_v39 = vadd.f32 %v5489_v48, %v5461_v58 }
 0x552   :  { %5549 = vmatmul.bf16.gmra.mxu3 %v4853_v23  ;;  %v5564_v23 = vpop.f32.mrf.mxu0 }
 0x555   :  { %v5492_v6 = vpop.f32.mrf.mxu3 }
 0x556   :  { %v5493_v28 = vadd.f32 %v5492_v6, %v5464_v55 }
 0x55a   :  { %v5566_v11 = vpop.f32.mrf.mxu0 }
 0x55d   :  { %v5494_v30 = vpop.f32.mrf.mxu3 }
 0x55e   :  { %v5495_v9 = vadd.f32 %v5494_v30, %v5466_v41  ;;  %v5600_v30 = vpop.f32.mrf.mxu1 }
 0x562   :  { %5650 = vmatmul.bf16.vlgmr.msra.gmra.mxu3 %v10552_v33  ;;  %v4857_v33 = vpack.c.bf16 %v4726_v42, %v10639_v51  ;;  %v5569_v62 = vpop.f32.mrf.mxu0 }
 0x565   :  { %v5506_v12 = vpop.f32.mrf.mxu3 }
 0x566   :  { %v5507_v0 = vadd.f32 %v5506_v12, %v5478_v49 }
 0x56a   :  { %v5571_v8 = vpop.f32.mrf.mxu0 }
 0x56d   :  { %v5508_v16 = vpop.f32.mrf.mxu3 }
 0x56e   :  { %v5509_v29 = vadd.f32 %v5508_v16, %v5480_v26 }
 0x572   :  { %5655 = vmatmul.bf16.gmra.mxu3 %v10601_v43  ;;  %v5574_v44 = vpop.f32.mrf.mxu0 }
 0x575   :  { %v5511_v19 = vpop.f32.mrf.mxu3 }
 0x576   :  { %v5512_v18 = vadd.f32 %v5511_v19, %v5483_v45 }
 0x57a   :  { %v5576_v1 = vpop.f32.mrf.mxu0 }
 0x57d   :  { %v5513_v36 = vpop.f32.mrf.mxu3 }
 0x57e   :  { %v5514_v53 = vadd.f32 %v5513_v36, %v5485_v5 }
 0x582   :  { %5660 = vmatmul.bf16.gmra.mxu3 %v10632_v32  ;;  %v5579_v57 = vpop.f32.mrf.mxu0 }
 0x585   :  { %v5516_v60 = vpop.f32.mrf.mxu3 }
 0x586   :  { %v5517_v50 = vadd.f32 %v5516_v60, %v5488_v25 }
 0x58a   :  { %v10753_v20 = vpop.f32.mrf.mxu0 }
 0x58d   :  { %v5518_v54 = vpop.f32.mrf.mxu3 }
 0x58e   :  { %v5519_v22 = vadd.f32 %v5518_v54, %v5490_v39  ;;  %v5627_v39 = vpop.f32.mrf.mxu2  ;;  %v5603_v54 = vpop.f32.mrf.mxu1 }
 0x592   :  { %5665 = vmatmul.bf16.gmra.mxu3 %v4857_v33  ;;  %v5680_v63 = vpop.f32.mrf.mxu0 }
 0x595   :  { %v5521_v46 = vpop.f32.mrf.mxu3 }
 0x596   :  { %v5522_v4 = vadd.f32 %v5521_v46, %v5493_v28 }
 0x59a   :  { %v5682_v5 = vpop.f32.mrf.mxu0 }
 0x59d   :  { %v5523_v43 = vpop.f32.mrf.mxu3 }
 0x59e   :  { %v10751_v31 = vadd.f32 %v5523_v43, %v5495_v9 }
 0x5a2   :  { %v5685_v6 = vpop.f32.mrf.mxu0 }
 0x5a5   :  { %v5535_v17 = vpop.f32.mrf.mxu3 }
 0x5a6   :  { %v5536_v47 = vadd.f32 %v5535_v17, %v5507_v0 }
 0x5a8   :  { %v5565_v32 = vadd.f32 %v5564_v23, %v5536_v47 }
 0x5aa   :  { %v5594_v37 = vadd.f32 %v5593_v40, %v5565_v32  ;;  %v5687_v60 = vpop.f32.mrf.mxu0  ;;  %v5605_v40 = vpop.f32.mrf.mxu1 }
 0x5ac   :  { %v5623_v3 = vadd.f32 %v5622_v7, %v5594_v37 }
 0x5ad   :  { %v5537_v2 = vpop.f32.mrf.mxu3 }
 0x5ae   :  { %v5538_v21 = vadd.f32 %v5537_v2, %v5509_v29  ;;  %v5629_v29 = vpop.f32.mrf.mxu2 }
 0x5b0   :  { %v5567_v14 = vadd.f32 %v5566_v11, %v5538_v21 }
 0x5b2   :  { %v5596_v48 = vadd.f32 %v5595_v35, %v5567_v14  ;;  %v5690_v17 = vpop.f32.mrf.mxu0 }
 0x5b4   :  { %v5625_v55 = vadd.f32 %v5624_v10, %v5596_v48 }
 0x5b5   :  { %v5540_v51 = vpop.f32.mrf.mxu3 }
 0x5b6   :  { %v5541_v61 = vadd.f32 %v5540_v51, %v5512_v18  ;;  %v5632_v33 = vpop.f32.mrf.mxu2 }
 0x5b8   :  { %v5570_v9 = vadd.f32 %v5569_v62, %v5541_v61 }
 0x5ba   :  { %v5599_v18 = vadd.f32 %v5598_v56, %v5570_v9 }
 0x5bd   :  { %v5542_v49 = vpop.f32.mrf.mxu3 }
 0x5be   :  { %v5543_v59 = vadd.f32 %v5542_v49, %v5514_v53  ;;  %v5634_v2 = vpop.f32.mrf.mxu2  ;;  %v5692_v49 = vpop.f32.mrf.mxu0 }
 0x5c0   :  { %v5572_v19 = vadd.f32 %v5571_v8, %v5543_v59 }
 0x5c2   :  { %v5601_v23 = vadd.f32 %v5600_v30, %v5572_v19 }
 0x5c5   :  { %v5545_v27 = vpop.f32.mrf.mxu3 }
 0x5c6   :  { %v5546_v34 = vadd.f32 %v5545_v27, %v5517_v50  ;;  %v5628_v50 = vadd.f32 %v5627_v39, %v5599_v18 }
 0x5c8   :  { %v5575_v43 = vadd.f32 %v5574_v44, %v5546_v34 }
 0x5ca   :  { %v5604_v37 = vadd.f32 %v5603_v54, %v5575_v43 }
 0x5cc   :  { %v5633_v21 = vadd.f32 %v5632_v33, %v5604_v37 }
 0x5cd   :  { %v5547_v26 = vpop.f32.mrf.mxu3 }
 0x5ce   :  { %v5548_v52 = vadd.f32 %v5547_v26, %v5519_v22  ;;  %v5630_v22 = vadd.f32 %v5629_v29, %v5601_v23 }
 0x5d0   :  { %v5577_v8 = vadd.f32 %v5576_v1, %v5548_v52 }
 0x5d2   :  { %v5606_v51 = vadd.f32 %v5605_v40, %v5577_v8 }
 0x5d4   :  { %v5635_v59 = vadd.f32 %v5634_v2, %v5606_v51 }
 0x5d5   :  { %v5550_v13 = vpop.f32.mrf.mxu3 }
 0x5d6   :  { %v5551_v24 = vadd.f32 %v5550_v13, %v5522_v4 }
 0x5d8   :  { %v10755_v45 = vadd.f32 %v5579_v57, %v5551_v24  ;;  %v5608_v57 = vpop.f32.mrf.mxu1  ;;  %v5637_v24 = vpop.f32.mrf.mxu2 }
 0x5da   :  { %v5609_v52 = vadd.f32 %v5608_v57, %v10755_v45  ;;  %v7236_v45 = vld [vmem:[%s10785_s6 + $0x8] sm:$0xff] }
 0x5dd   :  { %v5552_v15 = vpop.f32.mrf.mxu3 }
 0x5de   :  { %v5553_v44 = vadd.f32 %v5552_v15, %v10751_v31 }
 0x5e0   :  { %v5582_v1 = vadd.f32 %v10753_v20, %v5553_v44  ;;  %v5610_v56 = vpop.f32.mrf.mxu1  ;;  %v5639_v48 = vpop.f32.mrf.mxu2  ;;  %v7235_v20 = vld [vmem:[%s10785_s6] sm:$0xff] }
 0x5e5   :  { %v5651_v38 = vpop.f32.mrf.mxu3 }
 0x5e6   :  { %v5652_v25 = vadd.f32 %v5651_v38, %v5623_v3  ;;  %v5638_v38 = vadd.f32 %v5637_v24, %v5609_v52 }
 0x5e8   :  { %v5681_v58 = vadd.f32 %v5680_v63, %v5652_v25  ;;  %v5611_v25 = vadd.f32 %v5610_v56, %v5582_v1 }
 0x5ea   :  { %v5700_v0 = vmax.f32 %v5681_v58, 0.0  ;;  %v5640_v39 = vadd.f32 %v5639_v48, %v5611_v25 }
 0x5ed   :  { %v5653_v28 = vpop.f32.mrf.mxu3 }
 0x5ee   :  { %v5654_v41 = vadd.f32 %v5653_v28, %v5625_v55 }
 0x5f0   :  { %v5683_v12 = vadd.f32 %v5682_v5, %v5654_v41  ;;  %v5695_v5 = vpop.f32.mrf.mxu0 }
 0x5f2   :  { %v5701_v16 = vmax.f32 %v5683_v12, 0.0  ;;  %v7237_v12 = vld [vmem:[%s10785_s6 + $0x10] sm:$0xff] }
 0x5f4   :  { %v5716_v36 = vpack.c.bf16 %v5701_v16, %v5700_v0  ;;  %v7238_v0 = vld [vmem:[%s10785_s6 + $0x18] sm:$0xff] }
 0x5f5   :  { %v5656_v53 = vpop.f32.mrf.mxu3 }
 0x5f6   :  { %v5657_v42 = vadd.f32 %v5656_v53, %v5628_v50 }
 0x5f8   :  { %v5686_v46 = vadd.f32 %v5685_v6, %v5657_v42  ;;  %v5697_v15 = vpop.f32.mrf.mxu0 }
 0x5fa   :  { %v5702_v47 = vmax.f32 %v5686_v46, 0.0 }
 0x5fd   :  { %v5658_v11 = vpop.f32.mrf.mxu3 }
 0x5fe   :  { %v5659_v4 = vadd.f32 %v5658_v11, %v5630_v22 }
 0x600   :  { %v5688_v62 = vadd.f32 %v5687_v60, %v5659_v4 }
 0x602   :  { %v5703_v32 = vmax.f32 %v5688_v62, 0.0 }
 0x604   :  { %v5717_v7 = vpack.c.bf16 %v5703_v32, %v5702_v47 }
 0x605   :  { %v5661_v3 = vpop.f32.mrf.mxu3 }
 0x606   :  { %v5662_v61 = vadd.f32 %v5661_v3, %v5633_v21 }
 0x608   :  { %v5691_v26 = vadd.f32 %v5690_v17, %v5662_v61 }
 0x60a   :  { %v5704_v63 = vmax.f32 %v5691_v26, 0.0 }
 0x60d   :  { %v5663_v27 = vpop.f32.mrf.mxu3 }
 0x60e   :  { %v5664_v13 = vadd.f32 %v5663_v27, %v5635_v59 }
 0x610   :  { %v5693_v34 = vadd.f32 %v5692_v49, %v5664_v13 }
 0x612   :  { %v5705_v35 = vmax.f32 %v5693_v34, 0.0 }
 0x614   :  { %v5718_v10 = vpack.c.bf16 %v5705_v35, %v5704_v63 }
 0x615   :  { %v5666_v14 = vpop.f32.mrf.mxu3 }
 0x616   :  { %v5667_v58 = vadd.f32 %v5666_v14, %v5638_v38 }
 0x618   :  { %v5696_v6 = vadd.f32 %v5695_v5, %v5667_v58 }
 0x61a   :  { %v5706_v41 = vmax.f32 %v5696_v6, 0.0 }
 0x61d   :  { %v5668_v55 = vpop.f32.mrf.mxu3 }
 0x61e   :  { %v5669_v31 = vadd.f32 %v5668_v55, %v5640_v39 }
 0x620   :  { %v5698_v28 = vadd.f32 %v5697_v15, %v5669_v31 }
 0x622   :  { %v5707_v30 = vmax.f32 %v5698_v28, 0.0 }
 0x624   :  { %v5719_v9 = vpack.c.bf16 %v5707_v30, %v5706_v41 }
 0x626   :  { %5756 = vmatpush.bf16.msrb.mxu1 %v5719_v9 }
 0x62a   :  { %5757 = vmatpush.bf16.msrb.mxu1 %v5718_v10 }
 0x62e   :  { %5758 = vmatpush.bf16.msrb.mxu1 %v5717_v7 }
 0x632   :  { %5759 = vmatpush.bf16.msrb.mxu1 %v5716_v36 }
 0x635   :  { %7011 = vmatmul.msk.bf16.vlgmr.msrb.gmra.mxu1 %vm3641_vm8, %v7235_v20 }
 0x645   :  { %7012 = vmatmul.msk.bf16.gmra.mxu1 %vm3641_vm8, %v7236_v45 }
 0x655   :  { %7013 = vmatmul.msk.bf16.gmra.mxu1 %vm3641_vm8, %v7237_v12 }
 0x665   :  { %7014 = vmatmul.msk.bf16.gmra.mxu1 %vm3641_vm8, %v7238_v0 }
 0x6b2   :  { %v5761_v16 = vpop.f32.mrf.mxu1 }
 0x6ba   :  { %v5763_v29 = vpop.f32.mrf.mxu1 }
 0x6c2   :  { %v5766_v19 = vpop.f32.mrf.mxu1 }
 0x6c3   :  { %v5781_v54 = vmax.f32 %v5761_v16, %v5766_v19 }
 0x6ca   :  { %v5768_v18 = vpop.f32.mrf.mxu1 }
 0x6cb   :  { %v5782_v42 = vmax.f32 %v5763_v29, %v5768_v18 }
 0x6d2   :  { %v5771_v36 = vpop.f32.mrf.mxu1 }
 0x6da   :  { %v5773_v53 = vpop.f32.mrf.mxu1 }
 0x6e2   :  { %v5776_v60 = vpop.f32.mrf.mxu1 }
 0x6e3   :  { %v5783_v50 = vmax.f32 %v5771_v36, %v5776_v60 }
 0x6e5   :  { %v5785_v33 = vmax.f32 %v5781_v54, %v5783_v50 }
 0x6ea   :  { %v5778_v23 = vpop.f32.mrf.mxu1 }
 0x6eb   :  { %v5784_v22 = vmax.f32 %v5773_v53, %v5778_v23 }
 0x6ed   :  { %v5786_v11 = vmax.f32 %v5782_v42, %v5784_v22 }
 0x6ef   :  { %v7242_v46 = vpack.c.bf16 %v5786_v11, %v5785_v33 }
 0x6f1   :  { %7243 = vst [vmem:[%s10786_s7] sm:$0xff] %v7242_v46  }

</bundles_post_ra>
